<compile_context>
chip_gen: v7x
topology: tpu7x:2x2x1
jax: 0.10.0
libtpu: 0.0.40
codegen_flags: <defaults>
</compile_context>

<pallas_src>
import numpy as np
import jax
import jax.numpy as jnp
from jax.experimental import pallas as pl
from jax.experimental.pallas import tpu as pltpu

DTYPE = jnp.float32


# ---------------------------------------------------------------------------
# Layout: "padded slab" = (C, (H+4)*(W+2)) channel-major; valid data at padded
# rows [2, H+2), cols [1, W+1); zeros elsewhere.  The 2-row / 1-col guard lets
# every 3x3 tap be a contiguous lane slice of the flattened slab.
# ---------------------------------------------------------------------------
def _level_dims(h, w):
    wp = w + 2
    return dict(h=h, w=w, wp=wp, m=h * wp, s=(h + 4) * wp, s0=2 * wp)


def pad_to_slab(x_nchw):
    n, c, h, w = x_nchw.shape
    xp = jnp.pad(x_nchw, ((0, 0), (0, 0), (2, 2), (1, 1)))
    return xp.reshape(n, c, (h + 4) * (w + 2))


# ---------------------------------------------------------------------------
# Constant 0/1 matrices + masks (built once at pack time; shape-only)
# ---------------------------------------------------------------------------
def _pool_gather_mat(h, w):
    """(m_l, m_{l+1}) selection: 2x2-corner gather + guard-column drop."""
    wp = w + 2
    h2, w2 = h // 2, w // 2
    wp2 = w2 + 2
    mat = np.zeros((h * wp, h2 * wp2), np.float32)
    for r2 in range(h2):
        for c2 in range(w2):
            mat[(2 * r2) * wp + 1 + 2 * c2, r2 * wp2 + 1 + c2] = 1.0
    return jnp.asarray(mat)


def _upsample_scatter_mats(hs, ws):
    """(4, m_small, m_big) selection matrices interleaving the 4 transposed-conv
    phases into the (2hs, 2ws) padded-slab window (guard cols stay zero)."""
    wps = ws + 2
    hb, wb = 2 * hs, 2 * ws
    wpb = wb + 2
    mats = np.zeros((4, hs * wps, hb * wpb), np.float32)
    for dy in range(2):
        for dx in range(2):
            p = dy * 2 + dx
            for r in range(hs):
                for c in range(ws):
                    mats[p, r * wps + 1 + c,
                         (2 * r + dy) * wpb + 1 + 2 * c + dx] = 1.0
    return jnp.asarray(mats)


def _col_mask(h, w):
    wp = w + 2
    cols = np.arange(h * wp) % wp
    return jnp.asarray(((cols >= 1) & (cols <= w)).astype(np.float32)[None, :])


def _pack_conv3(wt):
    """(Cout, Cin, 3, 3) -> (Cout, 9*Cin); column index = (dy*3+dx)*Cin + cin."""
    co, ci = wt.shape[0], wt.shape[1]
    return jnp.transpose(wt, (0, 2, 3, 1)).reshape(co, 9 * ci).astype(DTYPE)


def _pack_bias(b):
    return b.reshape(-1, 1).astype(DTYPE)


# ---------------------------------------------------------------------------
# Builder: returns (pack_params, forward) for a fixed config / spatial size.
# ---------------------------------------------------------------------------
def make_unet_forward(in_channels=1, n_classes=2, depth=3, wf=3, h=16, w=16):
    assert h % (1 << (depth - 1)) == 0 and w % (1 << (depth - 1)) == 0, \
        "H, W must be divisible by 2**(depth-1)"
    levels = [_level_dims(h >> l, w >> l) for l in range(depth)]
    cdown = [2 ** (wf + i) for i in range(depth)]
    nup = depth - 1

    up_cfg = []
    prev = cdown[-1]
    for i in reversed(range(depth - 1)):
        up_cfg.append(dict(lev=i, cin=prev, cout=2 ** (wf + i)))
        prev = 2 ** (wf + i)

    pool_mats = [_pool_gather_mat(levels[l]["h"], levels[l]["w"])
                 for l in range(nup)]
    scat_mats = [_upsample_scatter_mats(levels[cfg["lev"] + 1]["h"],
                                        levels[cfg["lev"] + 1]["w"])
                 for cfg in up_cfg]
    masks = [_col_mask(lv["h"], lv["w"]) for lv in levels]

    # ---- one-time weight packing -------------------------------------------
    def pack_params(params):
        ops = []
        for l in range(depth):
            d = params["down"][l]
            ops += [_pack_conv3(d["w1"]), _pack_bias(d["b1"]),
                    _pack_conv3(d["w2"]), _pack_bias(d["b2"])]
        ops += list(pool_mats)
        for j, cfg in enumerate(up_cfg):
            u = params["up"][j]
            cout, cin = cfg["cout"], cfg["cin"]
            # ConvTranspose2d weight (Cin, Cout, 2, 2) -> (4*Cout, Cin), row p*Cout+co
            upw = jnp.transpose(u["up_w"], (2, 3, 1, 0)).reshape(4 * cout, cin)
            upb = jnp.tile(u["up_b"], 4).reshape(4 * cout, 1)
            ops += [upw.astype(DTYPE), upb.astype(DTYPE), scat_mats[j],
                    _pack_conv3(u["w1"]), _pack_bias(u["b1"]),
                    _pack_conv3(u["w2"]), _pack_bias(u["b2"])]
        ops += [params["last_w"].reshape(n_classes, -1).astype(DTYPE),
                params["last_b"].reshape(n_classes, 1).astype(DTYPE)]
        ops += list(masks)
        return ops

    # ---- scratch (all activations stay in VMEM) -----------------------------
    max_cin = max([in_channels] + cdown + [cfg["cin"] for cfg in up_cfg])
    im2col_shape = (9 * max_cin, max(lv["m"] for lv in levels))
    scratch_shapes = (
        [pltpu.VMEM((cdown[l], levels[l]["s"]), DTYPE) for l in range(depth)]      # d_mid
        + [pltpu.VMEM((cdown[l], levels[l]["s"]), DTYPE) for l in range(depth)]    # d_out
        + [pltpu.VMEM((cdown[l], levels[l + 1]["s"]), DTYPE) for l in range(nup)]  # pooled
        + [pltpu.VMEM((c["cout"], levels[c["lev"]]["s"]), DTYPE) for c in up_cfg]  # up slab
        + [pltpu.VMEM((c["cout"], levels[c["lev"]]["s"]), DTYPE) for c in up_cfg]  # u_mid
        + [pltpu.VMEM((c["cout"], levels[c["lev"]]["s"]), DTYPE) for c in up_cfg]  # u_out
        + [pltpu.VMEM(im2col_shape, DTYPE)]                                        # im2col
    )

    out_lv = levels[0]

    # ---- the single fused kernel --------------------------------------------
    def kernel(*refs):
        it = iter(refs)
        x_ref = next(it)
        down_w = [[next(it) for _ in range(4)] for _ in range(depth)]
        pool_d = [next(it) for _ in range(nup)]
        up_w = [[next(it) for _ in range(7)] for _ in range(nup)]
        lw_ref = next(it)
        lb_ref = next(it)
        mask_refs = [next(it) for _ in range(depth)]
        out_ref = next(it)
        d_mid = [next(it) for _ in range(depth)]
        d_out = [next(it) for _ in range(depth)]
        p_out = [next(it) for _ in range(nup)]
        u_slab = [next(it) for _ in range(nup)]
        u_mid = [next(it) for _ in range(nup)]
        u_out = [next(it) for _ in range(nup)]
        col_ref = next(it)

        def store_slab(dst, val, lv):
            # Write valid window; re-zero the 2 guard rows top/bottom so the
            # slab is self-consistent every grid step (safe under megacore).
            s0, m = lv["s0"], lv["m"]
            c = val.shape[0]
            dst[:, 0:s0] = jnp.zeros((c, s0), DTYPE)
            dst[:, s0:s0 + m] = val.astype(DTYPE)
            dst[:, s0 + m:2 * s0 + m] = jnp.zeros((c, s0), DTYPE)

        def conv3x3(srcs, w_ref, b_ref, dst, lv, msk_ref):
            """3x3 'same' conv + ReLU as ONE GEMM via an in-VMEM im2col."""
            wp, m, s0 = lv["wp"], lv["m"], lv["s0"]
            cin_tot = sum(cc for _, cc in srcs)
            for t in range(9):
                dy, dx = t // 3, t % 3
                off = s0 + (dy - 1) * wp + (dx - 1)
                r0 = t * cin_tot
                for src_ref, cc in srcs:
                    col_ref[r0:r0 + cc, 0:m] = src_ref[:, off:off + m]
                    r0 += cc
            patch = col_ref[0:9 * cin_tot, 0:m]
            acc = jnp.dot(w_ref[...], patch, preferred_element_type=jnp.float32)
            acc = jnp.maximum(acc + b_ref[...], 0.0) * msk_ref[...]
            store_slab(dst, acc, lv)

        def maxpool2x2(src, d_ref, dst, lv, lv2):
            wp, m, s0 = lv["wp"], lv["m"], lv["s0"]
            t00 = src[:, s0:s0 + m]
            t01 = src[:, s0 + 1:s0 + 1 + m]
            t10 = src[:, s0 + wp:s0 + wp + m]
            t11 = src[:, s0 + wp + 1:s0 + wp + 1 + m]
            mx = jnp.maximum(jnp.maximum(t00, t01), jnp.maximum(t10, t11))
            pooled = jnp.dot(mx, d_ref[...], preferred_element_type=jnp.float32)
            store_slab(dst, pooled, lv2)

        def conv_transpose2x2(src, upw_ref, upb_ref, scat_ref, dst, lv_s, lv_b, cout):
            m_s, s0s = lv_s["m"], lv_s["s0"]
            m_b = lv_b["m"]
            xwin = src[:, s0s:s0s + m_s]
            ph = jnp.dot(upw_ref[...], xwin,
                         preferred_element_type=jnp.float32) + upb_ref[...]
            acc = jnp.zeros((cout, m_b), jnp.float32)
            for p in range(4):
                acc = acc + jnp.dot(ph[p * cout:(p + 1) * cout, :], scat_ref[p],
                                    preferred_element_type=jnp.float32)
            store_slab(dst, acc, lv_b)

        # ------------------ down path ------------------
        cur = [(x_ref, in_channels)]
        for l in range(depth):
            w1, b1, w2, b2 = down_w[l]
            conv3x3(cur, w1, b1, d_mid[l], levels[l], mask_refs[l])
            conv3x3([(d_mid[l], cdown[l])], w2, b2, d_out[l], levels[l],
                    mask_refs[l])
            if l != depth - 1:
                maxpool2x2(d_out[l], pool_d[l], p_out[l], levels[l], levels[l + 1])
                cur = [(p_out[l], cdown[l])]

        # ------------------ up path ------------------
        src = d_out[depth - 1]
        for j, cfg in enumerate(up_cfg):
            lev, cout = cfg["lev"], cfg["cout"]
            upw, upb, scat, w1, b1, w2, b2 = up_w[j]
            conv_transpose2x2(src, upw, upb, scat, u_slab[j],
                              levels[lev + 1], levels[lev], cout)
            # torch.cat([up, bridge], 1) folded into the im2col fill order.
            conv3x3([(u_slab[j], cout), (d_out[lev], cdown[lev])],
                    w1, b1, u_mid[j], levels[lev], mask_refs[lev])
            conv3x3([(u_mid[j], cout)], w2, b2, u_out[j], levels[lev],
                    mask_refs[lev])
            src = u_out[j]

        # ------------------ final 1x1 conv ------------------
        s0, m = out_lv["s0"], out_lv["m"]
        xwin = src[:, s0:s0 + m]
        out_ref[...] = (jnp.dot(lw_ref[...], xwin,
                                preferred_element_type=jnp.float32)
                        + lb_ref[...]).astype(out_ref.dtype)

    # ---- forward wrapper -----------------------------------------------------
    s_in = levels[0]["s"]
    m_out = out_lv["m"]
    h0, w0 = levels[0]["h"], levels[0]["w"]

    def forward(packed, x_nchw):
        n = x_nchw.shape[0]
        assert x_nchw.shape[1:] == (in_channels, h, w), x_nchw.shape
        x_slab = pad_to_slab(x_nchw.astype(DTYPE))
        in_specs = [pl.BlockSpec((None, in_channels, s_in), lambda i: (i, 0, 0))]
        for op in packed:
            if op.ndim == 2:
                in_specs.append(pl.BlockSpec(op.shape, lambda i: (0, 0)))
            else:
                in_specs.append(pl.BlockSpec(op.shape, lambda i: (0, 0, 0)))
        out = pl.pallas_call(
            kernel,
            out_shape=jax.ShapeDtypeStruct((n, n_classes, m_out), DTYPE),
            grid=(n,),
            in_specs=in_specs,
            out_specs=pl.BlockSpec((None, n_classes, m_out), lambda i: (i, 0, 0)),
            scratch_shapes=scratch_shapes,
            compiler_params=pltpu.CompilerParams(
                dimension_semantics=("parallel",)),
        )(x_slab, *packed)
        # Drop the guard columns of the final slab window -> NCHW logits.
        return out.reshape(n, n_classes, h0, w0 + 2)[:, :, :, 1:w0 + 1]

    return pack_params, forward


# ---------------------------------------------------------------------------
# Parameter init (deterministic, PyTorch-Conv2d-style uniform bounds)
# ---------------------------------------------------------------------------
def init_unet_params(key, in_channels=1, n_classes=2, depth=3, wf=3):
    keys = iter(jax.random.split(key, 128))

    def uinit(shape, fan_in):
        bound = float(fan_in) ** -0.5
        return jax.random.uniform(next(keys), shape, jnp.float32, -bound, bound)

    def conv_params(cin, cout, k):
        fan_in = cin * k * k
        return uinit((cout, cin, k, k), fan_in), uinit((cout,), fan_in)

    down = []
    prev = in_channels
    for i in range(depth):
        cout = 2 ** (wf + i)
        w1, b1 = conv_params(prev, cout, 3)
        w2, b2 = conv_params(cout, cout, 3)
        down.append(dict(w1=w1, b1=b1, w2=w2, b2=b2))
        prev = cout

    up = []
    for i in reversed(range(depth - 1)):
        cout = 2 ** (wf + i)
        up_w = uinit((prev, cout, 2, 2), cout * 4)   # ConvTranspose2d weight
        up_b = uinit((cout,), cout * 4)
        w1, b1 = conv_params(prev, cout, 3)          # concat -> prev channels
        w2, b2 = conv_params(cout, cout, 3)
        up.append(dict(up_w=up_w, up_b=up_b, w1=w1, b1=b1, w2=w2, b2=b2))
        prev = cout

    last_w, last_b = conv_params(prev, n_classes, 1)
    return dict(down=down, up=up, last_w=last_w, last_b=last_b)


# ---------------------------------------------------------------------------
# Pure-JAX reference (matches the PyTorch forward for this config)
# ---------------------------------------------------------------------------
def unet_reference(params, x):
    hi = jax.lax.Precision.HIGHEST

    def conv3(t, wt, bt):
        y = jax.lax.conv_general_dilated(
            t, wt, window_strides=(1, 1), padding="SAME",
            dimension_numbers=("NCHW", "OIHW", "NCHW"), precision=hi)
        return jax.nn.relu(y + bt.reshape(1, -1, 1, 1))

    out = x
    blocks = []
    nd = len(params["down"])
    for i, d in enumerate(params["down"]):
        out = conv3(out, d["w1"], d["b1"])
        out = conv3(out, d["w2"], d["b2"])
        if i != nd - 1:
            blocks.append(out)
            n_, c_, hh, ww = out.shape
            out = out.reshape(n_, c_, hh // 2, 2, ww // 2, 2).max(axis=(3, 5))

    for i, u in enumerate(params["up"]):
        n_, _, hh, ww = out.shape
        co = u["up_w"].shape[1]
        t = jnp.einsum("nihw,ioyx->nohywx", out, u["up_w"], precision=hi)
        up = t.reshape(n_, co, 2 * hh, 2 * ww) + u["up_b"].reshape(1, -1, 1, 1)
        out = jnp.concatenate([up, blocks[-i - 1]], axis=1)
        out = conv3(out, u["w1"], u["b1"])
        out = conv3(out, u["w2"], u["b2"])

    y = jax.lax.conv_general_dilated(
        out, params["last_w"], (1, 1), "SAME",
        dimension_numbers=("NCHW", "OIHW", "NCHW"), precision=hi)
    return y + params["last_b"].reshape(1, -1, 1, 1)


# ---------------------------------------------------------------------------
if __name__ == "__main__":
    key = jax.random.PRNGKey(0)
    k_param, k_x = jax.random.split(key)

    params = init_unet_params(k_param, in_channels=1, n_classes=2, depth=3, wf=3)
    x = jax.random.normal(k_x, (2, 1, 16, 16), jnp.float32)  # NCHW input

    pack_params, forward = make_unet_forward(
        in_channels=1, n_classes=2, depth=3, wf=3, h=16, w=16)
    packed = pack_params(params)      # weight packing happens once, not per call

    fwd = jax.jit(forward)
    out = fwd(packed, x)
    jax.block_until_ready(out)

    assert out.shape == (2, 2, 16, 16), out.shape
    assert bool(jnp.all(jnp.isfinite(out)))

    ref = unet_reference(params, x)
    err = float(jnp.max(jnp.abs(out - ref)))
    assert err < 2e-2, f"max abs err vs reference: {err}"

    print("KERNEL_OK")
</pallas_src>

<mosaic_0001>
module attributes {stable_mosaic.version = 11 : i64} {
  func.func @kernel(%arg0: i32, %arg1: memref<1x1x360xf32, #tpu.memory_space<vmem>>, %arg2: memref<8x9xf32, #tpu.memory_space<vmem>>, %arg3: memref<8x1xf32, #tpu.memory_space<vmem>>, %arg4: memref<8x72xf32, #tpu.memory_space<vmem>>, %arg5: memref<8x1xf32, #tpu.memory_space<vmem>>, %arg6: memref<16x72xf32, #tpu.memory_space<vmem>>, %arg7: memref<16x1xf32, #tpu.memory_space<vmem>>, %arg8: memref<16x144xf32, #tpu.memory_space<vmem>>, %arg9: memref<16x1xf32, #tpu.memory_space<vmem>>, %arg10: memref<32x144xf32, #tpu.memory_space<vmem>>, %arg11: memref<32x1xf32, #tpu.memory_space<vmem>>, %arg12: memref<32x288xf32, #tpu.memory_space<vmem>>, %arg13: memref<32x1xf32, #tpu.memory_space<vmem>>, %arg14: memref<288x80xf32, #tpu.memory_space<vmem>>, %arg15: memref<80x24xf32, #tpu.memory_space<vmem>>, %arg16: memref<64x32xf32, #tpu.memory_space<vmem>>, %arg17: memref<64x1xf32, #tpu.memory_space<vmem>>, %arg18: memref<4x24x80xf32, #tpu.memory_space<vmem>>, %arg19: memref<16x288xf32, #tpu.memory_space<vmem>>, %arg20: memref<16x1xf32, #tpu.memory_space<vmem>>, %arg21: memref<16x144xf32, #tpu.memory_space<vmem>>, %arg22: memref<16x1xf32, #tpu.memory_space<vmem>>, %arg23: memref<32x16xf32, #tpu.memory_space<vmem>>, %arg24: memref<32x1xf32, #tpu.memory_space<vmem>>, %arg25: memref<4x80x288xf32, #tpu.memory_space<vmem>>, %arg26: memref<8x144xf32, #tpu.memory_space<vmem>>, %arg27: memref<8x1xf32, #tpu.memory_space<vmem>>, %arg28: memref<8x72xf32, #tpu.memory_space<vmem>>, %arg29: memref<8x1xf32, #tpu.memory_space<vmem>>, %arg30: memref<2x8xf32, #tpu.memory_space<vmem>>, %arg31: memref<2x1xf32, #tpu.memory_space<vmem>>, %arg32: memref<1x288xf32, #tpu.memory_space<vmem>>, %arg33: memref<1x80xf32, #tpu.memory_space<vmem>>, %arg34: memref<1x24xf32, #tpu.memory_space<vmem>>, %arg35: memref<1x2x288xf32, #tpu.memory_space<vmem>>, %arg36: memref<8x360xf32, #tpu.memory_space<vmem>>, %arg37: memref<16x120xf32, #tpu.memory_space<vmem>>, %arg38: memref<32x48xf32, #tpu.memory_space<vmem>>, %arg39: memref<8x360xf32, #tpu.memory_space<vmem>>, %arg40: memref<16x120xf32, #tpu.memory_space<vmem>>, %arg41: memref<32x48xf32, #tpu.memory_space<vmem>>, %arg42: memref<8x120xf32, #tpu.memory_space<vmem>>, %arg43: memref<16x48xf32, #tpu.memory_space<vmem>>, %arg44: memref<16x120xf32, #tpu.memory_space<vmem>>, %arg45: memref<8x360xf32, #tpu.memory_space<vmem>>, %arg46: memref<16x120xf32, #tpu.memory_space<vmem>>, %arg47: memref<8x360xf32, #tpu.memory_space<vmem>>, %arg48: memref<16x120xf32, #tpu.memory_space<vmem>>, %arg49: memref<8x360xf32, #tpu.memory_space<vmem>>, %arg50: memref<288x288xf32, #tpu.memory_space<vmem>>) attributes {dimension_semantics = [#tpu.dimension_semantics<parallel>], iteration_bounds = array<i64: 2>, scalar_prefetch = 0 : i64, scratch_operands = 15 : i64, tpu.core_type = #tpu.core_type<tc>, window_params = [{transform_indices = @transform_0, window_bounds = array<i64: 1, 1, 360>}, {pipeline_mode = #tpu.pipeline_mode<synchronous>, transform_indices = @transform_1, window_bounds = array<i64: 8, 9>}, {pipeline_mode = #tpu.pipeline_mode<synchronous>, transform_indices = @transform_2, window_bounds = array<i64: 8, 1>}, {pipeline_mode = #tpu.pipeline_mode<synchronous>, transform_indices = @transform_3, window_bounds = array<i64: 8, 72>}, {pipeline_mode = #tpu.pipeline_mode<synchronous>, transform_indices = @transform_4, window_bounds = array<i64: 8, 1>}, {pipeline_mode = #tpu.pipeline_mode<synchronous>, transform_indices = @transform_5, window_bounds = array<i64: 16, 72>}, {pipeline_mode = #tpu.pipeline_mode<synchronous>, transform_indices = @transform_6, window_bounds = array<i64: 16, 1>}, {pipeline_mode = #tpu.pipeline_mode<synchronous>, transform_indices = @transform_7, window_bounds = array<i64: 16, 144>}, {pipeline_mode = #tpu.pipeline_mode<synchronous>, transform_indices = @transform_8, window_bounds = array<i64: 16, 1>}, {pipeline_mode = #tpu.pipeline_mode<synchronous>, transform_indices = @transform_9, window_bounds = array<i64: 32, 144>}, {pipeline_mode = #tpu.pipeline_mode<synchronous>, transform_indices = @transform_10, window_bounds = array<i64: 32, 1>}, {pipeline_mode = #tpu.pipeline_mode<synchronous>, transform_indices = @transform_11, window_bounds = array<i64: 32, 288>}, {pipeline_mode = #tpu.pipeline_mode<synchronous>, transform_indices = @transform_12, window_bounds = array<i64: 32, 1>}, {pipeline_mode = #tpu.pipeline_mode<synchronous>, transform_indices = @transform_13, window_bounds = array<i64: 288, 80>}, {pipeline_mode = #tpu.pipeline_mode<synchronous>, transform_indices = @transform_14, window_bounds = array<i64: 80, 24>}, {pipeline_mode = #tpu.pipeline_mode<synchronous>, transform_indices = @transform_15, window_bounds = array<i64: 64, 32>}, {pipeline_mode = #tpu.pipeline_mode<synchronous>, transform_indices = @transform_16, window_bounds = array<i64: 64, 1>}, {pipeline_mode = #tpu.pipeline_mode<synchronous>, transform_indices = @transform_17, window_bounds = array<i64: 4, 24, 80>}, {pipeline_mode = #tpu.pipeline_mode<synchronous>, transform_indices = @transform_18, window_bounds = array<i64: 16, 288>}, {pipeline_mode = #tpu.pipeline_mode<synchronous>, transform_indices = @transform_19, window_bounds = array<i64: 16, 1>}, {pipeline_mode = #tpu.pipeline_mode<synchronous>, transform_indices = @transform_20, window_bounds = array<i64: 16, 144>}, {pipeline_mode = #tpu.pipeline_mode<synchronous>, transform_indices = @transform_21, window_bounds = array<i64: 16, 1>}, {pipeline_mode = #tpu.pipeline_mode<synchronous>, transform_indices = @transform_22, window_bounds = array<i64: 32, 16>}, {pipeline_mode = #tpu.pipeline_mode<synchronous>, transform_indices = @transform_23, window_bounds = array<i64: 32, 1>}, {pipeline_mode = #tpu.pipeline_mode<synchronous>, transform_indices = @transform_24, window_bounds = array<i64: 4, 80, 288>}, {pipeline_mode = #tpu.pipeline_mode<synchronous>, transform_indices = @transform_25, window_bounds = array<i64: 8, 144>}, {pipeline_mode = #tpu.pipeline_mode<synchronous>, transform_indices = @transform_26, window_bounds = array<i64: 8, 1>}, {pipeline_mode = #tpu.pipeline_mode<synchronous>, transform_indices = @transform_27, window_bounds = array<i64: 8, 72>}, {pipeline_mode = #tpu.pipeline_mode<synchronous>, transform_indices = @transform_28, window_bounds = array<i64: 8, 1>}, {pipeline_mode = #tpu.pipeline_mode<synchronous>, transform_indices = @transform_29, window_bounds = array<i64: 2, 8>}, {pipeline_mode = #tpu.pipeline_mode<synchronous>, transform_indices = @transform_30, window_bounds = array<i64: 2, 1>}, {pipeline_mode = #tpu.pipeline_mode<synchronous>, transform_indices = @transform_31, window_bounds = array<i64: 1, 288>}, {pipeline_mode = #tpu.pipeline_mode<synchronous>, transform_indices = @transform_32, window_bounds = array<i64: 1, 80>}, {pipeline_mode = #tpu.pipeline_mode<synchronous>, transform_indices = @transform_33, window_bounds = array<i64: 1, 24>}, {transform_indices = @transform_34, window_bounds = array<i64: 1, 2, 288>}]} {
    %c0 = arith.constant 0 : index
    %c0_0 = arith.constant 0 : index
    %c17 = arith.constant 17 : index
    %0 = vector.load %arg1[%c0, %c0_0, %c17] : memref<1x1x360xf32, #tpu.memory_space<vmem>>, vector<1x1x288xf32>
    %1 = vector.shape_cast %0 : vector<1x1x288xf32> to vector<1x288xf32>
    %c0_1 = arith.constant 0 : index
    %c0_2 = arith.constant 0 : index
    %2 = vector.load %arg50[%c0_1, %c0_2] : memref<288x288xf32, #tpu.memory_space<vmem>>, vector<1x288xf32>
    tpu.vector_store %arg50[%c0_1, %c0_2], %1 {strides = array<i32>} : memref<288x288xf32, #tpu.memory_space<vmem>>, vector<1x288xf32>,
    %c0_3 = arith.constant 0 : index
    %c0_4 = arith.constant 0 : index
    %c18 = arith.constant 18 : index
    %3 = vector.load %arg1[%c0_3, %c0_4, %c18] : memref<1x1x360xf32, #tpu.memory_space<vmem>>, vector<1x1x288xf32>
    %4 = vector.shape_cast %3 : vector<1x1x288xf32> to vector<1x288xf32>
    %c1 = arith.constant 1 : index
    %c0_5 = arith.constant 0 : index
    %5 = vector.load %arg50[%c1, %c0_5] : memref<288x288xf32, #tpu.memory_space<vmem>>, vector<1x288xf32>
    tpu.vector_store %arg50[%c1, %c0_5], %4 {strides = array<i32>} : memref<288x288xf32, #tpu.memory_space<vmem>>, vector<1x288xf32>,
    %c0_6 = arith.constant 0 : index
    %c0_7 = arith.constant 0 : index
    %c19 = arith.constant 19 : index
    %6 = vector.load %arg1[%c0_6, %c0_7, %c19] : memref<1x1x360xf32, #tpu.memory_space<vmem>>, vector<1x1x288xf32>
    %7 = vector.shape_cast %6 : vector<1x1x288xf32> to vector<1x288xf32>
    %c2 = arith.constant 2 : index
    %c0_8 = arith.constant 0 : index
    %8 = vector.load %arg50[%c2, %c0_8] : memref<288x288xf32, #tpu.memory_space<vmem>>, vector<1x288xf32>
    tpu.vector_store %arg50[%c2, %c0_8], %7 {strides = array<i32>} : memref<288x288xf32, #tpu.memory_space<vmem>>, vector<1x288xf32>,
    %c0_9 = arith.constant 0 : index
    %c0_10 = arith.constant 0 : index
    %c35 = arith.constant 35 : index
    %9 = vector.load %arg1[%c0_9, %c0_10, %c35] : memref<1x1x360xf32, #tpu.memory_space<vmem>>, vector<1x1x288xf32>
    %10 = vector.shape_cast %9 : vector<1x1x288xf32> to vector<1x288xf32>
    %c3 = arith.constant 3 : index
    %c0_11 = arith.constant 0 : index
    %11 = vector.load %arg50[%c3, %c0_11] : memref<288x288xf32, #tpu.memory_space<vmem>>, vector<1x288xf32>
    tpu.vector_store %arg50[%c3, %c0_11], %10 {strides = array<i32>} : memref<288x288xf32, #tpu.memory_space<vmem>>, vector<1x288xf32>,
    %c0_12 = arith.constant 0 : index
    %c0_13 = arith.constant 0 : index
    %c36 = arith.constant 36 : index
    %12 = vector.load %arg1[%c0_12, %c0_13, %c36] : memref<1x1x360xf32, #tpu.memory_space<vmem>>, vector<1x1x288xf32>
    %13 = vector.shape_cast %12 : vector<1x1x288xf32> to vector<1x288xf32>
    %c4 = arith.constant 4 : index
    %c0_14 = arith.constant 0 : index
    %14 = vector.load %arg50[%c4, %c0_14] : memref<288x288xf32, #tpu.memory_space<vmem>>, vector<1x288xf32>
    tpu.vector_store %arg50[%c4, %c0_14], %13 {strides = array<i32>} : memref<288x288xf32, #tpu.memory_space<vmem>>, vector<1x288xf32>,
    %c0_15 = arith.constant 0 : index
    %c0_16 = arith.constant 0 : index
    %c37 = arith.constant 37 : index
    %15 = vector.load %arg1[%c0_15, %c0_16, %c37] : memref<1x1x360xf32, #tpu.memory_space<vmem>>, vector<1x1x288xf32>
    %16 = vector.shape_cast %15 : vector<1x1x288xf32> to vector<1x288xf32>
    %c5 = arith.constant 5 : index
    %c0_17 = arith.constant 0 : index
    %17 = vector.load %arg50[%c5, %c0_17] : memref<288x288xf32, #tpu.memory_space<vmem>>, vector<1x288xf32>
    tpu.vector_store %arg50[%c5, %c0_17], %16 {strides = array<i32>} : memref<288x288xf32, #tpu.memory_space<vmem>>, vector<1x288xf32>,
    %c0_18 = arith.constant 0 : index
    %c0_19 = arith.constant 0 : index
    %c53 = arith.constant 53 : index
    %18 = vector.load %arg1[%c0_18, %c0_19, %c53] : memref<1x1x360xf32, #tpu.memory_space<vmem>>, vector<1x1x288xf32>
    %19 = vector.shape_cast %18 : vector<1x1x288xf32> to vector<1x288xf32>
    %c6 = arith.constant 6 : index
    %c0_20 = arith.constant 0 : index
    %20 = vector.load %arg50[%c6, %c0_20] : memref<288x288xf32, #tpu.memory_space<vmem>>, vector<1x288xf32>
    tpu.vector_store %arg50[%c6, %c0_20], %19 {strides = array<i32>} : memref<288x288xf32, #tpu.memory_space<vmem>>, vector<1x288xf32>,
    %c0_21 = arith.constant 0 : index
    %c0_22 = arith.constant 0 : index
    %c54 = arith.constant 54 : index
    %21 = vector.load %arg1[%c0_21, %c0_22, %c54] : memref<1x1x360xf32, #tpu.memory_space<vmem>>, vector<1x1x288xf32>
    %22 = vector.shape_cast %21 : vector<1x1x288xf32> to vector<1x288xf32>
    %c7 = arith.constant 7 : index
    %c0_23 = arith.constant 0 : index
    %23 = vector.load %arg50[%c7, %c0_23] : memref<288x288xf32, #tpu.memory_space<vmem>>, vector<1x288xf32>
    tpu.vector_store %arg50[%c7, %c0_23], %22 {strides = array<i32>} : memref<288x288xf32, #tpu.memory_space<vmem>>, vector<1x288xf32>,
    %c0_24 = arith.constant 0 : index
    %c0_25 = arith.constant 0 : index
    %c55 = arith.constant 55 : index
    %24 = vector.load %arg1[%c0_24, %c0_25, %c55] : memref<1x1x360xf32, #tpu.memory_space<vmem>>, vector<1x1x288xf32>
    %25 = vector.shape_cast %24 : vector<1x1x288xf32> to vector<1x288xf32>
    %c8 = arith.constant 8 : index
    %c0_26 = arith.constant 0 : index
    %26 = vector.load %arg50[%c8, %c0_26] : memref<288x288xf32, #tpu.memory_space<vmem>>, vector<1x288xf32>
    tpu.vector_store %arg50[%c8, %c0_26], %25 {strides = array<i32>} : memref<288x288xf32, #tpu.memory_space<vmem>>, vector<1x288xf32>,
    %c0_27 = arith.constant 0 : index
    %c0_28 = arith.constant 0 : index
    %27 = vector.load %arg50[%c0_27, %c0_28] : memref<288x288xf32, #tpu.memory_space<vmem>>, vector<9x288xf32>
    %c0_29 = arith.constant 0 : index
    %c0_30 = arith.constant 0 : index
    %28 = vector.load %arg2[%c0_29, %c0_30] : memref<8x9xf32, #tpu.memory_space<vmem>>, vector<8x9xf32>
    %cst = arith.constant dense<0.000000e+00> : vector<8x288xf32>
    %29 = tpu.matmul %28, %27, %cst {dimension_numbers = #tpu.dot_dimension_numbers<[1], [0], [0], [1], [0, 0, 1, 1], [], []>} : vector<8x9xf32>, vector<9x288xf32>, vector<8x288xf32> -> vector<8x288xf32>
    %c0_31 = arith.constant 0 : index
    %c0_32 = arith.constant 0 : index
    %30 = vector.load %arg3[%c0_31, %c0_32] : memref<8x1xf32, #tpu.memory_space<vmem>>, vector<8x1xf32>
    %31 = vector.broadcast %30 : vector<8x1xf32> to vector<8x288xf32>
    %32 = arith.addf %29, %31 : vector<8x288xf32>
    %cst_33 = arith.constant 0.000000e+00 : f32
    %33 = vector.broadcast %cst_33 : f32 to vector<8x288xf32>
    %34 = arith.maximumf %32, %33 : vector<8x288xf32>
    %c0_34 = arith.constant 0 : index
    %c0_35 = arith.constant 0 : index
    %35 = vector.load %arg32[%c0_34, %c0_35] : memref<1x288xf32, #tpu.memory_space<vmem>>, vector<1x288xf32>
    %36 = vector.broadcast %35 : vector<1x288xf32> to vector<8x288xf32>
    %37 = arith.mulf %34, %36 : vector<8x288xf32>
    %cst_36 = arith.constant 0.000000e+00 : f32
    %38 = vector.broadcast %cst_36 : f32 to vector<8x36xf32>
    %c0_37 = arith.constant 0 : index
    %c0_38 = arith.constant 0 : index
    %39 = vector.load %arg36[%c0_37, %c0_38] : memref<8x360xf32, #tpu.memory_space<vmem>>, vector<8x36xf32>
    tpu.vector_store %arg36[%c0_37, %c0_38], %38 {strides = array<i32>} : memref<8x360xf32, #tpu.memory_space<vmem>>, vector<8x36xf32>,
    %c0_39 = arith.constant 0 : index
    %c36_40 = arith.constant 36 : index
    %40 = vector.load %arg36[%c0_39, %c36_40] : memref<8x360xf32, #tpu.memory_space<vmem>>, vector<8x288xf32>
    tpu.vector_store %arg36[%c0_39, %c36_40], %37 {strides = array<i32>} : memref<8x360xf32, #tpu.memory_space<vmem>>, vector<8x288xf32>,
    %cst_41 = arith.constant 0.000000e+00 : f32
    %41 = vector.broadcast %cst_41 : f32 to vector<8x36xf32>
    %c0_42 = arith.constant 0 : index
    %c324 = arith.constant 324 : index
    %42 = vector.load %arg36[%c0_42, %c324] : memref<8x360xf32, #tpu.memory_space<vmem>>, vector<8x36xf32>
    tpu.vector_store %arg36[%c0_42, %c324], %41 {strides = array<i32>} : memref<8x360xf32, #tpu.memory_space<vmem>>, vector<8x36xf32>,
    %c0_43 = arith.constant 0 : index
    %c17_44 = arith.constant 17 : index
    %43 = vector.load %arg36[%c0_43, %c17_44] : memref<8x360xf32, #tpu.memory_space<vmem>>, vector<8x288xf32>
    %c0_45 = arith.constant 0 : index
    %c0_46 = arith.constant 0 : index
    %44 = vector.load %arg50[%c0_45, %c0_46] : memref<288x288xf32, #tpu.memory_space<vmem>>, vector<8x288xf32>
    tpu.vector_store %arg50[%c0_45, %c0_46], %43 {strides = array<i32>} : memref<288x288xf32, #tpu.memory_space<vmem>>, vector<8x288xf32>,
    %c0_47 = arith.constant 0 : index
    %c18_48 = arith.constant 18 : index
    %45 = vector.load %arg36[%c0_47, %c18_48] : memref<8x360xf32, #tpu.memory_space<vmem>>, vector<8x288xf32>
    %c8_49 = arith.constant 8 : index
    %c0_50 = arith.constant 0 : index
    %46 = vector.load %arg50[%c8_49, %c0_50] : memref<288x288xf32, #tpu.memory_space<vmem>>, vector<8x288xf32>
    tpu.vector_store %arg50[%c8_49, %c0_50], %45 {strides = array<i32>} : memref<288x288xf32, #tpu.memory_space<vmem>>, vector<8x288xf32>,
    %c0_51 = arith.constant 0 : index
    %c19_52 = arith.constant 19 : index
    %47 = vector.load %arg36[%c0_51, %c19_52] : memref<8x360xf32, #tpu.memory_space<vmem>>, vector<8x288xf32>
    %c16 = arith.constant 16 : index
    %c0_53 = arith.constant 0 : index
    %48 = vector.load %arg50[%c16, %c0_53] : memref<288x288xf32, #tpu.memory_space<vmem>>, vector<8x288xf32>
    tpu.vector_store %arg50[%c16, %c0_53], %47 {strides = array<i32>} : memref<288x288xf32, #tpu.memory_space<vmem>>, vector<8x288xf32>,
    %c0_54 = arith.constant 0 : index
    %c35_55 = arith.constant 35 : index
    %49 = vector.load %arg36[%c0_54, %c35_55] : memref<8x360xf32, #tpu.memory_space<vmem>>, vector<8x288xf32>
    %c24 = arith.constant 24 : index
    %c0_56 = arith.constant 0 : index
    %50 = vector.load %arg50[%c24, %c0_56] : memref<288x288xf32, #tpu.memory_space<vmem>>, vector<8x288xf32>
    tpu.vector_store %arg50[%c24, %c0_56], %49 {strides = array<i32>} : memref<288x288xf32, #tpu.memory_space<vmem>>, vector<8x288xf32>,
    %c0_57 = arith.constant 0 : index
    %c36_58 = arith.constant 36 : index
    %51 = vector.load %arg36[%c0_57, %c36_58] : memref<8x360xf32, #tpu.memory_space<vmem>>, vector<8x288xf32>
    %c32 = arith.constant 32 : index
    %c0_59 = arith.constant 0 : index
    %52 = vector.load %arg50[%c32, %c0_59] : memref<288x288xf32, #tpu.memory_space<vmem>>, vector<8x288xf32>
    tpu.vector_store %arg50[%c32, %c0_59], %51 {strides = array<i32>} : memref<288x288xf32, #tpu.memory_space<vmem>>, vector<8x288xf32>,
    %c0_60 = arith.constant 0 : index
    %c37_61 = arith.constant 37 : index
    %53 = vector.load %arg36[%c0_60, %c37_61] : memref<8x360xf32, #tpu.memory_space<vmem>>, vector<8x288xf32>
    %c40 = arith.constant 40 : index
    %c0_62 = arith.constant 0 : index
    %54 = vector.load %arg50[%c40, %c0_62] : memref<288x288xf32, #tpu.memory_space<vmem>>, vector<8x288xf32>
    tpu.vector_store %arg50[%c40, %c0_62], %53 {strides = array<i32>} : memref<288x288xf32, #tpu.memory_space<vmem>>, vector<8x288xf32>,
    %c0_63 = arith.constant 0 : index
    %c53_64 = arith.constant 53 : index
    %55 = vector.load %arg36[%c0_63, %c53_64] : memref<8x360xf32, #tpu.memory_space<vmem>>, vector<8x288xf32>
    %c48 = arith.constant 48 : index
    %c0_65 = arith.constant 0 : index
    %56 = vector.load %arg50[%c48, %c0_65] : memref<288x288xf32, #tpu.memory_space<vmem>>, vector<8x288xf32>
    tpu.vector_store %arg50[%c48, %c0_65], %55 {strides = array<i32>} : memref<288x288xf32, #tpu.memory_space<vmem>>, vector<8x288xf32>,
    %c0_66 = arith.constant 0 : index
    %c54_67 = arith.constant 54 : index
    %57 = vector.load %arg36[%c0_66, %c54_67] : memref<8x360xf32, #tpu.memory_space<vmem>>, vector<8x288xf32>
    %c56 = arith.constant 56 : index
    %c0_68 = arith.constant 0 : index
    %58 = vector.load %arg50[%c56, %c0_68] : memref<288x288xf32, #tpu.memory_space<vmem>>, vector<8x288xf32>
    tpu.vector_store %arg50[%c56, %c0_68], %57 {strides = array<i32>} : memref<288x288xf32, #tpu.memory_space<vmem>>, vector<8x288xf32>,
    %c0_69 = arith.constant 0 : index
    %c55_70 = arith.constant 55 : index
    %59 = vector.load %arg36[%c0_69, %c55_70] : memref<8x360xf32, #tpu.memory_space<vmem>>, vector<8x288xf32>
    %c64 = arith.constant 64 : index
    %c0_71 = arith.constant 0 : index
    %60 = vector.load %arg50[%c64, %c0_71] : memref<288x288xf32, #tpu.memory_space<vmem>>, vector<8x288xf32>
    tpu.vector_store %arg50[%c64, %c0_71], %59 {strides = array<i32>} : memref<288x288xf32, #tpu.memory_space<vmem>>, vector<8x288xf32>,
    %c0_72 = arith.constant 0 : index
    %c0_73 = arith.constant 0 : index
    %61 = vector.load %arg50[%c0_72, %c0_73] : memref<288x288xf32, #tpu.memory_space<vmem>>, vector<72x288xf32>
    %c0_74 = arith.constant 0 : index
    %c0_75 = arith.constant 0 : index
    %62 = vector.load %arg4[%c0_74, %c0_75] : memref<8x72xf32, #tpu.memory_space<vmem>>, vector<8x72xf32>
    %cst_76 = arith.constant dense<0.000000e+00> : vector<8x288xf32>
    %63 = tpu.matmul %62, %61, %cst_76 {dimension_numbers = #tpu.dot_dimension_numbers<[1], [0], [0], [1], [0, 0, 1, 1], [], []>} : vector<8x72xf32>, vector<72x288xf32>, vector<8x288xf32> -> vector<8x288xf32>
    %c0_77 = arith.constant 0 : index
    %c0_78 = arith.constant 0 : index
    %64 = vector.load %arg5[%c0_77, %c0_78] : memref<8x1xf32, #tpu.memory_space<vmem>>, vector<8x1xf32>
    %65 = vector.broadcast %64 : vector<8x1xf32> to vector<8x288xf32>
    %66 = arith.addf %63, %65 : vector<8x288xf32>
    %cst_79 = arith.constant 0.000000e+00 : f32
    %67 = vector.broadcast %cst_79 : f32 to vector<8x288xf32>
    %68 = arith.maximumf %66, %67 : vector<8x288xf32>
    %c0_80 = arith.constant 0 : index
    %c0_81 = arith.constant 0 : index
    %69 = vector.load %arg32[%c0_80, %c0_81] : memref<1x288xf32, #tpu.memory_space<vmem>>, vector<1x288xf32>
    %70 = vector.broadcast %69 : vector<1x288xf32> to vector<8x288xf32>
    %71 = arith.mulf %68, %70 : vector<8x288xf32>
    %cst_82 = arith.constant 0.000000e+00 : f32
    %72 = vector.broadcast %cst_82 : f32 to vector<8x36xf32>
    %c0_83 = arith.constant 0 : index
    %c0_84 = arith.constant 0 : index
    %73 = vector.load %arg39[%c0_83, %c0_84] : memref<8x360xf32, #tpu.memory_space<vmem>>, vector<8x36xf32>
    tpu.vector_store %arg39[%c0_83, %c0_84], %72 {strides = array<i32>} : memref<8x360xf32, #tpu.memory_space<vmem>>, vector<8x36xf32>,
    %c0_85 = arith.constant 0 : index
    %c36_86 = arith.constant 36 : index
    %74 = vector.load %arg39[%c0_85, %c36_86] : memref<8x360xf32, #tpu.memory_space<vmem>>, vector<8x288xf32>
    tpu.vector_store %arg39[%c0_85, %c36_86], %71 {strides = array<i32>} : memref<8x360xf32, #tpu.memory_space<vmem>>, vector<8x288xf32>,
    %cst_87 = arith.constant 0.000000e+00 : f32
    %75 = vector.broadcast %cst_87 : f32 to vector<8x36xf32>
    %c0_88 = arith.constant 0 : index
    %c324_89 = arith.constant 324 : index
    %76 = vector.load %arg39[%c0_88, %c324_89] : memref<8x360xf32, #tpu.memory_space<vmem>>, vector<8x36xf32>
    tpu.vector_store %arg39[%c0_88, %c324_89], %75 {strides = array<i32>} : memref<8x360xf32, #tpu.memory_space<vmem>>, vector<8x36xf32>,
    %c0_90 = arith.constant 0 : index
    %c36_91 = arith.constant 36 : index
    %77 = vector.load %arg39[%c0_90, %c36_91] : memref<8x360xf32, #tpu.memory_space<vmem>>, vector<8x288xf32>
    %c0_92 = arith.constant 0 : index
    %c37_93 = arith.constant 37 : index
    %78 = vector.load %arg39[%c0_92, %c37_93] : memref<8x360xf32, #tpu.memory_space<vmem>>, vector<8x288xf32>
    %c0_94 = arith.constant 0 : index
    %c54_95 = arith.constant 54 : index
    %79 = vector.load %arg39[%c0_94, %c54_95] : memref<8x360xf32, #tpu.memory_space<vmem>>, vector<8x288xf32>
    %c0_96 = arith.constant 0 : index
    %c55_97 = arith.constant 55 : index
    %80 = vector.load %arg39[%c0_96, %c55_97] : memref<8x360xf32, #tpu.memory_space<vmem>>, vector<8x288xf32>
    %81 = arith.maximumf %77, %78 : vector<8x288xf32>
    %82 = arith.maximumf %79, %80 : vector<8x288xf32>
    %83 = arith.maximumf %81, %82 : vector<8x288xf32>
    %c0_98 = arith.constant 0 : index
    %c0_99 = arith.constant 0 : index
    %84 = vector.load %arg14[%c0_98, %c0_99] : memref<288x80xf32, #tpu.memory_space<vmem>>, vector<288x80xf32>
    %cst_100 = arith.constant dense<0.000000e+00> : vector<8x80xf32>
    %85 = tpu.matmul %83, %84, %cst_100 {dimension_numbers = #tpu.dot_dimension_numbers<[1], [0], [0], [1], [0, 0, 1, 1], [], []>} : vector<8x288xf32>, vector<288x80xf32>, vector<8x80xf32> -> vector<8x80xf32>
    %cst_101 = arith.constant 0.000000e+00 : f32
    %86 = vector.broadcast %cst_101 : f32 to vector<8x20xf32>
    %c0_102 = arith.constant 0 : index
    %c0_103 = arith.constant 0 : index
    %87 = vector.load %arg42[%c0_102, %c0_103] : memref<8x120xf32, #tpu.memory_space<vmem>>, vector<8x20xf32>
    tpu.vector_store %arg42[%c0_102, %c0_103], %86 {strides = array<i32>} : memref<8x120xf32, #tpu.memory_space<vmem>>, vector<8x20xf32>,
    %c0_104 = arith.constant 0 : index
    %c20 = arith.constant 20 : index
    %88 = vector.load %arg42[%c0_104, %c20] : memref<8x120xf32, #tpu.memory_space<vmem>>, vector<8x80xf32>
    tpu.vector_store %arg42[%c0_104, %c20], %85 {strides = array<i32>} : memref<8x120xf32, #tpu.memory_space<vmem>>, vector<8x80xf32>,
    %cst_105 = arith.constant 0.000000e+00 : f32
    %89 = vector.broadcast %cst_105 : f32 to vector<8x20xf32>
    %c0_106 = arith.constant 0 : index
    %c100 = arith.constant 100 : index
    %90 = vector.load %arg42[%c0_106, %c100] : memref<8x120xf32, #tpu.memory_space<vmem>>, vector<8x20xf32>
    tpu.vector_store %arg42[%c0_106, %c100], %89 {strides = array<i32>} : memref<8x120xf32, #tpu.memory_space<vmem>>, vector<8x20xf32>,
    %c0_107 = arith.constant 0 : index
    %c9 = arith.constant 9 : index
    %91 = vector.load %arg42[%c0_107, %c9] : memref<8x120xf32, #tpu.memory_space<vmem>>, vector<8x80xf32>
    %c0_108 = arith.constant 0 : index
    %c0_109 = arith.constant 0 : index
    %92 = vector.load %arg50[%c0_108, %c0_109] : memref<288x288xf32, #tpu.memory_space<vmem>>, vector<8x80xf32>
    tpu.vector_store %arg50[%c0_108, %c0_109], %91 {strides = array<i32>} : memref<288x288xf32, #tpu.memory_space<vmem>>, vector<8x80xf32>,
    %c0_110 = arith.constant 0 : index
    %c10 = arith.constant 10 : index
    %93 = vector.load %arg42[%c0_110, %c10] : memref<8x120xf32, #tpu.memory_space<vmem>>, vector<8x80xf32>
    %c8_111 = arith.constant 8 : index
    %c0_112 = arith.constant 0 : index
    %94 = vector.load %arg50[%c8_111, %c0_112] : memref<288x288xf32, #tpu.memory_space<vmem>>, vector<8x80xf32>
    tpu.vector_store %arg50[%c8_111, %c0_112], %93 {strides = array<i32>} : memref<288x288xf32, #tpu.memory_space<vmem>>, vector<8x80xf32>,
    %c0_113 = arith.constant 0 : index
    %c11 = arith.constant 11 : index
    %95 = vector.load %arg42[%c0_113, %c11] : memref<8x120xf32, #tpu.memory_space<vmem>>, vector<8x80xf32>
    %c16_114 = arith.constant 16 : index
    %c0_115 = arith.constant 0 : index
    %96 = vector.load %arg50[%c16_114, %c0_115] : memref<288x288xf32, #tpu.memory_space<vmem>>, vector<8x80xf32>
    tpu.vector_store %arg50[%c16_114, %c0_115], %95 {strides = array<i32>} : memref<288x288xf32, #tpu.memory_space<vmem>>, vector<8x80xf32>,
    %c0_116 = arith.constant 0 : index
    %c19_117 = arith.constant 19 : index
    %97 = vector.load %arg42[%c0_116, %c19_117] : memref<8x120xf32, #tpu.memory_space<vmem>>, vector<8x80xf32>
    %c24_118 = arith.constant 24 : index
    %c0_119 = arith.constant 0 : index
    %98 = vector.load %arg50[%c24_118, %c0_119] : memref<288x288xf32, #tpu.memory_space<vmem>>, vector<8x80xf32>
    tpu.vector_store %arg50[%c24_118, %c0_119], %97 {strides = array<i32>} : memref<288x288xf32, #tpu.memory_space<vmem>>, vector<8x80xf32>,
    %c0_120 = arith.constant 0 : index
    %c20_121 = arith.constant 20 : index
    %99 = vector.load %arg42[%c0_120, %c20_121] : memref<8x120xf32, #tpu.memory_space<vmem>>, vector<8x80xf32>
    %c32_122 = arith.constant 32 : index
    %c0_123 = arith.constant 0 : index
    %100 = vector.load %arg50[%c32_122, %c0_123] : memref<288x288xf32, #tpu.memory_space<vmem>>, vector<8x80xf32>
    tpu.vector_store %arg50[%c32_122, %c0_123], %99 {strides = array<i32>} : memref<288x288xf32, #tpu.memory_space<vmem>>, vector<8x80xf32>,
    %c0_124 = arith.constant 0 : index
    %c21 = arith.constant 21 : index
    %101 = vector.load %arg42[%c0_124, %c21] : memref<8x120xf32, #tpu.memory_space<vmem>>, vector<8x80xf32>
    %c40_125 = arith.constant 40 : index
    %c0_126 = arith.constant 0 : index
    %102 = vector.load %arg50[%c40_125, %c0_126] : memref<288x288xf32, #tpu.memory_space<vmem>>, vector<8x80xf32>
    tpu.vector_store %arg50[%c40_125, %c0_126], %101 {strides = array<i32>} : memref<288x288xf32, #tpu.memory_space<vmem>>, vector<8x80xf32>,
    %c0_127 = arith.constant 0 : index
    %c29 = arith.constant 29 : index
    %103 = vector.load %arg42[%c0_127, %c29] : memref<8x120xf32, #tpu.memory_space<vmem>>, vector<8x80xf32>
    %c48_128 = arith.constant 48 : index
    %c0_129 = arith.constant 0 : index
    %104 = vector.load %arg50[%c48_128, %c0_129] : memref<288x288xf32, #tpu.memory_space<vmem>>, vector<8x80xf32>
    tpu.vector_store %arg50[%c48_128, %c0_129], %103 {strides = array<i32>} : memref<288x288xf32, #tpu.memory_space<vmem>>, vector<8x80xf32>,
    %c0_130 = arith.constant 0 : index
    %c30 = arith.constant 30 : index
    %105 = vector.load %arg42[%c0_130, %c30] : memref<8x120xf32, #tpu.memory_space<vmem>>, vector<8x80xf32>
    %c56_131 = arith.constant 56 : index
    %c0_132 = arith.constant 0 : index
    %106 = vector.load %arg50[%c56_131, %c0_132] : memref<288x288xf32, #tpu.memory_space<vmem>>, vector<8x80xf32>
    tpu.vector_store %arg50[%c56_131, %c0_132], %105 {strides = array<i32>} : memref<288x288xf32, #tpu.memory_space<vmem>>, vector<8x80xf32>,
    %c0_133 = arith.constant 0 : index
    %c31 = arith.constant 31 : index
    %107 = vector.load %arg42[%c0_133, %c31] : memref<8x120xf32, #tpu.memory_space<vmem>>, vector<8x80xf32>
    %c64_134 = arith.constant 64 : index
    %c0_135 = arith.constant 0 : index
    %108 = vector.load %arg50[%c64_134, %c0_135] : memref<288x288xf32, #tpu.memory_space<vmem>>, vector<8x80xf32>
    tpu.vector_store %arg50[%c64_134, %c0_135], %107 {strides = array<i32>} : memref<288x288xf32, #tpu.memory_space<vmem>>, vector<8x80xf32>,
    %c0_136 = arith.constant 0 : index
    %c0_137 = arith.constant 0 : index
    %109 = vector.load %arg50[%c0_136, %c0_137] : memref<288x288xf32, #tpu.memory_space<vmem>>, vector<72x80xf32>
    %c0_138 = arith.constant 0 : index
    %c0_139 = arith.constant 0 : index
    %110 = vector.load %arg6[%c0_138, %c0_139] : memref<16x72xf32, #tpu.memory_space<vmem>>, vector<16x72xf32>
    %cst_140 = arith.constant dense<0.000000e+00> : vector<16x80xf32>
    %111 = tpu.matmul %110, %109, %cst_140 {dimension_numbers = #tpu.dot_dimension_numbers<[1], [0], [0], [1], [0, 0, 1, 1], [], []>} : vector<16x72xf32>, vector<72x80xf32>, vector<16x80xf32> -> vector<16x80xf32>
    %c0_141 = arith.constant 0 : index
    %c0_142 = arith.constant 0 : index
    %112 = vector.load %arg7[%c0_141, %c0_142] : memref<16x1xf32, #tpu.memory_space<vmem>>, vector<16x1xf32>
    %113 = vector.broadcast %112 : vector<16x1xf32> to vector<16x80xf32>
    %114 = arith.addf %111, %113 : vector<16x80xf32>
    %cst_143 = arith.constant 0.000000e+00 : f32
    %115 = vector.broadcast %cst_143 : f32 to vector<16x80xf32>
    %116 = arith.maximumf %114, %115 : vector<16x80xf32>
    %c0_144 = arith.constant 0 : index
    %c0_145 = arith.constant 0 : index
    %117 = vector.load %arg33[%c0_144, %c0_145] : memref<1x80xf32, #tpu.memory_space<vmem>>, vector<1x80xf32>
    %118 = vector.broadcast %117 : vector<1x80xf32> to vector<16x80xf32>
    %119 = arith.mulf %116, %118 : vector<16x80xf32>
    %cst_146 = arith.constant 0.000000e+00 : f32
    %120 = vector.broadcast %cst_146 : f32 to vector<16x20xf32>
    %c0_147 = arith.constant 0 : index
    %c0_148 = arith.constant 0 : index
    %121 = vector.load %arg37[%c0_147, %c0_148] : memref<16x120xf32, #tpu.memory_space<vmem>>, vector<16x20xf32>
    tpu.vector_store %arg37[%c0_147, %c0_148], %120 {strides = array<i32>} : memref<16x120xf32, #tpu.memory_space<vmem>>, vector<16x20xf32>,
    %c0_149 = arith.constant 0 : index
    %c20_150 = arith.constant 20 : index
    %122 = vector.load %arg37[%c0_149, %c20_150] : memref<16x120xf32, #tpu.memory_space<vmem>>, vector<16x80xf32>
    tpu.vector_store %arg37[%c0_149, %c20_150], %119 {strides = array<i32>} : memref<16x120xf32, #tpu.memory_space<vmem>>, vector<16x80xf32>,
    %cst_151 = arith.constant 0.000000e+00 : f32
    %123 = vector.broadcast %cst_151 : f32 to vector<16x20xf32>
    %c0_152 = arith.constant 0 : index
    %c100_153 = arith.constant 100 : index
    %124 = vector.load %arg37[%c0_152, %c100_153] : memref<16x120xf32, #tpu.memory_space<vmem>>, vector<16x20xf32>
    tpu.vector_store %arg37[%c0_152, %c100_153], %123 {strides = array<i32>} : memref<16x120xf32, #tpu.memory_space<vmem>>, vector<16x20xf32>,
    %c0_154 = arith.constant 0 : index
    %c9_155 = arith.constant 9 : index
    %125 = vector.load %arg37[%c0_154, %c9_155] : memref<16x120xf32, #tpu.memory_space<vmem>>, vector<16x80xf32>
    %c0_156 = arith.constant 0 : index
    %c0_157 = arith.constant 0 : index
    %126 = vector.load %arg50[%c0_156, %c0_157] : memref<288x288xf32, #tpu.memory_space<vmem>>, vector<16x80xf32>
    tpu.vector_store %arg50[%c0_156, %c0_157], %125 {strides = array<i32>} : memref<288x288xf32, #tpu.memory_space<vmem>>, vector<16x80xf32>,
    %c0_158 = arith.constant 0 : index
    %c10_159 = arith.constant 10 : index
    %127 = vector.load %arg37[%c0_158, %c10_159] : memref<16x120xf32, #tpu.memory_space<vmem>>, vector<16x80xf32>
    %c16_160 = arith.constant 16 : index
    %c0_161 = arith.constant 0 : index
    %128 = vector.load %arg50[%c16_160, %c0_161] : memref<288x288xf32, #tpu.memory_space<vmem>>, vector<16x80xf32>
    tpu.vector_store %arg50[%c16_160, %c0_161], %127 {strides = array<i32>} : memref<288x288xf32, #tpu.memory_space<vmem>>, vector<16x80xf32>,
    %c0_162 = arith.constant 0 : index
    %c11_163 = arith.constant 11 : index
    %129 = vector.load %arg37[%c0_162, %c11_163] : memref<16x120xf32, #tpu.memory_space<vmem>>, vector<16x80xf32>
    %c32_164 = arith.constant 32 : index
    %c0_165 = arith.constant 0 : index
    %130 = vector.load %arg50[%c32_164, %c0_165] : memref<288x288xf32, #tpu.memory_space<vmem>>, vector<16x80xf32>
    tpu.vector_store %arg50[%c32_164, %c0_165], %129 {strides = array<i32>} : memref<288x288xf32, #tpu.memory_space<vmem>>, vector<16x80xf32>,
    %c0_166 = arith.constant 0 : index
    %c19_167 = arith.constant 19 : index
    %131 = vector.load %arg37[%c0_166, %c19_167] : memref<16x120xf32, #tpu.memory_space<vmem>>, vector<16x80xf32>
    %c48_168 = arith.constant 48 : index
    %c0_169 = arith.constant 0 : index
    %132 = vector.load %arg50[%c48_168, %c0_169] : memref<288x288xf32, #tpu.memory_space<vmem>>, vector<16x80xf32>
    tpu.vector_store %arg50[%c48_168, %c0_169], %131 {strides = array<i32>} : memref<288x288xf32, #tpu.memory_space<vmem>>, vector<16x80xf32>,
    %c0_170 = arith.constant 0 : index
    %c20_171 = arith.constant 20 : index
    %133 = vector.load %arg37[%c0_170, %c20_171] : memref<16x120xf32, #tpu.memory_space<vmem>>, vector<16x80xf32>
    %c64_172 = arith.constant 64 : index
    %c0_173 = arith.constant 0 : index
    %134 = vector.load %arg50[%c64_172, %c0_173] : memref<288x288xf32, #tpu.memory_space<vmem>>, vector<16x80xf32>
    tpu.vector_store %arg50[%c64_172, %c0_173], %133 {strides = array<i32>} : memref<288x288xf32, #tpu.memory_space<vmem>>, vector<16x80xf32>,
    %c0_174 = arith.constant 0 : index
    %c21_175 = arith.constant 21 : index
    %135 = vector.load %arg37[%c0_174, %c21_175] : memref<16x120xf32, #tpu.memory_space<vmem>>, vector<16x80xf32>
    %c80 = arith.constant 80 : index
    %c0_176 = arith.constant 0 : index
    %136 = vector.load %arg50[%c80, %c0_176] : memref<288x288xf32, #tpu.memory_space<vmem>>, vector<16x80xf32>
    tpu.vector_store %arg50[%c80, %c0_176], %135 {strides = array<i32>} : memref<288x288xf32, #tpu.memory_space<vmem>>, vector<16x80xf32>,
    %c0_177 = arith.constant 0 : index
    %c29_178 = arith.constant 29 : index
    %137 = vector.load %arg37[%c0_177, %c29_178] : memref<16x120xf32, #tpu.memory_space<vmem>>, vector<16x80xf32>
    %c96 = arith.constant 96 : index
    %c0_179 = arith.constant 0 : index
    %138 = vector.load %arg50[%c96, %c0_179] : memref<288x288xf32, #tpu.memory_space<vmem>>, vector<16x80xf32>
    tpu.vector_store %arg50[%c96, %c0_179], %137 {strides = array<i32>} : memref<288x288xf32, #tpu.memory_space<vmem>>, vector<16x80xf32>,
    %c0_180 = arith.constant 0 : index
    %c30_181 = arith.constant 30 : index
    %139 = vector.load %arg37[%c0_180, %c30_181] : memref<16x120xf32, #tpu.memory_space<vmem>>, vector<16x80xf32>
    %c112 = arith.constant 112 : index
    %c0_182 = arith.constant 0 : index
    %140 = vector.load %arg50[%c112, %c0_182] : memref<288x288xf32, #tpu.memory_space<vmem>>, vector<16x80xf32>
    tpu.vector_store %arg50[%c112, %c0_182], %139 {strides = array<i32>} : memref<288x288xf32, #tpu.memory_space<vmem>>, vector<16x80xf32>,
    %c0_183 = arith.constant 0 : index
    %c31_184 = arith.constant 31 : index
    %141 = vector.load %arg37[%c0_183, %c31_184] : memref<16x120xf32, #tpu.memory_space<vmem>>, vector<16x80xf32>
    %c128 = arith.constant 128 : index
    %c0_185 = arith.constant 0 : index
    %142 = vector.load %arg50[%c128, %c0_185] : memref<288x288xf32, #tpu.memory_space<vmem>>, vector<16x80xf32>
    tpu.vector_store %arg50[%c128, %c0_185], %141 {strides = array<i32>} : memref<288x288xf32, #tpu.memory_space<vmem>>, vector<16x80xf32>,
    %c0_186 = arith.constant 0 : index
    %c0_187 = arith.constant 0 : index
    %143 = vector.load %arg50[%c0_186, %c0_187] : memref<288x288xf32, #tpu.memory_space<vmem>>, vector<144x80xf32>
    %c0_188 = arith.constant 0 : index
    %c0_189 = arith.constant 0 : index
    %144 = vector.load %arg8[%c0_188, %c0_189] : memref<16x144xf32, #tpu.memory_space<vmem>>, vector<16x144xf32>
    %cst_190 = arith.constant dense<0.000000e+00> : vector<16x80xf32>
    %145 = tpu.matmul %144, %143, %cst_190 {dimension_numbers = #tpu.dot_dimension_numbers<[1], [0], [0], [1], [0, 0, 1, 1], [], []>} : vector<16x144xf32>, vector<144x80xf32>, vector<16x80xf32> -> vector<16x80xf32>
    %c0_191 = arith.constant 0 : index
    %c0_192 = arith.constant 0 : index
    %146 = vector.load %arg9[%c0_191, %c0_192] : memref<16x1xf32, #tpu.memory_space<vmem>>, vector<16x1xf32>
    %147 = vector.broadcast %146 : vector<16x1xf32> to vector<16x80xf32>
    %148 = arith.addf %145, %147 : vector<16x80xf32>
    %cst_193 = arith.constant 0.000000e+00 : f32
    %149 = vector.broadcast %cst_193 : f32 to vector<16x80xf32>
    %150 = arith.maximumf %148, %149 : vector<16x80xf32>
    %c0_194 = arith.constant 0 : index
    %c0_195 = arith.constant 0 : index
    %151 = vector.load %arg33[%c0_194, %c0_195] : memref<1x80xf32, #tpu.memory_space<vmem>>, vector<1x80xf32>
    %152 = vector.broadcast %151 : vector<1x80xf32> to vector<16x80xf32>
    %153 = arith.mulf %150, %152 : vector<16x80xf32>
    %cst_196 = arith.constant 0.000000e+00 : f32
    %154 = vector.broadcast %cst_196 : f32 to vector<16x20xf32>
    %c0_197 = arith.constant 0 : index
    %c0_198 = arith.constant 0 : index
    %155 = vector.load %arg40[%c0_197, %c0_198] : memref<16x120xf32, #tpu.memory_space<vmem>>, vector<16x20xf32>
    tpu.vector_store %arg40[%c0_197, %c0_198], %154 {strides = array<i32>} : memref<16x120xf32, #tpu.memory_space<vmem>>, vector<16x20xf32>,
    %c0_199 = arith.constant 0 : index
    %c20_200 = arith.constant 20 : index
    %156 = vector.load %arg40[%c0_199, %c20_200] : memref<16x120xf32, #tpu.memory_space<vmem>>, vector<16x80xf32>
    tpu.vector_store %arg40[%c0_199, %c20_200], %153 {strides = array<i32>} : memref<16x120xf32, #tpu.memory_space<vmem>>, vector<16x80xf32>,
    %cst_201 = arith.constant 0.000000e+00 : f32
    %157 = vector.broadcast %cst_201 : f32 to vector<16x20xf32>
    %c0_202 = arith.constant 0 : index
    %c100_203 = arith.constant 100 : index
    %158 = vector.load %arg40[%c0_202, %c100_203] : memref<16x120xf32, #tpu.memory_space<vmem>>, vector<16x20xf32>
    tpu.vector_store %arg40[%c0_202, %c100_203], %157 {strides = array<i32>} : memref<16x120xf32, #tpu.memory_space<vmem>>, vector<16x20xf32>,
    %c0_204 = arith.constant 0 : index
    %c20_205 = arith.constant 20 : index
    %159 = vector.load %arg40[%c0_204, %c20_205] : memref<16x120xf32, #tpu.memory_space<vmem>>, vector<16x80xf32>
    %c0_206 = arith.constant 0 : index
    %c21_207 = arith.constant 21 : index
    %160 = vector.load %arg40[%c0_206, %c21_207] : memref<16x120xf32, #tpu.memory_space<vmem>>, vector<16x80xf32>
    %c0_208 = arith.constant 0 : index
    %c30_209 = arith.constant 30 : index
    %161 = vector.load %arg40[%c0_208, %c30_209] : memref<16x120xf32, #tpu.memory_space<vmem>>, vector<16x80xf32>
    %c0_210 = arith.constant 0 : index
    %c31_211 = arith.constant 31 : index
    %162 = vector.load %arg40[%c0_210, %c31_211] : memref<16x120xf32, #tpu.memory_space<vmem>>, vector<16x80xf32>
    %163 = arith.maximumf %159, %160 : vector<16x80xf32>
    %164 = arith.maximumf %161, %162 : vector<16x80xf32>
    %165 = arith.maximumf %163, %164 : vector<16x80xf32>
    %c0_212 = arith.constant 0 : index
    %c0_213 = arith.constant 0 : index
    %166 = vector.load %arg15[%c0_212, %c0_213] : memref<80x24xf32, #tpu.memory_space<vmem>>, vector<80x24xf32>
    %cst_214 = arith.constant dense<0.000000e+00> : vector<16x24xf32>
    %167 = tpu.matmul %165, %166, %cst_214 {dimension_numbers = #tpu.dot_dimension_numbers<[1], [0], [0], [1], [0, 0, 1, 1], [], []>} : vector<16x80xf32>, vector<80x24xf32>, vector<16x24xf32> -> vector<16x24xf32>
    %cst_215 = arith.constant 0.000000e+00 : f32
    %168 = vector.broadcast %cst_215 : f32 to vector<16x12xf32>
    %c0_216 = arith.constant 0 : index
    %c0_217 = arith.constant 0 : index
    %169 = vector.load %arg43[%c0_216, %c0_217] : memref<16x48xf32, #tpu.memory_space<vmem>>, vector<16x12xf32>
    tpu.vector_store %arg43[%c0_216, %c0_217], %168 {strides = array<i32>} : memref<16x48xf32, #tpu.memory_space<vmem>>, vector<16x12xf32>,
    %c0_218 = arith.constant 0 : index
    %c12 = arith.constant 12 : index
    %170 = vector.load %arg43[%c0_218, %c12] : memref<16x48xf32, #tpu.memory_space<vmem>>, vector<16x24xf32>
    tpu.vector_store %arg43[%c0_218, %c12], %167 {strides = array<i32>} : memref<16x48xf32, #tpu.memory_space<vmem>>, vector<16x24xf32>,
    %cst_219 = arith.constant 0.000000e+00 : f32
    %171 = vector.broadcast %cst_219 : f32 to vector<16x12xf32>
    %c0_220 = arith.constant 0 : index
    %c36_221 = arith.constant 36 : index
    %172 = vector.load %arg43[%c0_220, %c36_221] : memref<16x48xf32, #tpu.memory_space<vmem>>, vector<16x12xf32>
    tpu.vector_store %arg43[%c0_220, %c36_221], %171 {strides = array<i32>} : memref<16x48xf32, #tpu.memory_space<vmem>>, vector<16x12xf32>,
    %c0_222 = arith.constant 0 : index
    %c5_223 = arith.constant 5 : index
    %173 = vector.load %arg43[%c0_222, %c5_223] : memref<16x48xf32, #tpu.memory_space<vmem>>, vector<16x24xf32>
    %c0_224 = arith.constant 0 : index
    %c0_225 = arith.constant 0 : index
    %174 = vector.load %arg50[%c0_224, %c0_225] : memref<288x288xf32, #tpu.memory_space<vmem>>, vector<16x24xf32>
    tpu.vector_store %arg50[%c0_224, %c0_225], %173 {strides = array<i32>} : memref<288x288xf32, #tpu.memory_space<vmem>>, vector<16x24xf32>,
    %c0_226 = arith.constant 0 : index
    %c6_227 = arith.constant 6 : index
    %175 = vector.load %arg43[%c0_226, %c6_227] : memref<16x48xf32, #tpu.memory_space<vmem>>, vector<16x24xf32>
    %c16_228 = arith.constant 16 : index
    %c0_229 = arith.constant 0 : index
    %176 = vector.load %arg50[%c16_228, %c0_229] : memref<288x288xf32, #tpu.memory_space<vmem>>, vector<16x24xf32>
    tpu.vector_store %arg50[%c16_228, %c0_229], %175 {strides = array<i32>} : memref<288x288xf32, #tpu.memory_space<vmem>>, vector<16x24xf32>,
    %c0_230 = arith.constant 0 : index
    %c7_231 = arith.constant 7 : index
    %177 = vector.load %arg43[%c0_230, %c7_231] : memref<16x48xf32, #tpu.memory_space<vmem>>, vector<16x24xf32>
    %c32_232 = arith.constant 32 : index
    %c0_233 = arith.constant 0 : index
    %178 = vector.load %arg50[%c32_232, %c0_233] : memref<288x288xf32, #tpu.memory_space<vmem>>, vector<16x24xf32>
    tpu.vector_store %arg50[%c32_232, %c0_233], %177 {strides = array<i32>} : memref<288x288xf32, #tpu.memory_space<vmem>>, vector<16x24xf32>,
    %c0_234 = arith.constant 0 : index
    %c11_235 = arith.constant 11 : index
    %179 = vector.load %arg43[%c0_234, %c11_235] : memref<16x48xf32, #tpu.memory_space<vmem>>, vector<16x24xf32>
    %c48_236 = arith.constant 48 : index
    %c0_237 = arith.constant 0 : index
    %180 = vector.load %arg50[%c48_236, %c0_237] : memref<288x288xf32, #tpu.memory_space<vmem>>, vector<16x24xf32>
    tpu.vector_store %arg50[%c48_236, %c0_237], %179 {strides = array<i32>} : memref<288x288xf32, #tpu.memory_space<vmem>>, vector<16x24xf32>,
    %c0_238 = arith.constant 0 : index
    %c12_239 = arith.constant 12 : index
    %181 = vector.load %arg43[%c0_238, %c12_239] : memref<16x48xf32, #tpu.memory_space<vmem>>, vector<16x24xf32>
    %c64_240 = arith.constant 64 : index
    %c0_241 = arith.constant 0 : index
    %182 = vector.load %arg50[%c64_240, %c0_241] : memref<288x288xf32, #tpu.memory_space<vmem>>, vector<16x24xf32>
    tpu.vector_store %arg50[%c64_240, %c0_241], %181 {strides = array<i32>} : memref<288x288xf32, #tpu.memory_space<vmem>>, vector<16x24xf32>,
    %c0_242 = arith.constant 0 : index
    %c13 = arith.constant 13 : index
    %183 = vector.load %arg43[%c0_242, %c13] : memref<16x48xf32, #tpu.memory_space<vmem>>, vector<16x24xf32>
    %c80_243 = arith.constant 80 : index
    %c0_244 = arith.constant 0 : index
    %184 = vector.load %arg50[%c80_243, %c0_244] : memref<288x288xf32, #tpu.memory_space<vmem>>, vector<16x24xf32>
    tpu.vector_store %arg50[%c80_243, %c0_244], %183 {strides = array<i32>} : memref<288x288xf32, #tpu.memory_space<vmem>>, vector<16x24xf32>,
    %c0_245 = arith.constant 0 : index
    %c17_246 = arith.constant 17 : index
    %185 = vector.load %arg43[%c0_245, %c17_246] : memref<16x48xf32, #tpu.memory_space<vmem>>, vector<16x24xf32>
    %c96_247 = arith.constant 96 : index
    %c0_248 = arith.constant 0 : index
    %186 = vector.load %arg50[%c96_247, %c0_248] : memref<288x288xf32, #tpu.memory_space<vmem>>, vector<16x24xf32>
    tpu.vector_store %arg50[%c96_247, %c0_248], %185 {strides = array<i32>} : memref<288x288xf32, #tpu.memory_space<vmem>>, vector<16x24xf32>,
    %c0_249 = arith.constant 0 : index
    %c18_250 = arith.constant 18 : index
    %187 = vector.load %arg43[%c0_249, %c18_250] : memref<16x48xf32, #tpu.memory_space<vmem>>, vector<16x24xf32>
    %c112_251 = arith.constant 112 : index
    %c0_252 = arith.constant 0 : index
    %188 = vector.load %arg50[%c112_251, %c0_252] : memref<288x288xf32, #tpu.memory_space<vmem>>, vector<16x24xf32>
    tpu.vector_store %arg50[%c112_251, %c0_252], %187 {strides = array<i32>} : memref<288x288xf32, #tpu.memory_space<vmem>>, vector<16x24xf32>,
    %c0_253 = arith.constant 0 : index
    %c19_254 = arith.constant 19 : index
    %189 = vector.load %arg43[%c0_253, %c19_254] : memref<16x48xf32, #tpu.memory_space<vmem>>, vector<16x24xf32>
    %c128_255 = arith.constant 128 : index
    %c0_256 = arith.constant 0 : index
    %190 = vector.load %arg50[%c128_255, %c0_256] : memref<288x288xf32, #tpu.memory_space<vmem>>, vector<16x24xf32>
    tpu.vector_store %arg50[%c128_255, %c0_256], %189 {strides = array<i32>} : memref<288x288xf32, #tpu.memory_space<vmem>>, vector<16x24xf32>,
    %c0_257 = arith.constant 0 : index
    %c0_258 = arith.constant 0 : index
    %191 = vector.load %arg50[%c0_257, %c0_258] : memref<288x288xf32, #tpu.memory_space<vmem>>, vector<144x24xf32>
    %c0_259 = arith.constant 0 : index
    %c0_260 = arith.constant 0 : index
    %192 = vector.load %arg10[%c0_259, %c0_260] : memref<32x144xf32, #tpu.memory_space<vmem>>, vector<32x144xf32>
    %cst_261 = arith.constant dense<0.000000e+00> : vector<32x24xf32>
    %193 = tpu.matmul %192, %191, %cst_261 {dimension_numbers = #tpu.dot_dimension_numbers<[1], [0], [0], [1], [0, 0, 1, 1], [], []>} : vector<32x144xf32>, vector<144x24xf32>, vector<32x24xf32> -> vector<32x24xf32>
    %c0_262 = arith.constant 0 : index
    %c0_263 = arith.constant 0 : index
    %194 = vector.load %arg11[%c0_262, %c0_263] : memref<32x1xf32, #tpu.memory_space<vmem>>, vector<32x1xf32>
    %195 = vector.broadcast %194 : vector<32x1xf32> to vector<32x24xf32>
    %196 = arith.addf %193, %195 : vector<32x24xf32>
    %cst_264 = arith.constant 0.000000e+00 : f32
    %197 = vector.broadcast %cst_264 : f32 to vector<32x24xf32>
    %198 = arith.maximumf %196, %197 : vector<32x24xf32>
    %c0_265 = arith.constant 0 : index
    %c0_266 = arith.constant 0 : index
    %199 = vector.load %arg34[%c0_265, %c0_266] : memref<1x24xf32, #tpu.memory_space<vmem>>, vector<1x24xf32>
    %200 = vector.broadcast %199 : vector<1x24xf32> to vector<32x24xf32>
    %201 = arith.mulf %198, %200 : vector<32x24xf32>
    %cst_267 = arith.constant 0.000000e+00 : f32
    %202 = vector.broadcast %cst_267 : f32 to vector<32x12xf32>
    %c0_268 = arith.constant 0 : index
    %c0_269 = arith.constant 0 : index
    %203 = vector.load %arg38[%c0_268, %c0_269] : memref<32x48xf32, #tpu.memory_space<vmem>>, vector<32x12xf32>
    tpu.vector_store %arg38[%c0_268, %c0_269], %202 {strides = array<i32>} : memref<32x48xf32, #tpu.memory_space<vmem>>, vector<32x12xf32>,
    %c0_270 = arith.constant 0 : index
    %c12_271 = arith.constant 12 : index
    %204 = vector.load %arg38[%c0_270, %c12_271] : memref<32x48xf32, #tpu.memory_space<vmem>>, vector<32x24xf32>
    tpu.vector_store %arg38[%c0_270, %c12_271], %201 {strides = array<i32>} : memref<32x48xf32, #tpu.memory_space<vmem>>, vector<32x24xf32>,
    %cst_272 = arith.constant 0.000000e+00 : f32
    %205 = vector.broadcast %cst_272 : f32 to vector<32x12xf32>
    %c0_273 = arith.constant 0 : index
    %c36_274 = arith.constant 36 : index
    %206 = vector.load %arg38[%c0_273, %c36_274] : memref<32x48xf32, #tpu.memory_space<vmem>>, vector<32x12xf32>
    tpu.vector_store %arg38[%c0_273, %c36_274], %205 {strides = array<i32>} : memref<32x48xf32, #tpu.memory_space<vmem>>, vector<32x12xf32>,
    %c0_275 = arith.constant 0 : index
    %c5_276 = arith.constant 5 : index
    %207 = vector.load %arg38[%c0_275, %c5_276] : memref<32x48xf32, #tpu.memory_space<vmem>>, vector<32x24xf32>
    %c0_277 = arith.constant 0 : index
    %c0_278 = arith.constant 0 : index
    %208 = vector.load %arg50[%c0_277, %c0_278] : memref<288x288xf32, #tpu.memory_space<vmem>>, vector<32x24xf32>
    tpu.vector_store %arg50[%c0_277, %c0_278], %207 {strides = array<i32>} : memref<288x288xf32, #tpu.memory_space<vmem>>, vector<32x24xf32>,
    %c0_279 = arith.constant 0 : index
    %c6_280 = arith.constant 6 : index
    %209 = vector.load %arg38[%c0_279, %c6_280] : memref<32x48xf32, #tpu.memory_space<vmem>>, vector<32x24xf32>
    %c32_281 = arith.constant 32 : index
    %c0_282 = arith.constant 0 : index
    %210 = vector.load %arg50[%c32_281, %c0_282] : memref<288x288xf32, #tpu.memory_space<vmem>>, vector<32x24xf32>
    tpu.vector_store %arg50[%c32_281, %c0_282], %209 {strides = array<i32>} : memref<288x288xf32, #tpu.memory_space<vmem>>, vector<32x24xf32>,
    %c0_283 = arith.constant 0 : index
    %c7_284 = arith.constant 7 : index
    %211 = vector.load %arg38[%c0_283, %c7_284] : memref<32x48xf32, #tpu.memory_space<vmem>>, vector<32x24xf32>
    %c64_285 = arith.constant 64 : index
    %c0_286 = arith.constant 0 : index
    %212 = vector.load %arg50[%c64_285, %c0_286] : memref<288x288xf32, #tpu.memory_space<vmem>>, vector<32x24xf32>
    tpu.vector_store %arg50[%c64_285, %c0_286], %211 {strides = array<i32>} : memref<288x288xf32, #tpu.memory_space<vmem>>, vector<32x24xf32>,
    %c0_287 = arith.constant 0 : index
    %c11_288 = arith.constant 11 : index
    %213 = vector.load %arg38[%c0_287, %c11_288] : memref<32x48xf32, #tpu.memory_space<vmem>>, vector<32x24xf32>
    %c96_289 = arith.constant 96 : index
    %c0_290 = arith.constant 0 : index
    %214 = vector.load %arg50[%c96_289, %c0_290] : memref<288x288xf32, #tpu.memory_space<vmem>>, vector<32x24xf32>
    tpu.vector_store %arg50[%c96_289, %c0_290], %213 {strides = array<i32>} : memref<288x288xf32, #tpu.memory_space<vmem>>, vector<32x24xf32>,
    %c0_291 = arith.constant 0 : index
    %c12_292 = arith.constant 12 : index
    %215 = vector.load %arg38[%c0_291, %c12_292] : memref<32x48xf32, #tpu.memory_space<vmem>>, vector<32x24xf32>
    %c128_293 = arith.constant 128 : index
    %c0_294 = arith.constant 0 : index
    %216 = vector.load %arg50[%c128_293, %c0_294] : memref<288x288xf32, #tpu.memory_space<vmem>>, vector<32x24xf32>
    tpu.vector_store %arg50[%c128_293, %c0_294], %215 {strides = array<i32>} : memref<288x288xf32, #tpu.memory_space<vmem>>, vector<32x24xf32>,
    %c0_295 = arith.constant 0 : index
    %c13_296 = arith.constant 13 : index
    %217 = vector.load %arg38[%c0_295, %c13_296] : memref<32x48xf32, #tpu.memory_space<vmem>>, vector<32x24xf32>
    %c160 = arith.constant 160 : index
    %c0_297 = arith.constant 0 : index
    %218 = vector.load %arg50[%c160, %c0_297] : memref<288x288xf32, #tpu.memory_space<vmem>>, vector<32x24xf32>
    tpu.vector_store %arg50[%c160, %c0_297], %217 {strides = array<i32>} : memref<288x288xf32, #tpu.memory_space<vmem>>, vector<32x24xf32>,
    %c0_298 = arith.constant 0 : index
    %c17_299 = arith.constant 17 : index
    %219 = vector.load %arg38[%c0_298, %c17_299] : memref<32x48xf32, #tpu.memory_space<vmem>>, vector<32x24xf32>
    %c192 = arith.constant 192 : index
    %c0_300 = arith.constant 0 : index
    %220 = vector.load %arg50[%c192, %c0_300] : memref<288x288xf32, #tpu.memory_space<vmem>>, vector<32x24xf32>
    tpu.vector_store %arg50[%c192, %c0_300], %219 {strides = array<i32>} : memref<288x288xf32, #tpu.memory_space<vmem>>, vector<32x24xf32>,
    %c0_301 = arith.constant 0 : index
    %c18_302 = arith.constant 18 : index
    %221 = vector.load %arg38[%c0_301, %c18_302] : memref<32x48xf32, #tpu.memory_space<vmem>>, vector<32x24xf32>
    %c224 = arith.constant 224 : index
    %c0_303 = arith.constant 0 : index
    %222 = vector.load %arg50[%c224, %c0_303] : memref<288x288xf32, #tpu.memory_space<vmem>>, vector<32x24xf32>
    tpu.vector_store %arg50[%c224, %c0_303], %221 {strides = array<i32>} : memref<288x288xf32, #tpu.memory_space<vmem>>, vector<32x24xf32>,
    %c0_304 = arith.constant 0 : index
    %c19_305 = arith.constant 19 : index
    %223 = vector.load %arg38[%c0_304, %c19_305] : memref<32x48xf32, #tpu.memory_space<vmem>>, vector<32x24xf32>
    %c256 = arith.constant 256 : index
    %c0_306 = arith.constant 0 : index
    %224 = vector.load %arg50[%c256, %c0_306] : memref<288x288xf32, #tpu.memory_space<vmem>>, vector<32x24xf32>
    tpu.vector_store %arg50[%c256, %c0_306], %223 {strides = array<i32>} : memref<288x288xf32, #tpu.memory_space<vmem>>, vector<32x24xf32>,
    %c0_307 = arith.constant 0 : index
    %c0_308 = arith.constant 0 : index
    %225 = vector.load %arg50[%c0_307, %c0_308] : memref<288x288xf32, #tpu.memory_space<vmem>>, vector<288x24xf32>
    %c0_309 = arith.constant 0 : index
    %c0_310 = arith.constant 0 : index
    %226 = vector.load %arg12[%c0_309, %c0_310] : memref<32x288xf32, #tpu.memory_space<vmem>>, vector<32x288xf32>
    %cst_311 = arith.constant dense<0.000000e+00> : vector<32x24xf32>
    %227 = tpu.matmul %226, %225, %cst_311 {dimension_numbers = #tpu.dot_dimension_numbers<[1], [0], [0], [1], [0, 0, 1, 1], [], []>} : vector<32x288xf32>, vector<288x24xf32>, vector<32x24xf32> -> vector<32x24xf32>
    %c0_312 = arith.constant 0 : index
    %c0_313 = arith.constant 0 : index
    %228 = vector.load %arg13[%c0_312, %c0_313] : memref<32x1xf32, #tpu.memory_space<vmem>>, vector<32x1xf32>
    %229 = vector.broadcast %228 : vector<32x1xf32> to vector<32x24xf32>
    %230 = arith.addf %227, %229 : vector<32x24xf32>
    %cst_314 = arith.constant 0.000000e+00 : f32
    %231 = vector.broadcast %cst_314 : f32 to vector<32x24xf32>
    %232 = arith.maximumf %230, %231 : vector<32x24xf32>
    %c0_315 = arith.constant 0 : index
    %c0_316 = arith.constant 0 : index
    %233 = vector.load %arg34[%c0_315, %c0_316] : memref<1x24xf32, #tpu.memory_space<vmem>>, vector<1x24xf32>
    %234 = vector.broadcast %233 : vector<1x24xf32> to vector<32x24xf32>
    %235 = arith.mulf %232, %234 : vector<32x24xf32>
    %cst_317 = arith.constant 0.000000e+00 : f32
    %236 = vector.broadcast %cst_317 : f32 to vector<32x12xf32>
    %c0_318 = arith.constant 0 : index
    %c0_319 = arith.constant 0 : index
    %237 = vector.load %arg41[%c0_318, %c0_319] : memref<32x48xf32, #tpu.memory_space<vmem>>, vector<32x12xf32>
    tpu.vector_store %arg41[%c0_318, %c0_319], %236 {strides = array<i32>} : memref<32x48xf32, #tpu.memory_space<vmem>>, vector<32x12xf32>,
    %c0_320 = arith.constant 0 : index
    %c12_321 = arith.constant 12 : index
    %238 = vector.load %arg41[%c0_320, %c12_321] : memref<32x48xf32, #tpu.memory_space<vmem>>, vector<32x24xf32>
    tpu.vector_store %arg41[%c0_320, %c12_321], %235 {strides = array<i32>} : memref<32x48xf32, #tpu.memory_space<vmem>>, vector<32x24xf32>,
    %cst_322 = arith.constant 0.000000e+00 : f32
    %239 = vector.broadcast %cst_322 : f32 to vector<32x12xf32>
    %c0_323 = arith.constant 0 : index
    %c36_324 = arith.constant 36 : index
    %240 = vector.load %arg41[%c0_323, %c36_324] : memref<32x48xf32, #tpu.memory_space<vmem>>, vector<32x12xf32>
    tpu.vector_store %arg41[%c0_323, %c36_324], %239 {strides = array<i32>} : memref<32x48xf32, #tpu.memory_space<vmem>>, vector<32x12xf32>,
    %c0_325 = arith.constant 0 : index
    %c12_326 = arith.constant 12 : index
    %241 = vector.load %arg41[%c0_325, %c12_326] : memref<32x48xf32, #tpu.memory_space<vmem>>, vector<32x24xf32>
    %c0_327 = arith.constant 0 : index
    %c0_328 = arith.constant 0 : index
    %242 = vector.load %arg16[%c0_327, %c0_328] : memref<64x32xf32, #tpu.memory_space<vmem>>, vector<64x32xf32>
    %cst_329 = arith.constant dense<0.000000e+00> : vector<64x24xf32>
    %243 = tpu.matmul %242, %241, %cst_329 {dimension_numbers = #tpu.dot_dimension_numbers<[1], [0], [0], [1], [0, 0, 1, 1], [], []>} : vector<64x32xf32>, vector<32x24xf32>, vector<64x24xf32> -> vector<64x24xf32>
    %c0_330 = arith.constant 0 : index
    %c0_331 = arith.constant 0 : index
    %244 = vector.load %arg17[%c0_330, %c0_331] : memref<64x1xf32, #tpu.memory_space<vmem>>, vector<64x1xf32>
    %245 = vector.broadcast %244 : vector<64x1xf32> to vector<64x24xf32>
    %246 = arith.addf %243, %245 : vector<64x24xf32>
    %cst_332 = arith.constant 0.000000e+00 : f32
    %247 = vector.broadcast %cst_332 : f32 to vector<16x80xf32>
    %248 = vector.extract_strided_slice %246 {offsets = [0, 0], sizes = [16, 24], strides = [1, 1]} : vector<64x24xf32> to vector<16x24xf32>
    %c0_333 = arith.constant 0 : index
    %c0_334 = arith.constant 0 : index
    %c0_335 = arith.constant 0 : index
    %249 = vector.load %arg18[%c0_333, %c0_334, %c0_335] : memref<4x24x80xf32, #tpu.memory_space<vmem>>, vector<1x24x80xf32>
    %250 = vector.shape_cast %249 : vector<1x24x80xf32> to vector<24x80xf32>
    %cst_336 = arith.constant dense<0.000000e+00> : vector<16x80xf32>
    %251 = tpu.matmul %248, %250, %cst_336 {dimension_numbers = #tpu.dot_dimension_numbers<[1], [0], [0], [1], [0, 0, 1, 1], [], []>} : vector<16x24xf32>, vector<24x80xf32>, vector<16x80xf32> -> vector<16x80xf32>
    %252 = arith.addf %247, %251 : vector<16x80xf32>
    %253 = vector.extract_strided_slice %246 {offsets = [16, 0], sizes = [16, 24], strides = [1, 1]} : vector<64x24xf32> to vector<16x24xf32>
    %c1_337 = arith.constant 1 : index
    %c0_338 = arith.constant 0 : index
    %c0_339 = arith.constant 0 : index
    %254 = vector.load %arg18[%c1_337, %c0_338, %c0_339] : memref<4x24x80xf32, #tpu.memory_space<vmem>>, vector<1x24x80xf32>
    %255 = vector.shape_cast %254 : vector<1x24x80xf32> to vector<24x80xf32>
    %cst_340 = arith.constant dense<0.000000e+00> : vector<16x80xf32>
    %256 = tpu.matmul %253, %255, %cst_340 {dimension_numbers = #tpu.dot_dimension_numbers<[1], [0], [0], [1], [0, 0, 1, 1], [], []>} : vector<16x24xf32>, vector<24x80xf32>, vector<16x80xf32> -> vector<16x80xf32>
    %257 = arith.addf %252, %256 : vector<16x80xf32>
    %258 = vector.extract_strided_slice %246 {offsets = [32, 0], sizes = [16, 24], strides = [1, 1]} : vector<64x24xf32> to vector<16x24xf32>
    %c2_341 = arith.constant 2 : index
    %c0_342 = arith.constant 0 : index
    %c0_343 = arith.constant 0 : index
    %259 = vector.load %arg18[%c2_341, %c0_342, %c0_343] : memref<4x24x80xf32, #tpu.memory_space<vmem>>, vector<1x24x80xf32>
    %260 = vector.shape_cast %259 : vector<1x24x80xf32> to vector<24x80xf32>
    %cst_344 = arith.constant dense<0.000000e+00> : vector<16x80xf32>
    %261 = tpu.matmul %258, %260, %cst_344 {dimension_numbers = #tpu.dot_dimension_numbers<[1], [0], [0], [1], [0, 0, 1, 1], [], []>} : vector<16x24xf32>, vector<24x80xf32>, vector<16x80xf32> -> vector<16x80xf32>
    %262 = arith.addf %257, %261 : vector<16x80xf32>
    %263 = vector.extract_strided_slice %246 {offsets = [48, 0], sizes = [16, 24], strides = [1, 1]} : vector<64x24xf32> to vector<16x24xf32>
    %c3_345 = arith.constant 3 : index
    %c0_346 = arith.constant 0 : index
    %c0_347 = arith.constant 0 : index
    %264 = vector.load %arg18[%c3_345, %c0_346, %c0_347] : memref<4x24x80xf32, #tpu.memory_space<vmem>>, vector<1x24x80xf32>
    %265 = vector.shape_cast %264 : vector<1x24x80xf32> to vector<24x80xf32>
    %cst_348 = arith.constant dense<0.000000e+00> : vector<16x80xf32>
    %266 = tpu.matmul %263, %265, %cst_348 {dimension_numbers = #tpu.dot_dimension_numbers<[1], [0], [0], [1], [0, 0, 1, 1], [], []>} : vector<16x24xf32>, vector<24x80xf32>, vector<16x80xf32> -> vector<16x80xf32>
    %267 = arith.addf %262, %266 : vector<16x80xf32>
    %cst_349 = arith.constant 0.000000e+00 : f32
    %268 = vector.broadcast %cst_349 : f32 to vector<16x20xf32>
    %c0_350 = arith.constant 0 : index
    %c0_351 = arith.constant 0 : index
    %269 = vector.load %arg44[%c0_350, %c0_351] : memref<16x120xf32, #tpu.memory_space<vmem>>, vector<16x20xf32>
    tpu.vector_store %arg44[%c0_350, %c0_351], %268 {strides = array<i32>} : memref<16x120xf32, #tpu.memory_space<vmem>>, vector<16x20xf32>,
    %c0_352 = arith.constant 0 : index
    %c20_353 = arith.constant 20 : index
    %270 = vector.load %arg44[%c0_352, %c20_353] : memref<16x120xf32, #tpu.memory_space<vmem>>, vector<16x80xf32>
    tpu.vector_store %arg44[%c0_352, %c20_353], %267 {strides = array<i32>} : memref<16x120xf32, #tpu.memory_space<vmem>>, vector<16x80xf32>,
    %cst_354 = arith.constant 0.000000e+00 : f32
    %271 = vector.broadcast %cst_354 : f32 to vector<16x20xf32>
    %c0_355 = arith.constant 0 : index
    %c100_356 = arith.constant 100 : index
    %272 = vector.load %arg44[%c0_355, %c100_356] : memref<16x120xf32, #tpu.memory_space<vmem>>, vector<16x20xf32>
    tpu.vector_store %arg44[%c0_355, %c100_356], %271 {strides = array<i32>} : memref<16x120xf32, #tpu.memory_space<vmem>>, vector<16x20xf32>,
    %c0_357 = arith.constant 0 : index
    %c9_358 = arith.constant 9 : index
    %273 = vector.load %arg44[%c0_357, %c9_358] : memref<16x120xf32, #tpu.memory_space<vmem>>, vector<16x80xf32>
    %c0_359 = arith.constant 0 : index
    %c0_360 = arith.constant 0 : index
    %274 = vector.load %arg50[%c0_359, %c0_360] : memref<288x288xf32, #tpu.memory_space<vmem>>, vector<16x80xf32>
    tpu.vector_store %arg50[%c0_359, %c0_360], %273 {strides = array<i32>} : memref<288x288xf32, #tpu.memory_space<vmem>>, vector<16x80xf32>,
    %c0_361 = arith.constant 0 : index
    %c9_362 = arith.constant 9 : index
    %275 = vector.load %arg40[%c0_361, %c9_362] : memref<16x120xf32, #tpu.memory_space<vmem>>, vector<16x80xf32>
    %c16_363 = arith.constant 16 : index
    %c0_364 = arith.constant 0 : index
    %276 = vector.load %arg50[%c16_363, %c0_364] : memref<288x288xf32, #tpu.memory_space<vmem>>, vector<16x80xf32>
    tpu.vector_store %arg50[%c16_363, %c0_364], %275 {strides = array<i32>} : memref<288x288xf32, #tpu.memory_space<vmem>>, vector<16x80xf32>,
    %c0_365 = arith.constant 0 : index
    %c10_366 = arith.constant 10 : index
    %277 = vector.load %arg44[%c0_365, %c10_366] : memref<16x120xf32, #tpu.memory_space<vmem>>, vector<16x80xf32>
    %c32_367 = arith.constant 32 : index
    %c0_368 = arith.constant 0 : index
    %278 = vector.load %arg50[%c32_367, %c0_368] : memref<288x288xf32, #tpu.memory_space<vmem>>, vector<16x80xf32>
    tpu.vector_store %arg50[%c32_367, %c0_368], %277 {strides = array<i32>} : memref<288x288xf32, #tpu.memory_space<vmem>>, vector<16x80xf32>,
    %c0_369 = arith.constant 0 : index
    %c10_370 = arith.constant 10 : index
    %279 = vector.load %arg40[%c0_369, %c10_370] : memref<16x120xf32, #tpu.memory_space<vmem>>, vector<16x80xf32>
    %c48_371 = arith.constant 48 : index
    %c0_372 = arith.constant 0 : index
    %280 = vector.load %arg50[%c48_371, %c0_372] : memref<288x288xf32, #tpu.memory_space<vmem>>, vector<16x80xf32>
    tpu.vector_store %arg50[%c48_371, %c0_372], %279 {strides = array<i32>} : memref<288x288xf32, #tpu.memory_space<vmem>>, vector<16x80xf32>,
    %c0_373 = arith.constant 0 : index
    %c11_374 = arith.constant 11 : index
    %281 = vector.load %arg44[%c0_373, %c11_374] : memref<16x120xf32, #tpu.memory_space<vmem>>, vector<16x80xf32>
    %c64_375 = arith.constant 64 : index
    %c0_376 = arith.constant 0 : index
    %282 = vector.load %arg50[%c64_375, %c0_376] : memref<288x288xf32, #tpu.memory_space<vmem>>, vector<16x80xf32>
    tpu.vector_store %arg50[%c64_375, %c0_376], %281 {strides = array<i32>} : memref<288x288xf32, #tpu.memory_space<vmem>>, vector<16x80xf32>,
    %c0_377 = arith.constant 0 : index
    %c11_378 = arith.constant 11 : index
    %283 = vector.load %arg40[%c0_377, %c11_378] : memref<16x120xf32, #tpu.memory_space<vmem>>, vector<16x80xf32>
    %c80_379 = arith.constant 80 : index
    %c0_380 = arith.constant 0 : index
    %284 = vector.load %arg50[%c80_379, %c0_380] : memref<288x288xf32, #tpu.memory_space<vmem>>, vector<16x80xf32>
    tpu.vector_store %arg50[%c80_379, %c0_380], %283 {strides = array<i32>} : memref<288x288xf32, #tpu.memory_space<vmem>>, vector<16x80xf32>,
    %c0_381 = arith.constant 0 : index
    %c19_382 = arith.constant 19 : index
    %285 = vector.load %arg44[%c0_381, %c19_382] : memref<16x120xf32, #tpu.memory_space<vmem>>, vector<16x80xf32>
    %c96_383 = arith.constant 96 : index
    %c0_384 = arith.constant 0 : index
    %286 = vector.load %arg50[%c96_383, %c0_384] : memref<288x288xf32, #tpu.memory_space<vmem>>, vector<16x80xf32>
    tpu.vector_store %arg50[%c96_383, %c0_384], %285 {strides = array<i32>} : memref<288x288xf32, #tpu.memory_space<vmem>>, vector<16x80xf32>,
    %c0_385 = arith.constant 0 : index
    %c19_386 = arith.constant 19 : index
    %287 = vector.load %arg40[%c0_385, %c19_386] : memref<16x120xf32, #tpu.memory_space<vmem>>, vector<16x80xf32>
    %c112_387 = arith.constant 112 : index
    %c0_388 = arith.constant 0 : index
    %288 = vector.load %arg50[%c112_387, %c0_388] : memref<288x288xf32, #tpu.memory_space<vmem>>, vector<16x80xf32>
    tpu.vector_store %arg50[%c112_387, %c0_388], %287 {strides = array<i32>} : memref<288x288xf32, #tpu.memory_space<vmem>>, vector<16x80xf32>,
    %c0_389 = arith.constant 0 : index
    %c20_390 = arith.constant 20 : index
    %289 = vector.load %arg44[%c0_389, %c20_390] : memref<16x120xf32, #tpu.memory_space<vmem>>, vector<16x80xf32>
    %c128_391 = arith.constant 128 : index
    %c0_392 = arith.constant 0 : index
    %290 = vector.load %arg50[%c128_391, %c0_392] : memref<288x288xf32, #tpu.memory_space<vmem>>, vector<16x80xf32>
    tpu.vector_store %arg50[%c128_391, %c0_392], %289 {strides = array<i32>} : memref<288x288xf32, #tpu.memory_space<vmem>>, vector<16x80xf32>,
    %c0_393 = arith.constant 0 : index
    %c20_394 = arith.constant 20 : index
    %291 = vector.load %arg40[%c0_393, %c20_394] : memref<16x120xf32, #tpu.memory_space<vmem>>, vector<16x80xf32>
    %c144 = arith.constant 144 : index
    %c0_395 = arith.constant 0 : index
    %292 = vector.load %arg50[%c144, %c0_395] : memref<288x288xf32, #tpu.memory_space<vmem>>, vector<16x80xf32>
    tpu.vector_store %arg50[%c144, %c0_395], %291 {strides = array<i32>} : memref<288x288xf32, #tpu.memory_space<vmem>>, vector<16x80xf32>,
    %c0_396 = arith.constant 0 : index
    %c21_397 = arith.constant 21 : index
    %293 = vector.load %arg44[%c0_396, %c21_397] : memref<16x120xf32, #tpu.memory_space<vmem>>, vector<16x80xf32>
    %c160_398 = arith.constant 160 : index
    %c0_399 = arith.constant 0 : index
    %294 = vector.load %arg50[%c160_398, %c0_399] : memref<288x288xf32, #tpu.memory_space<vmem>>, vector<16x80xf32>
    tpu.vector_store %arg50[%c160_398, %c0_399], %293 {strides = array<i32>} : memref<288x288xf32, #tpu.memory_space<vmem>>, vector<16x80xf32>,
    %c0_400 = arith.constant 0 : index
    %c21_401 = arith.constant 21 : index
    %295 = vector.load %arg40[%c0_400, %c21_401] : memref<16x120xf32, #tpu.memory_space<vmem>>, vector<16x80xf32>
    %c176 = arith.constant 176 : index
    %c0_402 = arith.constant 0 : index
    %296 = vector.load %arg50[%c176, %c0_402] : memref<288x288xf32, #tpu.memory_space<vmem>>, vector<16x80xf32>
    tpu.vector_store %arg50[%c176, %c0_402], %295 {strides = array<i32>} : memref<288x288xf32, #tpu.memory_space<vmem>>, vector<16x80xf32>,
    %c0_403 = arith.constant 0 : index
    %c29_404 = arith.constant 29 : index
    %297 = vector.load %arg44[%c0_403, %c29_404] : memref<16x120xf32, #tpu.memory_space<vmem>>, vector<16x80xf32>
    %c192_405 = arith.constant 192 : index
    %c0_406 = arith.constant 0 : index
    %298 = vector.load %arg50[%c192_405, %c0_406] : memref<288x288xf32, #tpu.memory_space<vmem>>, vector<16x80xf32>
    tpu.vector_store %arg50[%c192_405, %c0_406], %297 {strides = array<i32>} : memref<288x288xf32, #tpu.memory_space<vmem>>, vector<16x80xf32>,
    %c0_407 = arith.constant 0 : index
    %c29_408 = arith.constant 29 : index
    %299 = vector.load %arg40[%c0_407, %c29_408] : memref<16x120xf32, #tpu.memory_space<vmem>>, vector<16x80xf32>
    %c208 = arith.constant 208 : index
    %c0_409 = arith.constant 0 : index
    %300 = vector.load %arg50[%c208, %c0_409] : memref<288x288xf32, #tpu.memory_space<vmem>>, vector<16x80xf32>
    tpu.vector_store %arg50[%c208, %c0_409], %299 {strides = array<i32>} : memref<288x288xf32, #tpu.memory_space<vmem>>, vector<16x80xf32>,
    %c0_410 = arith.constant 0 : index
    %c30_411 = arith.constant 30 : index
    %301 = vector.load %arg44[%c0_410, %c30_411] : memref<16x120xf32, #tpu.memory_space<vmem>>, vector<16x80xf32>
    %c224_412 = arith.constant 224 : index
    %c0_413 = arith.constant 0 : index
    %302 = vector.load %arg50[%c224_412, %c0_413] : memref<288x288xf32, #tpu.memory_space<vmem>>, vector<16x80xf32>
    tpu.vector_store %arg50[%c224_412, %c0_413], %301 {strides = array<i32>} : memref<288x288xf32, #tpu.memory_space<vmem>>, vector<16x80xf32>,
    %c0_414 = arith.constant 0 : index
    %c30_415 = arith.constant 30 : index
    %303 = vector.load %arg40[%c0_414, %c30_415] : memref<16x120xf32, #tpu.memory_space<vmem>>, vector<16x80xf32>
    %c240 = arith.constant 240 : index
    %c0_416 = arith.constant 0 : index
    %304 = vector.load %arg50[%c240, %c0_416] : memref<288x288xf32, #tpu.memory_space<vmem>>, vector<16x80xf32>
    tpu.vector_store %arg50[%c240, %c0_416], %303 {strides = array<i32>} : memref<288x288xf32, #tpu.memory_space<vmem>>, vector<16x80xf32>,
    %c0_417 = arith.constant 0 : index
    %c31_418 = arith.constant 31 : index
    %305 = vector.load %arg44[%c0_417, %c31_418] : memref<16x120xf32, #tpu.memory_space<vmem>>, vector<16x80xf32>
    %c256_419 = arith.constant 256 : index
    %c0_420 = arith.constant 0 : index
    %306 = vector.load %arg50[%c256_419, %c0_420] : memref<288x288xf32, #tpu.memory_space<vmem>>, vector<16x80xf32>
    tpu.vector_store %arg50[%c256_419, %c0_420], %305 {strides = array<i32>} : memref<288x288xf32, #tpu.memory_space<vmem>>, vector<16x80xf32>,
    %c0_421 = arith.constant 0 : index
    %c31_422 = arith.constant 31 : index
    %307 = vector.load %arg40[%c0_421, %c31_422] : memref<16x120xf32, #tpu.memory_space<vmem>>, vector<16x80xf32>
    %c272 = arith.constant 272 : index
    %c0_423 = arith.constant 0 : index
    %308 = vector.load %arg50[%c272, %c0_423] : memref<288x288xf32, #tpu.memory_space<vmem>>, vector<16x80xf32>
    tpu.vector_store %arg50[%c272, %c0_423], %307 {strides = array<i32>} : memref<288x288xf32, #tpu.memory_space<vmem>>, vector<16x80xf32>,
    %c0_424 = arith.constant 0 : index
    %c0_425 = arith.constant 0 : index
    %309 = vector.load %arg50[%c0_424, %c0_425] : memref<288x288xf32, #tpu.memory_space<vmem>>, vector<288x80xf32>
    %c0_426 = arith.constant 0 : index
    %c0_427 = arith.constant 0 : index
    %310 = vector.load %arg19[%c0_426, %c0_427] : memref<16x288xf32, #tpu.memory_space<vmem>>, vector<16x288xf32>
    %cst_428 = arith.constant dense<0.000000e+00> : vector<16x80xf32>
    %311 = tpu.matmul %310, %309, %cst_428 {dimension_numbers = #tpu.dot_dimension_numbers<[1], [0], [0], [1], [0, 0, 1, 1], [], []>} : vector<16x288xf32>, vector<288x80xf32>, vector<16x80xf32> -> vector<16x80xf32>
    %c0_429 = arith.constant 0 : index
    %c0_430 = arith.constant 0 : index
    %312 = vector.load %arg20[%c0_429, %c0_430] : memref<16x1xf32, #tpu.memory_space<vmem>>, vector<16x1xf32>
    %313 = vector.broadcast %312 : vector<16x1xf32> to vector<16x80xf32>
    %314 = arith.addf %311, %313 : vector<16x80xf32>
    %cst_431 = arith.constant 0.000000e+00 : f32
    %315 = vector.broadcast %cst_431 : f32 to vector<16x80xf32>
    %316 = arith.maximumf %314, %315 : vector<16x80xf32>
    %c0_432 = arith.constant 0 : index
    %c0_433 = arith.constant 0 : index
    %317 = vector.load %arg33[%c0_432, %c0_433] : memref<1x80xf32, #tpu.memory_space<vmem>>, vector<1x80xf32>
    %318 = vector.broadcast %317 : vector<1x80xf32> to vector<16x80xf32>
    %319 = arith.mulf %316, %318 : vector<16x80xf32>
    %cst_434 = arith.constant 0.000000e+00 : f32
    %320 = vector.broadcast %cst_434 : f32 to vector<16x20xf32>
    %c0_435 = arith.constant 0 : index
    %c0_436 = arith.constant 0 : index
    %321 = vector.load %arg46[%c0_435, %c0_436] : memref<16x120xf32, #tpu.memory_space<vmem>>, vector<16x20xf32>
    tpu.vector_store %arg46[%c0_435, %c0_436], %320 {strides = array<i32>} : memref<16x120xf32, #tpu.memory_space<vmem>>, vector<16x20xf32>,
    %c0_437 = arith.constant 0 : index
    %c20_438 = arith.constant 20 : index
    %322 = vector.load %arg46[%c0_437, %c20_438] : memref<16x120xf32, #tpu.memory_space<vmem>>, vector<16x80xf32>
    tpu.vector_store %arg46[%c0_437, %c20_438], %319 {strides = array<i32>} : memref<16x120xf32, #tpu.memory_space<vmem>>, vector<16x80xf32>,
    %cst_439 = arith.constant 0.000000e+00 : f32
    %323 = vector.broadcast %cst_439 : f32 to vector<16x20xf32>
    %c0_440 = arith.constant 0 : index
    %c100_441 = arith.constant 100 : index
    %324 = vector.load %arg46[%c0_440, %c100_441] : memref<16x120xf32, #tpu.memory_space<vmem>>, vector<16x20xf32>
    tpu.vector_store %arg46[%c0_440, %c100_441], %323 {strides = array<i32>} : memref<16x120xf32, #tpu.memory_space<vmem>>, vector<16x20xf32>,
    %c0_442 = arith.constant 0 : index
    %c9_443 = arith.constant 9 : index
    %325 = vector.load %arg46[%c0_442, %c9_443] : memref<16x120xf32, #tpu.memory_space<vmem>>, vector<16x80xf32>
    %c0_444 = arith.constant 0 : index
    %c0_445 = arith.constant 0 : index
    %326 = vector.load %arg50[%c0_444, %c0_445] : memref<288x288xf32, #tpu.memory_space<vmem>>, vector<16x80xf32>
    tpu.vector_store %arg50[%c0_444, %c0_445], %325 {strides = array<i32>} : memref<288x288xf32, #tpu.memory_space<vmem>>, vector<16x80xf32>,
    %c0_446 = arith.constant 0 : index
    %c10_447 = arith.constant 10 : index
    %327 = vector.load %arg46[%c0_446, %c10_447] : memref<16x120xf32, #tpu.memory_space<vmem>>, vector<16x80xf32>
    %c16_448 = arith.constant 16 : index
    %c0_449 = arith.constant 0 : index
    %328 = vector.load %arg50[%c16_448, %c0_449] : memref<288x288xf32, #tpu.memory_space<vmem>>, vector<16x80xf32>
    tpu.vector_store %arg50[%c16_448, %c0_449], %327 {strides = array<i32>} : memref<288x288xf32, #tpu.memory_space<vmem>>, vector<16x80xf32>,
    %c0_450 = arith.constant 0 : index
    %c11_451 = arith.constant 11 : index
    %329 = vector.load %arg46[%c0_450, %c11_451] : memref<16x120xf32, #tpu.memory_space<vmem>>, vector<16x80xf32>
    %c32_452 = arith.constant 32 : index
    %c0_453 = arith.constant 0 : index
    %330 = vector.load %arg50[%c32_452, %c0_453] : memref<288x288xf32, #tpu.memory_space<vmem>>, vector<16x80xf32>
    tpu.vector_store %arg50[%c32_452, %c0_453], %329 {strides = array<i32>} : memref<288x288xf32, #tpu.memory_space<vmem>>, vector<16x80xf32>,
    %c0_454 = arith.constant 0 : index
    %c19_455 = arith.constant 19 : index
    %331 = vector.load %arg46[%c0_454, %c19_455] : memref<16x120xf32, #tpu.memory_space<vmem>>, vector<16x80xf32>
    %c48_456 = arith.constant 48 : index
    %c0_457 = arith.constant 0 : index
    %332 = vector.load %arg50[%c48_456, %c0_457] : memref<288x288xf32, #tpu.memory_space<vmem>>, vector<16x80xf32>
    tpu.vector_store %arg50[%c48_456, %c0_457], %331 {strides = array<i32>} : memref<288x288xf32, #tpu.memory_space<vmem>>, vector<16x80xf32>,
    %c0_458 = arith.constant 0 : index
    %c20_459 = arith.constant 20 : index
    %333 = vector.load %arg46[%c0_458, %c20_459] : memref<16x120xf32, #tpu.memory_space<vmem>>, vector<16x80xf32>
    %c64_460 = arith.constant 64 : index
    %c0_461 = arith.constant 0 : index
    %334 = vector.load %arg50[%c64_460, %c0_461] : memref<288x288xf32, #tpu.memory_space<vmem>>, vector<16x80xf32>
    tpu.vector_store %arg50[%c64_460, %c0_461], %333 {strides = array<i32>} : memref<288x288xf32, #tpu.memory_space<vmem>>, vector<16x80xf32>,
    %c0_462 = arith.constant 0 : index
    %c21_463 = arith.constant 21 : index
    %335 = vector.load %arg46[%c0_462, %c21_463] : memref<16x120xf32, #tpu.memory_space<vmem>>, vector<16x80xf32>
    %c80_464 = arith.constant 80 : index
    %c0_465 = arith.constant 0 : index
    %336 = vector.load %arg50[%c80_464, %c0_465] : memref<288x288xf32, #tpu.memory_space<vmem>>, vector<16x80xf32>
    tpu.vector_store %arg50[%c80_464, %c0_465], %335 {strides = array<i32>} : memref<288x288xf32, #tpu.memory_space<vmem>>, vector<16x80xf32>,
    %c0_466 = arith.constant 0 : index
    %c29_467 = arith.constant 29 : index
    %337 = vector.load %arg46[%c0_466, %c29_467] : memref<16x120xf32, #tpu.memory_space<vmem>>, vector<16x80xf32>
    %c96_468 = arith.constant 96 : index
    %c0_469 = arith.constant 0 : index
    %338 = vector.load %arg50[%c96_468, %c0_469] : memref<288x288xf32, #tpu.memory_space<vmem>>, vector<16x80xf32>
    tpu.vector_store %arg50[%c96_468, %c0_469], %337 {strides = array<i32>} : memref<288x288xf32, #tpu.memory_space<vmem>>, vector<16x80xf32>,
    %c0_470 = arith.constant 0 : index
    %c30_471 = arith.constant 30 : index
    %339 = vector.load %arg46[%c0_470, %c30_471] : memref<16x120xf32, #tpu.memory_space<vmem>>, vector<16x80xf32>
    %c112_472 = arith.constant 112 : index
    %c0_473 = arith.constant 0 : index
    %340 = vector.load %arg50[%c112_472, %c0_473] : memref<288x288xf32, #tpu.memory_space<vmem>>, vector<16x80xf32>
    tpu.vector_store %arg50[%c112_472, %c0_473], %339 {strides = array<i32>} : memref<288x288xf32, #tpu.memory_space<vmem>>, vector<16x80xf32>,
    %c0_474 = arith.constant 0 : index
    %c31_475 = arith.constant 31 : index
    %341 = vector.load %arg46[%c0_474, %c31_475] : memref<16x120xf32, #tpu.memory_space<vmem>>, vector<16x80xf32>
    %c128_476 = arith.constant 128 : index
    %c0_477 = arith.constant 0 : index
    %342 = vector.load %arg50[%c128_476, %c0_477] : memref<288x288xf32, #tpu.memory_space<vmem>>, vector<16x80xf32>
    tpu.vector_store %arg50[%c128_476, %c0_477], %341 {strides = array<i32>} : memref<288x288xf32, #tpu.memory_space<vmem>>, vector<16x80xf32>,
    %c0_478 = arith.constant 0 : index
    %c0_479 = arith.constant 0 : index
    %343 = vector.load %arg50[%c0_478, %c0_479] : memref<288x288xf32, #tpu.memory_space<vmem>>, vector<144x80xf32>
    %c0_480 = arith.constant 0 : index
    %c0_481 = arith.constant 0 : index
    %344 = vector.load %arg21[%c0_480, %c0_481] : memref<16x144xf32, #tpu.memory_space<vmem>>, vector<16x144xf32>
    %cst_482 = arith.constant dense<0.000000e+00> : vector<16x80xf32>
    %345 = tpu.matmul %344, %343, %cst_482 {dimension_numbers = #tpu.dot_dimension_numbers<[1], [0], [0], [1], [0, 0, 1, 1], [], []>} : vector<16x144xf32>, vector<144x80xf32>, vector<16x80xf32> -> vector<16x80xf32>
    %c0_483 = arith.constant 0 : index
    %c0_484 = arith.constant 0 : index
    %346 = vector.load %arg22[%c0_483, %c0_484] : memref<16x1xf32, #tpu.memory_space<vmem>>, vector<16x1xf32>
    %347 = vector.broadcast %346 : vector<16x1xf32> to vector<16x80xf32>
    %348 = arith.addf %345, %347 : vector<16x80xf32>
    %cst_485 = arith.constant 0.000000e+00 : f32
    %349 = vector.broadcast %cst_485 : f32 to vector<16x80xf32>
    %350 = arith.maximumf %348, %349 : vector<16x80xf32>
    %c0_486 = arith.constant 0 : index
    %c0_487 = arith.constant 0 : index
    %351 = vector.load %arg33[%c0_486, %c0_487] : memref<1x80xf32, #tpu.memory_space<vmem>>, vector<1x80xf32>
    %352 = vector.broadcast %351 : vector<1x80xf32> to vector<16x80xf32>
    %353 = arith.mulf %350, %352 : vector<16x80xf32>
    %cst_488 = arith.constant 0.000000e+00 : f32
    %354 = vector.broadcast %cst_488 : f32 to vector<16x20xf32>
    %c0_489 = arith.constant 0 : index
    %c0_490 = arith.constant 0 : index
    %355 = vector.load %arg48[%c0_489, %c0_490] : memref<16x120xf32, #tpu.memory_space<vmem>>, vector<16x20xf32>
    tpu.vector_store %arg48[%c0_489, %c0_490], %354 {strides = array<i32>} : memref<16x120xf32, #tpu.memory_space<vmem>>, vector<16x20xf32>,
    %c0_491 = arith.constant 0 : index
    %c20_492 = arith.constant 20 : index
    %356 = vector.load %arg48[%c0_491, %c20_492] : memref<16x120xf32, #tpu.memory_space<vmem>>, vector<16x80xf32>
    tpu.vector_store %arg48[%c0_491, %c20_492], %353 {strides = array<i32>} : memref<16x120xf32, #tpu.memory_space<vmem>>, vector<16x80xf32>,
    %cst_493 = arith.constant 0.000000e+00 : f32
    %357 = vector.broadcast %cst_493 : f32 to vector<16x20xf32>
    %c0_494 = arith.constant 0 : index
    %c100_495 = arith.constant 100 : index
    %358 = vector.load %arg48[%c0_494, %c100_495] : memref<16x120xf32, #tpu.memory_space<vmem>>, vector<16x20xf32>
    tpu.vector_store %arg48[%c0_494, %c100_495], %357 {strides = array<i32>} : memref<16x120xf32, #tpu.memory_space<vmem>>, vector<16x20xf32>,
    %c0_496 = arith.constant 0 : index
    %c20_497 = arith.constant 20 : index
    %359 = vector.load %arg48[%c0_496, %c20_497] : memref<16x120xf32, #tpu.memory_space<vmem>>, vector<16x80xf32>
    %c0_498 = arith.constant 0 : index
    %c0_499 = arith.constant 0 : index
    %360 = vector.load %arg23[%c0_498, %c0_499] : memref<32x16xf32, #tpu.memory_space<vmem>>, vector<32x16xf32>
    %cst_500 = arith.constant dense<0.000000e+00> : vector<32x80xf32>
    %361 = tpu.matmul %360, %359, %cst_500 {dimension_numbers = #tpu.dot_dimension_numbers<[1], [0], [0], [1], [0, 0, 1, 1], [], []>} : vector<32x16xf32>, vector<16x80xf32>, vector<32x80xf32> -> vector<32x80xf32>
    %c0_501 = arith.constant 0 : index
    %c0_502 = arith.constant 0 : index
    %362 = vector.load %arg24[%c0_501, %c0_502] : memref<32x1xf32, #tpu.memory_space<vmem>>, vector<32x1xf32>
    %363 = vector.broadcast %362 : vector<32x1xf32> to vector<32x80xf32>
    %364 = arith.addf %361, %363 : vector<32x80xf32>
    %cst_503 = arith.constant 0.000000e+00 : f32
    %365 = vector.broadcast %cst_503 : f32 to vector<8x288xf32>
    %366 = vector.extract_strided_slice %364 {offsets = [0, 0], sizes = [8, 80], strides = [1, 1]} : vector<32x80xf32> to vector<8x80xf32>
    %c0_504 = arith.constant 0 : index
    %c0_505 = arith.constant 0 : index
    %c0_506 = arith.constant 0 : index
    %367 = vector.load %arg25[%c0_504, %c0_505, %c0_506] : memref<4x80x288xf32, #tpu.memory_space<vmem>>, vector<1x80x288xf32>
    %368 = vector.shape_cast %367 : vector<1x80x288xf32> to vector<80x288xf32>
    %cst_507 = arith.constant dense<0.000000e+00> : vector<8x288xf32>
    %369 = tpu.matmul %366, %368, %cst_507 {dimension_numbers = #tpu.dot_dimension_numbers<[1], [0], [0], [1], [0, 0, 1, 1], [], []>} : vector<8x80xf32>, vector<80x288xf32>, vector<8x288xf32> -> vector<8x288xf32>
    %370 = arith.addf %365, %369 : vector<8x288xf32>
    %371 = vector.extract_strided_slice %364 {offsets = [8, 0], sizes = [8, 80], strides = [1, 1]} : vector<32x80xf32> to vector<8x80xf32>
    %c1_508 = arith.constant 1 : index
    %c0_509 = arith.constant 0 : index
    %c0_510 = arith.constant 0 : index
    %372 = vector.load %arg25[%c1_508, %c0_509, %c0_510] : memref<4x80x288xf32, #tpu.memory_space<vmem>>, vector<1x80x288xf32>
    %373 = vector.shape_cast %372 : vector<1x80x288xf32> to vector<80x288xf32>
    %cst_511 = arith.constant dense<0.000000e+00> : vector<8x288xf32>
    %374 = tpu.matmul %371, %373, %cst_511 {dimension_numbers = #tpu.dot_dimension_numbers<[1], [0], [0], [1], [0, 0, 1, 1], [], []>} : vector<8x80xf32>, vector<80x288xf32>, vector<8x288xf32> -> vector<8x288xf32>
    %375 = arith.addf %370, %374 : vector<8x288xf32>
    %376 = vector.extract_strided_slice %364 {offsets = [16, 0], sizes = [8, 80], strides = [1, 1]} : vector<32x80xf32> to vector<8x80xf32>
    %c2_512 = arith.constant 2 : index
    %c0_513 = arith.constant 0 : index
    %c0_514 = arith.constant 0 : index
    %377 = vector.load %arg25[%c2_512, %c0_513, %c0_514] : memref<4x80x288xf32, #tpu.memory_space<vmem>>, vector<1x80x288xf32>
    %378 = vector.shape_cast %377 : vector<1x80x288xf32> to vector<80x288xf32>
    %cst_515 = arith.constant dense<0.000000e+00> : vector<8x288xf32>
    %379 = tpu.matmul %376, %378, %cst_515 {dimension_numbers = #tpu.dot_dimension_numbers<[1], [0], [0], [1], [0, 0, 1, 1], [], []>} : vector<8x80xf32>, vector<80x288xf32>, vector<8x288xf32> -> vector<8x288xf32>
    %380 = arith.addf %375, %379 : vector<8x288xf32>
    %381 = vector.extract_strided_slice %364 {offsets = [24, 0], sizes = [8, 80], strides = [1, 1]} : vector<32x80xf32> to vector<8x80xf32>
    %c3_516 = arith.constant 3 : index
    %c0_517 = arith.constant 0 : index
    %c0_518 = arith.constant 0 : index
    %382 = vector.load %arg25[%c3_516, %c0_517, %c0_518] : memref<4x80x288xf32, #tpu.memory_space<vmem>>, vector<1x80x288xf32>
    %383 = vector.shape_cast %382 : vector<1x80x288xf32> to vector<80x288xf32>
    %cst_519 = arith.constant dense<0.000000e+00> : vector<8x288xf32>
    %384 = tpu.matmul %381, %383, %cst_519 {dimension_numbers = #tpu.dot_dimension_numbers<[1], [0], [0], [1], [0, 0, 1, 1], [], []>} : vector<8x80xf32>, vector<80x288xf32>, vector<8x288xf32> -> vector<8x288xf32>
    %385 = arith.addf %380, %384 : vector<8x288xf32>
    %cst_520 = arith.constant 0.000000e+00 : f32
    %386 = vector.broadcast %cst_520 : f32 to vector<8x36xf32>
    %c0_521 = arith.constant 0 : index
    %c0_522 = arith.constant 0 : index
    %387 = vector.load %arg45[%c0_521, %c0_522] : memref<8x360xf32, #tpu.memory_space<vmem>>, vector<8x36xf32>
    tpu.vector_store %arg45[%c0_521, %c0_522], %386 {strides = array<i32>} : memref<8x360xf32, #tpu.memory_space<vmem>>, vector<8x36xf32>,
    %c0_523 = arith.constant 0 : index
    %c36_524 = arith.constant 36 : index
    %388 = vector.load %arg45[%c0_523, %c36_524] : memref<8x360xf32, #tpu.memory_space<vmem>>, vector<8x288xf32>
    tpu.vector_store %arg45[%c0_523, %c36_524], %385 {strides = array<i32>} : memref<8x360xf32, #tpu.memory_space<vmem>>, vector<8x288xf32>,
    %cst_525 = arith.constant 0.000000e+00 : f32
    %389 = vector.broadcast %cst_525 : f32 to vector<8x36xf32>
    %c0_526 = arith.constant 0 : index
    %c324_527 = arith.constant 324 : index
    %390 = vector.load %arg45[%c0_526, %c324_527] : memref<8x360xf32, #tpu.memory_space<vmem>>, vector<8x36xf32>
    tpu.vector_store %arg45[%c0_526, %c324_527], %389 {strides = array<i32>} : memref<8x360xf32, #tpu.memory_space<vmem>>, vector<8x36xf32>,
    %c0_528 = arith.constant 0 : index
    %c17_529 = arith.constant 17 : index
    %391 = vector.load %arg45[%c0_528, %c17_529] : memref<8x360xf32, #tpu.memory_space<vmem>>, vector<8x288xf32>
    %c0_530 = arith.constant 0 : index
    %c0_531 = arith.constant 0 : index
    %392 = vector.load %arg50[%c0_530, %c0_531] : memref<288x288xf32, #tpu.memory_space<vmem>>, vector<8x288xf32>
    tpu.vector_store %arg50[%c0_530, %c0_531], %391 {strides = array<i32>} : memref<288x288xf32, #tpu.memory_space<vmem>>, vector<8x288xf32>,
    %c0_532 = arith.constant 0 : index
    %c17_533 = arith.constant 17 : index
    %393 = vector.load %arg39[%c0_532, %c17_533] : memref<8x360xf32, #tpu.memory_space<vmem>>, vector<8x288xf32>
    %c8_534 = arith.constant 8 : index
    %c0_535 = arith.constant 0 : index
    %394 = vector.load %arg50[%c8_534, %c0_535] : memref<288x288xf32, #tpu.memory_space<vmem>>, vector<8x288xf32>
    tpu.vector_store %arg50[%c8_534, %c0_535], %393 {strides = array<i32>} : memref<288x288xf32, #tpu.memory_space<vmem>>, vector<8x288xf32>,
    %c0_536 = arith.constant 0 : index
    %c18_537 = arith.constant 18 : index
    %395 = vector.load %arg45[%c0_536, %c18_537] : memref<8x360xf32, #tpu.memory_space<vmem>>, vector<8x288xf32>
    %c16_538 = arith.constant 16 : index
    %c0_539 = arith.constant 0 : index
    %396 = vector.load %arg50[%c16_538, %c0_539] : memref<288x288xf32, #tpu.memory_space<vmem>>, vector<8x288xf32>
    tpu.vector_store %arg50[%c16_538, %c0_539], %395 {strides = array<i32>} : memref<288x288xf32, #tpu.memory_space<vmem>>, vector<8x288xf32>,
    %c0_540 = arith.constant 0 : index
    %c18_541 = arith.constant 18 : index
    %397 = vector.load %arg39[%c0_540, %c18_541] : memref<8x360xf32, #tpu.memory_space<vmem>>, vector<8x288xf32>
    %c24_542 = arith.constant 24 : index
    %c0_543 = arith.constant 0 : index
    %398 = vector.load %arg50[%c24_542, %c0_543] : memref<288x288xf32, #tpu.memory_space<vmem>>, vector<8x288xf32>
    tpu.vector_store %arg50[%c24_542, %c0_543], %397 {strides = array<i32>} : memref<288x288xf32, #tpu.memory_space<vmem>>, vector<8x288xf32>,
    %c0_544 = arith.constant 0 : index
    %c19_545 = arith.constant 19 : index
    %399 = vector.load %arg45[%c0_544, %c19_545] : memref<8x360xf32, #tpu.memory_space<vmem>>, vector<8x288xf32>
    %c32_546 = arith.constant 32 : index
    %c0_547 = arith.constant 0 : index
    %400 = vector.load %arg50[%c32_546, %c0_547] : memref<288x288xf32, #tpu.memory_space<vmem>>, vector<8x288xf32>
    tpu.vector_store %arg50[%c32_546, %c0_547], %399 {strides = array<i32>} : memref<288x288xf32, #tpu.memory_space<vmem>>, vector<8x288xf32>,
    %c0_548 = arith.constant 0 : index
    %c19_549 = arith.constant 19 : index
    %401 = vector.load %arg39[%c0_548, %c19_549] : memref<8x360xf32, #tpu.memory_space<vmem>>, vector<8x288xf32>
    %c40_550 = arith.constant 40 : index
    %c0_551 = arith.constant 0 : index
    %402 = vector.load %arg50[%c40_550, %c0_551] : memref<288x288xf32, #tpu.memory_space<vmem>>, vector<8x288xf32>
    tpu.vector_store %arg50[%c40_550, %c0_551], %401 {strides = array<i32>} : memref<288x288xf32, #tpu.memory_space<vmem>>, vector<8x288xf32>,
    %c0_552 = arith.constant 0 : index
    %c35_553 = arith.constant 35 : index
    %403 = vector.load %arg45[%c0_552, %c35_553] : memref<8x360xf32, #tpu.memory_space<vmem>>, vector<8x288xf32>
    %c48_554 = arith.constant 48 : index
    %c0_555 = arith.constant 0 : index
    %404 = vector.load %arg50[%c48_554, %c0_555] : memref<288x288xf32, #tpu.memory_space<vmem>>, vector<8x288xf32>
    tpu.vector_store %arg50[%c48_554, %c0_555], %403 {strides = array<i32>} : memref<288x288xf32, #tpu.memory_space<vmem>>, vector<8x288xf32>,
    %c0_556 = arith.constant 0 : index
    %c35_557 = arith.constant 35 : index
    %405 = vector.load %arg39[%c0_556, %c35_557] : memref<8x360xf32, #tpu.memory_space<vmem>>, vector<8x288xf32>
    %c56_558 = arith.constant 56 : index
    %c0_559 = arith.constant 0 : index
    %406 = vector.load %arg50[%c56_558, %c0_559] : memref<288x288xf32, #tpu.memory_space<vmem>>, vector<8x288xf32>
    tpu.vector_store %arg50[%c56_558, %c0_559], %405 {strides = array<i32>} : memref<288x288xf32, #tpu.memory_space<vmem>>, vector<8x288xf32>,
    %c0_560 = arith.constant 0 : index
    %c36_561 = arith.constant 36 : index
    %407 = vector.load %arg45[%c0_560, %c36_561] : memref<8x360xf32, #tpu.memory_space<vmem>>, vector<8x288xf32>
    %c64_562 = arith.constant 64 : index
    %c0_563 = arith.constant 0 : index
    %408 = vector.load %arg50[%c64_562, %c0_563] : memref<288x288xf32, #tpu.memory_space<vmem>>, vector<8x288xf32>
    tpu.vector_store %arg50[%c64_562, %c0_563], %407 {strides = array<i32>} : memref<288x288xf32, #tpu.memory_space<vmem>>, vector<8x288xf32>,
    %c0_564 = arith.constant 0 : index
    %c36_565 = arith.constant 36 : index
    %409 = vector.load %arg39[%c0_564, %c36_565] : memref<8x360xf32, #tpu.memory_space<vmem>>, vector<8x288xf32>
    %c72 = arith.constant 72 : index
    %c0_566 = arith.constant 0 : index
    %410 = vector.load %arg50[%c72, %c0_566] : memref<288x288xf32, #tpu.memory_space<vmem>>, vector<8x288xf32>
    tpu.vector_store %arg50[%c72, %c0_566], %409 {strides = array<i32>} : memref<288x288xf32, #tpu.memory_space<vmem>>, vector<8x288xf32>,
    %c0_567 = arith.constant 0 : index
    %c37_568 = arith.constant 37 : index
    %411 = vector.load %arg45[%c0_567, %c37_568] : memref<8x360xf32, #tpu.memory_space<vmem>>, vector<8x288xf32>
    %c80_569 = arith.constant 80 : index
    %c0_570 = arith.constant 0 : index
    %412 = vector.load %arg50[%c80_569, %c0_570] : memref<288x288xf32, #tpu.memory_space<vmem>>, vector<8x288xf32>
    tpu.vector_store %arg50[%c80_569, %c0_570], %411 {strides = array<i32>} : memref<288x288xf32, #tpu.memory_space<vmem>>, vector<8x288xf32>,
    %c0_571 = arith.constant 0 : index
    %c37_572 = arith.constant 37 : index
    %413 = vector.load %arg39[%c0_571, %c37_572] : memref<8x360xf32, #tpu.memory_space<vmem>>, vector<8x288xf32>
    %c88 = arith.constant 88 : index
    %c0_573 = arith.constant 0 : index
    %414 = vector.load %arg50[%c88, %c0_573] : memref<288x288xf32, #tpu.memory_space<vmem>>, vector<8x288xf32>
    tpu.vector_store %arg50[%c88, %c0_573], %413 {strides = array<i32>} : memref<288x288xf32, #tpu.memory_space<vmem>>, vector<8x288xf32>,
    %c0_574 = arith.constant 0 : index
    %c53_575 = arith.constant 53 : index
    %415 = vector.load %arg45[%c0_574, %c53_575] : memref<8x360xf32, #tpu.memory_space<vmem>>, vector<8x288xf32>
    %c96_576 = arith.constant 96 : index
    %c0_577 = arith.constant 0 : index
    %416 = vector.load %arg50[%c96_576, %c0_577] : memref<288x288xf32, #tpu.memory_space<vmem>>, vector<8x288xf32>
    tpu.vector_store %arg50[%c96_576, %c0_577], %415 {strides = array<i32>} : memref<288x288xf32, #tpu.memory_space<vmem>>, vector<8x288xf32>,
    %c0_578 = arith.constant 0 : index
    %c53_579 = arith.constant 53 : index
    %417 = vector.load %arg39[%c0_578, %c53_579] : memref<8x360xf32, #tpu.memory_space<vmem>>, vector<8x288xf32>
    %c104 = arith.constant 104 : index
    %c0_580 = arith.constant 0 : index
    %418 = vector.load %arg50[%c104, %c0_580] : memref<288x288xf32, #tpu.memory_space<vmem>>, vector<8x288xf32>
    tpu.vector_store %arg50[%c104, %c0_580], %417 {strides = array<i32>} : memref<288x288xf32, #tpu.memory_space<vmem>>, vector<8x288xf32>,
    %c0_581 = arith.constant 0 : index
    %c54_582 = arith.constant 54 : index
    %419 = vector.load %arg45[%c0_581, %c54_582] : memref<8x360xf32, #tpu.memory_space<vmem>>, vector<8x288xf32>
    %c112_583 = arith.constant 112 : index
    %c0_584 = arith.constant 0 : index
    %420 = vector.load %arg50[%c112_583, %c0_584] : memref<288x288xf32, #tpu.memory_space<vmem>>, vector<8x288xf32>
    tpu.vector_store %arg50[%c112_583, %c0_584], %419 {strides = array<i32>} : memref<288x288xf32, #tpu.memory_space<vmem>>, vector<8x288xf32>,
    %c0_585 = arith.constant 0 : index
    %c54_586 = arith.constant 54 : index
    %421 = vector.load %arg39[%c0_585, %c54_586] : memref<8x360xf32, #tpu.memory_space<vmem>>, vector<8x288xf32>
    %c120 = arith.constant 120 : index
    %c0_587 = arith.constant 0 : index
    %422 = vector.load %arg50[%c120, %c0_587] : memref<288x288xf32, #tpu.memory_space<vmem>>, vector<8x288xf32>
    tpu.vector_store %arg50[%c120, %c0_587], %421 {strides = array<i32>} : memref<288x288xf32, #tpu.memory_space<vmem>>, vector<8x288xf32>,
    %c0_588 = arith.constant 0 : index
    %c55_589 = arith.constant 55 : index
    %423 = vector.load %arg45[%c0_588, %c55_589] : memref<8x360xf32, #tpu.memory_space<vmem>>, vector<8x288xf32>
    %c128_590 = arith.constant 128 : index
    %c0_591 = arith.constant 0 : index
    %424 = vector.load %arg50[%c128_590, %c0_591] : memref<288x288xf32, #tpu.memory_space<vmem>>, vector<8x288xf32>
    tpu.vector_store %arg50[%c128_590, %c0_591], %423 {strides = array<i32>} : memref<288x288xf32, #tpu.memory_space<vmem>>, vector<8x288xf32>,
    %c0_592 = arith.constant 0 : index
    %c55_593 = arith.constant 55 : index
    %425 = vector.load %arg39[%c0_592, %c55_593] : memref<8x360xf32, #tpu.memory_space<vmem>>, vector<8x288xf32>
    %c136 = arith.constant 136 : index
    %c0_594 = arith.constant 0 : index
    %426 = vector.load %arg50[%c136, %c0_594] : memref<288x288xf32, #tpu.memory_space<vmem>>, vector<8x288xf32>
    tpu.vector_store %arg50[%c136, %c0_594], %425 {strides = array<i32>} : memref<288x288xf32, #tpu.memory_space<vmem>>, vector<8x288xf32>,
    %c0_595 = arith.constant 0 : index
    %c0_596 = arith.constant 0 : index
    %427 = vector.load %arg50[%c0_595, %c0_596] : memref<288x288xf32, #tpu.memory_space<vmem>>, vector<144x288xf32>
    %c0_597 = arith.constant 0 : index
    %c0_598 = arith.constant 0 : index
    %428 = vector.load %arg26[%c0_597, %c0_598] : memref<8x144xf32, #tpu.memory_space<vmem>>, vector<8x144xf32>
    %cst_599 = arith.constant dense<0.000000e+00> : vector<8x288xf32>
    %429 = tpu.matmul %428, %427, %cst_599 {dimension_numbers = #tpu.dot_dimension_numbers<[1], [0], [0], [1], [0, 0, 1, 1], [], []>} : vector<8x144xf32>, vector<144x288xf32>, vector<8x288xf32> -> vector<8x288xf32>
    %c0_600 = arith.constant 0 : index
    %c0_601 = arith.constant 0 : index
    %430 = vector.load %arg27[%c0_600, %c0_601] : memref<8x1xf32, #tpu.memory_space<vmem>>, vector<8x1xf32>
    %431 = vector.broadcast %430 : vector<8x1xf32> to vector<8x288xf32>
    %432 = arith.addf %429, %431 : vector<8x288xf32>
    %cst_602 = arith.constant 0.000000e+00 : f32
    %433 = vector.broadcast %cst_602 : f32 to vector<8x288xf32>
    %434 = arith.maximumf %432, %433 : vector<8x288xf32>
    %c0_603 = arith.constant 0 : index
    %c0_604 = arith.constant 0 : index
    %435 = vector.load %arg32[%c0_603, %c0_604] : memref<1x288xf32, #tpu.memory_space<vmem>>, vector<1x288xf32>
    %436 = vector.broadcast %435 : vector<1x288xf32> to vector<8x288xf32>
    %437 = arith.mulf %434, %436 : vector<8x288xf32>
    %cst_605 = arith.constant 0.000000e+00 : f32
    %438 = vector.broadcast %cst_605 : f32 to vector<8x36xf32>
    %c0_606 = arith.constant 0 : index
    %c0_607 = arith.constant 0 : index
    %439 = vector.load %arg47[%c0_606, %c0_607] : memref<8x360xf32, #tpu.memory_space<vmem>>, vector<8x36xf32>
    tpu.vector_store %arg47[%c0_606, %c0_607], %438 {strides = array<i32>} : memref<8x360xf32, #tpu.memory_space<vmem>>, vector<8x36xf32>,
    %c0_608 = arith.constant 0 : index
    %c36_609 = arith.constant 36 : index
    %440 = vector.load %arg47[%c0_608, %c36_609] : memref<8x360xf32, #tpu.memory_space<vmem>>, vector<8x288xf32>
    tpu.vector_store %arg47[%c0_608, %c36_609], %437 {strides = array<i32>} : memref<8x360xf32, #tpu.memory_space<vmem>>, vector<8x288xf32>,
    %cst_610 = arith.constant 0.000000e+00 : f32
    %441 = vector.broadcast %cst_610 : f32 to vector<8x36xf32>
    %c0_611 = arith.constant 0 : index
    %c324_612 = arith.constant 324 : index
    %442 = vector.load %arg47[%c0_611, %c324_612] : memref<8x360xf32, #tpu.memory_space<vmem>>, vector<8x36xf32>
    tpu.vector_store %arg47[%c0_611, %c324_612], %441 {strides = array<i32>} : memref<8x360xf32, #tpu.memory_space<vmem>>, vector<8x36xf32>,
    %c0_613 = arith.constant 0 : index
    %c17_614 = arith.constant 17 : index
    %443 = vector.load %arg47[%c0_613, %c17_614] : memref<8x360xf32, #tpu.memory_space<vmem>>, vector<8x288xf32>
    %c0_615 = arith.constant 0 : index
    %c0_616 = arith.constant 0 : index
    %444 = vector.load %arg50[%c0_615, %c0_616] : memref<288x288xf32, #tpu.memory_space<vmem>>, vector<8x288xf32>
    tpu.vector_store %arg50[%c0_615, %c0_616], %443 {strides = array<i32>} : memref<288x288xf32, #tpu.memory_space<vmem>>, vector<8x288xf32>,
    %c0_617 = arith.constant 0 : index
    %c18_618 = arith.constant 18 : index
    %445 = vector.load %arg47[%c0_617, %c18_618] : memref<8x360xf32, #tpu.memory_space<vmem>>, vector<8x288xf32>
    %c8_619 = arith.constant 8 : index
    %c0_620 = arith.constant 0 : index
    %446 = vector.load %arg50[%c8_619, %c0_620] : memref<288x288xf32, #tpu.memory_space<vmem>>, vector<8x288xf32>
    tpu.vector_store %arg50[%c8_619, %c0_620], %445 {strides = array<i32>} : memref<288x288xf32, #tpu.memory_space<vmem>>, vector<8x288xf32>,
    %c0_621 = arith.constant 0 : index
    %c19_622 = arith.constant 19 : index
    %447 = vector.load %arg47[%c0_621, %c19_622] : memref<8x360xf32, #tpu.memory_space<vmem>>, vector<8x288xf32>
    %c16_623 = arith.constant 16 : index
    %c0_624 = arith.constant 0 : index
    %448 = vector.load %arg50[%c16_623, %c0_624] : memref<288x288xf32, #tpu.memory_space<vmem>>, vector<8x288xf32>
    tpu.vector_store %arg50[%c16_623, %c0_624], %447 {strides = array<i32>} : memref<288x288xf32, #tpu.memory_space<vmem>>, vector<8x288xf32>,
    %c0_625 = arith.constant 0 : index
    %c35_626 = arith.constant 35 : index
    %449 = vector.load %arg47[%c0_625, %c35_626] : memref<8x360xf32, #tpu.memory_space<vmem>>, vector<8x288xf32>
    %c24_627 = arith.constant 24 : index
    %c0_628 = arith.constant 0 : index
    %450 = vector.load %arg50[%c24_627, %c0_628] : memref<288x288xf32, #tpu.memory_space<vmem>>, vector<8x288xf32>
    tpu.vector_store %arg50[%c24_627, %c0_628], %449 {strides = array<i32>} : memref<288x288xf32, #tpu.memory_space<vmem>>, vector<8x288xf32>,
    %c0_629 = arith.constant 0 : index
    %c36_630 = arith.constant 36 : index
    %451 = vector.load %arg47[%c0_629, %c36_630] : memref<8x360xf32, #tpu.memory_space<vmem>>, vector<8x288xf32>
    %c32_631 = arith.constant 32 : index
    %c0_632 = arith.constant 0 : index
    %452 = vector.load %arg50[%c32_631, %c0_632] : memref<288x288xf32, #tpu.memory_space<vmem>>, vector<8x288xf32>
    tpu.vector_store %arg50[%c32_631, %c0_632], %451 {strides = array<i32>} : memref<288x288xf32, #tpu.memory_space<vmem>>, vector<8x288xf32>,
    %c0_633 = arith.constant 0 : index
    %c37_634 = arith.constant 37 : index
    %453 = vector.load %arg47[%c0_633, %c37_634] : memref<8x360xf32, #tpu.memory_space<vmem>>, vector<8x288xf32>
    %c40_635 = arith.constant 40 : index
    %c0_636 = arith.constant 0 : index
    %454 = vector.load %arg50[%c40_635, %c0_636] : memref<288x288xf32, #tpu.memory_space<vmem>>, vector<8x288xf32>
    tpu.vector_store %arg50[%c40_635, %c0_636], %453 {strides = array<i32>} : memref<288x288xf32, #tpu.memory_space<vmem>>, vector<8x288xf32>,
    %c0_637 = arith.constant 0 : index
    %c53_638 = arith.constant 53 : index
    %455 = vector.load %arg47[%c0_637, %c53_638] : memref<8x360xf32, #tpu.memory_space<vmem>>, vector<8x288xf32>
    %c48_639 = arith.constant 48 : index
    %c0_640 = arith.constant 0 : index
    %456 = vector.load %arg50[%c48_639, %c0_640] : memref<288x288xf32, #tpu.memory_space<vmem>>, vector<8x288xf32>
    tpu.vector_store %arg50[%c48_639, %c0_640], %455 {strides = array<i32>} : memref<288x288xf32, #tpu.memory_space<vmem>>, vector<8x288xf32>,
    %c0_641 = arith.constant 0 : index
    %c54_642 = arith.constant 54 : index
    %457 = vector.load %arg47[%c0_641, %c54_642] : memref<8x360xf32, #tpu.memory_space<vmem>>, vector<8x288xf32>
    %c56_643 = arith.constant 56 : index
    %c0_644 = arith.constant 0 : index
    %458 = vector.load %arg50[%c56_643, %c0_644] : memref<288x288xf32, #tpu.memory_space<vmem>>, vector<8x288xf32>
    tpu.vector_store %arg50[%c56_643, %c0_644], %457 {strides = array<i32>} : memref<288x288xf32, #tpu.memory_space<vmem>>, vector<8x288xf32>,
    %c0_645 = arith.constant 0 : index
    %c55_646 = arith.constant 55 : index
    %459 = vector.load %arg47[%c0_645, %c55_646] : memref<8x360xf32, #tpu.memory_space<vmem>>, vector<8x288xf32>
    %c64_647 = arith.constant 64 : index
    %c0_648 = arith.constant 0 : index
    %460 = vector.load %arg50[%c64_647, %c0_648] : memref<288x288xf32, #tpu.memory_space<vmem>>, vector<8x288xf32>
    tpu.vector_store %arg50[%c64_647, %c0_648], %459 {strides = array<i32>} : memref<288x288xf32, #tpu.memory_space<vmem>>, vector<8x288xf32>,
    %c0_649 = arith.constant 0 : index
    %c0_650 = arith.constant 0 : index
    %461 = vector.load %arg50[%c0_649, %c0_650] : memref<288x288xf32, #tpu.memory_space<vmem>>, vector<72x288xf32>
    %c0_651 = arith.constant 0 : index
    %c0_652 = arith.constant 0 : index
    %462 = vector.load %arg28[%c0_651, %c0_652] : memref<8x72xf32, #tpu.memory_space<vmem>>, vector<8x72xf32>
    %cst_653 = arith.constant dense<0.000000e+00> : vector<8x288xf32>
    %463 = tpu.matmul %462, %461, %cst_653 {dimension_numbers = #tpu.dot_dimension_numbers<[1], [0], [0], [1], [0, 0, 1, 1], [], []>} : vector<8x72xf32>, vector<72x288xf32>, vector<8x288xf32> -> vector<8x288xf32>
    %c0_654 = arith.constant 0 : index
    %c0_655 = arith.constant 0 : index
    %464 = vector.load %arg29[%c0_654, %c0_655] : memref<8x1xf32, #tpu.memory_space<vmem>>, vector<8x1xf32>
    %465 = vector.broadcast %464 : vector<8x1xf32> to vector<8x288xf32>
    %466 = arith.addf %463, %465 : vector<8x288xf32>
    %cst_656 = arith.constant 0.000000e+00 : f32
    %467 = vector.broadcast %cst_656 : f32 to vector<8x288xf32>
    %468 = arith.maximumf %466, %467 : vector<8x288xf32>
    %c0_657 = arith.constant 0 : index
    %c0_658 = arith.constant 0 : index
    %469 = vector.load %arg32[%c0_657, %c0_658] : memref<1x288xf32, #tpu.memory_space<vmem>>, vector<1x288xf32>
    %470 = vector.broadcast %469 : vector<1x288xf32> to vector<8x288xf32>
    %471 = arith.mulf %468, %470 : vector<8x288xf32>
    %cst_659 = arith.constant 0.000000e+00 : f32
    %472 = vector.broadcast %cst_659 : f32 to vector<8x36xf32>
    %c0_660 = arith.constant 0 : index
    %c0_661 = arith.constant 0 : index
    %473 = vector.load %arg49[%c0_660, %c0_661] : memref<8x360xf32, #tpu.memory_space<vmem>>, vector<8x36xf32>
    tpu.vector_store %arg49[%c0_660, %c0_661], %472 {strides = array<i32>} : memref<8x360xf32, #tpu.memory_space<vmem>>, vector<8x36xf32>,
    %c0_662 = arith.constant 0 : index
    %c36_663 = arith.constant 36 : index
    %474 = vector.load %arg49[%c0_662, %c36_663] : memref<8x360xf32, #tpu.memory_space<vmem>>, vector<8x288xf32>
    tpu.vector_store %arg49[%c0_662, %c36_663], %471 {strides = array<i32>} : memref<8x360xf32, #tpu.memory_space<vmem>>, vector<8x288xf32>,
    %cst_664 = arith.constant 0.000000e+00 : f32
    %475 = vector.broadcast %cst_664 : f32 to vector<8x36xf32>
    %c0_665 = arith.constant 0 : index
    %c324_666 = arith.constant 324 : index
    %476 = vector.load %arg49[%c0_665, %c324_666] : memref<8x360xf32, #tpu.memory_space<vmem>>, vector<8x36xf32>
    tpu.vector_store %arg49[%c0_665, %c324_666], %475 {strides = array<i32>} : memref<8x360xf32, #tpu.memory_space<vmem>>, vector<8x36xf32>,
    %c0_667 = arith.constant 0 : index
    %c36_668 = arith.constant 36 : index
    %477 = vector.load %arg49[%c0_667, %c36_668] : memref<8x360xf32, #tpu.memory_space<vmem>>, vector<8x288xf32>
    %c0_669 = arith.constant 0 : index
    %c0_670 = arith.constant 0 : index
    %478 = vector.load %arg30[%c0_669, %c0_670] : memref<2x8xf32, #tpu.memory_space<vmem>>, vector<2x8xf32>
    %cst_671 = arith.constant dense<0.000000e+00> : vector<2x288xf32>
    %479 = tpu.matmul %478, %477, %cst_671 {dimension_numbers = #tpu.dot_dimension_numbers<[1], [0], [0], [1], [0, 0, 1, 1], [], []>} : vector<2x8xf32>, vector<8x288xf32>, vector<2x288xf32> -> vector<2x288xf32>
    %c0_672 = arith.constant 0 : index
    %c0_673 = arith.constant 0 : index
    %480 = vector.load %arg31[%c0_672, %c0_673] : memref<2x1xf32, #tpu.memory_space<vmem>>, vector<2x1xf32>
    %481 = vector.broadcast %480 : vector<2x1xf32> to vector<2x288xf32>
    %482 = arith.addf %479, %481 : vector<2x288xf32>
    %c0_674 = arith.constant 0 : index
    %c0_675 = arith.constant 0 : index
    %c0_676 = arith.constant 0 : index
    %483 = vector.load %arg35[%c0_674, %c0_675, %c0_676] : memref<1x2x288xf32, #tpu.memory_space<vmem>>, vector<1x2x288xf32>
    %484 = vector.shape_cast %483 : vector<1x2x288xf32> to vector<2x288xf32>
    %485 = vector.shape_cast %482 : vector<2x288xf32> to vector<1x2x288xf32>
    tpu.vector_store %arg35[%c0_674, %c0_675, %c0_676], %485 {strides = array<i32>} : memref<1x2x288xf32, #tpu.memory_space<vmem>>, vector<1x2x288xf32>,
    return
  }
  func.func @transform_0(%arg0: i32) -> (i32, i32, i32) {
    %c0_i32 = arith.constant 0 : i32
    %c0_i32_0 = arith.constant 0 : i32
    %c0_i32_1 = arith.constant 0 : i32
    return %arg0, %c0_i32, %c0_i32_0 : i32, i32, i32
  }
  func.func @transform_1(%arg0: i32) -> (i32, i32) {
    %c0_i32 = arith.constant 0 : i32
    %c0_i32_0 = arith.constant 0 : i32
    %c0_i32_1 = arith.constant 0 : i32
    return %c0_i32, %c0_i32_0 : i32, i32
  }
  func.func @transform_2(%arg0: i32) -> (i32, i32) {
    %c0_i32 = arith.constant 0 : i32
    %c0_i32_0 = arith.constant 0 : i32
    %c0_i32_1 = arith.constant 0 : i32
    return %c0_i32, %c0_i32_0 : i32, i32
  }
  func.func @transform_3(%arg0: i32) -> (i32, i32) {
    %c0_i32 = arith.constant 0 : i32
    %c0_i32_0 = arith.constant 0 : i32
    %c0_i32_1 = arith.constant 0 : i32
    return %c0_i32, %c0_i32_0 : i32, i32
  }
  func.func @transform_4(%arg0: i32) -> (i32, i32) {
    %c0_i32 = arith.constant 0 : i32
    %c0_i32_0 = arith.constant 0 : i32
    %c0_i32_1 = arith.constant 0 : i32
    return %c0_i32, %c0_i32_0 : i32, i32
  }
  func.func @transform_5(%arg0: i32) -> (i32, i32) {
    %c0_i32 = arith.constant 0 : i32
    %c0_i32_0 = arith.constant 0 : i32
    %c0_i32_1 = arith.constant 0 : i32
    return %c0_i32, %c0_i32_0 : i32, i32
  }
  func.func @transform_6(%arg0: i32) -> (i32, i32) {
    %c0_i32 = arith.constant 0 : i32
    %c0_i32_0 = arith.constant 0 : i32
    %c0_i32_1 = arith.constant 0 : i32
    return %c0_i32, %c0_i32_0 : i32, i32
  }
  func.func @transform_7(%arg0: i32) -> (i32, i32) {
    %c0_i32 = arith.constant 0 : i32
    %c0_i32_0 = arith.constant 0 : i32
    %c0_i32_1 = arith.constant 0 : i32
    return %c0_i32, %c0_i32_0 : i32, i32
  }
  func.func @transform_8(%arg0: i32) -> (i32, i32) {
    %c0_i32 = arith.constant 0 : i32
    %c0_i32_0 = arith.constant 0 : i32
    %c0_i32_1 = arith.constant 0 : i32
    return %c0_i32, %c0_i32_0 : i32, i32
  }
  func.func @transform_9(%arg0: i32) -> (i32, i32) {
    %c0_i32 = arith.constant 0 : i32
    %c0_i32_0 = arith.constant 0 : i32
    %c0_i32_1 = arith.constant 0 : i32
    return %c0_i32, %c0_i32_0 : i32, i32
  }
  func.func @transform_10(%arg0: i32) -> (i32, i32) {
    %c0_i32 = arith.constant 0 : i32
    %c0_i32_0 = arith.constant 0 : i32
    %c0_i32_1 = arith.constant 0 : i32
    return %c0_i32, %c0_i32_0 : i32, i32
  }
  func.func @transform_11(%arg0: i32) -> (i32, i32) {
    %c0_i32 = arith.constant 0 : i32
    %c0_i32_0 = arith.constant 0 : i32
    %c0_i32_1 = arith.constant 0 : i32
    return %c0_i32, %c0_i32_0 : i32, i32
  }
  func.func @transform_12(%arg0: i32) -> (i32, i32) {
    %c0_i32 = arith.constant 0 : i32
    %c0_i32_0 = arith.constant 0 : i32
    %c0_i32_1 = arith.constant 0 : i32
    return %c0_i32, %c0_i32_0 : i32, i32
  }
  func.func @transform_13(%arg0: i32) -> (i32, i32) {
    %c0_i32 = arith.constant 0 : i32
    %c0_i32_0 = arith.constant 0 : i32
    %c0_i32_1 = arith.constant 0 : i32
    return %c0_i32, %c0_i32_0 : i32, i32
  }
  func.func @transform_14(%arg0: i32) -> (i32, i32) {
    %c0_i32 = arith.constant 0 : i32
    %c0_i32_0 = arith.constant 0 : i32
    %c0_i32_1 = arith.constant 0 : i32
    return %c0_i32, %c0_i32_0 : i32, i32
  }
  func.func @transform_15(%arg0: i32) -> (i32, i32) {
    %c0_i32 = arith.constant 0 : i32
    %c0_i32_0 = arith.constant 0 : i32
    %c0_i32_1 = arith.constant 0 : i32
    return %c0_i32, %c0_i32_0 : i32, i32
  }
  func.func @transform_16(%arg0: i32) -> (i32, i32) {
    %c0_i32 = arith.constant 0 : i32
    %c0_i32_0 = arith.constant 0 : i32
    %c0_i32_1 = arith.constant 0 : i32
    return %c0_i32, %c0_i32_0 : i32, i32
  }
  func.func @transform_17(%arg0: i32) -> (i32, i32, i32) {
    %c0_i32 = arith.constant 0 : i32
    %c0_i32_0 = arith.constant 0 : i32
    %c0_i32_1 = arith.constant 0 : i32
    %c0_i32_2 = arith.constant 0 : i32
    return %c0_i32, %c0_i32_0, %c0_i32_1 : i32, i32, i32
  }
  func.func @transform_18(%arg0: i32) -> (i32, i32) {
    %c0_i32 = arith.constant 0 : i32
    %c0_i32_0 = arith.constant 0 : i32
    %c0_i32_1 = arith.constant 0 : i32
    return %c0_i32, %c0_i32_0 : i32, i32
  }
  func.func @transform_19(%arg0: i32) -> (i32, i32) {
    %c0_i32 = arith.constant 0 : i32
    %c0_i32_0 = arith.constant 0 : i32
    %c0_i32_1 = arith.constant 0 : i32
    return %c0_i32, %c0_i32_0 : i32, i32
  }
  func.func @transform_20(%arg0: i32) -> (i32, i32) {
    %c0_i32 = arith.constant 0 : i32
    %c0_i32_0 = arith.constant 0 : i32
    %c0_i32_1 = arith.constant 0 : i32
    return %c0_i32, %c0_i32_0 : i32, i32
  }
  func.func @transform_21(%arg0: i32) -> (i32, i32) {
    %c0_i32 = arith.constant 0 : i32
    %c0_i32_0 = arith.constant 0 : i32
    %c0_i32_1 = arith.constant 0 : i32
    return %c0_i32, %c0_i32_0 : i32, i32
  }
  func.func @transform_22(%arg0: i32) -> (i32, i32) {
    %c0_i32 = arith.constant 0 : i32
    %c0_i32_0 = arith.constant 0 : i32
    %c0_i32_1 = arith.constant 0 : i32
    return %c0_i32, %c0_i32_0 : i32, i32
  }
  func.func @transform_23(%arg0: i32) -> (i32, i32) {
    %c0_i32 = arith.constant 0 : i32
    %c0_i32_0 = arith.constant 0 : i32
    %c0_i32_1 = arith.constant 0 : i32
    return %c0_i32, %c0_i32_0 : i32, i32
  }
  func.func @transform_24(%arg0: i32) -> (i32, i32, i32) {
    %c0_i32 = arith.constant 0 : i32
    %c0_i32_0 = arith.constant 0 : i32
    %c0_i32_1 = arith.constant 0 : i32
    %c0_i32_2 = arith.constant 0 : i32
    return %c0_i32, %c0_i32_0, %c0_i32_1 : i32, i32, i32
  }
  func.func @transform_25(%arg0: i32) -> (i32, i32) {
    %c0_i32 = arith.constant 0 : i32
    %c0_i32_0 = arith.constant 0 : i32
    %c0_i32_1 = arith.constant 0 : i32
    return %c0_i32, %c0_i32_0 : i32, i32
  }
  func.func @transform_26(%arg0: i32) -> (i32, i32) {
    %c0_i32 = arith.constant 0 : i32
    %c0_i32_0 = arith.constant 0 : i32
    %c0_i32_1 = arith.constant 0 : i32
    return %c0_i32, %c0_i32_0 : i32, i32
  }
  func.func @transform_27(%arg0: i32) -> (i32, i32) {
    %c0_i32 = arith.constant 0 : i32
    %c0_i32_0 = arith.constant 0 : i32
    %c0_i32_1 = arith.constant 0 : i32
    return %c0_i32, %c0_i32_0 : i32, i32
  }
  func.func @transform_28(%arg0: i32) -> (i32, i32) {
    %c0_i32 = arith.constant 0 : i32
    %c0_i32_0 = arith.constant 0 : i32
    %c0_i32_1 = arith.constant 0 : i32
    return %c0_i32, %c0_i32_0 : i32, i32
  }
  func.func @transform_29(%arg0: i32) -> (i32, i32) {
    %c0_i32 = arith.constant 0 : i32
    %c0_i32_0 = arith.constant 0 : i32
    %c0_i32_1 = arith.constant 0 : i32
    return %c0_i32, %c0_i32_0 : i32, i32
  }
  func.func @transform_30(%arg0: i32) -> (i32, i32) {
    %c0_i32 = arith.constant 0 : i32
    %c0_i32_0 = arith.constant 0 : i32
    %c0_i32_1 = arith.constant 0 : i32
    return %c0_i32, %c0_i32_0 : i32, i32
  }
  func.func @transform_31(%arg0: i32) -> (i32, i32) {
    %c0_i32 = arith.constant 0 : i32
    %c0_i32_0 = arith.constant 0 : i32
    %c0_i32_1 = arith.constant 0 : i32
    return %c0_i32, %c0_i32_0 : i32, i32
  }
  func.func @transform_32(%arg0: i32) -> (i32, i32) {
    %c0_i32 = arith.constant 0 : i32
    %c0_i32_0 = arith.constant 0 : i32
    %c0_i32_1 = arith.constant 0 : i32
    return %c0_i32, %c0_i32_0 : i32, i32
  }
  func.func @transform_33(%arg0: i32) -> (i32, i32) {
    %c0_i32 = arith.constant 0 : i32
    %c0_i32_0 = arith.constant 0 : i32
    %c0_i32_1 = arith.constant 0 : i32
    return %c0_i32, %c0_i32_0 : i32, i32
  }
  func.func @transform_34(%arg0: i32) -> (i32, i32, i32) {
    %c0_i32 = arith.constant 0 : i32
    %c0_i32_0 = arith.constant 0 : i32
    %c0_i32_1 = arith.constant 0 : i32
    return %arg0, %c0_i32, %c0_i32_0 : i32, i32, i32
  }
}

</mosaic_0001>

<bundles_post_ra>
// kernel: forward.1
= control target key start
LH: loop header
LB: loop body
LE: loop exit
PB: predicated region body
PF: predicated region fallthrough
CT: control target
= control target key end

     0   :  { %s8777_s6 = smov 1   ;;  %s8778_s10 = smov 2   ;;  %s10561_s0 = inlined_call_operand.smem [shape: u32[35], index: -1, kind: input, shape index: {}] }
   0x1   :  { %s8864_s5 = sld [smem:[%s10561_s0]]   ;;  %s8779_s14 = smov 3  }
   0x2   :  { %s8869_s9 = sld [smem:[%s10561_s0 + %s8777_s6]]   ;;  %s8780_s18 = smov 4  }
   0x3   :  { %s8874_s13 = sld [smem:[%s10561_s0 + %s8778_s10]]   ;;  %s8781_s22 = smov 5  }
   0x4   :  { %s8879_s17 = sld [smem:[%s10561_s0 + %s8779_s14]]   ;;  %s8782_s26 = smov 6  }
   0x5   :  { %s8884_s21 = sld [smem:[%s10561_s0 + %s8780_s18]]   ;;  %s8783_s30 = smov 7  }
   0x6   :  { %s8889_s25 = sld [smem:[%s10561_s0 + %s8781_s22]]   ;;  %s8784_s4 = smov 8  }
   0x7   :  { %10644 = sst [smem:[#allocation36_spill]] %s8864_s5  ;;  %s8785_s10 = smov 9  }
   0x8   :  { %10645 = sst [smem:[#allocation37_spill]] %s8869_s9  ;;  %s8786_s15 = smov 10  }
   0x9   :  { %s8894_s29 = sld [smem:[%s10561_s0 + %s8782_s26]]   ;;  %s8787_s20 = smov 11  }
   0xa   :  { %s8899_s3 = sld [smem:[%s10561_s0 + %s8783_s30]]   ;;  %s8788_s26 = smov 12  }
   0xb   :  { %s8904_s8 = sld [smem:[%s10561_s0 + %s8784_s4]]   ;;  %s8789_s1 = smov 13  }
   0xc   :  { %s8909_s14 = sld [smem:[%s10561_s0 + %s8785_s10]]   ;;  %s8790_s7 = smov 14  }
   0xd   :  { %s8914_s19 = sld [smem:[%s10561_s0 + %s8786_s15]]   ;;  %s8791_s15 = smov 15  }
   0xe   :  { %s8919_s24 = sld [smem:[%s10561_s0 + %s8787_s20]]   ;;  %s8792_s22 = smov 16  }
   0xf   :  { %s8924_s30 = sld [smem:[%s10561_s0 + %s8788_s26]]   ;;  %s8793_s28 = smov 17  }
  0x10   :  { %10646 = sst [smem:[#allocation38_spill]] %s8899_s3 }
  0x11   :  { %10647 = sst [smem:[#allocation39_spill]] %s8904_s8 }
  0x12   :  { %10648 = sst [smem:[#allocation40_spill]] %s8909_s14 }
  0x13   :  { %10649 = sst [smem:[#allocation41_spill]] %s8914_s19 }
  0x14   :  { %10650 = sst [smem:[#allocation42_spill]] %s8919_s24 }
  0x15   :  { %10651 = sst [smem:[#allocation43_spill]] %s8924_s30 }
  0x16   :  { %s8929_s6 = sld [smem:[%s10561_s0 + %s8789_s1]]  }
  0x17   :  { %s8934_s12 = sld [smem:[%s10561_s0 + %s8790_s7]]   ;;  %s8794_s7 = smov 18  }
  0x18   :  { %s8939_s20 = sld [smem:[%s10561_s0 + %s8791_s15]]   ;;  %s8795_s15 = smov 19  }
  0x19   :  { %s8944_s27 = sld [smem:[%s10561_s0 + %s8792_s22]]   ;;  %s8796_s22 = smov 20  }
  0x1a   :  { %s8949_s4 = sld [smem:[%s10561_s0 + %s8793_s28]]   ;;  %s8797_s28 = smov 21  }
  0x1b   :  { %s8954_s30 = sld [smem:[%s10561_s0 + %s8794_s7]]   ;;  %s8798_s7 = smov 22  }
  0x1c   :  { %10652 = sst [smem:[#allocation44_spill]] %s8929_s6 }
  0x1d   :  { %10653 = sst [smem:[#allocation45_spill]] %s8934_s12 }
  0x1e   :  { %10654 = sst [smem:[#allocation46_spill]] %s8939_s20 }
  0x1f   :  { %10655 = sst [smem:[#allocation47_spill]] %s8944_s27 }
  0x20   :  { %10656 = sst [smem:[#allocation48_spill]] %s8949_s4 }
  0x21   :  { %10657 = sst [smem:[#allocation49_spill]] %s8954_s30 }
  0x22   :  { %s8959_s20 = sld [smem:[%s10561_s0 + %s8795_s15]]   ;;  %s8799_s15 = smov 23  }
  0x23   :  { %s8964_s27 = sld [smem:[%s10561_s0 + %s8796_s22]]   ;;  %s8800_s22 = smov 24  }
  0x24   :  { %s8969_s4 = sld [smem:[%s10561_s0 + %s8797_s28]]   ;;  %s8801_s28 = smov 25  }
  0x25   :  { %s8974_s30 = sld [smem:[%s10561_s0 + %s8798_s7]]   ;;  %s8802_s7 = smov 26  }
  0x26   :  { %s8984_s24 = sld [smem:[%s10561_s0 + %s8800_s22]]   ;;  %s8804_s22 = smov 28  }
  0x28   :  { %10658 = sst [smem:[#allocation50_spill]] %s8959_s20 }
  0x29   :  { %s8979_s20 = sld [smem:[%s10561_s0 + %s8799_s15]]   ;;  %s8803_s15 = smov 27  }
  0x2a   :  { %10659 = sst [smem:[#allocation51_spill]] %s8969_s4 }
  0x2b   :  { %10660 = sst [smem:[#allocation52_spill]] %s8974_s30 }
  0x2c   :  { %10662 = sst [smem:[#allocation54_spill]] %s8984_s24 }
  0x2d   :  { %s8989_s4 = sld [smem:[%s10561_s0 + %s8801_s28]]   ;;  %s8805_s28 = smov 29  }
  0x2e   :  { %s8994_s30 = sld [smem:[%s10561_s0 + %s8802_s7]]   ;;  %s8806_s7 = smov 30  }
  0x2f   :  { %10661 = sst [smem:[#allocation53_spill]] %s8979_s20 }
  0x30   :  { %s8999_s20 = sld [smem:[%s10561_s0 + %s8803_s15]]   ;;  %s8807_s15 = smov 31  }
  0x31   :  { %s9004_s24 = sld [smem:[%s10561_s0 + %s8804_s22]]   ;;  %s8808_s22 = smov 32  }
  0x32   :  { %s9009_s19 = sld [smem:[%s10561_s0 + %s8805_s28]]   ;;  %s8809_s28 = smov 33  }
  0x33   :  { %10663 = sst [smem:[#allocation55_spill]] %s8989_s4 }
  0x34   :  { %10664 = sst [smem:[#allocation56_spill]] %s8994_s30 }
  0x35   :  { %s9014_s30 = sld [smem:[%s10561_s0 + %s8806_s7]]   ;;  %s8810_s7 = smov 34  }
  0x36   :  { %s9019_s14 = sld [smem:[%s10561_s0 + %s8807_s15]]  }
  0x37   :  { %10665 = sst [smem:[#allocation57_spill]] %s9004_s24 }
  0x38   :  { %s9024_s24 = sld [smem:[%s10561_s0 + %s8808_s22]]  }
  0x39   :  { %s9029_s12 = sld [smem:[%s10561_s0 + %s8809_s28]]  }
  0x3b   :  { %10666 = sst [smem:[#allocation58_spill]] %s9014_s30 }
  0x3c   :  { %s9034_s30 = sld [smem:[%s10561_s0 + %s8810_s7]]  }
  0x3d   :  { %74 = vsyncpa [#allocation18], 0 }
  0x3e   :  { %75 = vsyncpa [#allocation20], 0 }
  0x3f   :  { %76 = vsyncpa [#allocation23], 0 }
  0x40   :  { %77 = vsyncpa [#allocation26], 0 }
  0x41   :  { %78 = vsyncpa [#allocation29], 0  ;;  %s9036_s15 = smov 0  }
  0x42 LB: > { %s10667_s9 = sld [smem:[#allocation37_spill]]  ;;  %s10668_s8 = sld [smem:[#allocation39_spill]]  ;;  %s8775_s15 = sphi %s9036_s15, %s84_s15  }
  0x43   : > { %s10669_s6 = sld [smem:[#allocation44_spill]]  ;;  %s10670_s4 = sld [smem:[#allocation55_spill]] }
  0x44   : > { %s10671_s3 = sld [smem:[#allocation38_spill]]  ;;  %s8811_s16 = smov [#allocation19]  }
  0x45   : > { %s861_s18 = sshll.u32 %s8811_s16, 4  ;;  %s9042_s22 = sadd.s32 4294967295, %s8775_s15   ;;  %s9047_s18 = int_to_ptr.vmem [resolvable:$true] %s861_s18 }
  0x46   : > { %p6997_p0 = scmp.ge.s32.totalorder %s8775_s15, 1  ;;  %p834_p1 = scmp.lt.s32.totalorder %s8775_s15, 3 }
  0x47   : > { %p10576_p2 = scmp.eq.s32.totalorder %s9042_s22, 0  ;;  %s8812_s23 = smov [#allocation22]  }
  0x48   : > { %p9049_p3 = pnand %p6997_p0, %p834_p1  ;;  %s890_s26 = sshll.u32 %s8812_s23, 4  ;;  %s9055_s26 = int_to_ptr.vmem [resolvable:$true] %s890_s26 }
  0x49   : > { %s8813_s1 = smov [#allocation25]   ;;  %s8814_s7 = smov [#allocation28]  }
  0x4a   : > { %s10672_s0 = scalar_select %p9049_p3, 1, 0 }
  0x4b   : > { %p8332_p4 = pneg %p9049_p3  ;;  %s965_s2 = sshll.u32 %s8813_s1, 4  ;;  %s9063_s2 = int_to_ptr.vmem [resolvable:$true] %s965_s2 }
  0x4c   : > { %s9065_s10 = sshll.u32 %s8814_s7, 4  ;;  %s8497_s11 = scalar_lea.hbm %s8879_s17, 128  ;;  %s994_s10 = int_to_ptr.vmem [resolvable:$true] %s9065_s10 }
  0x4d   : > { %p9059_p5 = pnand %p10576_p2, %p8332_p4  ;;  %p8498_p6 = scmp.ne.s32.totalorder %s8879_s17, %s8497_s11 }
  0x4e   : > { %p8504_p10 = scmp.lt.u32.totalorder %s8497_s11, %s8879_s17 }
  0x4f   : > { %p9071_p7 = pneg %p9059_p5 }
  0x51   : > { %p8500_p8 = pnand %p9071_p7, %p8498_p6 }
  0x53   : > { %p8501_p9 = pneg %p8500_p8 }
  0x55   : > { %p8506_p11 = pnand %p8504_p10, %p8501_p9 }
  0x57   : > { %8509 = shalt.err (!%p8506_p11)
}
  0x58   : > { %s8510_s23 = scalar_lea.vmem %s9047_s18, 128  ;;  %p8518_p1 = scmp.lt.s32.totalorder %s9047_s18, %s9047_s18 }
  0x59   : > { %p8511_p12 = scmp.ne.s32.totalorder %s9047_s18, %s8510_s23  ;;  %p8519_p4 = scmp.lt.s32.totalorder %s8510_s23, %s8510_s23 }
  0x5b   : > { %p8513_p13 = pnand %p8511_p12, %p9071_p7  ;;  %p8520_p2 = por %p8519_p4, %p8518_p1 }
  0x5d   : > { %p8514_p0 = pneg %p8513_p13 }
  0x5f   : > { %p8521_p3 = pnand %p8520_p2, %p8514_p0 }
  0x61   : > { %8524 = shalt.err (!%p8521_p3)
}
  0x62   : > { %8338 = dma.hbm_to_vmem [thread:$0]  (!%p9059_p5), %s8879_s17, 128, %s9047_s18, [#allocation20]  }
  0x63   : > { %s8525_s1 = scalar_lea.hbm %s10671_s3, 512 }
  0x64   : > { %p8526_p6 = scmp.ne.s32.totalorder %s10671_s3, %s8525_s1  ;;  %p8532_p10 = scmp.lt.u32.totalorder %s8525_s1, %s10671_s3 }
  0x66   : > { %p8528_p8 = pnand %p8526_p6, %p9071_p7 }
  0x68   : > { %p8529_p9 = pneg %p8528_p8 }
  0x6a   : > { %p8534_p11 = pnand %p8532_p10, %p8529_p9 }
  0x6c   : > { %8537 = shalt.err (!%p8534_p11)
}
  0x6d   : > { %s8538_s7 = scalar_lea.vmem %s9055_s26, 512  ;;  %p8546_p13 = scmp.lt.s32.totalorder %s9055_s26, %s9055_s26 }
  0x6e   : > { %p8539_p2 = scmp.ne.s32.totalorder %s9055_s26, %s8538_s7  ;;  %p8547_p0 = scmp.lt.s32.totalorder %s8538_s7, %s8538_s7 }
  0x70   : > { %p8541_p3 = pnand %p8539_p2, %p9071_p7  ;;  %p8548_p1 = por %p8547_p0, %p8546_p13 }
  0x72   : > { %p8542_p12 = pneg %p8541_p3 }
  0x74   : > { %p8549_p4 = pnand %p8548_p1, %p8542_p12 }
  0x76   : > { %8552 = shalt.err (!%p8549_p4)
}
  0x77   : > { %s10578_s18 = smov 256   ;;  %s10579_s11 = smov 16  }
  0x78   : > { %8344 = dma.hbm_to_vmem [thread:$0]  (!%p9059_p5), %s10671_s3, 512, %s9055_s26, [#allocation23], %s10578_s18, %s10578_s18, %s10579_s11  }
  0x79   : > { %s8553_s23 = scalar_lea.hbm %s10670_s4, 256 }
  0x7a   : > { %p8554_p6 = scmp.ne.s32.totalorder %s10670_s4, %s8553_s23  ;;  %p8560_p10 = scmp.lt.u32.totalorder %s8553_s23, %s10670_s4 }
  0x7c   : > { %p8556_p8 = pnand %p8554_p6, %p9071_p7 }
  0x7e   : > { %p8557_p9 = pneg %p8556_p8 }
  0x80   : > { %p8562_p11 = pnand %p8560_p10, %p8557_p9 }
  0x82   : > { %8565 = shalt.err (!%p8562_p11)
}
  0x83   : > { %s8566_s1 = scalar_lea.vmem %s9063_s2, 256  ;;  %p8574_p13 = scmp.lt.s32.totalorder %s9063_s2, %s9063_s2 }
  0x84   : > { %p8567_p2 = scmp.ne.s32.totalorder %s9063_s2, %s8566_s1  ;;  %p8575_p0 = scmp.lt.s32.totalorder %s8566_s1, %s8566_s1 }
  0x86   : > { %p8569_p3 = pnand %p8567_p2, %p9071_p7  ;;  %p8576_p1 = por %p8575_p0, %p8574_p13 }
  0x88   : > { %p8570_p12 = pneg %p8569_p3 }
  0x8a   : > { %p8577_p4 = pnand %p8576_p1, %p8570_p12 }
  0x8c   : > { %8580 = shalt.err (!%p8577_p4)
}
  0x8d   : > { %8350 = dma.hbm_to_vmem [thread:$0]  (!%p9059_p5), %s10670_s4, 256, %s9063_s2, [#allocation26]  }
  0x8e   : > { %s8581_s26 = scalar_lea.hbm %s9009_s19, 32 }
  0x8f   : > { %p8582_p6 = scmp.ne.s32.totalorder %s9009_s19, %s8581_s26  ;;  %p8588_p10 = scmp.lt.u32.totalorder %s8581_s26, %s9009_s19 }
  0x91   : > { %p8584_p8 = pnand %p8582_p6, %p9071_p7 }
  0x93   : > { %p8585_p9 = pneg %p8584_p8 }
  0x95   : > { %p8590_p11 = pnand %p8588_p10, %p8585_p9 }
  0x97   : > { %8593 = shalt.err (!%p8590_p11)
}
  0x98   : > { %s8594_s7 = scalar_lea.vmem %s994_s10, 32  ;;  %p8602_p13 = scmp.lt.s32.totalorder %s994_s10, %s994_s10 }
  0x99   : > { %p8595_p2 = scmp.ne.s32.totalorder %s994_s10, %s8594_s7  ;;  %p8603_p0 = scmp.lt.s32.totalorder %s8594_s7, %s8594_s7 }
  0x9b   : > { %p8597_p3 = pnand %p8595_p2, %p9071_p7  ;;  %p8604_p1 = por %p8603_p0, %p8602_p13 }
  0x9d   : > { %p8598_p12 = pneg %p8597_p3 }
  0x9f   : > { %p8605_p4 = pnand %p8604_p1, %p8598_p12 }
  0xa1   : > { %8608 = shalt.err (!%p8605_p4)
}
  0xa2   : > { %8356 = dma.hbm_to_vmem [thread:$0]  (!%p9059_p5), %s9009_s19, 32, %s994_s10, [#allocation29]  }
  0xa3   : > { %s8817_s2 = smov [#allocation17]   ;;  %s8818_s1 = smov [#allocation21]  }
  0xa4   : > { %s847_s23 = sshll.u32 %s8817_s2, 4  ;;  %s874_s26 = sshll.u32 %s8818_s1, 4  ;;  %s848_s23 = int_to_ptr.vmem [resolvable:$true] %s847_s23  ;;  %s875_s26 = int_to_ptr.vmem [resolvable:$true] %s874_s26 }
  0xa5   : > { %s8609_s18 = scalar_lea.hbm %s10667_s9, 128 }
  0xa6   : > { %p8610_p6 = scmp.ne.s32.totalorder %s10667_s9, %s8609_s18  ;;  %p8616_p10 = scmp.lt.u32.totalorder %s8609_s18, %s10667_s9 }
  0xa8   : > { %p8612_p8 = pnand %p8610_p6, %p9071_p7 }
  0xaa   : > { %p8613_p9 = pneg %p8612_p8 }
  0xac   : > { %p8618_p11 = pnand %p8616_p10, %p8613_p9 }
  0xae   : > { %8621 = shalt.err (!%p8618_p11)
}
  0xaf   : > { %s8622_s7 = scalar_lea.vmem %s848_s23, 128  ;;  %p8630_p13 = scmp.lt.s32.totalorder %s848_s23, %s848_s23 }
  0xb0   : > { %p8623_p2 = scmp.ne.s32.totalorder %s848_s23, %s8622_s7  ;;  %p8631_p0 = scmp.lt.s32.totalorder %s8622_s7, %s8622_s7 }
  0xb2   : > { %p8625_p3 = pnand %p8623_p2, %p9071_p7  ;;  %p8632_p1 = por %p8631_p0, %p8630_p13 }
  0xb4   : > { %p8626_p12 = pneg %p8625_p3 }
  0xb6   : > { %p8633_p4 = pnand %p8632_p1, %p8626_p12 }
  0xb8   : > { %8636 = shalt.err (!%p8633_p4)
}
  0xb9   : > { %8335 = dma.hbm_to_vmem [thread:$0]  (!%p9059_p5), %s10667_s9, 128, %s848_s23, [#allocation18]  }
  0xba   : > { %s8637_s10 = scalar_lea.hbm %s8889_s25, 256 }
  0xbb   : > { %p8638_p6 = scmp.ne.s32.totalorder %s8889_s25, %s8637_s10  ;;  %p8644_p10 = scmp.lt.u32.totalorder %s8637_s10, %s8889_s25 }
  0xbd   : > { %p8640_p8 = pnand %p8638_p6, %p9071_p7 }
  0xbf   : > { %p8641_p9 = pneg %p8640_p8 }
  0xc1   : > { %p8646_p11 = pnand %p8644_p10, %p8641_p9 }
  0xc3   : > { %8649 = shalt.err (!%p8646_p11)
}
  0xc4   : > { %s8650_s18 = scalar_lea.vmem %s875_s26, 256  ;;  %p8658_p13 = scmp.lt.s32.totalorder %s875_s26, %s875_s26 }
  0xc5   : > { %p8651_p2 = scmp.ne.s32.totalorder %s875_s26, %s8650_s18  ;;  %p8659_p0 = scmp.lt.s32.totalorder %s8650_s18, %s8650_s18 }
  0xc7   : > { %p8653_p3 = pnand %p8651_p2, %p9071_p7  ;;  %p8660_p1 = por %p8659_p0, %p8658_p13 }
  0xc9   : > { %p8654_p12 = pneg %p8653_p3 }
  0xcb   : > { %p8661_p4 = pnand %p8660_p1, %p8654_p12 }
  0xcd   : > { %8664 = shalt.err (!%p8661_p4)
}
  0xce   : > { %s8819_s2 = smov 128   ;;  %s8820_s23 = smov 8  }
  0xcf   : > { %8341 = dma.hbm_to_vmem [thread:$0]  (!%p9059_p5), %s8889_s25, 256, %s875_s26, [#allocation20], %s8819_s2, %s8819_s2, %s8820_s23  }
  0xd0   : > { %s8821_s1 = smov [#allocation24]   ;;  %s8822_s10 = smov [#allocation27]  }
  0xd1   : > { %s939_s7 = sshll.u32 %s8821_s1, 4  ;;  %s979_s11 = sshll.u32 %s8822_s10, 4  ;;  %s940_s7 = int_to_ptr.vmem [resolvable:$true] %s939_s7  ;;  %s980_s11 = int_to_ptr.vmem [resolvable:$true] %s979_s11 }
  0xd2   : > { %s8665_s3 = scalar_lea.hbm %s8964_s27, 512 }
  0xd3   : > { %p8666_p6 = scmp.ne.s32.totalorder %s8964_s27, %s8665_s3  ;;  %p8672_p10 = scmp.lt.u32.totalorder %s8665_s3, %s8964_s27 }
  0xd5   : > { %p8668_p8 = pnand %p8666_p6, %p9071_p7 }
  0xd7   : > { %p8669_p9 = pneg %p8668_p8 }
  0xd9   : > { %p8674_p11 = pnand %p8672_p10, %p8669_p9 }
  0xdb   : > { %8677 = shalt.err (!%p8674_p11)
}
  0xdc   : > { %s8678_s18 = scalar_lea.vmem %s940_s7, 512  ;;  %p8686_p13 = scmp.lt.s32.totalorder %s940_s7, %s940_s7 }
  0xdd   : > { %p8679_p2 = scmp.ne.s32.totalorder %s940_s7, %s8678_s18  ;;  %p8687_p0 = scmp.lt.s32.totalorder %s8678_s18, %s8678_s18 }
  0xdf   : > { %p8681_p3 = pnand %p8679_p2, %p9071_p7  ;;  %p8688_p1 = por %p8687_p0, %p8686_p13 }
  0xe1   : > { %p8682_p12 = pneg %p8681_p3 }
  0xe3   : > { %p8689_p4 = pnand %p8688_p1, %p8682_p12 }
  0xe5   : > { %8692 = shalt.err (!%p8689_p4)
}
  0xe6   : > { %s10675_s26 = smov 16   ;;  %s10676_s2 = smov 256  }
  0xe7   : > { %8347 = dma.hbm_to_vmem [thread:$0]  (!%p9059_p5), %s8964_s27, 512, %s940_s7, [#allocation23], %s10676_s2, %s10676_s2, %s10675_s26  }
  0xe8   : > { %s8693_s3 = scalar_lea.hbm %s8999_s20, 128 }
  0xe9   : > { %p8694_p6 = scmp.ne.s32.totalorder %s8999_s20, %s8693_s3  ;;  %p8700_p10 = scmp.lt.u32.totalorder %s8693_s3, %s8999_s20 }
  0xeb   : > { %p8696_p8 = pnand %p8694_p6, %p9071_p7 }
  0xed   : > { %p8697_p9 = pneg %p8696_p8 }
  0xef   : > { %p8702_p11 = pnand %p8700_p10, %p8697_p9 }
  0xf1   : > { %8705 = shalt.err (!%p8702_p11)
}
  0xf2   : > { %s8706_s23 = scalar_lea.vmem %s980_s11, 128  ;;  %p8714_p13 = scmp.lt.s32.totalorder %s980_s11, %s980_s11 }
  0xf3   : > { %p8707_p2 = scmp.ne.s32.totalorder %s980_s11, %s8706_s23  ;;  %p8715_p0 = scmp.lt.s32.totalorder %s8706_s23, %s8706_s23 }
  0xf5   : > { %p8709_p3 = pnand %p8707_p2, %p9071_p7  ;;  %p8716_p1 = por %p8715_p0, %p8714_p13 }
  0xf7   : > { %p8710_p12 = pneg %p8709_p3 }
  0xf9   : > { %p8717_p4 = pnand %p8716_p1, %p8710_p12 }
  0xfb   : > { %8720 = shalt.err (!%p8717_p4)
}
  0xfc   : > { %8353 = dma.hbm_to_vmem [thread:$0]  (!%p9059_p5), %s8999_s20, 128, %s980_s11, [#allocation26]  }
  0xfd   : > { %s8823_s1 = smov [#allocation30]   ;;  %s8721_s10 = scalar_lea.hbm %s9029_s12, 16 }
  0xfe   : > { %s1013_s7 = sshll.u32 %s8823_s1, 4  ;;  %p8722_p6 = scmp.ne.s32.totalorder %s9029_s12, %s8721_s10  ;;  %s1014_s7 = int_to_ptr.vmem [resolvable:$true] %s1013_s7 }
  0xff   : > { %p8728_p10 = scmp.lt.u32.totalorder %s8721_s10, %s9029_s12 }
 0x100   : > { %p8724_p8 = pnand %p8722_p6, %p9071_p7 }
 0x102   : > { %p8725_p9 = pneg %p8724_p8 }
 0x104   : > { %p8730_p11 = pnand %p8728_p10, %p8725_p9 }
 0x106   : > { %8733 = shalt.err (!%p8730_p11)
}
 0x107   : > { %s8734_s18 = scalar_lea.vmem %s1014_s7, 16  ;;  %s8741_s26 = scalar_lea.vmem %s1014_s7, 32 }
 0x108   : > { %p8735_p2 = scmp.ne.s32.totalorder %s1014_s7, %s8734_s18  ;;  %p8742_p13 = scmp.lt.s32.totalorder %s1014_s7, %s1014_s7 }
 0x109   : > { %p8743_p0 = scmp.lt.s32.totalorder %s8741_s26, %s8734_s18 }
 0x10a   : > { %p8737_p3 = pnand %p8735_p2, %p9071_p7 }
 0x10b   : > { %p8744_p1 = por %p8743_p0, %p8742_p13 }
 0x10c   : > { %p8738_p12 = pneg %p8737_p3 }
 0x10e   : > { %p8745_p4 = pnand %p8744_p1, %p8738_p12 }
 0x110   : > { %8748 = shalt.err (!%p8745_p4)
}
 0x111   : > { %8359 = dma.hbm_to_vmem [thread:$0]  (!%p9059_p5), %s9029_s12, 16, %s1014_s7, [#allocation29]  }
 0x112   : > { %p10677_p6 = scmp.ne.s32.totalorder %s10672_s0, 0 }
 0x113   : > { %p10678_p8 = scmp.eq.s32.totalorder (!%p10677_p6), %s9042_s22, 0 }
 0x114   : > { %1033 = sbr.rel (%p10677_p6) target bundleno = 8702 (0x21fe), region = 156 }
 0x11b   : > { %8754 = dma.done.wait (%p10678_p8), [#allocation18], 128   ;;  %p10679_p9 = pmov %p10678_p8 }
 0x11c   : > { %p10680_p7 = pmov %p10678_p8 }
 0x11d   : > { %8756 = vsyncadd (%p10679_p9), [#allocation18], 4294967168 }
 0x11e   : > { %8758 = dma.done.wait (%p10680_p7), [#allocation20], 384   ;;  %p10681_p10 = pmov %p10680_p7 }
 0x11f   : > { %p10682_p11 = pmov %p10680_p7 }
 0x120   : > { %8760 = vsyncadd (%p10681_p10), [#allocation20], 4294966912 }
 0x121   : > { %8762 = dma.done.wait (%p10682_p11), [#allocation23], 1024   ;;  %p10683_p5 = pmov %p10680_p7 }
 0x123   : > { %8764 = vsyncadd (%p10683_p5), [#allocation23], 4294966272  ;;  %p10684_p2 = pmov %p10683_p5 }
 0x125   : > { %8766 = dma.done.wait (%p10684_p2), [#allocation26], 384   ;;  %p10685_p3 = pmov %p10684_p2 }
 0x126   : > { %p10686_p12 = pmov %p10684_p2 }
 0x127   : > { %8768 = vsyncadd (%p10685_p3), [#allocation26], 4294966912 }
 0x128   : > { %8770 = dma.done.wait (%p10686_p12), [#allocation29], 48   ;;  %p10687_p13 = pmov %p10684_p2 }
 0x129   : > { %s10688_s5 = sld [smem:[#allocation36_spill]]  ;;  %p1150_p0 = scmp.lt.s32.totalorder %s9042_s22, 1  ;;  %v8828_v6 = vmov 0.0|0.0   ;;  %v8834_v10 = vmov 0.0   ;;  %vm8835_vm0 = vmmov 0   ;;  %v1268_v11 = vld [vmem:[%s8874_s13] sm:$0xff]  ;;  %v1167_v13 = vlaneseq }
 0x12a   : > { %8772 = vsyncadd (%p10687_p13), [#allocation29], 4294967248  ;;  %s10624_s16 = smov 109   ;;  %s10626_s11 = smov 111   ;;  %7750 = vmatprep.subr.bf16.mxu1 %v8828_v6  ;;  %1352 = vmatprep.mubr.f32.mxu0 %v8834_v10  ;;  %v8836_v12 = vmov 0   ;;  %vm1189_vm1 = vcmask 891904  }
 0x12b   : > { %s10771_s22 = smov (!%p1150_p0, %s9042_s22), 1  ;;  %s10594_s2 = smov 93   ;;  %7456 = vmatprep.mubr.msk.f32.mxu1 %vm8835_vm0, %v8834_v10  ;;  %8465 = vset.pattern.permute.xlu1 %v8836_v12  ;;  %vm10581_vm2 = vcmask 908288   ;;  %vm9228_vm3 = vcmp.lt.s32.totalorder %v1167_v13, 288  ;;  %vm1200_vm4 = vcmask 760832   ;;  %vm1178_vm5 = vcmask 900096  }
 0x12c   : > { %s8294_s0 = smul.u32 3, %s10771_s22  ;;  %s10598_s3 = smov 110   ;;  %8466 = vset.pattern.permute.xlu0 %v8836_v12  ;;  %vm10604_vm6 = vcmask 744448   ;;  %vm10605_vm7 = vcmask 752640   ;;  %vm10583_vm8 = vcmask 605184   ;;  %vm10603_vm9 = vcmask 613376  }
 0x12d   : > { %s10590_s23 = smov 91   ;;  %s10592_s1 = smov 92   ;;  %vm10582_vm10 = vcmask 596992   ;;  %vm1278_vm11 = vcmask 1040384   ;;  %vm8837_vm12 = vmmov 1   ;;  %v1267_v51 = vld [vmem:[#allocation17] sm:$0xff] }
 0x12e   : > { %s10586_s7 = smov 74   ;;  %s10588_s10 = smov 75   ;;  %vm7745_vm13 = vmpackc.low %vm1278_vm11, %vm8837_vm12  ;;  %vm1274_vm14 = vcmask 72704   ;;  %v9264_v52 = vshrl.u32 %v1167_v13, 7  ;;  %vm1452_vm15 = vcmask 293888   ;;  %vm1473_vm11 = vcmask 851488  }
 0x12f   : > { %s1153_s28 = scalar_lea.vmem %s10688_s5, %s8294_s0  ;;  %s10584_s18 = smov 73   ;;  %1453 = vst.msk [vmem:[#allocation2] sm:$0xff] %vm1452_vm15, %v8834_v10  ;;  %1858 = vst.msk [vmem:[#allocation5] sm:$0xff] %vm1452_vm15, %v8834_v10  ;;  %v1432_v55 = vld [vmem:[%s9019_s14] sm:$0x7]  ;;  %vm1468_vm12 = vcmask 1047840  }
 0x130   : > { %v1184_v0 = vld [vmem:[%s1153_s28] sm:$0x7]  ;;  %5596 = vst.msk [vmem:[#allocation11] sm:$0xff] %vm1452_vm15, %v8834_v10  ;;  %6204 = vst.msk [vmem:[#allocation13] sm:$0xff] %vm1452_vm15, %v8834_v10  ;;  %v9277_v53 = vsub.s32 2, %v9264_v52  ;;  %v9281_v56 = vsub.s32 1, %v9264_v52 }
 0x131   : > { %v1159_v1 = vld [vmem:[%s1153_s28] sm:$0x7]  ;;  %1186 = vrot.lane.b32.xlu1 %v1184_v0, %s10624_s16  ;;  %6604 = vst.msk [vmem:[#allocation15] sm:$0xff] %vm1452_vm15, %v8834_v10  ;;  %v9285_v62 = vsub.s32 0, %v9264_v52  ;;  %s10596_s26 = smov 36   ;;  %s8839_s0 = smov 127  }
 0x132   : > { %1161 = vrot.lane.b32.xlu0 %v1159_v1, %s10626_s11  ;;  %v1195_v2 = vld [vmem:[%s1153_s28] sm:$0x7]  ;;  %v1445_v60 = vrot.slane %v1432_v55, %v9277_v53  ;;  %s10709_s4 = smov 107   ;;  %s10710_s5 = smov 118  }
 0x133   : > { %v1173_v3 = vld [vmem:[%s1153_s28] sm:$0x7]  ;;  %s10714_s9 = sld [smem:[#allocation50_spill]] }
 0x134   : > { %v1217_v4 = vld [vmem:[%s1153_s28] sm:$0x7] }
 0x135   : > { %1197 = vrot.lane.b32.xlu1 %v1195_v2, %s10594_s2  ;;  %v1206_v5 = vld [vmem:[%s1153_s28] sm:$0x7]  ;;  %v1441_v2 = vrot.slane %v1432_v55, %v9281_v56 }
 0x136   : > { %1175 = vrot.lane.b32.xlu0 %v1173_v3, %s10598_s3  ;;  %v1239_v7 = vld [vmem:[%s1153_s28] sm:$0x7] }
 0x137   : > { %v1228_v8 = vld [vmem:[%s1153_s28] sm:$0x7] }
 0x138   : > { %v1250_v9 = vld [vmem:[%s1153_s28] sm:$0x7]  ;;  %s10618_s28 = smov 20  }
 0x139   : > { %1219 = vrot.lane.b32.xlu1 %v1217_v4, %s10590_s23 }
 0x13a   : > { %1208 = vrot.lane.b32.xlu0 %v1206_v5, %s10592_s1 }
 0x13d   : > { %1241 = vrot.lane.b32.xlu1 %v1239_v7, %s10586_s7 }
 0x13e   : > { %1230 = vrot.lane.b32.xlu0 %v1228_v8, %s10588_s10  ;;  %v1437_v8 = vrot.slane %v1432_v55, %v9285_v62 }
 0x141   : > { %1271 = vperm.xlu1 %8465, %v1268_v11  }
 0x142   : > { %1252 = vrot.lane.b32.xlu0 %v1250_v9, %s10584_s18 }
 0x1a3   : > { %v1187_v14 = vpop.permute.xlu1 %1186 }
 0x1a4   : > { %v1162_v15 = vpop.permute.xlu0 %1161  ;;  %v1188_v17 = vrot.slane %v1187_v14, 1 }
 0x1a5   : > { %v1163_v18 = vrot.slane %v1162_v15, 1 }
 0x1a6   : > { %v1190_v19 = vsel %vm1189_vm1, %v1187_v14, %v1188_v17 }
 0x1a7   : > { %v1165_v20 = vsel %vm10581_vm2, %v1162_v15, %v1163_v18  ;;  %1193 = vst.msk [vmem:[#allocation16 + $0x2] ss:$8 sm:$0x7] %vm9228_vm3, %v1190_v19  ;;  %v1198_v21 = vpop.permute.xlu1 %1197  ;;  %v1684_v19 = vld [vmem:[%s8884_s21] sm:$0xff] }
 0x1a8   : > { %1171 = vst.msk [vmem:[#allocation16] ss:$8 sm:$0x7] %vm9228_vm3, %v1165_v20  ;;  %v1176_v22 = vpop.permute.xlu0 %1175  ;;  %v1199_v23 = vrot.slane %v1198_v21, 1 }
 0x1a9   : > { %v1177_v24 = vrot.slane %v1176_v22, 1 }
 0x1aa   : > { %v1201_v25 = vsel %vm1200_vm4, %v1198_v21, %v1199_v23 }
 0x1ab   : > { %v1179_v26 = vsel %vm1178_vm5, %v1176_v22, %v1177_v24  ;;  %1204 = vst.msk [vmem:[#allocation16 + $0x3] ss:$8 sm:$0x7] %vm9228_vm3, %v1201_v25  ;;  %v1220_v27 = vpop.permute.xlu1 %1219 }
 0x1ac   : > { %1182 = vst.msk [vmem:[#allocation16 + $0x1] ss:$8 sm:$0x7] %vm9228_vm3, %v1179_v26  ;;  %v1209_v28 = vpop.permute.xlu0 %1208  ;;  %v1221_v29 = vrot.slane %v1220_v27, 1 }
 0x1ad   : > { %v1210_v30 = vrot.slane %v1209_v28, 1 }
 0x1ae   : > { %v1223_v31 = vsel %vm10604_vm6, %v1220_v27, %v1221_v29 }
 0x1af   : > { %v1212_v32 = vsel %vm10605_vm7, %v1209_v28, %v1210_v30  ;;  %1226 = vst.msk [vmem:[#allocation16 + $0x5] ss:$8 sm:$0x7] %vm9228_vm3, %v1223_v31  ;;  %v1242_v33 = vpop.permute.xlu1 %1241 }
 0x1b0   : > { %1215 = vst.msk [vmem:[#allocation16 + $0x4] ss:$8 sm:$0x7] %vm9228_vm3, %v1212_v32  ;;  %v1231_v34 = vpop.permute.xlu0 %1230  ;;  %v1243_v35 = vrot.slane %v1242_v33, 1 }
 0x1b1   : > { %v1232_v36 = vrot.slane %v1231_v34, 1 }
 0x1b2   : > { %v1245_v37 = vsel %vm10583_vm8, %v1242_v33, %v1243_v35 }
 0x1b3   : > { %v1234_v38 = vsel %vm10603_vm9, %v1231_v34, %v1232_v36  ;;  %1248 = vst.msk [vmem:[#allocation16 + $0x7] ss:$8 sm:$0x7] %vm9228_vm3, %v1245_v37 }
 0x1b4   : > { %1237 = vst.msk [vmem:[#allocation16 + $0x6] ss:$8 sm:$0x7] %vm9228_vm3, %v1234_v38  ;;  %v1253_v39 = vpop.permute.xlu0 %1252 }
 0x1b5   : > { %v1254_v40 = vrot.slane %v1253_v39, 1 }
 0x1b7   : > { %v1256_v41 = vsel %vm10582_vm10, %v1253_v39, %v1254_v40 }
 0x1b8   : > { %1259 = vst.msk [vmem:[#allocation16 + $0x18] ss:$8 sm:$0x7] %vm9228_vm3, %v1256_v41  ;;  %vm1471_vm3 = vcmask 556032  }
 0x1bb   : > { %v1262_v42 = vld [vmem:[#allocation16 + $0x8] sm:$0xff]  ;;  %v1263_v43 = vld [vmem:[#allocation16 + $0x10] sm:$0xff]  ;;  %v1261_v44 = vld [vmem:[#allocation16] sm:$0xff] }
 0x1bf   : > { %v1265_v45 = vld [vmem:[#allocation16 + $0x20] sm:$0x1]  ;;  %v1266_v46 = vld [vmem:[#allocation16 + $0x28] sm:$0x1]  ;;  %v1264_v47 = vld [vmem:[#allocation16 + $0x18] sm:$0x1] }
 0x1c0   : > { %v7744_v48 = vpack.c.bf16 %v1265_v45, %v1262_v42  ;;  %v7751_v49 = vpack.c.bf16 %v1266_v46, %v1263_v43  ;;  %v7747_v50 = vpack.c.bf16 %v1264_v47, %v1261_v44  ;;  %v1272_v54 = vpop.permute.xlu1 %1271 }
 0x1c2   : > { %7746 = vmatprep.subr.msk.bf16.mxu0 %vm7745_vm13, %v7744_v48  ;;  %7753 = vmatpush3.bf16.msk.msra.mxu1 %vm7745_vm13, %v7751_v49 }
 0x1c3   : > { %7749 = vmatpush1.bf16.msk.msra.mxu0 %vm7745_vm13, %v7747_v50  ;;  %7770 = vmatprep.subr.bf16.mxu1 %v8828_v6  ;;  %vm1494_vm13 = vcmask 261120  }
 0x1c5   : > { %7457 = vmatmul.mubr.msk.f32.vlgmr.msra.gmra.mrb[0].mxu1 %vm1274_vm14, %v1267_v51 }
 0x1c6   : > { %7021 = vmatmul.mubr.msk.f32.vlgmr.msra.gmra.mrb[0].mxu0 %vm1274_vm14, %v1267_v51  ;;  %7477 = vmatprep.mubr.msk.f32.mxu1 %vm8835_vm0, %v8834_v10  ;;  %vm10600_vm14 = vcmask 588800  }
 0x1c7   : > { %1758 = vmatprep.mubr.f32.mxu0 %v8834_v10 }
 0x298   : > { %v1425_v57 = vpop.f32.mrb[0].mxu1 }
 0x299   : > { %v1354_v58 = vpop.f32.mrb[0].mxu0  ;;  %v1426_v59 = vadd.f32 %v1425_v57, %v1272_v54  ;;  %v7458_v61 = vpop.f32.mrb[1].mxu1 }
 0x29a   : > { %v1356_v63 = vpop.f32.mrb[1].mxu0  ;;  %v1355_v0 = vadd.f32 %v1354_v58, %v1272_v54 }
 0x29b   : > { %v1357_v1 = vadd.f32 %v1356_v63, %v1272_v54  ;;  %v1431_v3 = vmax.f32 %v1426_v59, 0.0 }
 0x29c   : > { %v1429_v7 = vmax.f32 %v1355_v0, 0.0 }
 0x29d   : > { %v1430_v4 = vmax.f32 %v1357_v1, 0.0  ;;  %v1451_v5 = vmul.f32 %v1445_v60, %v1431_v3 }
 0x29e   : > { %v1449_v11 = vmul.f32 %v1437_v8, %v1429_v7 }
 0x29f   : > { %v1450_v9 = vmul.f32 %v1441_v2, %v1430_v4  ;;  %1461 = vrot.lane.b32.xlu1 %v1451_v5, %s10596_s26 }
 0x2a1   : > { %1459 = vrot.lane.b32.xlu0 %v1450_v9, %s10596_s26 }
 0x2a5   : > { %1457 = vrot.lane.b32.xlu0 %v1449_v11, %s10596_s26 }
 0x311   : > { %v1462_v12 = vpop.permute.xlu1 %1461 }
 0x313   : > { %v1460_v13 = vpop.permute.xlu0 %1459 }
 0x314   : > { %v1464_v14 = vsel %vm1452_vm15, %v1460_v13, %v1462_v12 }
 0x315   : > { %1472 = vst.msk [vmem:[#allocation2 + $0x10] sm:$0xff] %vm1471_vm3, %v1464_v14 }
 0x316   : > { %1474 = vst.msk [vmem:[#allocation2 + $0x10] sm:$0xff] %vm1473_vm11, %v8834_v10 }
 0x317   : > { %v1458_v15 = vpop.permute.xlu0 %1457 }
 0x318   : > { %v1463_v16 = vsel %vm1452_vm15, %v1458_v15, %v1460_v13  ;;  %1469 = vst.msk [vmem:[#allocation2] sm:$0xff] %vm1468_vm12, %v1458_v15 }
 0x31d   : > { %v1477_v18 = vld [vmem:[#allocation2 + $0x10] sm:$0xff] }
 0x31f   : > { %v1496_v17 = vld [vmem:[#allocation2] sm:$0xff] }
 0x320   : > { %1502 = vrot.lane.b32.xlu0 %v1496_v17, %s10598_s3  ;;  %1481 = vrot.lane.b32.xlu1 %v1496_v17, %s10626_s11 }
 0x324   : > { %1542 = vrot.lane.b32.xlu0 %v1496_v17, %s10594_s2  ;;  %1522 = vrot.lane.b32.xlu1 %v1496_v17, %s10624_s16 }
 0x328   : > { %1582 = vrot.lane.b32.xlu0 %v1496_v17, %s10590_s23  ;;  %1562 = vrot.lane.b32.xlu1 %v1496_v17, %s10592_s1 }
 0x32c   : > { %1485 = vrot.lane.b32.xlu0 %v1477_v18, %s10626_s11  ;;  %1602 = vrot.lane.b32.xlu1 %v1496_v17, %s10588_s10 }
 0x330   : > { %1506 = vrot.lane.b32.xlu0 %v1477_v18, %s10598_s3  ;;  %1483 = vrot.lane.b32.xlu1 %v1463_v16, %s10626_s11 }
 0x334   : > { %1526 = vrot.lane.b32.xlu0 %v1477_v18, %s10624_s16  ;;  %1504 = vrot.lane.b32.xlu1 %v1463_v16, %s10598_s3 }
 0x338   : > { %1546 = vrot.lane.b32.xlu0 %v1477_v18, %s10594_s2  ;;  %1524 = vrot.lane.b32.xlu1 %v1463_v16, %s10624_s16 }
 0x33c   : > { %1566 = vrot.lane.b32.xlu0 %v1477_v18, %s10592_s1  ;;  %1544 = vrot.lane.b32.xlu1 %v1463_v16, %s10594_s2  ;;  %s10606_s2 = smov 98  }
 0x340   : > { %1586 = vrot.lane.b32.xlu0 %v1477_v18, %s10590_s23  ;;  %1564 = vrot.lane.b32.xlu1 %v1463_v16, %s10592_s1 }
 0x344   : > { %1606 = vrot.lane.b32.xlu0 %v1477_v18, %s10588_s10  ;;  %1584 = vrot.lane.b32.xlu1 %v1463_v16, %s10590_s23  ;;  %s10612_s23 = smov 107  }
 0x348   : > { %1626 = vrot.lane.b32.xlu0 %v1477_v18, %s10586_s7  ;;  %1604 = vrot.lane.b32.xlu1 %v1463_v16, %s10588_s10  ;;  %s10628_s10 = smov 117  }
 0x34c   : > { %1622 = vrot.lane.b32.xlu0 %v1496_v17, %s10586_s7  ;;  %1624 = vrot.lane.b32.xlu1 %v1463_v16, %s10586_s7  ;;  %s10614_s7 = smov 119  }
 0x350   : > { %1646 = vrot.lane.b32.xlu0 %v1477_v18, %s10584_s18  ;;  %1644 = vrot.lane.b32.xlu1 %v1463_v16, %s10584_s18 }
 0x354   : > { %1642 = vrot.lane.b32.xlu1 %v1496_v17, %s10584_s18  ;;  %1687 = vperm.xlu0 %8466, %v1684_v19   ;;  %s10610_s18 = smov 118  }
 0x392   : > { %v1503_v20 = vpop.permute.xlu0 %1502  ;;  %v1482_v21 = vpop.permute.xlu1 %1481 }
 0x396   : > { %v1543_v22 = vpop.permute.xlu0 %1542  ;;  %v1523_v23 = vpop.permute.xlu1 %1522 }
 0x39a   : > { %v1583_v24 = vpop.permute.xlu0 %1582  ;;  %v1563_v25 = vpop.permute.xlu1 %1562 }
 0x39e   : > { %v1486_v26 = vpop.permute.xlu0 %1485  ;;  %v9326_v27 = vpop.permute.xlu1 %1602 }
 0x39f   : > { %1495 = vst.msk [vmem:[#allocation16 + $0x10] sm:$0xff] %vm1494_vm13, %v1486_v26 }
 0x3a2   : > { %v1507_v28 = vpop.permute.xlu0 %1506  ;;  %v1484_v29 = vpop.permute.xlu1 %1483 }
 0x3a3   : > { %1515 = vst.msk [vmem:[#allocation16 + $0x28] sm:$0xff] %vm1494_vm13, %v1507_v28  ;;  %v1487_v30 = vsel %vm10581_vm2, %v1482_v21, %v1484_v29  ;;  %v1488_v33 = vsel %vm10581_vm2, %v1484_v29, %v1486_v26  ;;  %v1683_v26 = vld [vmem:[#allocation19] sm:$0xff]  ;;  %vm1889_vm2 = vcmask 1039360  }
 0x3a4   : > { %1492 = vst [vmem:[#allocation16] sm:$0xff] %v1487_v30 }
 0x3a6   : > { %v1527_v31 = vpop.permute.xlu0 %1526  ;;  %v1505_v32 = vpop.permute.xlu1 %1504  ;;  %v1658_v40 = vld [vmem:[#allocation16 + $0x10] sm:$0xff] }
 0x3a7   : > { %1535 = vst.msk [vmem:[#allocation16 + $0x40] sm:$0xff] %vm1494_vm13, %v1527_v31  ;;  %v1508_v34 = vsel %vm1178_vm5, %v1503_v20, %v1505_v32  ;;  %v1509_v35 = vsel %vm1178_vm5, %v1505_v32, %v1507_v28 }
 0x3a8   : > { %1513 = vst [vmem:[#allocation16 + $0x18] sm:$0xff] %v1508_v34  ;;  %v7754_v36 = vpack.c.bf16 %v1509_v35, %v1488_v33  ;;  %v7756_v37 = vpack.c.bf16 %v1508_v34, %v1487_v30  ;;  %v1838_v30 = vld [vmem:[%s9019_s14] sm:$0x7] }
 0x3a9   : > { %v1843_v33 = vrot.slane %v1838_v30, %v9285_v62 }
 0x3aa   : > { %v1547_v38 = vpop.permute.xlu0 %1546  ;;  %v1525_v39 = vpop.permute.xlu1 %1524  ;;  %v1661_v41 = vld [vmem:[#allocation16 + $0x28] sm:$0xff]  ;;  %7755 = vmatprep.subr.bf16.mxu0 %v7754_v36  ;;  %v1847_v36 = vrot.slane %v1838_v30, %v9281_v56 }
 0x3ab   : > { %1555 = vst.msk [vmem:[#allocation16 + $0x58] sm:$0xff] %vm1494_vm13, %v1547_v38  ;;  %v1528_v42 = vsel %vm1189_vm1, %v1523_v23, %v1525_v39  ;;  %v7771_v43 = vpack.c.bf16 %v1661_v41, %v1658_v40  ;;  %7757 = vmatpush1.bf16.msra.mxu0 %v7756_v37  ;;  %v1529_v46 = vsel %vm1189_vm1, %v1525_v39, %v1527_v31 }
 0x3ac   : > { %1533 = vst [vmem:[#allocation16 + $0x30] sm:$0xff] %v1528_v42 }
 0x3ad   : > { %7772 = vmatpush3.bf16.msra.mxu1 %v7771_v43 }
 0x3ae   : > { %v1567_v44 = vpop.permute.xlu0 %1566  ;;  %v1545_v45 = vpop.permute.xlu1 %1544  ;;  %7773 = vmatprep.subr.bf16.mxu1 %v8828_v6  ;;  %v1664_v55 = vld [vmem:[#allocation16 + $0x40] sm:$0xff] }
 0x3af   : > { %1575 = vst.msk [vmem:[#allocation16 + $0x70] sm:$0xff] %vm1494_vm13, %v1567_v44  ;;  %v1548_v47 = vsel %vm1200_vm4, %v1543_v22, %v1545_v45  ;;  %v1549_v48 = vsel %vm1200_vm4, %v1545_v45, %v1547_v38  ;;  %v1851_v45 = vrot.slane %v1838_v30, %v9277_v53  ;;  %v1939_v30 = vld [vmem:[%s10669_s6 + $0xc0] sm:$0xff] }
 0x3b0   : > { %1553 = vst [vmem:[#allocation16 + $0x48] sm:$0xff] %v1548_v47  ;;  %v7758_v49 = vpack.c.bf16 %v1549_v48, %v1529_v46  ;;  %v7760_v50 = vpack.c.bf16 %v1548_v47, %v1528_v42 }
 0x3b2   : > { %v1587_v51 = vpop.permute.xlu0 %1586  ;;  %v1565_v54 = vpop.permute.xlu1 %1564  ;;  %v1667_v57 = vld [vmem:[#allocation16 + $0x58] sm:$0xff]  ;;  %7759 = vmatprep.subr.bf16.mxu0 %v7758_v49 }
 0x3b3   : > { %1595 = vst.msk [vmem:[#allocation16 + $0x88] sm:$0xff] %vm1494_vm13, %v1587_v51  ;;  %v1568_v58 = vsel %vm10605_vm7, %v1563_v25, %v1565_v54  ;;  %v7774_v59 = vpack.c.bf16 %v1667_v57, %v1664_v55  ;;  %7761 = vmatpush1.bf16.msra.mxu0 %v7760_v50  ;;  %v1569_v63 = vsel %vm10605_vm7, %v1565_v54, %v1567_v44 }
 0x3b4   : > { %1573 = vst [vmem:[#allocation16 + $0x60] sm:$0xff] %v1568_v58 }
 0x3b5   : > { %7775 = vmatpush3.bf16.msra.mxu1 %v7774_v59 }
 0x3b6   : > { %v1607_v60 = vpop.permute.xlu0 %1606  ;;  %v1585_v61 = vpop.permute.xlu1 %1584  ;;  %7776 = vmatprep.subr.bf16.mxu1 %v8828_v6  ;;  %v1670_v7 = vld [vmem:[#allocation16 + $0x70] sm:$0xff] }
 0x3b7   : > { %1615 = vst.msk [vmem:[#allocation16 + $0xa0] sm:$0xff] %vm1494_vm13, %v1607_v60  ;;  %v1588_v0 = vsel %vm10604_vm6, %v1583_v24, %v1585_v61  ;;  %v1589_v1 = vsel %vm10604_vm6, %v1585_v61, %v1587_v51  ;;  %vm2677_vm6 = vcmask 293984  }
 0x3b8   : > { %1593 = vst [vmem:[#allocation16 + $0x78] sm:$0xff] %v1588_v0  ;;  %v7762_v2 = vpack.c.bf16 %v1589_v1, %v1569_v63  ;;  %v7764_v3 = vpack.c.bf16 %v1588_v0, %v1568_v58  ;;  %v1931_v0 = vld [vmem:[%s10669_s6 + $0x80] sm:$0xff]  ;;  %v1932_v1 = vld [vmem:[%s10669_s6 + $0x88] sm:$0xff] }
 0x3ba   : > { %v1627_v4 = vpop.permute.xlu0 %1626  ;;  %v1605_v5 = vpop.permute.xlu1 %1604  ;;  %v1673_v8 = vld [vmem:[#allocation16 + $0x88] sm:$0xff]  ;;  %7763 = vmatprep.subr.bf16.mxu0 %v7762_v2  ;;  %v1915_v2 = vld [vmem:[%s10669_s6] sm:$0xff] }
 0x3bb   : > { %1635 = vst.msk [vmem:[#allocation16 + $0xb8] sm:$0xff] %vm1494_vm13, %v1627_v4  ;;  %v1608_v9 = vsel %vm10603_vm9, %v9326_v27, %v1605_v5  ;;  %v7777_v11 = vpack.c.bf16 %v1673_v8, %v1670_v7  ;;  %7765 = vmatpush1.bf16.msra.mxu0 %v7764_v3  ;;  %v1609_v14 = vsel %vm10603_vm9, %v1605_v5, %v1607_v60  ;;  %v1916_v7 = vld [vmem:[%s10669_s6 + $0x8] sm:$0xff]  ;;  %v1933_v8 = vld [vmem:[%s10669_s6 + $0x90] sm:$0xff]  ;;  %vm2666_vm9 = vcmask 97280  }
 0x3bc   : > { %1613 = vst [vmem:[#allocation16 + $0x90] sm:$0xff] %v1608_v9  ;;  %v7782_v5 = vpack.c.bf16 %v1932_v1, %v1931_v0  ;;  %2668 = vst.msk [vmem:[#allocation9 + $0x8] sm:$0xff] %vm2666_vm9, %v8834_v10 }
 0x3bd   : > { %7778 = vmatpush3.bf16.msra.mxu1 %v7777_v11  ;;  %2667 = vst.msk [vmem:[#allocation9] sm:$0xff] %vm2666_vm9, %v8834_v10  ;;  %2954 = vst.msk [vmem:[#allocation4] sm:$0xff] %vm2666_vm9, %v8834_v10 }
 0x3be   : > { %v1623_v12 = vpop.permute.xlu0 %1622  ;;  %v1625_v13 = vpop.permute.xlu1 %1624  ;;  %7779 = vmatprep.subr.bf16.mxu1 %v8828_v6  ;;  %v1676_v21 = vld [vmem:[#allocation16 + $0xa0] sm:$0xff]  ;;  %2955 = vst.msk [vmem:[#allocation4 + $0x8] sm:$0xff] %vm2666_vm9, %v8834_v10  ;;  %2956 = vst.msk [vmem:[#allocation4 + $0x10] sm:$0xff] %vm2666_vm9, %v8834_v10 }
 0x3bf   : > { %v1628_v15 = vsel %vm10583_vm8, %v1623_v12, %v1625_v13  ;;  %v1629_v16 = vsel %vm10583_vm8, %v1625_v13, %v1627_v4  ;;  %v7784_v13 = vpack.c.bf16 %v1916_v7, %v1915_v2  ;;  %v1947_v7 = vld [vmem:[%s10669_s6 + $0x100] sm:$0xff]  ;;  %vm2114_vm8 = vcmask 982816   ;;  %2957 = vst.msk [vmem:[#allocation4 + $0x18] sm:$0xff] %vm2666_vm9, %v8834_v10  ;;  %3467 = vst.msk [vmem:[#allocation7] sm:$0xff] %vm2666_vm9, %v8834_v10 }
 0x3c0   : > { %1633 = vst [vmem:[#allocation16 + $0xa8] sm:$0xff] %v1628_v15  ;;  %v7766_v17 = vpack.c.bf16 %v1629_v16, %v1609_v14  ;;  %v7768_v18 = vpack.c.bf16 %v1628_v15, %v1608_v9  ;;  %v1934_v9 = vld [vmem:[%s10669_s6 + $0x98] sm:$0xff]  ;;  %v1917_v15 = vld [vmem:[%s10669_s6 + $0x10] sm:$0xff]  ;;  %3468 = vst.msk [vmem:[#allocation7 + $0x8] sm:$0xff] %vm2666_vm9, %v8834_v10 }
 0x3c1   : > { %v7786_v14 = vpack.c.bf16 %v1934_v9, %v1933_v8  ;;  %v1918_v16 = vld [vmem:[%s10669_s6 + $0x18] sm:$0xff]  ;;  %3469 = vst.msk [vmem:[#allocation7 + $0x10] sm:$0xff] %vm2666_vm9, %v8834_v10  ;;  %3470 = vst.msk [vmem:[#allocation7 + $0x18] sm:$0xff] %vm2666_vm9, %v8834_v10  ;;  %vm2693_vm9 = vcmask 195584  }
 0x3c2   : > { %v1647_v19 = vpop.permute.xlu0 %1646  ;;  %v1645_v20 = vpop.permute.xlu1 %1644  ;;  %v1679_v22 = vld [vmem:[#allocation16 + $0xb8] sm:$0xff]  ;;  %7767 = vmatprep.subr.bf16.mxu0 %v7766_v17  ;;  %v1935_v17 = vld [vmem:[%s10669_s6 + $0xa0] sm:$0xff] }
 0x3c3   : > { %1655 = vst.msk [vmem:[#allocation16 + $0xd0] sm:$0xff] %vm1494_vm13, %v1647_v19  ;;  %v1649_v23 = vsel %vm10582_vm10, %v1645_v20, %v1647_v19  ;;  %v7780_v24 = vpack.c.bf16 %v1679_v22, %v1676_v21  ;;  %7769 = vmatpush1.bf16.msra.mxu0 %v7768_v18  ;;  %v1936_v18 = vld [vmem:[%s10669_s6 + $0xa8] sm:$0xff]  ;;  %v1919_v22 = vld [vmem:[%s10669_s6 + $0x20] sm:$0xff] }
 0x3c4   : > { %1710 = vmatprep.subr.mxu0 %v1649_v23  ;;  %v7790_v21 = vpack.c.bf16 %v1936_v18, %v1935_v17  ;;  %v1920_v23 = vld [vmem:[%s10669_s6 + $0x28] sm:$0xff]  ;;  %v1949_v18 = vld [vmem:[%s10669_s6 + $0x110] sm:$0xff] }
 0x3c5   : > { %7781 = vmatpush3.bf16.msra.mxu1 %v7780_v24  ;;  %v1937_v24 = vld [vmem:[%s10669_s6 + $0xb0] sm:$0xff] }
 0x3c6   : > { %v1643_v25 = vpop.permute.xlu1 %1642  ;;  %7475 = vmatprep.subr.mxu1 %v8834_v10 }
 0x3c7   : > { %v1648_v27 = vsel %vm10582_vm10, %v1643_v25, %v1645_v20  ;;  %v7788_v20 = vpack.c.bf16 %v1918_v16, %v1917_v15  ;;  %v1938_v25 = vld [vmem:[%s10669_s6 + $0xb8] sm:$0xff]  ;;  %vm2112_vm10 = vcmask 818336  }
 0x3c8   : > { %1653 = vst [vmem:[#allocation16 + $0xc0] sm:$0xff] %v1648_v27  ;;  %1711 = vmatpush1.msra.mxu0 %v1648_v27  ;;  %v7794_v27 = vpack.c.bf16 %v1938_v25, %v1937_v24 }
 0x3c9   : > { %7024 = vmatmul.mubr.msk.f32.vlgmr.msra.gmra.mrb[2].mxu0 %vm10600_vm14, %v1683_v26  ;;  %7783 = vmatprep.subr.bf16.mxu0 %v7782_v5 }
 0x3ca   : > { %v1682_v28 = vld [vmem:[#allocation16 + $0xd0] sm:$0xff]  ;;  %7785 = vmatpush3.bf16.msra.mxu0 %v7784_v13 }
 0x3cb   : > { %7476 = vmatpush3.msra.mxu1 %v1682_v28  ;;  %7787 = vmatprep.subr.bf16.mxu0 %v7786_v14  ;;  %v1921_v28 = vld [vmem:[%s10669_s6 + $0x30] sm:$0xff] }
 0x3cc   : > { %7478 = vmatmul.mubr.msk.f32.vlgmr.msra.gmra.mrb[2].mxu1 %vm10600_vm14, %v1683_v26  ;;  %v7792_v26 = vpack.c.bf16 %v1920_v23, %v1919_v22 }
 0x3ce   : > { %7789 = vmatpush3.bf16.msra.mxu0 %v7788_v20 }
 0x3cf   : > { %7791 = vmatprep.subr.bf16.mxu0 %v7790_v21 }
 0x3d2   : > { %7793 = vmatpush3.bf16.msra.mxu0 %v7792_v26 }
 0x3d3   : > { %v1688_v29 = vpop.permute.xlu0 %1687  ;;  %7795 = vmatprep.subr.bf16.mxu0 %v7794_v27  ;;  %v2182_v27 = vld [vmem:[%s8894_s29] sm:$0xff] }
 0x49c   : > { %v1760_v31 = vpop.f32.mrb[2].mxu0 }
 0x49d   : > { %v1761_v32 = vadd.f32 %v1760_v31, %v1688_v29  ;;  %v1762_v34 = vpop.f32.mrb[3].mxu0  ;;  %v1940_v31 = vld [vmem:[%s10669_s6 + $0xc8] sm:$0xff] }
 0x49e   : > { %v1763_v35 = vadd.f32 %v1762_v34, %v1688_v29  ;;  %v1923_v34 = vld [vmem:[%s10669_s6 + $0x40] sm:$0xff] }
 0x49f   : > { %v1835_v37 = vmax.f32 %v1761_v32, 0.0  ;;  %v1831_v38 = vpop.f32.mrb[2].mxu1 }
 0x4a0   : > { %v1836_v39 = vmax.f32 %v1763_v35, 0.0  ;;  %v1832_v40 = vadd.f32 %v1831_v38, %v1688_v29  ;;  %v7479_v41 = vpop.f32.mrb[3].mxu1  ;;  %v1922_v29 = vld [vmem:[%s10669_s6 + $0x38] sm:$0xff]  ;;  %v1924_v35 = vld [vmem:[%s10669_s6 + $0x48] sm:$0xff] }
 0x4a1   : > { %v1855_v42 = vmul.f32 %v1843_v33, %v1835_v37  ;;  %v7796_v32 = vpack.c.bf16 %v1922_v29, %v1921_v28  ;;  %v7798_v33 = vpack.c.bf16 %v1940_v31, %v1939_v30  ;;  %v1942_v37 = vld [vmem:[%s10669_s6 + $0xd8] sm:$0xff]  ;;  %v7800_v38 = vpack.c.bf16 %v1924_v35, %v1923_v34  ;;  %v2180_v28 = vld [vmem:[#allocation21] sm:$0xff]  ;;  %v2183_v29 = vld [vmem:[%s8894_s29 + $0x8] sm:$0xff] }
 0x4a2   : > { %v1856_v43 = vmul.f32 %v1847_v36, %v1836_v39  ;;  %v1837_v44 = vmax.f32 %v1832_v40, 0.0  ;;  %v1941_v36 = vld [vmem:[%s10669_s6 + $0xd0] sm:$0xff]  ;;  %v1926_v41 = vld [vmem:[%s10669_s6 + $0x58] sm:$0xff]  ;;  %7509 = vmatprep.mubr.msk.f32.mxu1 %vm10600_vm14, %v2180_v28 }
 0x4a3   : > { %1862 = vrot.lane.b32.xlu0 %v1855_v42, %s10596_s26  ;;  %7797 = vmatpush3.bf16.msra.mxu0 %v7796_v32  ;;  %v7802_v39 = vpack.c.bf16 %v1942_v37, %v1941_v36  ;;  %v1925_v40 = vld [vmem:[%s10669_s6 + $0x50] sm:$0xff] }
 0x4a4   : > { %1864 = vrot.lane.b32.xlu1 %v1856_v43, %s10596_s26  ;;  %v1857_v46 = vmul.f32 %v1851_v45, %v1837_v44  ;;  %7799 = vmatprep.subr.bf16.mxu0 %v7798_v33  ;;  %v7804_v42 = vpack.c.bf16 %v1926_v41, %v1925_v40  ;;  %v1943_v43 = vld [vmem:[%s10669_s6 + $0xe0] sm:$0xff]  ;;  %v1944_v44 = vld [vmem:[%s10669_s6 + $0xe8] sm:$0xff] }
 0x4a5   : > { %v1927_v45 = vld [vmem:[%s10669_s6 + $0x60] sm:$0xff] }
 0x4a7   : > { %7801 = vmatpush3.bf16.msra.mxu0 %v7800_v38 }
 0x4a8   : > { %1866 = vrot.lane.b32.xlu1 %v1857_v46, %s10596_s26  ;;  %7803 = vmatprep.subr.bf16.mxu0 %v7802_v39  ;;  %v7806_v46 = vpack.c.bf16 %v1944_v44, %v1943_v43  ;;  %s10608_s26 = smov 99  }
 0x4ab   : > { %7805 = vmatpush3.bf16.msra.mxu0 %v7804_v42 }
 0x4ac   : > { %7807 = vmatprep.subr.bf16.mxu0 %v7806_v46 }
 0x515   : > { %v1863_v47 = vpop.permute.xlu0 %1862 }
 0x516   : > { %1873 = vst.msk [vmem:[#allocation5] sm:$0xff] %vm1468_vm12, %v1863_v47  ;;  %v1865_v48 = vpop.permute.xlu1 %1864 }
 0x517   : > { %v1868_v49 = vsel %vm1452_vm15, %v1863_v47, %v1865_v48  ;;  %v1928_v47 = vld [vmem:[%s10669_s6 + $0x68] sm:$0xff] }
 0x518   : > { %1874 = vst [vmem:[#allocation5 + $0x8] sm:$0xff] %v1868_v49 }
 0x51a   : > { %v1867_v50 = vpop.permute.xlu1 %1866 }
 0x51b   : > { %v1869_v51 = vsel %vm1452_vm15, %v1865_v48, %v1867_v50  ;;  %v1945_v48 = vld [vmem:[%s10669_s6 + $0xf0] sm:$0xff]  ;;  %v7808_v50 = vpack.c.bf16 %v1928_v47, %v1927_v45 }
 0x51c   : > { %1875 = vst.msk [vmem:[#allocation5 + $0x10] sm:$0xff] %vm1471_vm3, %v1869_v51 }
 0x51d   : > { %1876 = vst.msk [vmem:[#allocation5 + $0x10] sm:$0xff] %vm1473_vm11, %v8834_v10  ;;  %v1877_v54 = vld [vmem:[#allocation5] sm:$0xff]  ;;  %7809 = vmatpush3.bf16.msra.mxu0 %v7808_v50 }
 0x51e   : > { %v8467_v55 = vpack.i.bf16 %v1877_v54, %v1868_v49 }
 0x520   : > { %8468 = vrot.lane.b32.xlu1 %v8467_v55, %s8839_s0  ;;  %v1930_v55 = vld [vmem:[%s10669_s6 + $0x78] sm:$0xff] }
 0x524   : > { %v1879_v57 = vld [vmem:[#allocation5 + $0x10] sm:$0xff] }
 0x525   : > { %1887 = vrot.lane.b32.xlu0 %v1879_v57, %s8839_s0 }
 0x592   : > { %v8469_v58 = vpop.permute.xlu1 %8468 }
 0x593   : > { %v8471_v59 = vunpack.i.h.bf16 %v8469_v58  ;;  %v8470_v60 = vunpack.i.l.bf16 %v8469_v58 }
 0x595   : > { %v1890_v61 = vsel %vm1889_vm2, %v8471_v59, %v8470_v60 }
 0x596   : > { %v9387_v12 = vmax.f32 %v1877_v54, %v1890_v61  ;;  %v1929_v54 = vld [vmem:[%s10669_s6 + $0x70] sm:$0xff] }
 0x597   : > { %v1888_v63 = vpop.permute.xlu0 %1887 }
 0x598   : > { %v1891_v3 = vsel %vm1889_vm2, %v8470_v60, %v1888_v63  ;;  %v9380_v4 = vmax.f32 %v1879_v57, %v1888_v63  ;;  %v7812_v57 = vpack.c.bf16 %v1930_v55, %v1929_v54  ;;  %vm2106_vm2 = vcmask 162816   ;;  %v2181_v54 = vld [vmem:[#allocation21 + $0x8] sm:$0xff] }
 0x599   : > { %v9385_v11 = vmax.f32 %v1868_v49, %v1891_v3  ;;  %v1946_v49 = vld [vmem:[%s10669_s6 + $0xf8] sm:$0xff]  ;;  %2107 = vst.msk [vmem:[#allocation8] sm:$0xff] %vm2106_vm2, %v8834_v10  ;;  %2286 = vst.msk [vmem:[#allocation3] sm:$0xff] %vm2106_vm2, %v8834_v10 }
 0x59a   : > { %1905 = vrot.lane.b32.xlu0 %v9380_v4, %s10598_s3  ;;  %v7810_v51 = vpack.c.bf16 %v1946_v49, %v1945_v48  ;;  %2287 = vst.msk [vmem:[#allocation3 + $0x8] sm:$0xff] %vm2106_vm2, %v8834_v10  ;;  %2535 = vst.msk [vmem:[#allocation6] sm:$0xff] %vm2106_vm2, %v8834_v10 }
 0x59b   : > { %v8472_v19 = vpack.i.bf16 %v9387_v12, %v9385_v11  ;;  %2536 = vst.msk [vmem:[#allocation6 + $0x8] sm:$0xff] %vm2106_vm2, %v8834_v10  ;;  %4043 = vst.msk [vmem:[#allocation10] sm:$0xff] %vm2106_vm2, %v8834_v10 }
 0x59c   : > { %7811 = vmatprep.subr.bf16.mxu0 %v7810_v51  ;;  %4044 = vst.msk [vmem:[#allocation10 + $0x8] sm:$0xff] %vm2106_vm2, %v8834_v10  ;;  %4494 = vst.msk [vmem:[#allocation12] sm:$0xff] %vm2106_vm2, %v8834_v10 }
 0x59d   : > { %8473 = vrot.lane.b32.xlu1 %v8472_v19, %s10598_s3  ;;  %7813 = vmatpush3.bf16.msra.mxu0 %v7812_v57  ;;  %v1950_v19 = vld [vmem:[%s10669_s6 + $0x118] sm:$0xff]  ;;  %4495 = vst.msk [vmem:[#allocation12 + $0x8] sm:$0xff] %vm2106_vm2, %v8834_v10  ;;  %4742 = vst.msk [vmem:[#allocation14] sm:$0xff] %vm2106_vm2, %v8834_v10  ;;  %s10601_s3 = smov 97  }
 0x59e   : > { %7814 = vmatprep.subr.bf16.mxu0 %v8828_v6  ;;  %4743 = vst.msk [vmem:[#allocation14 + $0x8] sm:$0xff] %vm2106_vm2, %v8834_v10  ;;  %vm2121_vm2 = vcmask 654336  }
 0x60c   : > { %v1906_v58 = vpop.permute.xlu0 %1905 }
 0x60d   : > { %v1914_v59 = vmax.f32 %v9380_v4, %v1906_v58  ;;  %v1948_v4 = vld [vmem:[%s10669_s6 + $0x108] sm:$0xff]  ;;  %s10711_s6 = smov 99  }
 0x60e   : > { %v7815_v15 = vpack.c.bf16 %v1948_v4, %v1947_v7 }
 0x60f   : > { %1958 = vrot.lane.b32.xlu0 %v1914_v59, %s10592_s1  ;;  %v8474_v60 = vpop.permute.xlu1 %8473 }
 0x610   : > { %v8476_v61 = vunpack.i.h.bf16 %v8474_v60  ;;  %v8475_v63 = vunpack.i.l.bf16 %v8474_v60 }
 0x612   : > { %v1907_v0 = vsel %vm1178_vm5, %v8476_v61, %v8475_v63  ;;  %v1908_v1 = vsel %vm1178_vm5, %v8475_v63, %v1906_v58  ;;  %v9477_v61 = vld [vmem:[%s9024_s24] ss:$0 sm:$0xff] }
 0x613   : > { %v1912_v2 = vmax.f32 %v9387_v12, %v1907_v0  ;;  %v1913_v3 = vmax.f32 %v9385_v11, %v1908_v1  ;;  %v7818_v11 = vpack.c.bf16 %v1950_v19, %v1949_v18 }
 0x615   : > { %v8477_v5 = vpack.i.bf16 %v1912_v2, %v1913_v3 }
 0x617   : > { %8478 = vrot.lane.b32.xlu1 %v8477_v5, %s10592_s1  ;;  %s10616_s1 = smov 108  }
 0x681   : > { %v1959_v14 = vpop.permute.xlu0 %1958 }
 0x689   : > { %v8479_v8 = vpop.permute.xlu1 %8478 }
 0x68a   : > { %v8481_v9 = vunpack.i.h.bf16 %v8479_v8  ;;  %v8480_v13 = vunpack.i.l.bf16 %v8479_v8 }
 0x68c   : > { %v1961_v16 = vsel %vm10605_vm7, %v8480_v13, %v1959_v14  ;;  %v1960_v17 = vsel %vm10605_vm7, %v8481_v9, %v8480_v13  ;;  %v2427_v9 = vld [vmem:[#allocation22 + $0x8] sm:$0xff]  ;;  %vm2680_vm7 = vcmask 392480  }
 0x68d   : > { %2030 = vmatprep.mubr.f32.mxu0 %v1961_v16  ;;  %v2431_v13 = vld [vmem:[%s10668_s8 + $0x8] sm:$0xff] }
 0x68e   : > { %2031 = vmatmul.mubr.f32.vlgmr.msra.gmra.mrb[4].mxu0 %v1960_v17 }
 0x68f   : > { %7816 = vmatpush3.bf16.msra.mxu0 %v7815_v15  ;;  %7488 = vmatprep.mubr.msk.f32.mxu0 %vm8835_vm0, %v8834_v10 }
 0x690   : > { %7817 = vmatprep.subr.bf16.mxu0 %v8828_v6 }
 0x693   : > { %7819 = vmatpush3.bf16.msra.mxu0 %v7818_v11 }
 0x696   : > { %7489 = vmatmul.mubr.msk.f32.vlgmr.msra.gmra.mrb[6].mxu0 %vm1494_vm13, %v1959_v14  ;;  %v2430_v14 = vld [vmem:[%s10668_s8] sm:$0xff]  ;;  %s10713_s8 = sld [smem:[#allocation49_spill]] }
 0x761   : > { %v7231_v12 = vpop.f32.mrb[4].mxu0 }
 0x762   : > { %v7232_v20 = vpop.f32.mrb[5].mxu0 }
 0x763   : > { %v7233_v21 = vadd.f32 %v7232_v20, %v7231_v12 }
 0x769   : > { %v2102_v22 = vpop.f32.mrb[6].mxu0 }
 0x76a   : > { %v2103_v23 = vadd.f32 %v7233_v21, %v2102_v22  ;;  %v7490_v24 = vpop.f32.mrb[7].mxu0 }
 0x76c   : > { %2109 = vrot.lane.b32.xlu1 %v2103_v23, %s10618_s28 }
 0x7de   : > { %v2110_v25 = vpop.permute.xlu1 %2109 }
 0x7df   : > { %2113 = vst.msk [vmem:[#allocation8] sm:$0xff] %vm2112_vm10, %v2110_v25 }
 0x7e0   : > { %2115 = vst.msk [vmem:[#allocation8] sm:$0xff] %vm2114_vm8, %v8834_v10 }
 0x7e7   : > { %v2123_v26 = vld [vmem:[#allocation8] sm:$0xff] }
 0x7e8   : > { %2125 = vrot.lane.b32.xlu1 %v2123_v26, %s10610_s18  ;;  %2118 = vrot.lane.b32.xlu0 %v2123_v26, %s10614_s7 }
 0x7ec   : > { %2137 = vrot.lane.b32.xlu1 %v2123_v26, %s10624_s16  ;;  %2131 = vrot.lane.b32.xlu0 %v2123_v26, %s10628_s10 }
 0x7f0   : > { %2149 = vrot.lane.b32.xlu1 %v2123_v26, %s10612_s23  ;;  %2143 = vrot.lane.b32.xlu0 %v2123_v26, %s10616_s1 }
 0x7f4   : > { %2161 = vrot.lane.b32.xlu1 %v2123_v26, %s10606_s2  ;;  %2155 = vrot.lane.b32.xlu0 %v2123_v26, %s10608_s26 }
 0x7f8   : > { %2186 = vperm.xlu1 %8465, %v2182_v27   ;;  %2167 = vrot.lane.b32.xlu0 %v2123_v26, %s10601_s3 }
 0x7fc   : > { %2191 = vperm.xlu0 %8466, %v2183_v29  }
 0x85a   : > { %v2126_v30 = vpop.permute.xlu1 %2125  ;;  %v2119_v31 = vpop.permute.xlu0 %2118 }
 0x85b   : > { %2128 = vst.msk [vmem:[#allocation16 + $0x18] sm:$0xff] %vm2121_vm2, %v2126_v30  ;;  %2122 = vst.msk [vmem:[#allocation16] sm:$0xff] %vm2121_vm2, %v2119_v31 }
 0x85e   : > { %v2138_v32 = vpop.permute.xlu1 %2137  ;;  %v2132_v33 = vpop.permute.xlu0 %2131 }
 0x85f   : > { %2140 = vst.msk [vmem:[#allocation16 + $0x48] sm:$0xff] %vm2121_vm2, %v2138_v32  ;;  %2134 = vst.msk [vmem:[#allocation16 + $0x30] sm:$0xff] %vm2121_vm2, %v2132_v33 }
 0x862   : > { %v2150_v34 = vpop.permute.xlu1 %2149  ;;  %v2144_v35 = vpop.permute.xlu0 %2143  ;;  %v2171_v36 = vld [vmem:[#allocation16] sm:$0xff]  ;;  %v2172_v37 = vld [vmem:[#allocation16 + $0x18] sm:$0xff] }
 0x863   : > { %2152 = vst.msk [vmem:[#allocation16 + $0x78] sm:$0xff] %vm2121_vm2, %v2150_v34  ;;  %2146 = vst.msk [vmem:[#allocation16 + $0x60] sm:$0xff] %vm2121_vm2, %v2144_v35  ;;  %v7820_v38 = vpack.c.bf16 %v2172_v37, %v2171_v36 }
 0x865   : > { %7821 = vmatprep.subr.bf16.mxu1 %v7820_v38 }
 0x866   : > { %v2162_v39 = vpop.permute.xlu1 %2161  ;;  %7823 = vmatpush3.bf16.msra.mxu1 %v7820_v38  ;;  %v2156_v40 = vpop.permute.xlu0 %2155  ;;  %v2173_v41 = vld [vmem:[#allocation16 + $0x30] sm:$0xff]  ;;  %v2174_v42 = vld [vmem:[#allocation16 + $0x48] sm:$0xff] }
 0x867   : > { %2164 = vst.msk [vmem:[#allocation16 + $0xa8] sm:$0xff] %vm2121_vm2, %v2162_v39  ;;  %2158 = vst.msk [vmem:[#allocation16 + $0x90] sm:$0xff] %vm2121_vm2, %v2156_v40  ;;  %v7824_v43 = vpack.c.bf16 %v2174_v42, %v2173_v41 }
 0x869   : > { %7825 = vmatprep.subr.bf16.mxu1 %v7824_v43 }
 0x86a   : > { %7827 = vmatpush3.bf16.msra.mxu1 %v7824_v43  ;;  %v2168_v44 = vpop.permute.xlu0 %2167  ;;  %v2175_v45 = vld [vmem:[#allocation16 + $0x60] sm:$0xff]  ;;  %v2176_v46 = vld [vmem:[#allocation16 + $0x78] sm:$0xff] }
 0x86b   : > { %2170 = vst.msk [vmem:[#allocation16 + $0xc0] sm:$0xff] %vm2121_vm2, %v2168_v44  ;;  %v7828_v47 = vpack.c.bf16 %v2176_v46, %v2175_v45 }
 0x86d   : > { %7829 = vmatprep.subr.bf16.mxu1 %v7828_v47 }
 0x86e   : > { %7831 = vmatpush3.bf16.msra.mxu1 %v7828_v47  ;;  %v2177_v48 = vld [vmem:[#allocation16 + $0x90] sm:$0xff]  ;;  %v2178_v49 = vld [vmem:[#allocation16 + $0xa8] sm:$0xff] }
 0x86f   : > { %v7832_v50 = vpack.c.bf16 %v2178_v49, %v2177_v48 }
 0x871   : > { %7833 = vmatprep.subr.bf16.mxu1 %v7832_v50 }
 0x872   : > { %7835 = vmatpush3.bf16.msra.mxu1 %v7832_v50  ;;  %v2179_v51 = vld [vmem:[#allocation16 + $0xc0] sm:$0xff] }
 0x873   : > { %7507 = vmatprep.subr.mxu1 %v2179_v51 }
 0x876   : > { %7508 = vmatpush3.msra.mxu1 %v2179_v51 }
 0x877   : > { %7510 = vmatmul.mubr.msk.f32.vlgmr.msra.gmra.mrb[4].mxu1 %vm10600_vm14, %v2181_v54  ;;  %7836 = vmatprep.subr.bf16.mxu1 %v8828_v6  ;;  %v2187_v58 = vpop.permute.xlu1 %2186  ;;  %vm2442_vm14 = vcmask 130048  }
 0x878   : > { %7030 = vmatprep.mubr.msk.f32.mxu1 %vm2442_vm14, %v2427_v9 }
 0x87b   : > { %v2192_v55 = vpop.permute.xlu0 %2191 }
 0x94a   : > { %v7511_v57 = vpop.f32.mrb[4].mxu1 }
 0x94b   : > { %v2272_v59 = vadd.f32 %v7511_v57, %v2192_v55  ;;  %v2266_v60 = vpop.f32.mrb[5].mxu1 }
 0x94c   : > { %v2267_v63 = vadd.f32 %v2266_v60, %v2187_v58 }
 0x94d   : > { %v2276_v0 = vmax.f32 %v2272_v59, 0.0 }
 0x94e   : > { %v2275_v1 = vmax.f32 %v2267_v63, 0.0  ;;  %v2426_v63 = vld [vmem:[#allocation22] sm:$0xff] }
 0x94f   : > { %v2285_v2 = vmul.f32 %v9477_v61, %v2276_v0  ;;  %v2429_v0 = vld [vmem:[#allocation22 + $0x18] sm:$0xff] }
 0x950   : > { %v2284_v3 = vmul.f32 %v9477_v61, %v2275_v1  ;;  %v2428_v1 = vld [vmem:[#allocation22 + $0x10] sm:$0xff] }
 0x951   : > { %2292 = vrot.lane.b32.xlu0 %v2285_v2, %s10618_s28 }
 0x952   : > { %2290 = vrot.lane.b32.xlu1 %v2284_v3, %s10618_s28 }
 0x9c3   : > { %v2293_v5 = vpop.permute.xlu0 %2292 }
 0x9c4   : > { %2297 = vst.msk [vmem:[#allocation3 + $0x8] sm:$0xff] %vm2112_vm10, %v2293_v5  ;;  %v2291_v7 = vpop.permute.xlu1 %2290 }
 0x9c5   : > { %2299 = vst.msk [vmem:[#allocation3 + $0x8] sm:$0xff] %vm2114_vm8, %v8834_v10 }
 0x9c6   : > { %2296 = vst.msk [vmem:[#allocation3] sm:$0xff] %vm2112_vm10, %v2291_v7 }
 0x9c7   : > { %2298 = vst.msk [vmem:[#allocation3] sm:$0xff] %vm2114_vm8, %v8834_v10 }
 0x9cc   : > { %v2301_v4 = vld [vmem:[#allocation3 + $0x8] sm:$0xff] }
 0x9cd   : > { %2306 = vrot.lane.b32.xlu0 %v2301_v4, %s10614_s7 }
 0x9ce   : > { %v2300_v8 = vld [vmem:[#allocation3] sm:$0xff] }
 0x9cf   : > { %2304 = vrot.lane.b32.xlu1 %v2300_v8, %s10614_s7  ;;  %s10693_s7 = sld [smem:[#allocation41_spill]] }
 0x9d1   : > { %2318 = vrot.lane.b32.xlu0 %v2301_v4, %s10610_s18 }
 0x9d3   : > { %2316 = vrot.lane.b32.xlu1 %v2300_v8, %s10610_s18 }
 0x9d5   : > { %2330 = vrot.lane.b32.xlu0 %v2301_v4, %s10628_s10 }
 0x9d7   : > { %2328 = vrot.lane.b32.xlu1 %v2300_v8, %s10628_s10 }
 0x9d9   : > { %2342 = vrot.lane.b32.xlu0 %v2301_v4, %s10624_s16 }
 0x9db   : > { %2340 = vrot.lane.b32.xlu1 %v2300_v8, %s10624_s16 }
 0x9dd   : > { %2354 = vrot.lane.b32.xlu0 %v2301_v4, %s10616_s1 }
 0x9df   : > { %2352 = vrot.lane.b32.xlu1 %v2300_v8, %s10616_s1 }
 0x9e1   : > { %2366 = vrot.lane.b32.xlu0 %v2301_v4, %s10612_s23 }
 0x9e3   : > { %2364 = vrot.lane.b32.xlu1 %v2300_v8, %s10612_s23  ;;  %s10620_s23 = smov 121  }
 0x9e5   : > { %2378 = vrot.lane.b32.xlu0 %v2301_v4, %s10608_s26 }
 0x9e7   : > { %2376 = vrot.lane.b32.xlu1 %v2300_v8, %s10608_s26  ;;  %s8851_s26 = smov 122  }
 0x9e9   : > { %2390 = vrot.lane.b32.xlu0 %v2301_v4, %s10606_s2 }
 0x9eb   : > { %2388 = vrot.lane.b32.xlu1 %v2300_v8, %s10606_s2  ;;  %s8850_s2 = smov 123  }
 0x9ed   : > { %2402 = vrot.lane.b32.xlu0 %v2301_v4, %s10601_s3 }
 0x9ef   : > { %2400 = vrot.lane.b32.xlu1 %v2300_v8, %s10601_s3  ;;  %s10691_s3 = sld [smem:[#allocation45_spill]] }
 0x9f1   : > { %2439 = vperm.xlu0 %8466, %v2431_v13  }
 0x9f3   : > { %2434 = vperm.xlu1 %8465, %v2430_v14  }
 0xa3f   : > { %v2307_v15 = vpop.permute.xlu0 %2306 }
 0xa40   : > { %2311 = vst.msk [vmem:[#allocation16 + $0x18] sm:$0xff] %vm2121_vm2, %v2307_v15 }
 0xa41   : > { %v2305_v16 = vpop.permute.xlu1 %2304 }
 0xa42   : > { %2310 = vst.msk [vmem:[#allocation16] sm:$0xff] %vm2121_vm2, %v2305_v16 }
 0xa43   : > { %v2319_v17 = vpop.permute.xlu0 %2318 }
 0xa44   : > { %2323 = vst.msk [vmem:[#allocation16 + $0x48] sm:$0xff] %vm2121_vm2, %v2319_v17 }
 0xa45   : > { %v2317_v18 = vpop.permute.xlu1 %2316 }
 0xa46   : > { %2322 = vst.msk [vmem:[#allocation16 + $0x30] sm:$0xff] %vm2121_vm2, %v2317_v18 }
 0xa47   : > { %v2331_v19 = vpop.permute.xlu0 %2330  ;;  %v2409_v11 = vld [vmem:[#allocation16 + $0x18] sm:$0xff] }
 0xa48   : > { %2335 = vst.msk [vmem:[#allocation16 + $0x78] sm:$0xff] %vm2121_vm2, %v2331_v19 }
 0xa49   : > { %v2329_v12 = vpop.permute.xlu1 %2328  ;;  %v2408_v20 = vld [vmem:[#allocation16] sm:$0xff] }
 0xa4a   : > { %2334 = vst.msk [vmem:[#allocation16 + $0x60] sm:$0xff] %vm2121_vm2, %v2329_v12  ;;  %v7837_v21 = vpack.c.bf16 %v2409_v11, %v2408_v20  ;;  %v2571_v12 = vld [vmem:[%s10691_s3] sm:$0xff]  ;;  %v2572_v20 = vld [vmem:[%s10691_s3 + $0x8] sm:$0xff] }
 0xa4b   : > { %v2343_v22 = vpop.permute.xlu0 %2342  ;;  %v2411_v23 = vld [vmem:[#allocation16 + $0x48] sm:$0xff] }
 0xa4c   : > { %7838 = vmatpush1.bf16.msra.mxu1 %v7837_v21  ;;  %2347 = vst.msk [vmem:[#allocation16 + $0xa8] sm:$0xff] %vm2121_vm2, %v2343_v22  ;;  %v2573_v21 = vld [vmem:[%s10691_s3 + $0x10] sm:$0xff]  ;;  %v7863_v22 = vpack.c.bf16 %v2572_v20, %v2571_v12 }
 0xa4d   : > { %v2341_v24 = vpop.permute.xlu1 %2340  ;;  %7839 = vmatprep.subr.bf16.mxu1 %v8828_v6  ;;  %v2410_v25 = vld [vmem:[#allocation16 + $0x30] sm:$0xff] }
 0xa4e   : > { %2346 = vst.msk [vmem:[#allocation16 + $0x90] sm:$0xff] %vm2121_vm2, %v2341_v24  ;;  %v7840_v26 = vpack.c.bf16 %v2411_v23, %v2410_v25  ;;  %v2574_v23 = vld [vmem:[%s10691_s3 + $0x18] sm:$0xff]  ;;  %v2575_v25 = vld [vmem:[%s10691_s3 + $0x20] sm:$0xff]  ;;  %7864 = vmatprep.subr.bf16.mxu0 %v7863_v22 }
 0xa4f   : > { %v2355_v27 = vpop.permute.xlu0 %2354  ;;  %v2413_v28 = vld [vmem:[#allocation16 + $0x78] sm:$0xff]  ;;  %v7867_v24 = vpack.c.bf16 %v2574_v23, %v2573_v21  ;;  %7866 = vmatpush3.bf16.msra.mxu0 %v7863_v22 }
 0xa50   : > { %7841 = vmatpush1.bf16.msra.mxu1 %v7840_v26  ;;  %2359 = vst.msk [vmem:[#allocation16 + $0xd8] sm:$0xff] %vm2121_vm2, %v2355_v27  ;;  %v2576_v26 = vld [vmem:[%s10691_s3 + $0x28] sm:$0xff] }
 0xa51   : > { %v2353_v29 = vpop.permute.xlu1 %2352  ;;  %7842 = vmatprep.subr.bf16.mxu1 %v8828_v6  ;;  %v2412_v30 = vld [vmem:[#allocation16 + $0x60] sm:$0xff]  ;;  %7868 = vmatprep.subr.bf16.mxu0 %v7867_v24 }
 0xa52   : > { %2358 = vst.msk [vmem:[#allocation16 + $0xc0] sm:$0xff] %vm2121_vm2, %v2353_v29  ;;  %v7843_v31 = vpack.c.bf16 %v2413_v28, %v2412_v30  ;;  %v7871_v29 = vpack.c.bf16 %v2576_v26, %v2575_v25  ;;  %v2577_v30 = vld [vmem:[%s10691_s3 + $0x30] sm:$0xff] }
 0xa53   : > { %v2367_v32 = vpop.permute.xlu0 %2366  ;;  %v2415_v33 = vld [vmem:[#allocation16 + $0xa8] sm:$0xff]  ;;  %7870 = vmatpush3.bf16.msra.mxu0 %v7867_v24 }
 0xa54   : > { %7844 = vmatpush1.bf16.msra.mxu1 %v7843_v31  ;;  %2371 = vst.msk [vmem:[#allocation16 + $0x108] sm:$0xff] %vm2121_vm2, %v2367_v32  ;;  %v2578_v31 = vld [vmem:[%s10691_s3 + $0x38] sm:$0xff]  ;;  %7872 = vmatprep.subr.bf16.mxu0 %v7871_v29 }
 0xa55   : > { %v2365_v34 = vpop.permute.xlu1 %2364  ;;  %7845 = vmatprep.subr.bf16.mxu1 %v8828_v6  ;;  %v2414_v35 = vld [vmem:[#allocation16 + $0x90] sm:$0xff] }
 0xa56   : > { %2370 = vst.msk [vmem:[#allocation16 + $0xf0] sm:$0xff] %vm2121_vm2, %v2365_v34  ;;  %v7846_v36 = vpack.c.bf16 %v2415_v33, %v2414_v35  ;;  %v7875_v34 = vpack.c.bf16 %v2578_v31, %v2577_v30  ;;  %v2579_v35 = vld [vmem:[%s10691_s3 + $0x40] sm:$0xff] }
 0xa57   : > { %v2379_v37 = vpop.permute.xlu0 %2378  ;;  %v2417_v38 = vld [vmem:[#allocation16 + $0xd8] sm:$0xff]  ;;  %7874 = vmatpush3.bf16.msra.mxu0 %v7871_v29 }
 0xa58   : > { %7847 = vmatpush1.bf16.msra.mxu1 %v7846_v36  ;;  %2383 = vst.msk [vmem:[#allocation16 + $0x138] sm:$0xff] %vm2121_vm2, %v2379_v37  ;;  %7876 = vmatprep.subr.bf16.mxu0 %v7875_v34  ;;  %v2580_v36 = vld [vmem:[%s10691_s3 + $0x48] sm:$0xff]  ;;  %s10708_s3 = smov 119  }
 0xa59   : > { %v2377_v39 = vpop.permute.xlu1 %2376  ;;  %7848 = vmatprep.subr.bf16.mxu1 %v8828_v6  ;;  %v2416_v40 = vld [vmem:[#allocation16 + $0xc0] sm:$0xff]  ;;  %v7879_v37 = vpack.c.bf16 %v2580_v36, %v2579_v35 }
 0xa5a   : > { %2382 = vst.msk [vmem:[#allocation16 + $0x120] sm:$0xff] %vm2121_vm2, %v2377_v39  ;;  %v7849_v41 = vpack.c.bf16 %v2417_v38, %v2416_v40 }
 0xa5b   : > { %v2391_v42 = vpop.permute.xlu0 %2390  ;;  %v2419_v43 = vld [vmem:[#allocation16 + $0x108] sm:$0xff]  ;;  %7878 = vmatpush3.bf16.msra.mxu0 %v7875_v34 }
 0xa5c   : > { %7850 = vmatpush1.bf16.msra.mxu1 %v7849_v41  ;;  %2395 = vst.msk [vmem:[#allocation16 + $0x168] sm:$0xff] %vm2121_vm2, %v2391_v42  ;;  %7880 = vmatprep.subr.bf16.mxu0 %v7879_v37 }
 0xa5d   : > { %v2389_v44 = vpop.permute.xlu1 %2388  ;;  %7851 = vmatprep.subr.bf16.mxu1 %v8828_v6  ;;  %v2418_v45 = vld [vmem:[#allocation16 + $0xf0] sm:$0xff] }
 0xa5e   : > { %2394 = vst.msk [vmem:[#allocation16 + $0x150] sm:$0xff] %vm2121_vm2, %v2389_v44  ;;  %v7852_v46 = vpack.c.bf16 %v2419_v43, %v2418_v45 }
 0xa5f   : > { %v2403_v47 = vpop.permute.xlu0 %2402  ;;  %v2421_v48 = vld [vmem:[#allocation16 + $0x138] sm:$0xff]  ;;  %7882 = vmatpush3.bf16.msra.mxu0 %v7879_v37 }
 0xa60   : > { %7853 = vmatpush1.bf16.msra.mxu1 %v7852_v46  ;;  %2407 = vst.msk [vmem:[#allocation16 + $0x198] sm:$0xff] %vm2121_vm2, %v2403_v47  ;;  %7883 = vmatprep.subr.bf16.mxu0 %v8828_v6 }
 0xa61   : > { %v2401_v49 = vpop.permute.xlu1 %2400  ;;  %7854 = vmatprep.subr.bf16.mxu1 %v8828_v6  ;;  %v2420_v50 = vld [vmem:[#allocation16 + $0x120] sm:$0xff] }
 0xa62   : > { %2406 = vst.msk [vmem:[#allocation16 + $0x180] sm:$0xff] %vm2121_vm2, %v2401_v49  ;;  %v7855_v51 = vpack.c.bf16 %v2421_v48, %v2420_v50 }
 0xa63   : > { %v2423_v54 = vld [vmem:[#allocation16 + $0x168] sm:$0xff] }
 0xa64   : > { %7856 = vmatpush1.bf16.msra.mxu1 %v7855_v51  ;;  %v2819_v51 = vld [vmem:[%s10693_s7 + $0x8] sm:$0xff] }
 0xa65   : > { %7857 = vmatprep.subr.bf16.mxu1 %v8828_v6  ;;  %v2422_v55 = vld [vmem:[#allocation16 + $0x150] sm:$0xff] }
 0xa66   : > { %v7858_v57 = vpack.c.bf16 %v2423_v54, %v2422_v55  ;;  %v2818_v54 = vld [vmem:[%s10693_s7] sm:$0xff]  ;;  %v2821_v55 = vld [vmem:[%s10693_s7 + $0x18] sm:$0xff] }
 0xa67   : > { %v2425_v58 = vld [vmem:[#allocation16 + $0x198] sm:$0xff] }
 0xa68   : > { %7859 = vmatpush1.bf16.msra.mxu1 %v7858_v57  ;;  %v2820_v57 = vld [vmem:[%s10693_s7 + $0x10] sm:$0xff]  ;;  %s10712_s7 = smov 98  }
 0xa69   : > { %7860 = vmatprep.subr.bf16.mxu1 %v8828_v6  ;;  %v2424_v59 = vld [vmem:[#allocation16 + $0x180] sm:$0xff] }
 0xa6a   : > { %v7861_v60 = vpack.c.bf16 %v2425_v58, %v2424_v59 }
 0xa6c   : > { %7862 = vmatpush1.bf16.msra.mxu1 %v7861_v60 }
 0xa6f   : > { %2514 = vmatmul.mubr.f32.vlgmr.msra.gmra.mrb[6].mxu1 %v2426_v63 }
 0xa70   : > { %7031 = vmatprep.mubr.msk.f32.mxu1 %vm2442_vm14, %v2429_v0  ;;  %v2440_v8 = vpop.permute.xlu0 %2439 }
 0xa72   : > { %v2435_v2 = vpop.permute.xlu1 %2434 }
 0xa73   : > { %2519 = vmatmul.mubr.f32.gmra.mrb[8].mxu1 %v2428_v1 }
 0xb42   : > { %v2515_v3 = vpop.f32.mrb[6].mxu1 }
 0xb43   : > { %v2516_v5 = vadd.f32 %v2515_v3, %v2435_v2  ;;  %v2517_v7 = vpop.f32.mrb[7].mxu1 }
 0xb45   : > { %v2524_v4 = vmax.f32 %v2516_v5, 0.0 }
 0xb46   : > { %v2520_v9 = vpop.f32.mrb[8].mxu1 }
 0xb47   : > { %v2533_v13 = vmul.f32 %v9477_v61, %v2524_v4  ;;  %v2521_v14 = vadd.f32 %v2520_v9, %v2440_v8  ;;  %v2522_v15 = vpop.f32.mrb[9].mxu1 }
 0xb49   : > { %v2525_v16 = vmax.f32 %v2521_v14, 0.0  ;;  %2539 = vrot.lane.b32.xlu1 %v2533_v13, %s10618_s28 }
 0xb4b   : > { %v2534_v17 = vmul.f32 %v9477_v61, %v2525_v16 }
 0xb4d   : > { %2541 = vrot.lane.b32.xlu0 %v2534_v17, %s10618_s28  ;;  %s8854_s28 = smov 115  }
 0xbbb   : > { %v2540_v18 = vpop.permute.xlu1 %2539 }
 0xbbc   : > { %2545 = vst.msk [vmem:[#allocation6] sm:$0xff] %vm2112_vm10, %v2540_v18 }
 0xbbd   : > { %2547 = vst.msk [vmem:[#allocation6] sm:$0xff] %vm2114_vm8, %v8834_v10 }
 0xbbf   : > { %v2542_v19 = vpop.permute.xlu0 %2541 }
 0xbc0   : > { %2546 = vst.msk [vmem:[#allocation6 + $0x8] sm:$0xff] %vm2112_vm10, %v2542_v19 }
 0xbc1   : > { %2548 = vst.msk [vmem:[#allocation6 + $0x8] sm:$0xff] %vm2114_vm8, %v8834_v10 }
 0xbc4   : > { %v2549_v11 = vld [vmem:[#allocation6] sm:$0xff] }
 0xbc5   : > { %2553 = vrot.lane.b32.xlu1 %v2549_v11, %s8839_s0 }
 0xbc8   : > { %v2550_v61 = vld [vmem:[#allocation6 + $0x8] sm:$0xff] }
 0xbc9   : > { %2555 = vrot.lane.b32.xlu0 %v2550_v61, %s8839_s0  ;;  %s10622_s0 = smov 12  }
 0xc37   : > { %v2554_v27 = vpop.permute.xlu1 %2553 }
 0xc38   : > { %v2559_v28 = vmax.f32 %v2549_v11, %v2554_v27 }
 0xc3a   : > { %2563 = vrot.lane.b32.xlu1 %v2559_v28, %s10610_s18 }
 0xc3b   : > { %v2556_v32 = vpop.permute.xlu0 %2555 }
 0xc3c   : > { %v2560_v33 = vmax.f32 %v2550_v61, %v2556_v32 }
 0xc3e   : > { %2565 = vrot.lane.b32.xlu0 %v2560_v33, %s10610_s18  ;;  %s10692_s18 = sld [smem:[#allocation40_spill]] }
 0xc44   : > { %v2811_v50 = vld [vmem:[%s10692_s18 + $0x8] sm:$0xff] }
 0xcac   : > { %v2564_v38 = vpop.permute.xlu1 %2563 }
 0xcad   : > { %v2569_v39 = vmax.f32 %v2559_v28, %v2564_v38 }
 0xcaf   : > { %2583 = vrot.lane.b32.xlu1 %v2569_v39, %s10616_s1 }
 0xcb0   : > { %v2566_v40 = vpop.permute.xlu0 %2565 }
 0xcb1   : > { %v2570_v41 = vmax.f32 %v2560_v33, %v2566_v40 }
 0xcb3   : > { %2585 = vrot.lane.b32.xlu0 %v2570_v41, %s10616_s1  ;;  %s10630_s1 = smov 116  }
 0xd21   : > { %v2584_v42 = vpop.permute.xlu1 %2583 }
 0xd22   : > { %7532 = vmatprep.mubr.msk.f32.mxu0 %vm2121_vm2, %v2584_v42  ;;  %v2810_v42 = vld [vmem:[%s10692_s18] sm:$0xff] }
 0xd25   : > { %v2586_v43 = vpop.permute.xlu0 %2585 }
 0xd26   : > { %7533 = vmatmul.mubr.msk.f32.vlgmr.msra.gmra.mrb[8].mxu0 %vm2121_vm2, %v2586_v43  ;;  %v2813_v43 = vld [vmem:[%s10692_s18 + $0x18] sm:$0xff] }
 0xd27   : > { %7035 = vmatprep.mubr.msk.f32.mxu0 %vm2442_vm14, %v2811_v50 }
 0xdf9   : > { %v7534_v44 = vpop.f32.mrb[8].mxu0 }
 0xdfa   : > { %2673 = vrot.lane.b32.xlu0 %v7534_v44, %s10622_s0  ;;  %v2657_v45 = vpop.f32.mrb[9].mxu0  ;;  %v2812_v44 = vld [vmem:[%s10692_s18 + $0x10] sm:$0xff] }
 0xdfb   : > { %2671 = vrot.lane.b32.xlu1 %v2657_v45, %s10622_s0  ;;  %v2815_v45 = vld [vmem:[%s10692_s18 + $0x28] sm:$0xff] }
 0xe6c   : > { %v2674_v46 = vpop.permute.xlu0 %2673 }
 0xe6d   : > { %2679 = vst.msk [vmem:[#allocation9 + $0x8] sm:$0xff] %vm2677_vm6, %v2674_v46  ;;  %v2672_v47 = vpop.permute.xlu1 %2671  ;;  %v2814_v46 = vld [vmem:[%s10692_s18 + $0x20] sm:$0xff] }
 0xe6e   : > { %2682 = vst.msk [vmem:[#allocation9 + $0x8] sm:$0xff] %vm2680_vm7, %v8834_v10 }
 0xe6f   : > { %2678 = vst.msk [vmem:[#allocation9] sm:$0xff] %vm2677_vm6, %v2672_v47  ;;  %v2817_v47 = vld [vmem:[%s10692_s18 + $0x38] sm:$0xff] }
 0xe70   : > { %2681 = vst.msk [vmem:[#allocation9] sm:$0xff] %vm2680_vm7, %v8834_v10 }
 0xe75   : > { %v2684_v48 = vld [vmem:[#allocation9 + $0x8] sm:$0xff] }
 0xe76   : > { %2689 = vrot.lane.b32.xlu0 %v2684_v48, %s8850_s2 }
 0xe77   : > { %v2683_v49 = vld [vmem:[#allocation9] sm:$0xff] }
 0xe78   : > { %2687 = vrot.lane.b32.xlu1 %v2683_v49, %s8850_s2 }
 0xe7a   : > { %2702 = vrot.lane.b32.xlu0 %v2684_v48, %s8851_s26 }
 0xe7c   : > { %2700 = vrot.lane.b32.xlu1 %v2683_v49, %s8851_s26 }
 0xe7e   : > { %2714 = vrot.lane.b32.xlu0 %v2684_v48, %s10620_s23 }
 0xe80   : > { %2712 = vrot.lane.b32.xlu1 %v2683_v49, %s10620_s23  ;;  %s10694_s23 = smov 110  }
 0xe82   : > { %2726 = vrot.lane.b32.xlu0 %v2684_v48, %s10628_s10 }
 0xe84   : > { %2724 = vrot.lane.b32.xlu1 %v2683_v49, %s10628_s10 }
 0xe86   : > { %2738 = vrot.lane.b32.xlu0 %v2684_v48, %s10630_s1 }
 0xe88   : > { %2736 = vrot.lane.b32.xlu1 %v2683_v49, %s10630_s1 }
 0xe8a   : > { %2750 = vrot.lane.b32.xlu0 %v2684_v48, %s8854_s28 }
 0xe8c   : > { %2748 = vrot.lane.b32.xlu1 %v2683_v49, %s8854_s28 }
 0xe8e   : > { %2762 = vrot.lane.b32.xlu0 %v2684_v48, %s10626_s11 }
 0xe90   : > { %2760 = vrot.lane.b32.xlu1 %v2683_v49, %s10626_s11 }
 0xe92   : > { %2774 = vrot.lane.b32.xlu0 %v2684_v48, %s10694_s23 }
 0xe94   : > { %2772 = vrot.lane.b32.xlu1 %v2683_v49, %s10694_s23 }
 0xe96   : > { %2786 = vrot.lane.b32.xlu0 %v2684_v48, %s10624_s16  ;;  %v2816_v48 = vld [vmem:[%s10692_s18 + $0x30] sm:$0xff] }
 0xe98   : > { %2784 = vrot.lane.b32.xlu1 %v2683_v49, %s10624_s16  ;;  %s10696_s16 = sld [smem:[#allocation42_spill]] }
 0xe9a   : > { %2829 = vperm.xlu0 %8466, %v2819_v51  }
 0xe9c   : > { %2824 = vperm.xlu1 %8465, %v2818_v54  }
 0xe9e   : > { %2839 = vperm.xlu0 %8466, %v2821_v55   ;;  %v9644_v55 = vld [vmem:[#allocation30] ss:$0 sm:$0xff] }
 0xea0   : > { %2834 = vperm.xlu1 %8465, %v2820_v57  }
 0xee8   : > { %v2690_v58 = vpop.permute.xlu0 %2689 }
 0xee9   : > { %2695 = vst.msk [vmem:[#allocation16 + $0x18] sm:$0xff] %vm2693_vm9, %v2690_v58 }
 0xeea   : > { %v2688_v59 = vpop.permute.xlu1 %2687 }
 0xeeb   : > { %2694 = vst.msk [vmem:[#allocation16] sm:$0xff] %vm2693_vm9, %v2688_v59 }
 0xeec   : > { %v2703_v60 = vpop.permute.xlu0 %2702 }
 0xeed   : > { %2707 = vst.msk [vmem:[#allocation16 + $0x48] sm:$0xff] %vm2693_vm9, %v2703_v60 }
 0xeee   : > { %v2701_v63 = vpop.permute.xlu1 %2700 }
 0xeef   : > { %2706 = vst.msk [vmem:[#allocation16 + $0x30] sm:$0xff] %vm2693_vm9, %v2701_v63 }
 0xef0   : > { %v2715_v0 = vpop.permute.xlu0 %2714  ;;  %v2793_v1 = vld [vmem:[#allocation16 + $0x18] sm:$0xff] }
 0xef1   : > { %2719 = vst.msk [vmem:[#allocation16 + $0x78] sm:$0xff] %vm2693_vm9, %v2715_v0 }
 0xef2   : > { %v2713_v2 = vpop.permute.xlu1 %2712  ;;  %v2792_v3 = vld [vmem:[#allocation16] sm:$0xff] }
 0xef3   : > { %2718 = vst.msk [vmem:[#allocation16 + $0x60] sm:$0xff] %vm2693_vm9, %v2713_v2  ;;  %v7884_v5 = vpack.c.bf16 %v2793_v1, %v2792_v3 }
 0xef4   : > { %v2727_v7 = vpop.permute.xlu0 %2726  ;;  %v2795_v4 = vld [vmem:[#allocation16 + $0x48] sm:$0xff] }
 0xef5   : > { %7885 = vmatpush1.bf16.msra.mxu0 %v7884_v5  ;;  %2731 = vst.msk [vmem:[#allocation16 + $0xa8] sm:$0xff] %vm2693_vm9, %v2727_v7 }
 0xef6   : > { %v2725_v8 = vpop.permute.xlu1 %2724  ;;  %7886 = vmatprep.subr.bf16.mxu0 %v8828_v6  ;;  %v2794_v9 = vld [vmem:[#allocation16 + $0x30] sm:$0xff] }
 0xef7   : > { %2730 = vst.msk [vmem:[#allocation16 + $0x90] sm:$0xff] %vm2693_vm9, %v2725_v8  ;;  %v7887_v13 = vpack.c.bf16 %v2795_v4, %v2794_v9 }
 0xef8   : > { %v2739_v14 = vpop.permute.xlu0 %2738  ;;  %v2797_v15 = vld [vmem:[#allocation16 + $0x78] sm:$0xff] }
 0xef9   : > { %7888 = vmatpush1.bf16.msra.mxu0 %v7887_v13  ;;  %2743 = vst.msk [vmem:[#allocation16 + $0xd8] sm:$0xff] %vm2693_vm9, %v2739_v14 }
 0xefa   : > { %v2737_v16 = vpop.permute.xlu1 %2736  ;;  %7889 = vmatprep.subr.bf16.mxu0 %v8828_v6  ;;  %v2796_v17 = vld [vmem:[#allocation16 + $0x60] sm:$0xff] }
 0xefb   : > { %2742 = vst.msk [vmem:[#allocation16 + $0xc0] sm:$0xff] %vm2693_vm9, %v2737_v16  ;;  %v7890_v18 = vpack.c.bf16 %v2797_v15, %v2796_v17 }
 0xefc   : > { %v2751_v19 = vpop.permute.xlu0 %2750  ;;  %v2799_v11 = vld [vmem:[#allocation16 + $0xa8] sm:$0xff] }
 0xefd   : > { %7891 = vmatpush1.bf16.msra.mxu0 %v7890_v18  ;;  %2755 = vst.msk [vmem:[#allocation16 + $0x108] sm:$0xff] %vm2693_vm9, %v2751_v19 }
 0xefe   : > { %v2749_v61 = vpop.permute.xlu1 %2748  ;;  %7892 = vmatprep.subr.bf16.mxu0 %v8828_v6  ;;  %v2798_v12 = vld [vmem:[#allocation16 + $0x90] sm:$0xff] }
 0xeff   : > { %2754 = vst.msk [vmem:[#allocation16 + $0xf0] sm:$0xff] %vm2693_vm9, %v2749_v61  ;;  %v7893_v20 = vpack.c.bf16 %v2799_v11, %v2798_v12 }
 0xf00   : > { %v2763_v21 = vpop.permute.xlu0 %2762  ;;  %v2801_v22 = vld [vmem:[#allocation16 + $0xd8] sm:$0xff] }
 0xf01   : > { %7894 = vmatpush1.bf16.msra.mxu0 %v7893_v20  ;;  %2767 = vst.msk [vmem:[#allocation16 + $0x138] sm:$0xff] %vm2693_vm9, %v2763_v21 }
 0xf02   : > { %v2761_v23 = vpop.permute.xlu1 %2760  ;;  %7895 = vmatprep.subr.bf16.mxu0 %v8828_v6  ;;  %v2800_v24 = vld [vmem:[#allocation16 + $0xc0] sm:$0xff] }
 0xf03   : > { %2766 = vst.msk [vmem:[#allocation16 + $0x120] sm:$0xff] %vm2693_vm9, %v2761_v23  ;;  %v7896_v25 = vpack.c.bf16 %v2801_v22, %v2800_v24  ;;  %v3235_v24 = vld [vmem:[%s10696_s16 + $0x8] sm:$0xff] }
 0xf04   : > { %v2775_v26 = vpop.permute.xlu0 %2774  ;;  %v2803_v27 = vld [vmem:[#allocation16 + $0x108] sm:$0xff]  ;;  %3346 = vmatprep.mubr.f32.mxu1 %v3235_v24 }
 0xf05   : > { %7897 = vmatpush1.bf16.msra.mxu0 %v7896_v25  ;;  %2779 = vst.msk [vmem:[#allocation16 + $0x168] sm:$0xff] %vm2693_vm9, %v2775_v26  ;;  %v3236_v26 = vld [vmem:[%s10696_s16 + $0x10] sm:$0xff] }
 0xf06   : > { %v2773_v28 = vpop.permute.xlu1 %2772  ;;  %7898 = vmatprep.subr.bf16.mxu0 %v8828_v6  ;;  %v2802_v29 = vld [vmem:[#allocation16 + $0xf0] sm:$0xff] }
 0xf07   : > { %2778 = vst.msk [vmem:[#allocation16 + $0x150] sm:$0xff] %vm2693_vm9, %v2773_v28  ;;  %v7899_v30 = vpack.c.bf16 %v2803_v27, %v2802_v29 }
 0xf08   : > { %v2787_v31 = vpop.permute.xlu0 %2786  ;;  %v2805_v32 = vld [vmem:[#allocation16 + $0x138] sm:$0xff] }
 0xf09   : > { %7900 = vmatpush1.bf16.msra.mxu0 %v7899_v30  ;;  %2791 = vst.msk [vmem:[#allocation16 + $0x198] sm:$0xff] %vm2693_vm9, %v2787_v31 }
 0xf0a   : > { %v2785_v33 = vpop.permute.xlu1 %2784  ;;  %7901 = vmatprep.subr.bf16.mxu0 %v8828_v6  ;;  %v2804_v34 = vld [vmem:[#allocation16 + $0x120] sm:$0xff] }
 0xf0b   : > { %2790 = vst.msk [vmem:[#allocation16 + $0x180] sm:$0xff] %vm2693_vm9, %v2785_v33  ;;  %v7902_v35 = vpack.c.bf16 %v2805_v32, %v2804_v34 }
 0xf0c   : > { %v2807_v36 = vld [vmem:[#allocation16 + $0x168] sm:$0xff] }
 0xf0d   : > { %7903 = vmatpush1.bf16.msra.mxu0 %v7902_v35 }
 0xf0e   : > { %7904 = vmatprep.subr.bf16.mxu0 %v8828_v6  ;;  %v2806_v37 = vld [vmem:[#allocation16 + $0x150] sm:$0xff] }
 0xf0f   : > { %v7905_v38 = vpack.c.bf16 %v2807_v36, %v2806_v37 }
 0xf10   : > { %v2809_v39 = vld [vmem:[#allocation16 + $0x198] sm:$0xff] }
 0xf11   : > { %7906 = vmatpush1.bf16.msra.mxu0 %v7905_v38 }
 0xf12   : > { %7907 = vmatprep.subr.bf16.mxu0 %v8828_v6  ;;  %v2808_v40 = vld [vmem:[#allocation16 + $0x180] sm:$0xff] }
 0xf13   : > { %v7908_v41 = vpack.c.bf16 %v2809_v39, %v2808_v40 }
 0xf15   : > { %7909 = vmatpush1.bf16.msra.mxu0 %v7908_v41 }
 0xf18   : > { %2919 = vmatmul.mubr.f32.vlgmr.msra.gmra.mrb[10].mxu0 %v2810_v42 }
 0xf19   : > { %7036 = vmatprep.mubr.msk.f32.mxu0 %vm2442_vm14, %v2813_v43  ;;  %v2830_v58 = vpop.permute.xlu0 %2829 }
 0xf1b   : > { %v2825_v49 = vpop.permute.xlu1 %2824 }
 0xf1c   : > { %2924 = vmatmul.mubr.f32.gmra.mrb[12].mxu0 %v2812_v44 }
 0xf1d   : > { %7037 = vmatprep.mubr.msk.f32.mxu0 %vm2442_vm14, %v2815_v45  ;;  %v2840_v9 = vpop.permute.xlu0 %2839 }
 0xf1f   : > { %v2835_v2 = vpop.permute.xlu1 %2834 }
 0xf20   : > { %2929 = vmatmul.mubr.f32.gmra.mrb[14].mxu0 %v2814_v46 }
 0xf21   : > { %7038 = vmatprep.mubr.msk.f32.mxu0 %vm2442_vm14, %v2817_v47 }
 0xf24   : > { %2934 = vmatmul.mubr.f32.gmra.mrb[16].mxu0 %v2816_v48 }
 0xf25   : > { %7543 = vmatprep.mubr.msk.f32.mxu0 %vm1494_vm13, %v3236_v26 }
 0xfeb   : > { %v2920_v50 = vpop.f32.mrb[10].mxu0 }
 0xfec   : > { %v2921_v51 = vadd.f32 %v2920_v50, %v2825_v49  ;;  %v2922_v54 = vpop.f32.mrb[11].mxu0 }
 0xfee   : > { %v2939_v57 = vmax.f32 %v2921_v51, 0.0 }
 0xfef   : > { %v2925_v59 = vpop.f32.mrb[12].mxu0 }
 0xff0   : > { %v2950_v60 = vmul.f32 %v9644_v55, %v2939_v57  ;;  %v2926_v63 = vadd.f32 %v2925_v59, %v2830_v58  ;;  %v2927_v0 = vpop.f32.mrb[13].mxu0 }
 0xff2   : > { %v2940_v1 = vmax.f32 %v2926_v63, 0.0  ;;  %2962 = vrot.lane.b32.xlu1 %v2950_v60, %s10622_s0 }
 0xff3   : > { %v2930_v3 = vpop.f32.mrb[14].mxu0 }
 0xff4   : > { %v2951_v5 = vmul.f32 %v9644_v55, %v2940_v1  ;;  %v2931_v7 = vadd.f32 %v2930_v3, %v2835_v2  ;;  %v2932_v4 = vpop.f32.mrb[15].mxu0 }
 0xff6   : > { %v2941_v8 = vmax.f32 %v2931_v7, 0.0  ;;  %2964 = vrot.lane.b32.xlu0 %v2951_v5, %s10622_s0 }
 0xff7   : > { %v2935_v13 = vpop.f32.mrb[16].mxu0 }
 0xff8   : > { %v2952_v14 = vmul.f32 %v9644_v55, %v2941_v8  ;;  %v2936_v15 = vadd.f32 %v2935_v13, %v2840_v9  ;;  %v2937_v16 = vpop.f32.mrb[17].mxu0 }
 0xffa   : > { %v2942_v17 = vmax.f32 %v2936_v15, 0.0  ;;  %2966 = vrot.lane.b32.xlu1 %v2952_v14, %s10622_s0 }
 0xffc   : > { %v2953_v18 = vmul.f32 %v9644_v55, %v2942_v17 }
 0xffe   : > { %2968 = vrot.lane.b32.xlu0 %v2953_v18, %s10622_s0  ;;  %s10695_s0 = smov 121  }
0x1064   : > { %v2963_v19 = vpop.permute.xlu1 %2962 }
0x1065   : > { %2974 = vst.msk [vmem:[#allocation4] sm:$0xff] %vm2677_vm6, %v2963_v19 }
0x1066   : > { %2978 = vst.msk [vmem:[#allocation4] sm:$0xff] %vm2680_vm7, %v8834_v10 }
0x1068   : > { %v2965_v11 = vpop.permute.xlu0 %2964 }
0x1069   : > { %2975 = vst.msk [vmem:[#allocation4 + $0x8] sm:$0xff] %vm2677_vm6, %v2965_v11 }
0x106a   : > { %2979 = vst.msk [vmem:[#allocation4 + $0x8] sm:$0xff] %vm2680_vm7, %v8834_v10 }
0x106c   : > { %v2967_v61 = vpop.permute.xlu1 %2966 }
0x106d   : > { %2976 = vst.msk [vmem:[#allocation4 + $0x10] sm:$0xff] %vm2677_vm6, %v2967_v61  ;;  %v3078_v12 = vld [vmem:[#allocation4] sm:$0xff] }
0x106e   : > { %2980 = vst.msk [vmem:[#allocation4 + $0x10] sm:$0xff] %vm2680_vm7, %v8834_v10  ;;  %3086 = vrot.lane.b32.xlu1 %v3078_v12, %s10630_s1 }
0x1070   : > { %v2969_v20 = vpop.permute.xlu0 %2968 }
0x1071   : > { %2977 = vst.msk [vmem:[#allocation4 + $0x18] sm:$0xff] %vm2677_vm6, %v2969_v20  ;;  %v3079_v21 = vld [vmem:[#allocation4 + $0x8] sm:$0xff] }
0x1072   : > { %2981 = vst.msk [vmem:[#allocation4 + $0x18] sm:$0xff] %vm2680_vm7, %v8834_v10  ;;  %3088 = vrot.lane.b32.xlu0 %v3079_v21, %s10630_s1  ;;  %2990 = vrot.lane.b32.xlu1 %v3078_v12, %s8850_s2 }
0x1075   : > { %v3080_v22 = vld [vmem:[#allocation4 + $0x10] sm:$0xff] }
0x1076   : > { %2992 = vrot.lane.b32.xlu0 %v3079_v21, %s8850_s2  ;;  %3110 = vrot.lane.b32.xlu1 %v3078_v12, %s8854_s28 }
0x1079   : > { %v3081_v23 = vld [vmem:[#allocation4 + $0x18] sm:$0xff] }
0x107a   : > { %3112 = vrot.lane.b32.xlu0 %v3079_v21, %s8854_s28  ;;  %3014 = vrot.lane.b32.xlu1 %v3078_v12, %s8851_s26 }
0x107e   : > { %3016 = vrot.lane.b32.xlu0 %v3079_v21, %s8851_s26  ;;  %3134 = vrot.lane.b32.xlu1 %v3078_v12, %s10626_s11 }
0x1082   : > { %3136 = vrot.lane.b32.xlu0 %v3079_v21, %s10626_s11  ;;  %3038 = vrot.lane.b32.xlu1 %v3078_v12, %s10695_s0  ;;  %s10697_s11 = sld [smem:[#allocation43_spill]] }
0x1086   : > { %3040 = vrot.lane.b32.xlu0 %v3079_v21, %s10695_s0  ;;  %3158 = vrot.lane.b32.xlu1 %v3078_v12, %s10694_s23 }
0x1088   : > { %v3246_v25 = vld [vmem:[%s10697_s11] sm:$0xff]  ;;  %v3247_v27 = vld [vmem:[%s10697_s11 + $0x8] sm:$0xff]  ;;  %v3248_v28 = vld [vmem:[%s10697_s11 + $0x10] sm:$0xff] }
0x1089   : > { %v3249_v29 = vld [vmem:[%s10697_s11 + $0x18] sm:$0xff]  ;;  %s10715_s11 = smov 97  }
0x108a   : > { %3160 = vrot.lane.b32.xlu0 %v3079_v21, %s10694_s23  ;;  %3062 = vrot.lane.b32.xlu1 %v3078_v12, %s10628_s10 }
0x108e   : > { %3064 = vrot.lane.b32.xlu0 %v3079_v21, %s10628_s10  ;;  %3090 = vrot.lane.b32.xlu1 %v3080_v22, %s10630_s1  ;;  %s10698_s10 = smov 111  }
0x1092   : > { %3092 = vrot.lane.b32.xlu0 %v3081_v23, %s10630_s1  ;;  %2994 = vrot.lane.b32.xlu1 %v3080_v22, %s8850_s2  ;;  %s10703_s1 = sld [smem:[#allocation47_spill]] }
0x1096   : > { %2996 = vrot.lane.b32.xlu0 %v3081_v23, %s8850_s2  ;;  %3114 = vrot.lane.b32.xlu1 %v3080_v22, %s8854_s28  ;;  %s10699_s2 = smov 117  }
0x109a   : > { %3116 = vrot.lane.b32.xlu0 %v3081_v23, %s8854_s28  ;;  %3018 = vrot.lane.b32.xlu1 %v3080_v22, %s8851_s26  ;;  %s10701_s28 = smov 12  }
0x109e   : > { %3020 = vrot.lane.b32.xlu0 %v3081_v23, %s8851_s26  ;;  %3138 = vrot.lane.b32.xlu1 %v3080_v22, %s10698_s10  ;;  %s10700_s26 = smov 109  }
0x10a2   : > { %3140 = vrot.lane.b32.xlu0 %v3081_v23, %s10698_s10  ;;  %3042 = vrot.lane.b32.xlu1 %v3080_v22, %s10695_s0 }
0x10a6   : > { %3044 = vrot.lane.b32.xlu0 %v3081_v23, %s10695_s0  ;;  %3162 = vrot.lane.b32.xlu1 %v3080_v22, %s10694_s23  ;;  %s10702_s0 = sld [smem:[#allocation46_spill]] }
0x10aa   : > { %3164 = vrot.lane.b32.xlu0 %v3081_v23, %s10694_s23  ;;  %3066 = vrot.lane.b32.xlu1 %v3080_v22, %s10699_s2 }
0x10ae   : > { %3068 = vrot.lane.b32.xlu0 %v3081_v23, %s10699_s2  ;;  %3182 = vrot.lane.b32.xlu1 %v3078_v12, %s10700_s26 }
0x10b2   : > { %3184 = vrot.lane.b32.xlu0 %v3079_v21, %s10700_s26  ;;  %3186 = vrot.lane.b32.xlu1 %v3080_v22, %s10700_s26 }
0x10b6   : > { %3188 = vrot.lane.b32.xlu0 %v3081_v23, %s10700_s26  ;;  %3252 = vperm.xlu1 %8465, %v3246_v25  }
0x10ba   : > { %3257 = vperm.xlu0 %8466, %v3247_v27   ;;  %3262 = vperm.xlu1 %8465, %v3248_v28  }
0x10be   : > { %3267 = vperm.xlu0 %8466, %v3249_v29  }
0x10e0   : > { %v3087_v30 = vpop.permute.xlu1 %3086 }
0x10e1   : > { %3098 = vst.msk [vmem:[#allocation16 + $0x180] sm:$0xff] %vm2693_vm9, %v3087_v30 }
0x10e4   : > { %v3089_v31 = vpop.permute.xlu0 %3088  ;;  %v2991_v32 = vpop.permute.xlu1 %2990 }
0x10e5   : > { %3099 = vst.msk [vmem:[#allocation16 + $0x198] sm:$0xff] %vm2693_vm9, %v3089_v31  ;;  %3002 = vst.msk [vmem:[#allocation16] sm:$0xff] %vm2693_vm9, %v2991_v32 }
0x10e8   : > { %v2993_v33 = vpop.permute.xlu0 %2992  ;;  %v3111_v34 = vpop.permute.xlu1 %3110  ;;  %v3214_v35 = vld [vmem:[#allocation16 + $0x180] sm:$0xff] }
0x10e9   : > { %3003 = vst.msk [vmem:[#allocation16 + $0x18] sm:$0xff] %vm2693_vm9, %v2993_v33  ;;  %3122 = vst.msk [vmem:[#allocation16 + $0x1e0] sm:$0xff] %vm2693_vm9, %v3111_v34 }
0x10ec   : > { %v3113_v36 = vpop.permute.xlu0 %3112  ;;  %v3215_v37 = vld [vmem:[#allocation16 + $0x198] sm:$0xff]  ;;  %v3015_v38 = vpop.permute.xlu1 %3014  ;;  %v3198_v40 = vld [vmem:[#allocation16] sm:$0xff] }
0x10ed   : > { %3123 = vst.msk [vmem:[#allocation16 + $0x1f8] sm:$0xff] %vm2693_vm9, %v3113_v36  ;;  %v7910_v39 = vpack.c.bf16 %v3215_v37, %v3214_v35  ;;  %3026 = vst.msk [vmem:[#allocation16 + $0x60] sm:$0xff] %vm2693_vm9, %v3015_v38 }
0x10ef   : > { %7911 = vmatprep.subr.bf16.mxu1 %v7910_v39 }
0x10f0   : > { %v3017_v41 = vpop.permute.xlu0 %3016  ;;  %v3199_v42 = vld [vmem:[#allocation16 + $0x18] sm:$0xff]  ;;  %v3135_v43 = vpop.permute.xlu1 %3134  ;;  %v3218_v7 = vld [vmem:[#allocation16 + $0x1e0] sm:$0xff] }
0x10f1   : > { %3027 = vst.msk [vmem:[#allocation16 + $0x78] sm:$0xff] %vm2693_vm9, %v3017_v41  ;;  %v7912_v44 = vpack.c.bf16 %v3199_v42, %v3198_v40  ;;  %3146 = vst.msk [vmem:[#allocation16 + $0x240] sm:$0xff] %vm2693_vm9, %v3135_v43 }
0x10f3   : > { %7913 = vmatpush3.bf16.msra.mxu1 %v7912_v44 }
0x10f4   : > { %v3137_v45 = vpop.permute.xlu0 %3136  ;;  %v3039_v46 = vpop.permute.xlu1 %3038  ;;  %v3219_v4 = vld [vmem:[#allocation16 + $0x1f8] sm:$0xff]  ;;  %v3202_v16 = vld [vmem:[#allocation16 + $0x60] sm:$0xff] }
0x10f5   : > { %3147 = vst.msk [vmem:[#allocation16 + $0x258] sm:$0xff] %vm2693_vm9, %v3137_v45  ;;  %3050 = vst.msk [vmem:[#allocation16 + $0xc0] sm:$0xff] %vm2693_vm9, %v3039_v46  ;;  %v7918_v15 = vpack.c.bf16 %v3219_v4, %v3218_v7  ;;  %v3237_v7 = vld [vmem:[%s10696_s16 + $0x18] sm:$0xff] }
0x10f8   : > { %v3041_v47 = vpop.permute.xlu0 %3040  ;;  %v3159_v48 = vpop.permute.xlu1 %3158  ;;  %v3203_v17 = vld [vmem:[#allocation16 + $0x78] sm:$0xff]  ;;  %v3222_v22 = vld [vmem:[#allocation16 + $0x240] sm:$0xff] }
0x10f9   : > { %3051 = vst.msk [vmem:[#allocation16 + $0xd8] sm:$0xff] %vm2693_vm9, %v3041_v47  ;;  %3170 = vst.msk [vmem:[#allocation16 + $0x2a0] sm:$0xff] %vm2693_vm9, %v3159_v48  ;;  %v7920_v12 = vpack.c.bf16 %v3203_v17, %v3202_v16  ;;  %v3242_v16 = vld [vmem:[%s10696_s16 + $0x40] sm:$0xff]  ;;  %v3243_v17 = vld [vmem:[%s10696_s16 + $0x48] sm:$0xff] }
0x10fc   : > { %v3161_v49 = vpop.permute.xlu0 %3160  ;;  %v3063_v50 = vpop.permute.xlu1 %3062  ;;  %v3223_v23 = vld [vmem:[#allocation16 + $0x258] sm:$0xff]  ;;  %v3206_v29 = vld [vmem:[#allocation16 + $0xc0] sm:$0xff] }
0x10fd   : > { %3171 = vst.msk [vmem:[#allocation16 + $0x2b8] sm:$0xff] %vm2693_vm9, %v3161_v49  ;;  %3074 = vst.msk [vmem:[#allocation16 + $0x120] sm:$0xff] %vm2693_vm9, %v3063_v50  ;;  %v7926_v28 = vpack.c.bf16 %v3223_v23, %v3222_v22 }
0x1100   : > { %v3065_v51 = vpop.permute.xlu0 %3064  ;;  %v3091_v54 = vpop.permute.xlu1 %3090  ;;  %v3207_v30 = vld [vmem:[#allocation16 + $0xd8] sm:$0xff]  ;;  %v3226_v38 = vld [vmem:[#allocation16 + $0x2a0] sm:$0xff] }
0x1101   : > { %3075 = vst.msk [vmem:[#allocation16 + $0x138] sm:$0xff] %vm2693_vm9, %v3065_v51  ;;  %3100 = vst.msk [vmem:[#allocation16 + $0x1b0] sm:$0xff] %vm2693_vm9, %v3091_v54  ;;  %v7928_v35 = vpack.c.bf16 %v3207_v30, %v3206_v29 }
0x1104   : > { %v3093_v57 = vpop.permute.xlu0 %3092  ;;  %v2995_v58 = vpop.permute.xlu1 %2994  ;;  %v3227_v39 = vld [vmem:[#allocation16 + $0x2b8] sm:$0xff]  ;;  %v3210_v45 = vld [vmem:[#allocation16 + $0x120] sm:$0xff] }
0x1105   : > { %3101 = vst.msk [vmem:[#allocation16 + $0x1c8] sm:$0xff] %vm2693_vm9, %v3093_v57  ;;  %3004 = vst.msk [vmem:[#allocation16 + $0x30] sm:$0xff] %vm2693_vm9, %v2995_v58  ;;  %v7934_v44 = vpack.c.bf16 %v3227_v39, %v3226_v38 }
0x1108   : > { %v2997_v59 = vpop.permute.xlu0 %2996  ;;  %v3115_v60 = vpop.permute.xlu1 %3114  ;;  %v3216_v63 = vld [vmem:[#allocation16 + $0x1b0] sm:$0xff]  ;;  %v3211_v46 = vld [vmem:[#allocation16 + $0x138] sm:$0xff] }
0x1109   : > { %3005 = vst.msk [vmem:[#allocation16 + $0x48] sm:$0xff] %vm2693_vm9, %v2997_v59  ;;  %3124 = vst.msk [vmem:[#allocation16 + $0x210] sm:$0xff] %vm2693_vm9, %v3115_v60  ;;  %v7936_v51 = vpack.c.bf16 %v3211_v46, %v3210_v45 }
0x110c   : > { %v3117_v0 = vpop.permute.xlu0 %3116  ;;  %v3217_v1 = vld [vmem:[#allocation16 + $0x1c8] sm:$0xff]  ;;  %v3019_v2 = vpop.permute.xlu1 %3018  ;;  %v3200_v5 = vld [vmem:[#allocation16 + $0x30] sm:$0xff] }
0x110d   : > { %3125 = vst.msk [vmem:[#allocation16 + $0x228] sm:$0xff] %vm2693_vm9, %v3117_v0  ;;  %v7914_v3 = vpack.c.bf16 %v3217_v1, %v3216_v63  ;;  %3028 = vst.msk [vmem:[#allocation16 + $0x90] sm:$0xff] %vm2693_vm9, %v3019_v2  ;;  %v3234_v0 = vld [vmem:[%s10696_s16] sm:$0xff] }
0x110e   : > { %v3238_v2 = vld [vmem:[%s10696_s16 + $0x20] sm:$0xff] }
0x110f   : > { %7915 = vmatprep.subr.bf16.mxu1 %v7914_v3 }
0x1110   : > { %v3021_v8 = vpop.permute.xlu0 %3020  ;;  %v3201_v9 = vld [vmem:[#allocation16 + $0x48] sm:$0xff]  ;;  %v3139_v13 = vpop.permute.xlu1 %3138  ;;  %v3220_v18 = vld [vmem:[#allocation16 + $0x210] sm:$0xff] }
0x1111   : > { %3029 = vst.msk [vmem:[#allocation16 + $0xa8] sm:$0xff] %vm2693_vm9, %v3021_v8  ;;  %v7916_v14 = vpack.c.bf16 %v3201_v9, %v3200_v5  ;;  %3148 = vst.msk [vmem:[#allocation16 + $0x270] sm:$0xff] %vm2693_vm9, %v3139_v13  ;;  %v3241_v8 = vld [vmem:[%s10696_s16 + $0x38] sm:$0xff]  ;;  %v3240_v13 = vld [vmem:[%s10696_s16 + $0x30] sm:$0xff] }
0x1113   : > { %7917 = vmatpush3.bf16.msra.mxu1 %v7916_v14  ;;  %v3239_v14 = vld [vmem:[%s10696_s16 + $0x28] sm:$0xff] }
0x1114   : > { %v3141_v19 = vpop.permute.xlu0 %3140  ;;  %7919 = vmatprep.subr.bf16.mxu1 %v7918_v15  ;;  %v3221_v11 = vld [vmem:[#allocation16 + $0x228] sm:$0xff]  ;;  %v3043_v61 = vpop.permute.xlu1 %3042  ;;  %v3204_v21 = vld [vmem:[#allocation16 + $0x90] sm:$0xff] }
0x1115   : > { %3149 = vst.msk [vmem:[#allocation16 + $0x288] sm:$0xff] %vm2693_vm9, %v3141_v19  ;;  %v7922_v20 = vpack.c.bf16 %v3221_v11, %v3220_v18  ;;  %3052 = vst.msk [vmem:[#allocation16 + $0xf0] sm:$0xff] %vm2693_vm9, %v3043_v61  ;;  %v3244_v15 = vld [vmem:[%s10696_s16 + $0x50] sm:$0xff]  ;;  %v3245_v18 = vld [vmem:[%s10696_s16 + $0x58] sm:$0xff] }
0x1117   : > { %7921 = vmatpush3.bf16.msra.mxu1 %v7920_v12 }
0x1118   : > { %v3045_v24 = vpop.permute.xlu0 %3044  ;;  %7923 = vmatprep.subr.bf16.mxu1 %v7922_v20  ;;  %v3205_v25 = vld [vmem:[#allocation16 + $0xa8] sm:$0xff]  ;;  %v3163_v26 = vpop.permute.xlu1 %3162  ;;  %v3224_v31 = vld [vmem:[#allocation16 + $0x270] sm:$0xff] }
0x1119   : > { %3053 = vst.msk [vmem:[#allocation16 + $0x108] sm:$0xff] %vm2693_vm9, %v3045_v24  ;;  %v7924_v27 = vpack.c.bf16 %v3205_v25, %v3204_v21  ;;  %3172 = vst.msk [vmem:[#allocation16 + $0x2d0] sm:$0xff] %vm2693_vm9, %v3163_v26 }
0x111b   : > { %7925 = vmatpush3.bf16.msra.mxu1 %v7924_v27 }
0x111c   : > { %v3165_v32 = vpop.permute.xlu0 %3164  ;;  %7927 = vmatprep.subr.bf16.mxu1 %v7926_v28  ;;  %v3225_v33 = vld [vmem:[#allocation16 + $0x288] sm:$0xff]  ;;  %v3067_v34 = vpop.permute.xlu1 %3066  ;;  %v3208_v37 = vld [vmem:[#allocation16 + $0xf0] sm:$0xff] }
0x111d   : > { %3173 = vst.msk [vmem:[#allocation16 + $0x2e8] sm:$0xff] %vm2693_vm9, %v3165_v32  ;;  %v7930_v36 = vpack.c.bf16 %v3225_v33, %v3224_v31  ;;  %3076 = vst.msk [vmem:[#allocation16 + $0x150] sm:$0xff] %vm2693_vm9, %v3067_v34 }
0x111f   : > { %7929 = vmatpush3.bf16.msra.mxu1 %v7928_v35 }
0x1120   : > { %v3069_v40 = vpop.permute.xlu0 %3068  ;;  %7931 = vmatprep.subr.bf16.mxu1 %v7930_v36  ;;  %v3209_v41 = vld [vmem:[#allocation16 + $0x108] sm:$0xff]  ;;  %v3183_v42 = vpop.permute.xlu1 %3182  ;;  %v3228_v47 = vld [vmem:[#allocation16 + $0x2d0] sm:$0xff] }
0x1121   : > { %3077 = vst.msk [vmem:[#allocation16 + $0x168] sm:$0xff] %vm2693_vm9, %v3069_v40  ;;  %v7932_v43 = vpack.c.bf16 %v3209_v41, %v3208_v37  ;;  %3194 = vst.msk [vmem:[#allocation16 + $0x300] sm:$0xff] %vm2693_vm9, %v3183_v42 }
0x1123   : > { %7933 = vmatpush3.bf16.msra.mxu1 %v7932_v43 }
0x1124   : > { %v3185_v48 = vpop.permute.xlu0 %3184  ;;  %7935 = vmatprep.subr.bf16.mxu1 %v7934_v44  ;;  %v3229_v49 = vld [vmem:[#allocation16 + $0x2e8] sm:$0xff]  ;;  %v3187_v50 = vpop.permute.xlu1 %3186  ;;  %v3212_v57 = vld [vmem:[#allocation16 + $0x150] sm:$0xff] }
0x1125   : > { %3195 = vst.msk [vmem:[#allocation16 + $0x318] sm:$0xff] %vm2693_vm9, %v3185_v48  ;;  %v7938_v54 = vpack.c.bf16 %v3229_v49, %v3228_v47  ;;  %3196 = vst.msk [vmem:[#allocation16 + $0x330] sm:$0xff] %vm2693_vm9, %v3187_v50 }
0x1127   : > { %7937 = vmatpush3.bf16.msra.mxu1 %v7936_v51 }
0x1128   : > { %v3189_v58 = vpop.permute.xlu0 %3188  ;;  %7939 = vmatprep.subr.bf16.mxu1 %v7938_v54  ;;  %v3213_v59 = vld [vmem:[#allocation16 + $0x168] sm:$0xff]  ;;  %v3230_v63 = vld [vmem:[#allocation16 + $0x300] sm:$0xff] }
0x1129   : > { %3197 = vst.msk [vmem:[#allocation16 + $0x348] sm:$0xff] %vm2693_vm9, %v3189_v58  ;;  %v7940_v60 = vpack.c.bf16 %v3213_v59, %v3212_v57 }
0x112b   : > { %7941 = vmatpush3.bf16.msra.mxu1 %v7940_v60 }
0x112c   : > { %v3231_v1 = vld [vmem:[#allocation16 + $0x318] sm:$0xff]  ;;  %v3232_v5 = vld [vmem:[#allocation16 + $0x330] sm:$0xff] }
0x112d   : > { %v7942_v3 = vpack.c.bf16 %v3231_v1, %v3230_v63  ;;  %v3509_v1 = vld [vmem:[%s10703_s1 + $0x10] sm:$0xff] }
0x112e   : > { %3347 = vmatmul.mubr.f32.vlgmr.msra.gmra.mrb[10].mxu1 %v3234_v0  ;;  %v3499_v0 = vld [vmem:[%s10702_s0] sm:$0xff] }
0x112f   : > { %7943 = vmatprep.subr.bf16.mxu0 %v7942_v3  ;;  %3351 = vmatprep.mubr.f32.mxu1 %v3238_v2 }
0x1130   : > { %7945 = vmatpush3.bf16.msra.mxu0 %v7942_v3  ;;  %v3233_v4 = vld [vmem:[#allocation16 + $0x348] sm:$0xff] }
0x1131   : > { %v7946_v9 = vpack.c.bf16 %v3233_v4, %v3232_v5  ;;  %v3510_v4 = vld [vmem:[%s10703_s1 + $0x18] sm:$0xff] }
0x1132   : > { %3352 = vmatmul.mubr.f32.gmra.mrb[12].mxu1 %v3237_v7  ;;  %v3507_v7 = vld [vmem:[%s10703_s1] sm:$0xff] }
0x1133   : > { %7947 = vmatprep.subr.bf16.mxu0 %v7946_v9  ;;  %3356 = vmatprep.mubr.f32.mxu1 %v3241_v8  ;;  %v3511_v8 = vld [vmem:[%s10703_s1 + $0x20] sm:$0xff] }
0x1134   : > { %7949 = vmatpush3.bf16.msra.mxu0 %v7946_v9  ;;  %v3508_v9 = vld [vmem:[%s10703_s1 + $0x8] sm:$0xff] }
0x1135   : > { %v3253_v20 = vpop.permute.xlu1 %3252 }
0x1136   : > { %3357 = vmatmul.mubr.f32.gmra.mrb[14].mxu1 %v3240_v13  ;;  %v3513_v13 = vld [vmem:[%s10703_s1 + $0x30] sm:$0xff] }
0x1137   : > { %7544 = vmatmul.mubr.msk.f32.vlgmr.msra.gmra.mrb[18].mxu0 %vm1494_vm13, %v3239_v14  ;;  %3361 = vmatprep.mubr.f32.mxu1 %v3244_v15  ;;  %v3512_v14 = vld [vmem:[%s10703_s1 + $0x28] sm:$0xff]  ;;  %v3514_v15 = vld [vmem:[%s10703_s1 + $0x38] sm:$0xff]  ;;  %s10707_s1 = smov 108  }
0x1138   : > { %7546 = vmatprep.mubr.msk.f32.mxu0 %vm1494_vm13, %v3242_v16 }
0x1139   : > { %v3258_v23 = vpop.permute.xlu0 %3257  ;;  %v3263_v32 = vpop.permute.xlu1 %3262 }
0x113a   : > { %3362 = vmatmul.mubr.f32.gmra.mrb[16].mxu1 %v3243_v17 }
0x113b   : > { %7547 = vmatmul.mubr.msk.f32.gmra.mrb[20].mxu0 %vm1494_vm13, %v3245_v18  ;;  %7557 = vmatprep.mubr.msk.f32.mxu1 %vm1494_vm13, %v3499_v0 }
0x113d   : > { %v3268_v43 = vpop.permute.xlu0 %3267 }
0x1201   : > { %v7294_v19 = vpop.f32.mrb[10].mxu1 }
0x1202   : > { %v7295_v11 = vpop.f32.mrb[11].mxu1 }
0x1203   : > { %v7296_v61 = vadd.f32 %v7295_v11, %v7294_v19 }
0x1205   : > { %v7297_v12 = vpop.f32.mrb[12].mxu1  ;;  %v3349_v28 = vadd.f32 %v7296_v61, %v3253_v20 }
0x1206   : > { %v7298_v21 = vpop.f32.mrb[13].mxu1 }
0x1207   : > { %v7299_v22 = vadd.f32 %v7298_v21, %v7297_v12  ;;  %v3500_v21 = vld [vmem:[%s10702_s0 + $0x8] sm:$0xff] }
0x1209   : > { %v7300_v24 = vpop.f32.mrb[14].mxu1  ;;  %v3354_v25 = vadd.f32 %v7299_v22, %v3258_v23  ;;  %v3501_v22 = vld [vmem:[%s10702_s0 + $0x10] sm:$0xff]  ;;  %v3502_v23 = vld [vmem:[%s10702_s0 + $0x18] sm:$0xff] }
0x120a   : > { %v7301_v26 = vpop.f32.mrb[15].mxu1  ;;  %v7545_v27 = vpop.f32.mrb[18].mxu0 }
0x120b   : > { %v7302_v29 = vadd.f32 %v7301_v26, %v7300_v24  ;;  %v3439_v30 = vadd.f32 %v7545_v27, %v3354_v25  ;;  %v3433_v31 = vpop.f32.mrb[19].mxu0  ;;  %v3503_v24 = vld [vmem:[%s10702_s0 + $0x20] sm:$0xff]  ;;  %v3504_v25 = vld [vmem:[%s10702_s0 + $0x28] sm:$0xff]  ;;  %v3505_v26 = vld [vmem:[%s10702_s0 + $0x30] sm:$0xff] }
0x120c   : > { %v3434_v33 = vadd.f32 %v3433_v31, %v3349_v28  ;;  %v3506_v27 = vld [vmem:[%s10702_s0 + $0x38] sm:$0xff]  ;;  %s10706_s0 = smov 20  }
0x120d   : > { %v3453_v34 = vmax.f32 %v3439_v30, 0.0  ;;  %v7303_v35 = vpop.f32.mrb[16].mxu1  ;;  %v3359_v36 = vadd.f32 %v7302_v29, %v3263_v32 }
0x120e   : > { %v3452_v37 = vmax.f32 %v3434_v33, 0.0  ;;  %v7304_v38 = vpop.f32.mrb[17].mxu1  ;;  %v7548_v39 = vpop.f32.mrb[20].mxu0 }
0x120f   : > { %v3464_v40 = vmul.f32 %v9644_v55, %v3453_v34  ;;  %v7305_v41 = vadd.f32 %v7304_v38, %v7303_v35  ;;  %v3443_v42 = vpop.f32.mrb[21].mxu0 }
0x1210   : > { %v3463_v44 = vmul.f32 %v9644_v55, %v3452_v37  ;;  %v3444_v45 = vadd.f32 %v3443_v42, %v3359_v36 }
0x1211   : > { %v3364_v46 = vadd.f32 %v7305_v41, %v3268_v43  ;;  %3477 = vrot.lane.b32.xlu0 %v3464_v40, %s10701_s28 }
0x1212   : > { %v3454_v47 = vmax.f32 %v3444_v45, 0.0  ;;  %3475 = vrot.lane.b32.xlu1 %v3463_v44, %s10701_s28 }
0x1213   : > { %v3449_v48 = vadd.f32 %v7548_v39, %v3364_v46 }
0x1214   : > { %v3465_v49 = vmul.f32 %v9644_v55, %v3454_v47 }
0x1215   : > { %v3455_v50 = vmax.f32 %v3449_v48, 0.0 }
0x1216   : > { %3479 = vrot.lane.b32.xlu1 %v3465_v49, %s10701_s28 }
0x1217   : > { %v3466_v51 = vmul.f32 %v9644_v55, %v3455_v50 }
0x1219   : > { %3481 = vrot.lane.b32.xlu0 %v3466_v51, %s10701_s28  ;;  %s10704_s28 = smov 116  }
0x1283   : > { %v3478_v54 = vpop.permute.xlu0 %3477 }
0x1284   : > { %3488 = vst.msk [vmem:[#allocation7 + $0x8] sm:$0xff] %vm2677_vm6, %v3478_v54  ;;  %v3476_v57 = vpop.permute.xlu1 %3475 }
0x1285   : > { %3492 = vst.msk [vmem:[#allocation7 + $0x8] sm:$0xff] %vm2680_vm7, %v8834_v10 }
0x1286   : > { %3487 = vst.msk [vmem:[#allocation7] sm:$0xff] %vm2677_vm6, %v3476_v57 }
0x1287   : > { %3491 = vst.msk [vmem:[#allocation7] sm:$0xff] %vm2680_vm7, %v8834_v10 }
0x1288   : > { %v3480_v58 = vpop.permute.xlu1 %3479 }
0x1289   : > { %3489 = vst.msk [vmem:[#allocation7 + $0x10] sm:$0xff] %vm2677_vm6, %v3480_v58 }
0x128a   : > { %3493 = vst.msk [vmem:[#allocation7 + $0x10] sm:$0xff] %vm2680_vm7, %v8834_v10 }
0x128b   : > { %v3482_v55 = vpop.permute.xlu0 %3481 }
0x128c   : > { %3490 = vst.msk [vmem:[#allocation7 + $0x18] sm:$0xff] %vm2677_vm6, %v3482_v55  ;;  %v3496_v59 = vld [vmem:[#allocation7 + $0x8] sm:$0xff]  ;;  %vm10727_vm6 = vcmask 752640  }
0x128d   : > { %3494 = vst.msk [vmem:[#allocation7 + $0x18] sm:$0xff] %vm2680_vm7, %v8834_v10  ;;  %vm10728_vm7 = vmmov %vm10727_vm6 }
0x128e   : > { %v3495_v60 = vld [vmem:[#allocation7] sm:$0xff] }
0x128f   : > { %v8482_v63 = vpack.i.bf16 %v3496_v59, %v3495_v60 }
0x1291   : > { %8483 = vrot.lane.b32.xlu1 %v8482_v63, %s10704_s28  ;;  %v3497_v2 = vld [vmem:[#allocation7 + $0x10] sm:$0xff] }
0x1294   : > { %v3498_v3 = vld [vmem:[#allocation7 + $0x18] sm:$0xff] }
0x1295   : > { %3527 = vperm.xlu1 %8465, %v3509_v1   ;;  %v8487_v5 = vpack.i.bf16 %v3498_v3, %v3497_v2 }
0x1297   : > { %8488 = vrot.lane.b32.xlu0 %v8487_v5, %s10704_s28  ;;  %s10705_s28 = sld [smem:[#allocation48_spill]] }
0x1299   : > { %3517 = vperm.xlu1 %8465, %v3507_v7  }
0x129b   : > { %3532 = vperm.xlu0 %8466, %v3510_v4  }
0x129d   : > { %3537 = vperm.xlu1 %8465, %v3511_v8   ;;  %v7053_v28 = vld [vmem:[%s10705_s28 + $0x18] sm:$0xff]  ;;  %v7054_v29 = vld [vmem:[%s10705_s28 + $0x20] sm:$0xff]  ;;  %v7055_v31 = vld [vmem:[%s10705_s28 + $0x28] sm:$0xff] }
0x129e   : > { %v7958_v30 = vpack.c.bf16 %v7054_v29, %v7053_v28  ;;  %v3700_v32 = vld [vmem:[%s10705_s28] sm:$0xff]  ;;  %v3701_v33 = vld [vmem:[%s10705_s28 + $0x8] sm:$0xff]  ;;  %v3702_v46 = vld [vmem:[%s10705_s28 + $0x10] sm:$0xff] }
0x129f   : > { %3522 = vperm.xlu0 %8466, %v3508_v9   ;;  %v7962_v34 = vpack.c.bf16 %v3701_v33, %v3700_v32  ;;  %v7060_v47 = vld [vmem:[%s10705_s28 + $0x30] sm:$0xff]  ;;  %v7061_v48 = vld [vmem:[%s10705_s28 + $0x38] sm:$0xff]  ;;  %v7062_v60 = vld [vmem:[%s10705_s28 + $0x40] sm:$0xff] }
0x12a0   : > { %7959 = vmatprep.subr.bf16.mxu0 %v7958_v30  ;;  %v7966_v50 = vpack.c.bf16 %v7061_v48, %v7060_v47  ;;  %v7065_v63 = vld [vmem:[%s10705_s28 + $0x48] sm:$0xff]  ;;  %v7066_v0 = vld [vmem:[%s10705_s28 + $0x50] sm:$0xff]  ;;  %v7067_v4 = vld [vmem:[%s10705_s28 + $0x58] sm:$0xff] }
0x12a1   : > { %3547 = vperm.xlu1 %8465, %v3513_v13   ;;  %7961 = vmatpush3.bf16.msra.mxu0 %v7958_v30  ;;  %v7970_v1 = vpack.c.bf16 %v7066_v0, %v7065_v63  ;;  %v4310_v32 = vld [vmem:[%s10713_s8 + $0x8] sm:$0xff]  ;;  %v4311_v33 = vld [vmem:[%s10713_s8 + $0x10] sm:$0xff] }
0x12a2   : > { %7573 = vmatprep.subr.mxu0 %v7055_v31 }
0x12a3   : > { %3542 = vperm.xlu0 %8466, %v3512_v14  }
0x12a5   : > { %7574 = vmatpush3.msra.mxu0 %v7055_v31 }
0x12a6   : > { %7963 = vmatprep.subr.bf16.mxu0 %v7962_v34 }
0x12a7   : > { %3552 = vperm.xlu0 %8466, %v3514_v15   ;;  %v9826_v15 = vld [vmem:[#allocation6 + $0x8] sm:$0xff] }
0x1303   : > { %v8484_v16 = vpop.permute.xlu1 %8483 }
0x1304   : > { %v8486_v17 = vunpack.i.h.bf16 %v8484_v16  ;;  %v8485_v18 = vunpack.i.l.bf16 %v8484_v16  ;;  %v9828_v16 = vld [vmem:[#allocation6] sm:$0xff] }
0x1306   : > { %v7950_v19 = vpack.c.bf16 %v8486_v17, %v8485_v18 }
0x1308   : > { %7951 = vmatprep.subr.bf16.mxu1 %v7950_v19 }
0x1309   : > { %7953 = vmatpush3.bf16.msra.mxu1 %v7950_v19  ;;  %v8489_v11 = vpop.permute.xlu0 %8488 }
0x130a   : > { %v8491_v61 = vunpack.i.h.bf16 %v8489_v11  ;;  %v8490_v12 = vunpack.i.l.bf16 %v8489_v11 }
0x130c   : > { %v7954_v20 = vpack.c.bf16 %v8491_v61, %v8490_v12 }
0x130e   : > { %7955 = vmatprep.subr.bf16.mxu1 %v7954_v20 }
0x130f   : > { %7957 = vmatpush3.bf16.msra.mxu1 %v7954_v20 }
0x1312   : > { %7558 = vmatmul.mubr.msk.f32.vlgmr.msra.gmra.mrb[18].mxu1 %vm1494_vm13, %v3500_v21 }
0x1313   : > { %7560 = vmatprep.mubr.msk.f32.mxu1 %vm1494_vm13, %v3501_v22 }
0x1314   : > { %v3528_v36 = vpop.permute.xlu1 %3527 }
0x1316   : > { %7561 = vmatmul.mubr.msk.f32.gmra.mrb[20].mxu1 %vm1494_vm13, %v3502_v23 }
0x1317   : > { %7563 = vmatprep.mubr.msk.f32.mxu1 %vm1494_vm13, %v3503_v24 }
0x1318   : > { %v3518_v42 = vpop.permute.xlu1 %3517 }
0x131a   : > { %7564 = vmatmul.mubr.msk.f32.gmra.mrb[22].mxu1 %vm1494_vm13, %v3504_v25  ;;  %v3533_v40 = vpop.permute.xlu0 %3532 }
0x131b   : > { %7566 = vmatprep.mubr.msk.f32.mxu1 %vm1494_vm13, %v3505_v26 }
0x131c   : > { %v3538_v58 = vpop.permute.xlu1 %3537 }
0x131e   : > { %7567 = vmatmul.mubr.msk.f32.gmra.mrb[24].mxu1 %vm1494_vm13, %v3506_v27  ;;  %v3523_v57 = vpop.permute.xlu0 %3522 }
0x131f   : > { %4397 = vmatprep.mubr.f32.mxu1 %v4310_v32 }
0x1320   : > { %v3548_v3 = vpop.permute.xlu1 %3547 }
0x1322   : > { %v3543_v2 = vpop.permute.xlu0 %3542 }
0x1326   : > { %v3553_v8 = vpop.permute.xlu0 %3552 }
0x13e5   : > { %v7559_v35 = vpop.f32.mrb[18].mxu1 }
0x13e6   : > { %v3661_v37 = vpop.f32.mrb[19].mxu1  ;;  %v3667_v55 = vadd.f32 %v7559_v35, %v3523_v57  ;;  %v4315_v35 = vld [vmem:[%s10714_s9] sm:$0xff] }
0x13e7   : > { %v3662_v44 = vadd.f32 %v3661_v37, %v3518_v42 }
0x13e9   : > { %v7562_v38 = vpop.f32.mrb[20].mxu1 }
0x13ea   : > { %v3671_v39 = vpop.f32.mrb[21].mxu1  ;;  %v3677_v43 = vadd.f32 %v7562_v38, %v3533_v40 }
0x13eb   : > { %v3672_v41 = vadd.f32 %v3671_v39, %v3528_v36 }
0x13ed   : > { %v7565_v45 = vpop.f32.mrb[22].mxu1  ;;  %7575 = vmatprep.mubr.msk.f32.mxu0 %vm2693_vm9, %v3672_v41 }
0x13ee   : > { %v3681_v49 = vpop.f32.mrb[23].mxu1  ;;  %7576 = vmatmul.mubr.msk.f32.vlgmr.msra.gmra.mrb[22].mxu0 %vm2693_vm9, %v3677_v43  ;;  %v3687_v5 = vadd.f32 %v7565_v45, %v3543_v2 }
0x13ef   : > { %7584 = vmatprep.mubr.msk.f32.mxu0 %vm2693_vm9, %v3662_v44  ;;  %7965 = vmatpush3.bf16.msra.mxu0 %v7962_v34  ;;  %v3682_v59 = vadd.f32 %v3681_v49, %v3538_v58  ;;  %v4316_v34 = vld [vmem:[%s10714_s9 + $0x8] sm:$0xff] }
0x13f0   : > { %7582 = vmatprep.subr.mxu0 %v3702_v46 }
0x13f1   : > { %v7568_v51 = vpop.f32.mrb[24].mxu1 }
0x13f2   : > { %v3691_v54 = vpop.f32.mrb[25].mxu1  ;;  %v3697_v9 = vadd.f32 %v7568_v51, %v3553_v8 }
0x13f3   : > { %7583 = vmatpush3.msra.mxu0 %v3702_v46  ;;  %v3692_v7 = vadd.f32 %v3691_v54, %v3548_v3 }
0x13f4   : > { %7967 = vmatprep.subr.bf16.mxu0 %v7966_v50 }
0x13f6   : > { %7585 = vmatmul.mubr.msk.f32.vlgmr.msra.gmra.mrb[22].mxu0 %vm2693_vm9, %v3667_v55 }
0x13f7   : > { %7593 = vmatprep.mubr.msk.f32.mxu0 %vm2693_vm9, %v3682_v59  ;;  %7969 = vmatpush3.bf16.msra.mxu0 %v7966_v50 }
0x13f8   : > { %7591 = vmatprep.subr.mxu0 %v7062_v60 }
0x13fb   : > { %7592 = vmatpush3.msra.mxu0 %v7062_v60 }
0x13fc   : > { %7971 = vmatprep.subr.bf16.mxu0 %v7970_v1 }
0x13fe   : > { %7594 = vmatmul.mubr.msk.f32.vlgmr.msra.gmra.mrb[22].mxu0 %vm2693_vm9, %v3687_v5 }
0x13ff   : > { %7602 = vmatprep.mubr.msk.f32.mxu0 %vm2693_vm9, %v3692_v7  ;;  %7973 = vmatpush3.bf16.msra.mxu0 %v7970_v1 }
0x1400   : > { %7600 = vmatprep.subr.mxu0 %v7067_v4 }
0x1403   : > { %7601 = vmatpush3.msra.mxu0 %v7067_v4 }
0x1406   : > { %7603 = vmatmul.mubr.msk.f32.vlgmr.msra.gmra.mrb[22].mxu0 %vm2693_vm9, %v3697_v9 }
0x1407   : > { %7613 = vmatprep.mubr.msk.f32.mxu0 %vm1494_vm13, %v4311_v33 }
0x14d9   : > { %v7604_v13 = vpop.f32.mrb[22].mxu0 }
0x14da   : > { %4049 = vrot.lane.b32.xlu0 %v7604_v13, %s10706_s0  ;;  %v4032_v14 = vpop.f32.mrb[23].mxu0 }
0x14db   : > { %4047 = vrot.lane.b32.xlu1 %v4032_v14, %s10706_s0 }
0x14de   : > { %4171 = vrot.lane.b32.xlu0 %v9826_v15, %s10707_s1 }
0x14df   : > { %4169 = vrot.lane.b32.xlu1 %v9828_v16, %s10707_s1 }
0x14e2   : > { %4075 = vrot.lane.b32.xlu0 %v9826_v15, %s10708_s3 }
0x14e3   : > { %4073 = vrot.lane.b32.xlu1 %v9828_v16, %s10708_s3 }
0x14e6   : > { %4195 = vrot.lane.b32.xlu0 %v9826_v15, %s10709_s4 }
0x14e7   : > { %4193 = vrot.lane.b32.xlu1 %v9828_v16, %s10709_s4 }
0x14ea   : > { %4099 = vrot.lane.b32.xlu0 %v9826_v15, %s10710_s5 }
0x14eb   : > { %4097 = vrot.lane.b32.xlu1 %v9828_v16, %s10710_s5 }
0x14ee   : > { %4219 = vrot.lane.b32.xlu0 %v9826_v15, %s10711_s6 }
0x14ef   : > { %4217 = vrot.lane.b32.xlu1 %v9828_v16, %s10711_s6 }
0x14f2   : > { %4123 = vrot.lane.b32.xlu0 %v9826_v15, %s10699_s2 }
0x14f3   : > { %4121 = vrot.lane.b32.xlu1 %v9828_v16, %s10699_s2 }
0x14f6   : > { %4243 = vrot.lane.b32.xlu0 %v9826_v15, %s10712_s7 }
0x14f7   : > { %4241 = vrot.lane.b32.xlu1 %v9828_v16, %s10712_s7 }
0x154c   : > { %v4050_v17 = vpop.permute.xlu0 %4049 }
0x154d   : > { %4054 = vst.msk [vmem:[#allocation10 + $0x8] sm:$0xff] %vm2112_vm10, %v4050_v17  ;;  %v4048_v18 = vpop.permute.xlu1 %4047 }
0x154e   : > { %4056 = vst.msk [vmem:[#allocation10 + $0x8] sm:$0xff] %vm2114_vm8, %v8834_v10 }
0x154f   : > { %4053 = vst.msk [vmem:[#allocation10] sm:$0xff] %vm2112_vm10, %v4048_v18 }
0x1550   : > { %4055 = vst.msk [vmem:[#allocation10] sm:$0xff] %vm2114_vm8, %v8834_v10  ;;  %v4172_v19 = vpop.permute.xlu0 %4171 }
0x1551   : > { %4176 = vst.msk [vmem:[#allocation16 + $0x1c8] sm:$0xff] %vm2121_vm2, %v4172_v19  ;;  %v4170_v11 = vpop.permute.xlu1 %4169 }
0x1552   : > { %4175 = vst.msk [vmem:[#allocation16 + $0x1b0] sm:$0xff] %vm2121_vm2, %v4170_v11 }
0x1554   : > { %v4076_v61 = vpop.permute.xlu0 %4075 }
0x1555   : > { %v4154_v12 = vld [vmem:[#allocation10 + $0x8] sm:$0xff]  ;;  %4080 = vst.msk [vmem:[#allocation16 + $0x48] sm:$0xff] %vm2121_vm2, %v4076_v61  ;;  %v4074_v20 = vpop.permute.xlu1 %4073 }
0x1556   : > { %4159 = vrot.lane.b32.xlu0 %v4154_v12, %s10707_s1  ;;  %4079 = vst.msk [vmem:[#allocation16 + $0x30] sm:$0xff] %vm2121_vm2, %v4074_v20 }
0x1557   : > { %v4153_v21 = vld [vmem:[#allocation10] sm:$0xff] }
0x1558   : > { %4157 = vrot.lane.b32.xlu1 %v4153_v21, %s10707_s1  ;;  %v4196_v22 = vpop.permute.xlu0 %4195  ;;  %v4292_v48 = vld [vmem:[#allocation16 + $0x1c8] sm:$0xff] }
0x1559   : > { %4200 = vst.msk [vmem:[#allocation16 + $0x228] sm:$0xff] %vm2121_vm2, %v4196_v22  ;;  %v4194_v23 = vpop.permute.xlu1 %4193  ;;  %v4291_v47 = vld [vmem:[#allocation16 + $0x1b0] sm:$0xff] }
0x155a   : > { %4063 = vrot.lane.b32.xlu0 %v4154_v12, %s10708_s3  ;;  %4199 = vst.msk [vmem:[#allocation16 + $0x210] sm:$0xff] %vm2121_vm2, %v4194_v23  ;;  %v7978_v54 = vpack.c.bf16 %v4292_v48, %v4291_v47  ;;  %v4309_v48 = vld [vmem:[%s10713_s8] sm:$0xff] }
0x155c   : > { %4061 = vrot.lane.b32.xlu1 %v4153_v21, %s10708_s3  ;;  %v4100_v24 = vpop.permute.xlu0 %4099  ;;  %v4276_v58 = vld [vmem:[#allocation16 + $0x48] sm:$0xff] }
0x155d   : > { %4104 = vst.msk [vmem:[#allocation16 + $0xa8] sm:$0xff] %vm2121_vm2, %v4100_v24  ;;  %v4098_v25 = vpop.permute.xlu1 %4097  ;;  %v4275_v57 = vld [vmem:[#allocation16 + $0x30] sm:$0xff] }
0x155e   : > { %4183 = vrot.lane.b32.xlu0 %v4154_v12, %s10709_s4  ;;  %4103 = vst.msk [vmem:[#allocation16 + $0x90] sm:$0xff] %vm2121_vm2, %v4098_v25  ;;  %v7980_v0 = vpack.c.bf16 %v4276_v58, %v4275_v57  ;;  %v4312_v57 = vld [vmem:[%s10713_s8 + $0x18] sm:$0xff] }
0x1560   : > { %4181 = vrot.lane.b32.xlu1 %v4153_v21, %s10709_s4  ;;  %v4220_v26 = vpop.permute.xlu0 %4219  ;;  %v4296_v7 = vld [vmem:[#allocation16 + $0x228] sm:$0xff] }
0x1561   : > { %4224 = vst.msk [vmem:[#allocation16 + $0x288] sm:$0xff] %vm2121_vm2, %v4220_v26  ;;  %v4218_v27 = vpop.permute.xlu1 %4217  ;;  %v4295_v5 = vld [vmem:[#allocation16 + $0x210] sm:$0xff] }
0x1562   : > { %4087 = vrot.lane.b32.xlu0 %v4154_v12, %s10710_s5  ;;  %4223 = vst.msk [vmem:[#allocation16 + $0x270] sm:$0xff] %vm2121_vm2, %v4218_v27  ;;  %v7986_v13 = vpack.c.bf16 %v4296_v7, %v4295_v5 }
0x1564   : > { %4085 = vrot.lane.b32.xlu1 %v4153_v21, %s10710_s5  ;;  %v4124_v28 = vpop.permute.xlu0 %4123 }
0x1565   : > { %4128 = vst.msk [vmem:[#allocation16 + $0x108] sm:$0xff] %vm2121_vm2, %v4124_v28  ;;  %v4122_v29 = vpop.permute.xlu1 %4121  ;;  %v4279_v14 = vld [vmem:[#allocation16 + $0x90] sm:$0xff] }
0x1566   : > { %4207 = vrot.lane.b32.xlu0 %v4154_v12, %s10711_s6  ;;  %4127 = vst.msk [vmem:[#allocation16 + $0xf0] sm:$0xff] %vm2121_vm2, %v4122_v29 }
0x1568   : > { %4205 = vrot.lane.b32.xlu1 %v4153_v21, %s10711_s6  ;;  %v4244_v30 = vpop.permute.xlu0 %4243  ;;  %v4300_v22 = vld [vmem:[#allocation16 + $0x288] sm:$0xff] }
0x1569   : > { %4248 = vst.msk [vmem:[#allocation16 + $0x2e8] sm:$0xff] %vm2121_vm2, %v4244_v30  ;;  %v4242_v31 = vpop.permute.xlu1 %4241 }
0x156a   : > { %4111 = vrot.lane.b32.xlu0 %v4154_v12, %s10699_s2  ;;  %4247 = vst.msk [vmem:[#allocation16 + $0x2d0] sm:$0xff] %vm2121_vm2, %v4242_v31 }
0x156c   : > { %4109 = vrot.lane.b32.xlu1 %v4153_v21, %s10699_s2  ;;  %v4284_v28 = vld [vmem:[#allocation16 + $0x108] sm:$0xff] }
0x156d   : > { %v4283_v27 = vld [vmem:[#allocation16 + $0xf0] sm:$0xff] }
0x156e   : > { %4231 = vrot.lane.b32.xlu0 %v4154_v12, %s10712_s7  ;;  %v7996_v33 = vpack.c.bf16 %v4284_v28, %v4283_v27 }
0x1570   : > { %4229 = vrot.lane.b32.xlu1 %v4153_v21, %s10712_s7 }
0x1572   : > { %4135 = vrot.lane.b32.xlu0 %v4154_v12, %s10700_s26 }
0x1574   : > { %4133 = vrot.lane.b32.xlu1 %v4153_v21, %s10700_s26 }
0x1576   : > { %4147 = vrot.lane.b32.xlu0 %v9826_v15, %s10700_s26 }
0x1578   : > { %4145 = vrot.lane.b32.xlu1 %v9828_v16, %s10700_s26 }
0x157a   : > { %4255 = vrot.lane.b32.xlu0 %v4154_v12, %s10715_s11 }
0x157c   : > { %4253 = vrot.lane.b32.xlu1 %v4153_v21, %s10715_s11  ;;  %v4299_v21 = vld [vmem:[#allocation16 + $0x270] sm:$0xff] }
0x157d   : > { %v7994_v26 = vpack.c.bf16 %v4300_v22, %v4299_v21 }
0x157e   : > { %4267 = vrot.lane.b32.xlu0 %v9826_v15, %s10715_s11  ;;  %v4280_v15 = vld [vmem:[#allocation16 + $0xa8] sm:$0xff] }
0x157f   : > { %v7988_v11 = vpack.c.bf16 %v4280_v15, %v4279_v14 }
0x1580   : > { %4265 = vrot.lane.b32.xlu1 %v9828_v16, %s10715_s11 }
0x1582   : > { %4324 = vperm.xlu0 %8466, %v4316_v34  }
0x1584   : > { %4319 = vperm.xlu1 %8465, %v4315_v35  }
0x15c8   : > { %v4160_v36 = vpop.permute.xlu0 %4159 }
0x15c9   : > { %4164 = vst.msk [vmem:[#allocation16 + $0x198] sm:$0xff] %vm2121_vm2, %v4160_v36 }
0x15ca   : > { %v4158_v37 = vpop.permute.xlu1 %4157 }
0x15cb   : > { %4163 = vst.msk [vmem:[#allocation16 + $0x180] sm:$0xff] %vm2121_vm2, %v4158_v37  ;;  %v4303_v37 = vld [vmem:[#allocation16 + $0x2d0] sm:$0xff] }
0x15cc   : > { %v4064_v38 = vpop.permute.xlu0 %4063 }
0x15cd   : > { %4068 = vst.msk [vmem:[#allocation16 + $0x18] sm:$0xff] %vm2121_vm2, %v4064_v38  ;;  %v4304_v38 = vld [vmem:[#allocation16 + $0x2e8] sm:$0xff] }
0x15ce   : > { %v4062_v39 = vpop.permute.xlu1 %4061 }
0x15cf   : > { %4067 = vst.msk [vmem:[#allocation16] sm:$0xff] %vm2121_vm2, %v4062_v39 }
0x15d0   : > { %v4184_v40 = vpop.permute.xlu0 %4183  ;;  %v4290_v41 = vld [vmem:[#allocation16 + $0x198] sm:$0xff] }
0x15d1   : > { %4188 = vst.msk [vmem:[#allocation16 + $0x1f8] sm:$0xff] %vm2121_vm2, %v4184_v40 }
0x15d2   : > { %v4182_v42 = vpop.permute.xlu1 %4181  ;;  %v4289_v43 = vld [vmem:[#allocation16 + $0x180] sm:$0xff] }
0x15d3   : > { %4187 = vst.msk [vmem:[#allocation16 + $0x1e0] sm:$0xff] %vm2121_vm2, %v4182_v42  ;;  %v7974_v44 = vpack.c.bf16 %v4290_v41, %v4289_v43  ;;  %v8002_v42 = vpack.c.bf16 %v4304_v38, %v4303_v37 }
0x15d4   : > { %v4088_v45 = vpop.permute.xlu0 %4087  ;;  %v4274_v46 = vld [vmem:[#allocation16 + $0x18] sm:$0xff] }
0x15d5   : > { %7975 = vmatprep.subr.bf16.mxu1 %v7974_v44  ;;  %4092 = vst.msk [vmem:[#allocation16 + $0x78] sm:$0xff] %vm2121_vm2, %v4088_v45 }
0x15d6   : > { %v4086_v49 = vpop.permute.xlu1 %4085  ;;  %v4273_v50 = vld [vmem:[#allocation16] sm:$0xff] }
0x15d7   : > { %4091 = vst.msk [vmem:[#allocation16 + $0x60] sm:$0xff] %vm2121_vm2, %v4086_v49  ;;  %v7976_v51 = vpack.c.bf16 %v4274_v46, %v4273_v50 }
0x15d8   : > { %v4208_v55 = vpop.permute.xlu0 %4207  ;;  %v4294_v59 = vld [vmem:[#allocation16 + $0x1f8] sm:$0xff] }
0x15d9   : > { %7977 = vmatpush3.bf16.msra.mxu1 %v7976_v51  ;;  %4212 = vst.msk [vmem:[#allocation16 + $0x258] sm:$0xff] %vm2121_vm2, %v4208_v55  ;;  %v4313_v51 = vld [vmem:[%s10713_s8 + $0x20] sm:$0xff] }
0x15da   : > { %7979 = vmatprep.subr.bf16.mxu1 %v7978_v54  ;;  %v4206_v60 = vpop.permute.xlu1 %4205  ;;  %v4293_v63 = vld [vmem:[#allocation16 + $0x1e0] sm:$0xff] }
0x15db   : > { %4211 = vst.msk [vmem:[#allocation16 + $0x240] sm:$0xff] %vm2121_vm2, %v4206_v60  ;;  %v7982_v1 = vpack.c.bf16 %v4294_v59, %v4293_v63  ;;  %v4314_v60 = vld [vmem:[%s10713_s8 + $0x28] sm:$0xff]  ;;  %s10716_s8 = sld [smem:[#allocation51_spill]] }
0x15dc   : > { %v4112_v2 = vpop.permute.xlu0 %4111  ;;  %v4278_v3 = vld [vmem:[#allocation16 + $0x78] sm:$0xff] }
0x15dd   : > { %7981 = vmatpush3.bf16.msra.mxu1 %v7980_v0  ;;  %4116 = vst.msk [vmem:[#allocation16 + $0xd8] sm:$0xff] %vm2121_vm2, %v4112_v2 }
0x15de   : > { %7983 = vmatprep.subr.bf16.mxu1 %v7982_v1  ;;  %v4110_v4 = vpop.permute.xlu1 %4109  ;;  %v4277_v8 = vld [vmem:[#allocation16 + $0x60] sm:$0xff] }
0x15df   : > { %4115 = vst.msk [vmem:[#allocation16 + $0xc0] sm:$0xff] %vm2121_vm2, %v4110_v4  ;;  %v7984_v9 = vpack.c.bf16 %v4278_v3, %v4277_v8 }
0x15e0   : > { %v4232_v16 = vpop.permute.xlu0 %4231  ;;  %v4298_v17 = vld [vmem:[#allocation16 + $0x258] sm:$0xff] }
0x15e1   : > { %7985 = vmatpush3.bf16.msra.mxu1 %v7984_v9  ;;  %4236 = vst.msk [vmem:[#allocation16 + $0x2b8] sm:$0xff] %vm2121_vm2, %v4232_v16  ;;  %v9938_v16 = vld [vmem:[%s9024_s24] ss:$0 sm:$0xff] }
0x15e2   : > { %7987 = vmatprep.subr.bf16.mxu1 %v7986_v13  ;;  %v4230_v18 = vpop.permute.xlu1 %4229  ;;  %v4297_v19 = vld [vmem:[#allocation16 + $0x240] sm:$0xff] }
0x15e3   : > { %4235 = vst.msk [vmem:[#allocation16 + $0x2a0] sm:$0xff] %vm2121_vm2, %v4230_v18  ;;  %v7990_v61 = vpack.c.bf16 %v4298_v17, %v4297_v19 }
0x15e4   : > { %v4136_v12 = vpop.permute.xlu0 %4135  ;;  %v4282_v20 = vld [vmem:[#allocation16 + $0xd8] sm:$0xff] }
0x15e5   : > { %7989 = vmatpush3.bf16.msra.mxu1 %v7988_v11  ;;  %4140 = vst.msk [vmem:[#allocation16 + $0x138] sm:$0xff] %vm2121_vm2, %v4136_v12 }
0x15e6   : > { %7991 = vmatprep.subr.bf16.mxu1 %v7990_v61  ;;  %v4134_v23 = vpop.permute.xlu1 %4133  ;;  %v4281_v24 = vld [vmem:[#allocation16 + $0xc0] sm:$0xff] }
0x15e7   : > { %4139 = vst.msk [vmem:[#allocation16 + $0x120] sm:$0xff] %vm2121_vm2, %v4134_v23  ;;  %v7992_v25 = vpack.c.bf16 %v4282_v20, %v4281_v24  ;;  %v4635_v23 = vld [vmem:[#allocation24 + $0x8] sm:$0xff] }
0x15e8   : > { %v4148_v29 = vpop.permute.xlu0 %4147  ;;  %v4302_v30 = vld [vmem:[#allocation16 + $0x2b8] sm:$0xff]  ;;  %v4639_v24 = vld [vmem:[%s10716_s8 + $0x8] sm:$0xff] }
0x15e9   : > { %7993 = vmatpush3.bf16.msra.mxu1 %v7992_v25  ;;  %4152 = vst.msk [vmem:[#allocation16 + $0x168] sm:$0xff] %vm2121_vm2, %v4148_v29  ;;  %v4638_v25 = vld [vmem:[%s10716_s8] sm:$0xff] }
0x15ea   : > { %7995 = vmatprep.subr.bf16.mxu1 %v7994_v26  ;;  %v4146_v31 = vpop.permute.xlu1 %4145  ;;  %v4301_v32 = vld [vmem:[#allocation16 + $0x2a0] sm:$0xff] }
0x15eb   : > { %4151 = vst.msk [vmem:[#allocation16 + $0x150] sm:$0xff] %vm2121_vm2, %v4146_v31  ;;  %v7998_v34 = vpack.c.bf16 %v4302_v30, %v4301_v32 }
0x15ec   : > { %v4256_v35 = vpop.permute.xlu0 %4255  ;;  %v4286_v36 = vld [vmem:[#allocation16 + $0x138] sm:$0xff] }
0x15ed   : > { %7997 = vmatpush3.bf16.msra.mxu1 %v7996_v33  ;;  %4260 = vst.msk [vmem:[#allocation16 + $0x318] sm:$0xff] %vm2121_vm2, %v4256_v35 }
0x15ee   : > { %7999 = vmatprep.subr.bf16.mxu1 %v7998_v34  ;;  %v4254_v39 = vpop.permute.xlu1 %4253  ;;  %v4285_v40 = vld [vmem:[#allocation16 + $0x120] sm:$0xff] }
0x15ef   : > { %4259 = vst.msk [vmem:[#allocation16 + $0x300] sm:$0xff] %vm2121_vm2, %v4254_v39  ;;  %v8000_v41 = vpack.c.bf16 %v4286_v36, %v4285_v40 }
0x15f0   : > { %v4268_v43 = vpop.permute.xlu0 %4267  ;;  %v4288_v44 = vld [vmem:[#allocation16 + $0x168] sm:$0xff] }
0x15f1   : > { %8001 = vmatpush3.bf16.msra.mxu1 %v8000_v41  ;;  %4272 = vst.msk [vmem:[#allocation16 + $0x348] sm:$0xff] %vm2121_vm2, %v4268_v43 }
0x15f2   : > { %8003 = vmatprep.subr.bf16.mxu1 %v8002_v42  ;;  %v4266_v45 = vpop.permute.xlu1 %4265  ;;  %v4287_v46 = vld [vmem:[#allocation16 + $0x150] sm:$0xff] }
0x15f3   : > { %4271 = vst.msk [vmem:[#allocation16 + $0x330] sm:$0xff] %vm2121_vm2, %v4266_v45  ;;  %v8004_v47 = vpack.c.bf16 %v4288_v44, %v4287_v46 }
0x15f4   : > { %v4306_v49 = vld [vmem:[#allocation16 + $0x318] sm:$0xff] }
0x15f5   : > { %8005 = vmatpush3.bf16.msra.mxu1 %v8004_v47 }
0x15f6   : > { %v4305_v50 = vld [vmem:[#allocation16 + $0x300] sm:$0xff] }
0x15f7   : > { %v8006_v54 = vpack.c.bf16 %v4306_v49, %v4305_v50 }
0x15f8   : > { %4398 = vmatmul.mubr.f32.vlgmr.msra.gmra.mrb[26].mxu1 %v4309_v48  ;;  %v4308_v58 = vld [vmem:[#allocation16 + $0x348] sm:$0xff] }
0x15f9   : > { %8007 = vmatprep.subr.bf16.mxu0 %v8006_v54  ;;  %4402 = vmatprep.mubr.f32.mxu1 %v4313_v51 }
0x15fa   : > { %8009 = vmatpush3.bf16.msra.mxu0 %v8006_v54  ;;  %v4307_v55 = vld [vmem:[#allocation16 + $0x330] sm:$0xff] }
0x15fb   : > { %v8010_v59 = vpack.c.bf16 %v4308_v58, %v4307_v55 }
0x15fc   : > { %4403 = vmatmul.mubr.f32.gmra.mrb[28].mxu1 %v4312_v57 }
0x15fd   : > { %8011 = vmatprep.subr.bf16.mxu0 %v8010_v59 }
0x15fe   : > { %8013 = vmatpush3.bf16.msra.mxu0 %v8010_v59 }
0x15ff   : > { %8014 = vmatprep.subr.bf16.mxu0 %v8828_v6 }
0x1601   : > { %7614 = vmatmul.mubr.msk.f32.vlgmr.msra.gmra.mrb[24].mxu0 %vm1494_vm13, %v4314_v60  ;;  %v4325_v7 = vpop.permute.xlu0 %4324 }
0x1602   : > { %7073 = vmatprep.mubr.msk.f32.mxu0 %vm2442_vm14, %v4635_v23 }
0x1603   : > { %v4320_v4 = vpop.permute.xlu1 %4319 }
0x16cb   : > { %v7378_v63 = vpop.f32.mrb[26].mxu1 }
0x16cc   : > { %v7379_v0 = vpop.f32.mrb[27].mxu1 }
0x16cd   : > { %v7380_v1 = vadd.f32 %v7379_v0, %v7378_v63 }
0x16cf   : > { %v7381_v2 = vpop.f32.mrb[28].mxu1  ;;  %v4400_v13 = vadd.f32 %v7380_v1, %v4320_v4 }
0x16d0   : > { %v7382_v3 = vpop.f32.mrb[29].mxu1 }
0x16d1   : > { %v7383_v5 = vadd.f32 %v7382_v3, %v7381_v2 }
0x16d3   : > { %v4405_v8 = vadd.f32 %v7383_v5, %v4325_v7 }
0x16d4   : > { %v7615_v9 = vpop.f32.mrb[24].mxu0 }
0x16d5   : > { %v4480_v14 = vadd.f32 %v7615_v9, %v4405_v8  ;;  %v4474_v15 = vpop.f32.mrb[25].mxu0 }
0x16d6   : > { %v4475_v17 = vadd.f32 %v4474_v15, %v4400_v13 }
0x16d7   : > { %v4484_v18 = vmax.f32 %v4480_v14, 0.0 }
0x16d8   : > { %v4483_v19 = vmax.f32 %v4475_v17, 0.0  ;;  %v4634_v17 = vld [vmem:[#allocation24] sm:$0xff] }
0x16d9   : > { %v4493_v11 = vmul.f32 %v9938_v16, %v4484_v18  ;;  %v4637_v18 = vld [vmem:[#allocation24 + $0x18] sm:$0xff] }
0x16da   : > { %v4492_v61 = vmul.f32 %v9938_v16, %v4483_v19  ;;  %v4636_v19 = vld [vmem:[#allocation24 + $0x10] sm:$0xff] }
0x16db   : > { %4500 = vrot.lane.b32.xlu0 %v4493_v11, %s10706_s0 }
0x16dc   : > { %4498 = vrot.lane.b32.xlu1 %v4492_v61, %s10706_s0 }
0x174d   : > { %v4501_v12 = vpop.permute.xlu0 %4500 }
0x174e   : > { %4505 = vst.msk [vmem:[#allocation12 + $0x8] sm:$0xff] %vm2112_vm10, %v4501_v12  ;;  %v4499_v20 = vpop.permute.xlu1 %4498 }
0x174f   : > { %4507 = vst.msk [vmem:[#allocation12 + $0x8] sm:$0xff] %vm2114_vm8, %v8834_v10 }
0x1750   : > { %4504 = vst.msk [vmem:[#allocation12] sm:$0xff] %vm2112_vm10, %v4499_v20 }
0x1751   : > { %4506 = vst.msk [vmem:[#allocation12] sm:$0xff] %vm2114_vm8, %v8834_v10 }
0x1756   : > { %v4509_v21 = vld [vmem:[#allocation12 + $0x8] sm:$0xff] }
0x1757   : > { %4514 = vrot.lane.b32.xlu0 %v4509_v21, %s10708_s3 }
0x1758   : > { %v4508_v22 = vld [vmem:[#allocation12] sm:$0xff] }
0x1759   : > { %4512 = vrot.lane.b32.xlu1 %v4508_v22, %s10708_s3  ;;  %s10721_s3 = smov 93  }
0x175b   : > { %4526 = vrot.lane.b32.xlu0 %v4509_v21, %s10710_s5 }
0x175d   : > { %4524 = vrot.lane.b32.xlu1 %v4508_v22, %s10710_s5  ;;  %s10717_s5 = sld [smem:[#allocation53_spill]] }
0x175f   : > { %4538 = vrot.lane.b32.xlu0 %v4509_v21, %s10699_s2 }
0x1761   : > { %4536 = vrot.lane.b32.xlu1 %v4508_v22, %s10699_s2  ;;  %s10724_s2 = smov 75  }
0x1763   : > { %4550 = vrot.lane.b32.xlu0 %v4509_v21, %s10700_s26 }
0x1765   : > { %4548 = vrot.lane.b32.xlu1 %v4508_v22, %s10700_s26 }
0x1767   : > { %4562 = vrot.lane.b32.xlu0 %v4509_v21, %s10707_s1 }
0x1769   : > { %4560 = vrot.lane.b32.xlu1 %v4508_v22, %s10707_s1 }
0x176b   : > { %4574 = vrot.lane.b32.xlu0 %v4509_v21, %s10709_s4 }
0x176d   : > { %4572 = vrot.lane.b32.xlu1 %v4508_v22, %s10709_s4  ;;  %s10719_s4 = sld [smem:[#allocation54_spill]] }
0x176f   : > { %4586 = vrot.lane.b32.xlu0 %v4509_v21, %s10711_s6 }
0x1771   : > { %4584 = vrot.lane.b32.xlu1 %v4508_v22, %s10711_s6  ;;  %s10718_s6 = sld [smem:[#allocation52_spill]] }
0x1773   : > { %4598 = vrot.lane.b32.xlu0 %v4509_v21, %s10712_s7 }
0x1775   : > { %4596 = vrot.lane.b32.xlu1 %v4508_v22, %s10712_s7  ;;  %s10723_s7 = smov 91  }
0x1777   : > { %4610 = vrot.lane.b32.xlu0 %v4509_v21, %s10715_s11 }
0x1779   : > { %4608 = vrot.lane.b32.xlu1 %v4508_v22, %s10715_s11  ;;  %s10720_s11 = smov 36  }
0x177b   : > { %4647 = vperm.xlu0 %8466, %v4639_v24  }
0x177d   : > { %4642 = vperm.xlu1 %8465, %v4638_v25  }
0x17c9   : > { %v4515_v26 = vpop.permute.xlu0 %4514 }
0x17ca   : > { %4519 = vst.msk [vmem:[#allocation16 + $0x18] sm:$0xff] %vm2121_vm2, %v4515_v26 }
0x17cb   : > { %v4513_v27 = vpop.permute.xlu1 %4512 }
0x17cc   : > { %4518 = vst.msk [vmem:[#allocation16] sm:$0xff] %vm2121_vm2, %v4513_v27 }
0x17cd   : > { %v4527_v28 = vpop.permute.xlu0 %4526 }
0x17ce   : > { %4531 = vst.msk [vmem:[#allocation16 + $0x48] sm:$0xff] %vm2121_vm2, %v4527_v28 }
0x17cf   : > { %v4525_v29 = vpop.permute.xlu1 %4524 }
0x17d0   : > { %4530 = vst.msk [vmem:[#allocation16 + $0x30] sm:$0xff] %vm2121_vm2, %v4525_v29  ;;  %v4763_v29 = vld [vmem:[%s10717_s5 + $0x8] sm:$0xff] }
0x17d1   : > { %v4539_v30 = vpop.permute.xlu0 %4538  ;;  %v4617_v31 = vld [vmem:[#allocation16 + $0x18] sm:$0xff] }
0x17d2   : > { %4543 = vst.msk [vmem:[#allocation16 + $0x78] sm:$0xff] %vm2121_vm2, %v4539_v30  ;;  %v4764_v30 = vld [vmem:[%s10717_s5 + $0x10] sm:$0xff] }
0x17d3   : > { %v4537_v32 = vpop.permute.xlu1 %4536  ;;  %v4616_v33 = vld [vmem:[#allocation16] sm:$0xff] }
0x17d4   : > { %4542 = vst.msk [vmem:[#allocation16 + $0x60] sm:$0xff] %vm2121_vm2, %v4537_v32  ;;  %v8015_v34 = vpack.c.bf16 %v4617_v31, %v4616_v33  ;;  %v10004_v31 = vld [vmem:[#allocation5 + $0x10] sm:$0xff]  ;;  %v4758_v33 = vld [vmem:[%s10718_s6] sm:$0xff] }
0x17d5   : > { %v4551_v35 = vpop.permute.xlu0 %4550  ;;  %v4619_v36 = vld [vmem:[#allocation16 + $0x48] sm:$0xff]  ;;  %7620 = vmatprep.mubr.msk.f32.mxu1 %vm2442_vm14, %v4758_v33 }
0x17d6   : > { %8016 = vmatpush1.bf16.msra.mxu0 %v8015_v34  ;;  %4555 = vst.msk [vmem:[#allocation16 + $0xa8] sm:$0xff] %vm2121_vm2, %v4551_v35 }
0x17d7   : > { %v4549_v37 = vpop.permute.xlu1 %4548  ;;  %8017 = vmatprep.subr.bf16.mxu0 %v8828_v6  ;;  %v4618_v38 = vld [vmem:[#allocation16 + $0x30] sm:$0xff] }
0x17d8   : > { %4554 = vst.msk [vmem:[#allocation16 + $0x90] sm:$0xff] %vm2121_vm2, %v4549_v37  ;;  %v8018_v39 = vpack.c.bf16 %v4619_v36, %v4618_v38  ;;  %v4762_v37 = vld [vmem:[%s10717_s5] sm:$0xff] }
0x17d9   : > { %v4563_v40 = vpop.permute.xlu0 %4562  ;;  %v4621_v41 = vld [vmem:[#allocation16 + $0x78] sm:$0xff] }
0x17da   : > { %8019 = vmatpush1.bf16.msra.mxu0 %v8018_v39  ;;  %4567 = vst.msk [vmem:[#allocation16 + $0xd8] sm:$0xff] %vm2121_vm2, %v4563_v40  ;;  %v4765_v39 = vld [vmem:[%s10717_s5 + $0x18] sm:$0xff]  ;;  %s10734_s5 = sld [smem:[#allocation56_spill]] }
0x17db   : > { %v4561_v42 = vpop.permute.xlu1 %4560  ;;  %8020 = vmatprep.subr.bf16.mxu0 %v8828_v6  ;;  %v4620_v43 = vld [vmem:[#allocation16 + $0x60] sm:$0xff] }
0x17dc   : > { %4566 = vst.msk [vmem:[#allocation16 + $0xc0] sm:$0xff] %vm2121_vm2, %v4561_v42  ;;  %v8021_v44 = vpack.c.bf16 %v4621_v41, %v4620_v43  ;;  %v10023_v41 = vld [vmem:[#allocation5 + $0x8] sm:$0xff] }
0x17dd   : > { %v4575_v45 = vpop.permute.xlu0 %4574  ;;  %v4623_v46 = vld [vmem:[#allocation16 + $0xa8] sm:$0xff] }
0x17de   : > { %8022 = vmatpush1.bf16.msra.mxu0 %v8021_v44  ;;  %4579 = vst.msk [vmem:[#allocation16 + $0x108] sm:$0xff] %vm2121_vm2, %v4575_v45  ;;  %v7081_v44 = vld [vmem:[%s10719_s4 + $0xf8] sm:$0xff]  ;;  %v7084_v45 = vld [vmem:[%s10719_s4 + $0x110] sm:$0xff] }
0x17df   : > { %v4573_v47 = vpop.permute.xlu1 %4572  ;;  %8023 = vmatprep.subr.bf16.mxu0 %v8828_v6  ;;  %v4622_v48 = vld [vmem:[#allocation16 + $0x90] sm:$0xff] }
0x17e0   : > { %4578 = vst.msk [vmem:[#allocation16 + $0xf0] sm:$0xff] %vm2121_vm2, %v4573_v47  ;;  %v8024_v49 = vpack.c.bf16 %v4623_v46, %v4622_v48 }
0x17e1   : > { %v4587_v50 = vpop.permute.xlu0 %4586  ;;  %v4625_v51 = vld [vmem:[#allocation16 + $0xd8] sm:$0xff] }
0x17e2   : > { %8025 = vmatpush1.bf16.msra.mxu0 %v8024_v49  ;;  %4591 = vst.msk [vmem:[#allocation16 + $0x138] sm:$0xff] %vm2121_vm2, %v4587_v50  ;;  %v8045_v49 = vpack.c.bf16 %v7084_v45, %v7081_v44  ;;  %v7080_v50 = vld [vmem:[%s10719_s4 + $0xf0] sm:$0xff]  ;;  %v7109_v44 = vld [vmem:[%s10719_s4 + $0x1d8] sm:$0xff]  ;;  %v4892_v45 = vld [vmem:[%s10719_s4 + $0x8] sm:$0xff] }
0x17e3   : > { %v4585_v54 = vpop.permute.xlu1 %4584  ;;  %8026 = vmatprep.subr.bf16.mxu0 %v8828_v6  ;;  %v4624_v57 = vld [vmem:[#allocation16 + $0xc0] sm:$0xff] }
0x17e4   : > { %4590 = vst.msk [vmem:[#allocation16 + $0x120] sm:$0xff] %vm2121_vm2, %v4585_v54  ;;  %v8027_v58 = vpack.c.bf16 %v4625_v51, %v4624_v57  ;;  %v7083_v51 = vld [vmem:[%s10719_s4 + $0x108] sm:$0xff]  ;;  %v7090_v57 = vld [vmem:[%s10719_s4 + $0x140] sm:$0xff] }
0x17e5   : > { %v4599_v55 = vpop.permute.xlu0 %4598  ;;  %v4627_v59 = vld [vmem:[#allocation16 + $0x108] sm:$0xff] }
0x17e6   : > { %8028 = vmatpush1.bf16.msra.mxu0 %v8027_v58  ;;  %4603 = vst.msk [vmem:[#allocation16 + $0x168] sm:$0xff] %vm2121_vm2, %v4599_v55  ;;  %v7087_v54 = vld [vmem:[%s10719_s4 + $0x128] sm:$0xff]  ;;  %v8047_v55 = vpack.c.bf16 %v7083_v51, %v7080_v50  ;;  %v4894_v50 = vld [vmem:[%s10719_s4 + $0x18] sm:$0xff] }
0x17e7   : > { %v4597_v60 = vpop.permute.xlu1 %4596  ;;  %8029 = vmatprep.subr.bf16.mxu0 %v8828_v6  ;;  %v4626_v63 = vld [vmem:[#allocation16 + $0xf0] sm:$0xff]  ;;  %v4759_v58 = vld [vmem:[%s10718_s6 + $0x8] sm:$0xff]  ;;  %v4898_v51 = vld [vmem:[%s10719_s4 + $0x38] sm:$0xff] }
0x17e8   : > { %4602 = vst.msk [vmem:[#allocation16 + $0x150] sm:$0xff] %vm2121_vm2, %v4597_v60  ;;  %v8030_v0 = vpack.c.bf16 %v4627_v59, %v4626_v63  ;;  %v4760_v59 = vld [vmem:[%s10718_s6 + $0x10] sm:$0xff]  ;;  %v8049_v60 = vpack.c.bf16 %v7090_v57, %v7087_v54  ;;  %v7086_v63 = vld [vmem:[%s10719_s4 + $0x120] sm:$0xff] }
0x17e9   : > { %v4611_v1 = vpop.permute.xlu0 %4610  ;;  %v4629_v2 = vld [vmem:[#allocation16 + $0x138] sm:$0xff]  ;;  %v4901_v54 = vld [vmem:[%s10719_s4 + $0x50] sm:$0xff] }
0x17ea   : > { %8031 = vmatpush1.bf16.msra.mxu0 %v8030_v0  ;;  %4615 = vst.msk [vmem:[#allocation16 + $0x198] sm:$0xff] %vm2121_vm2, %v4611_v1  ;;  %v7089_v0 = vld [vmem:[%s10719_s4 + $0x138] sm:$0xff] }
0x17eb   : > { %v4609_v3 = vpop.permute.xlu1 %4608  ;;  %8032 = vmatprep.subr.bf16.mxu0 %v8828_v6  ;;  %v4628_v5 = vld [vmem:[#allocation16 + $0x120] sm:$0xff]  ;;  %v7093_v1 = vld [vmem:[%s10719_s4 + $0x158] sm:$0xff] }
0x17ec   : > { %4614 = vst.msk [vmem:[#allocation16 + $0x180] sm:$0xff] %vm2121_vm2, %v4609_v3  ;;  %v8033_v7 = vpack.c.bf16 %v4629_v2, %v4628_v5  ;;  %v7096_v2 = vld [vmem:[%s10719_s4 + $0x170] sm:$0xff]  ;;  %v4761_v3 = vld [vmem:[%s10718_s6 + $0x18] sm:$0xff]  ;;  %v8051_v5 = vpack.c.bf16 %v7089_v0, %v7086_v63  ;;  %v4907_v63 = vld [vmem:[%s10719_s4 + $0x80] sm:$0xff] }
0x17ed   : > { %v4631_v4 = vld [vmem:[#allocation16 + $0x168] sm:$0xff] }
0x17ee   : > { %8034 = vmatpush1.bf16.msra.mxu0 %v8033_v7  ;;  %v8053_v7 = vpack.c.bf16 %v7096_v2, %v7093_v1  ;;  %v4903_v2 = vld [vmem:[%s10719_s4 + $0x60] sm:$0xff] }
0x17ef   : > { %8035 = vmatprep.subr.bf16.mxu0 %v8828_v6  ;;  %v4630_v8 = vld [vmem:[#allocation16 + $0x150] sm:$0xff] }
0x17f0   : > { %v8036_v9 = vpack.c.bf16 %v4631_v4, %v4630_v8  ;;  %v7092_v4 = vld [vmem:[%s10719_s4 + $0x150] sm:$0xff]  ;;  %v7095_v8 = vld [vmem:[%s10719_s4 + $0x168] sm:$0xff] }
0x17f1   : > { %v4633_v13 = vld [vmem:[#allocation16 + $0x198] sm:$0xff] }
0x17f2   : > { %8037 = vmatpush1.bf16.msra.mxu0 %v8036_v9  ;;  %v7099_v9 = vld [vmem:[%s10719_s4 + $0x188] sm:$0xff] }
0x17f3   : > { %8038 = vmatprep.subr.bf16.mxu0 %v8828_v6  ;;  %v4632_v14 = vld [vmem:[#allocation16 + $0x180] sm:$0xff] }
0x17f4   : > { %v8039_v15 = vpack.c.bf16 %v4633_v13, %v4632_v14  ;;  %v7102_v13 = vld [vmem:[%s10719_s4 + $0x1a0] sm:$0xff]  ;;  %v8055_v14 = vpack.c.bf16 %v7095_v8, %v7092_v4 }
0x17f6   : > { %8040 = vmatpush1.bf16.msra.mxu0 %v8039_v15  ;;  %v8057_v15 = vpack.c.bf16 %v7102_v13, %v7099_v9  ;;  %v4909_v9 = vld [vmem:[%s10719_s4 + $0x90] sm:$0xff]  ;;  %v4912_v13 = vld [vmem:[%s10719_s4 + $0xa8] sm:$0xff] }
0x17f9   : > { %4721 = vmatmul.mubr.f32.vlgmr.msra.gmra.mrb[26].mxu0 %v4634_v17  ;;  %v7098_v17 = vld [vmem:[%s10719_s4 + $0x180] sm:$0xff] }
0x17fa   : > { %7074 = vmatprep.mubr.msk.f32.mxu0 %vm2442_vm14, %v4637_v18  ;;  %v4648_v22 = vpop.permute.xlu0 %4647  ;;  %v7101_v18 = vld [vmem:[%s10719_s4 + $0x198] sm:$0xff] }
0x17fc   : > { %v4643_v11 = vpop.permute.xlu1 %4642 }
0x17fd   : > { %4726 = vmatmul.mubr.f32.gmra.mrb[28].mxu0 %v4636_v19  ;;  %v7105_v19 = vld [vmem:[%s10719_s4 + $0x1b8] sm:$0xff] }
0x18cc   : > { %v4722_v61 = vpop.f32.mrb[26].mxu0 }
0x18cd   : > { %v4723_v12 = vadd.f32 %v4722_v61, %v4643_v11  ;;  %v4724_v20 = vpop.f32.mrb[27].mxu0  ;;  %v7108_v11 = vld [vmem:[%s10719_s4 + $0x1d0] sm:$0xff]  ;;  %v8059_v61 = vpack.c.bf16 %v7101_v18, %v7098_v17  ;;  %v8094_v17 = vpack.c.bf16 %v4912_v13, %v4909_v9  ;;  %v7138_v13 = vld [vmem:[%s10719_s4 + $0x2a0] sm:$0xff] }
0x18ce   : > { %v7104_v20 = vld [vmem:[%s10719_s4 + $0x1b0] sm:$0xff] }
0x18cf   : > { %v4731_v21 = vmax.f32 %v4723_v12, 0.0  ;;  %v8061_v12 = vpack.c.bf16 %v7108_v11, %v7105_v19  ;;  %v4915_v19 = vld [vmem:[%s10719_s4 + $0xc0] sm:$0xff]  ;;  %v4918_v11 = vld [vmem:[%s10719_s4 + $0xd8] sm:$0xff] }
0x18d0   : > { %v4727_v23 = vpop.f32.mrb[28].mxu0 }
0x18d1   : > { %v4740_v24 = vmul.f32 %v9938_v16, %v4731_v21  ;;  %v4728_v25 = vadd.f32 %v4727_v23, %v4648_v22  ;;  %v4729_v26 = vpop.f32.mrb[29].mxu0  ;;  %v7107_v21 = vld [vmem:[%s10719_s4 + $0x1c8] sm:$0xff]  ;;  %v7082_v23 = vld [vmem:[%s10719_s4 + $0x100] sm:$0xff] }
0x18d2   : > { %v8063_v22 = vpack.c.bf16 %v7107_v21, %v7104_v20  ;;  %v4896_v20 = vld [vmem:[%s10719_s4 + $0x28] sm:$0xff] }
0x18d3   : > { %v4732_v27 = vmax.f32 %v4728_v25, 0.0  ;;  %4746 = vrot.lane.b32.xlu1 %v4740_v24, %s10706_s0  ;;  %v7085_v24 = vld [vmem:[%s10719_s4 + $0x118] sm:$0xff] }
0x18d4   : > { %v8066_v26 = vpack.c.bf16 %v7085_v24, %v7082_v23  ;;  %v4899_v24 = vld [vmem:[%s10719_s4 + $0x40] sm:$0xff] }
0x18d5   : > { %v4741_v28 = vmul.f32 %v9938_v16, %v4732_v27 }
0x18d7   : > { %4748 = vrot.lane.b32.xlu0 %v4741_v28, %s10706_s0  ;;  %s10725_s0 = smov 74  }
0x18db   : > { %4773 = vperm.xlu0 %8466, %v4763_v29   ;;  %v7088_v29 = vld [vmem:[%s10719_s4 + $0x130] sm:$0xff] }
0x18df   : > { %4778 = vperm.xlu0 %8466, %v4764_v30   ;;  %v7091_v30 = vld [vmem:[%s10719_s4 + $0x148] sm:$0xff] }
0x18e3   : > { %5645 = vrot.lane.b32.xlu0 %v10004_v31, %s10698_s10 }
0x1945   : > { %v4747_v32 = vpop.permute.xlu1 %4746 }
0x1946   : > { %4752 = vst.msk [vmem:[#allocation14] sm:$0xff] %vm2112_vm10, %v4747_v32 }
0x1947   : > { %4754 = vst.msk [vmem:[#allocation14] sm:$0xff] %vm2114_vm8, %v8834_v10 }
0x1949   : > { %v4749_v16 = vpop.permute.xlu0 %4748 }
0x194a   : > { %4753 = vst.msk [vmem:[#allocation14 + $0x8] sm:$0xff] %vm2112_vm10, %v4749_v16  ;;  %v8069_v16 = vpack.c.bf16 %v7091_v30, %v7088_v29  ;;  %v4908_v29 = vld [vmem:[%s10719_s4 + $0x88] sm:$0xff]  ;;  %v4911_v30 = vld [vmem:[%s10719_s4 + $0xa0] sm:$0xff] }
0x194b   : > { %4755 = vst.msk [vmem:[#allocation14 + $0x8] sm:$0xff] %vm2114_vm8, %v8834_v10  ;;  %vm10729_vm8 = vcmask 744448  }
0x194c   : > { %vm10730_vm10 = vmmov %vm10729_vm8 }
0x194e   : > { %v4756_v34 = vld [vmem:[#allocation14] sm:$0xff] }
0x1952   : > { %v4757_v35 = vld [vmem:[#allocation14 + $0x8] sm:$0xff] }
0x1953   : > { %v8492_v36 = vpack.i.bf16 %v4757_v35, %v4756_v34  ;;  %v7094_v34 = vld [vmem:[%s10719_s4 + $0x160] sm:$0xff]  ;;  %v7097_v35 = vld [vmem:[%s10719_s4 + $0x178] sm:$0xff] }
0x1955   : > { %8493 = vrot.lane.b32.xlu1 %v8492_v36, %s10707_s1  ;;  %v8072_v36 = vpack.c.bf16 %v7097_v35, %v7094_v34  ;;  %v4917_v35 = vld [vmem:[%s10719_s4 + $0xd0] sm:$0xff]  ;;  %s10722_s1 = smov 92  }
0x1959   : > { %4768 = vperm.xlu1 %8465, %v4762_v37   ;;  %v7100_v37 = vld [vmem:[%s10719_s4 + $0x190] sm:$0xff] }
0x195a   : > { %v10018_v38 = vpop.permute.xlu0 %4773 }
0x195d   : > { %4783 = vperm.xlu1 %8465, %v4765_v39  }
0x195e   : > { %v10021_v40 = vpop.permute.xlu0 %4778 }
0x1961   : > { %5643 = vrot.lane.b32.xlu1 %v10023_v41, %s10698_s10 }
0x1962   : > { %v10027_v42 = vpop.permute.xlu0 %5645 }
0x1963   : > { %5654 = vst.msk [vmem:[#allocation16 + $0x28] sm:$0xff] %vm1494_vm13, %v10027_v42 }
0x19c7   : > { %v8494_v43 = vpop.permute.xlu1 %8493 }
0x19c8   : > { %v8496_v46 = vunpack.i.h.bf16 %v8494_v43  ;;  %v8495_v47 = vunpack.i.l.bf16 %v8494_v43  ;;  %v7106_v43 = vld [vmem:[%s10719_s4 + $0x1c0] sm:$0xff] }
0x19ca   : > { %v8041_v48 = vpack.c.bf16 %v8496_v46, %v8495_v47  ;;  %v4895_v46 = vld [vmem:[%s10719_s4 + $0x20] sm:$0xff]  ;;  %v8078_v47 = vpack.c.bf16 %v7109_v44, %v7106_v43 }
0x19cb   : > { %v7114_v44 = vld [vmem:[%s10719_s4 + $0x1e0] sm:$0xff] }
0x19cc   : > { %8042 = vmatprep.subr.bf16.mxu1 %v8041_v48 }
0x19cd   : > { %8044 = vmatpush3.bf16.msra.mxu1 %v8041_v48  ;;  %v8080_v48 = vpack.c.bf16 %v4895_v46, %v4892_v45  ;;  %v7117_v45 = vld [vmem:[%s10719_s4 + $0x1f8] sm:$0xff] }
0x19ce   : > { %8046 = vmatprep.subr.bf16.mxu1 %v8045_v49  ;;  %v4891_v49 = vld [vmem:[%s10719_s4] sm:$0xff]  ;;  %v7121_v46 = vld [vmem:[%s10719_s4 + $0x218] sm:$0xff] }
0x19cf   : > { %v8082_v57 = vpack.c.bf16 %v4894_v50, %v4891_v49  ;;  %v7120_v50 = vld [vmem:[%s10719_s4 + $0x210] sm:$0xff] }
0x19d0   : > { %7621 = vmatmul.mubr.msk.f32.vlgmr.msra.gmra.mrb[30].mxu1 %vm2442_vm14, %v4759_v58  ;;  %v8084_v58 = vpack.c.bf16 %v4901_v54, %v4898_v51  ;;  %v7123_v51 = vld [vmem:[%s10719_s4 + $0x228] sm:$0xff] }
0x19d1   : > { %7623 = vmatprep.mubr.msk.f32.mxu1 %vm2442_vm14, %v4760_v59  ;;  %8048 = vmatpush1.bf16.msra.mxu1 %v8047_v55  ;;  %v4897_v55 = vld [vmem:[%s10719_s4 + $0x30] sm:$0xff]  ;;  %v4900_v59 = vld [vmem:[%s10719_s4 + $0x48] sm:$0xff] }
0x19d2   : > { %8050 = vmatprep.subr.bf16.mxu1 %v8049_v60  ;;  %v4904_v60 = vld [vmem:[%s10719_s4 + $0x68] sm:$0xff]  ;;  %v8086_v0 = vpack.c.bf16 %v4900_v59, %v4897_v55  ;;  %v7126_v59 = vld [vmem:[%s10719_s4 + $0x240] sm:$0xff] }
0x19d3   : > { %v8088_v1 = vpack.c.bf16 %v4907_v63, %v4904_v60  ;;  %v7127_v54 = vld [vmem:[%s10719_s4 + $0x248] sm:$0xff]  ;;  %v7129_v60 = vld [vmem:[%s10719_s4 + $0x258] sm:$0xff] }
0x19d4   : > { %7624 = vmatmul.mubr.msk.f32.gmra.mrb[32].mxu1 %vm2442_vm14, %v4761_v3  ;;  %v4906_v3 = vld [vmem:[%s10719_s4 + $0x78] sm:$0xff] }
0x19d5   : > { %8052 = vmatpush1.bf16.msra.mxu1 %v8051_v5  ;;  %5019 = vmatprep.mubr.f32.mxu1 %v8834_v10  ;;  %v4910_v5 = vld [vmem:[%s10719_s4 + $0x98] sm:$0xff]  ;;  %v8090_v4 = vpack.c.bf16 %v4906_v3, %v4903_v2  ;;  %v7132_v3 = vld [vmem:[%s10719_s4 + $0x270] sm:$0xff] }
0x19d6   : > { %8054 = vmatprep.subr.bf16.mxu1 %v8053_v7  ;;  %v4913_v7 = vld [vmem:[%s10719_s4 + $0xb0] sm:$0xff]  ;;  %v7133_v63 = vld [vmem:[%s10719_s4 + $0x278] sm:$0xff] }
0x19d7   : > { %v8092_v8 = vpack.c.bf16 %v4913_v7, %v4910_v5  ;;  %v7135_v5 = vld [vmem:[%s10719_s4 + $0x288] sm:$0xff] }
0x19d8   : > { %v4769_v21 = vpop.permute.xlu1 %4768  ;;  %v7139_v7 = vld [vmem:[%s10719_s4 + $0x2a8] sm:$0xff] }
0x19d9   : > { %8056 = vmatpush1.bf16.msra.mxu1 %v8055_v14  ;;  %v4916_v14 = vld [vmem:[%s10719_s4 + $0xc8] sm:$0xff] }
0x19da   : > { %8058 = vmatprep.subr.bf16.mxu1 %v8057_v15  ;;  %v4919_v15 = vld [vmem:[%s10719_s4 + $0xe0] sm:$0xff] }
0x19db   : > { %v8096_v18 = vpack.c.bf16 %v4919_v15, %v4916_v14  ;;  %v7141_v14 = vld [vmem:[%s10719_s4 + $0x2b8] sm:$0xff] }
0x19dc   : > { %v8133_v15 = vpack.c.bf16 %v7141_v14, %v7138_v13  ;;  %v7154_v13 = vld [vmem:[%s10719_s4 + $0x310] sm:$0xff]  ;;  %v7157_v14 = vld [vmem:[%s10719_s4 + $0x328] sm:$0xff] }
0x19dd   : > { %8060 = vmatpush1.bf16.msra.mxu1 %v8059_v61  ;;  %v8098_v61 = vpack.c.bf16 %v4918_v11, %v4915_v19 }
0x19de   : > { %8062 = vmatprep.subr.bf16.mxu1 %v8061_v12  ;;  %v4893_v12 = vld [vmem:[%s10719_s4 + $0x10] sm:$0xff] }
0x19e1   : > { %8064 = vmatpush1.bf16.msra.mxu1 %v8063_v22  ;;  %v8101_v22 = vpack.c.bf16 %v4896_v20, %v4893_v12  ;;  %v7125_v12 = vld [vmem:[%s10719_s4 + $0x238] sm:$0xff] }
0x19e2   : > { %8065 = vmatprep.subr.bf16.mxu1 %v8828_v6 }
0x1aa3   : > { %v7622_v25 = vpop.f32.mrb[30].mxu1 }
0x1aa4   : > { %v4878_v27 = vadd.f32 %v7622_v25, %v10018_v38  ;;  %v10062_v28 = vpop.f32.mrb[31].mxu1  ;;  %v7103_v38 = vld [vmem:[%s10719_s4 + $0x1a8] sm:$0xff]  ;;  %v4902_v25 = vld [vmem:[%s10719_s4 + $0x58] sm:$0xff] }
0x1aa5   : > { %v8075_v39 = vpack.c.bf16 %v7103_v38, %v7100_v37  ;;  %v4873_v23 = vadd.f32 %v10062_v28, %v4769_v21  ;;  %v7115_v37 = vld [vmem:[%s10719_s4 + $0x1e8] sm:$0xff]  ;;  %v7118_v38 = vld [vmem:[%s10719_s4 + $0x200] sm:$0xff]  ;;  %v7128_v21 = vld [vmem:[%s10719_s4 + $0x250] sm:$0xff] }
0x1aa6   : > { %7110 = vmatmul.mubr.msk.f32.vlgmr.msra.gmra.mrb[34].mxu1 %vm2121_vm2, %v4878_v27  ;;  %v8115_v43 = vpack.c.bf16 %v7118_v38, %v7115_v37 }
0x1aa7   : > { %8067 = vmatpush3.bf16.msra.mxu1 %v8066_v26  ;;  %v10067_v32 = vpop.f32.mrb[32].mxu1  ;;  %7646 = vmatprep.mubr.msk.f32.mxu1 %vm8835_vm0, %v8834_v10  ;;  %v8104_v26 = vpack.c.bf16 %v4902_v25, %v4899_v24  ;;  %v7140_v25 = vld [vmem:[%s10719_s4 + $0x2b0] sm:$0xff] }
0x1aa8   : > { %v10071_v33 = vpop.f32.mrb[33].mxu1  ;;  %8068 = vmatprep.subr.bf16.mxu1 %v8828_v6 }
0x1aa9   : > { %v4883_v11 = vadd.f32 %v10071_v33, %v10021_v40  ;;  %v7134_v33 = vld [vmem:[%s10719_s4 + $0x280] sm:$0xff] }
0x1aab   : > { %8070 = vmatpush3.bf16.msra.mxu1 %v8069_v16  ;;  %v4914_v16 = vld [vmem:[%s10719_s4 + $0xb8] sm:$0xff] }
0x1aac   : > { %8071 = vmatprep.subr.bf16.mxu1 %v8828_v6  ;;  %v8110_v34 = vpack.c.bf16 %v4914_v16, %v4911_v30  ;;  %v7146_v16 = vld [vmem:[%s10719_s4 + $0x2d0] sm:$0xff] }
0x1aaf   : > { %8073 = vmatpush3.bf16.msra.mxu1 %v8072_v36  ;;  %v4920_v36 = vld [vmem:[%s10719_s4 + $0xe8] sm:$0xff] }
0x1ab0   : > { %8074 = vmatprep.subr.bf16.mxu1 %v8828_v6 }
0x1ab3   : > { %8076 = vmatpush3.bf16.msra.mxu1 %v8075_v39  ;;  %v8113_v39 = vpack.c.bf16 %v4920_v36, %v4917_v35  ;;  %v7153_v35 = vld [vmem:[%s10719_s4 + $0x308] sm:$0xff]  ;;  %v7156_v36 = vld [vmem:[%s10719_s4 + $0x320] sm:$0xff] }
0x1ab4   : > { %8077 = vmatprep.subr.bf16.mxu1 %v8828_v6  ;;  %v8154_v38 = vpack.c.bf16 %v7156_v36, %v7153_v35 }
0x1ab7   : > { %8079 = vmatpush3.bf16.msra.mxu1 %v8078_v47  ;;  %v7124_v47 = vld [vmem:[%s10719_s4 + $0x230] sm:$0xff] }
0x1ab8   : > { %8081 = vmatprep.subr.bf16.mxu1 %v8080_v48  ;;  %v8117_v48 = vpack.c.bf16 %v7117_v45, %v7114_v44  ;;  %v8119_v49 = vpack.c.bf16 %v7124_v47, %v7121_v46  ;;  %v7159_v44 = vld [vmem:[%s10719_s4 + $0x338] sm:$0xff]  ;;  %v7162_v45 = vld [vmem:[%s10719_s4 + $0x350] sm:$0xff] }
0x1ab9   : > { %v8158_v47 = vpack.c.bf16 %v7162_v45, %v7159_v44 }
0x1aba   : > { %7647 = vmatmul.mubr.msk.f32.vlgmr.msra.gmra.mrb[36].mxu1 %vm2121_vm2, %v4878_v27  ;;  %v4905_v27 = vld [vmem:[%s10719_s4 + $0x70] sm:$0xff] }
0x1abb   : > { %8083 = vmatpush1.bf16.msra.mxu1 %v8082_v57  ;;  %5163 = vmatprep.mubr.f32.mxu1 %v8834_v10  ;;  %v8107_v28 = vpack.c.bf16 %v4908_v29, %v4905_v27  ;;  %v7130_v57 = vld [vmem:[%s10719_s4 + $0x260] sm:$0xff]  ;;  %v7147_v27 = vld [vmem:[%s10719_s4 + $0x2d8] sm:$0xff]  ;;  %v7150_v29 = vld [vmem:[%s10719_s4 + $0x2f0] sm:$0xff] }
0x1abc   : > { %8085 = vmatprep.subr.bf16.mxu1 %v8084_v58  ;;  %v8121_v58 = vpack.c.bf16 %v7123_v51, %v7120_v50  ;;  %v8123_v55 = vpack.c.bf16 %v7130_v57, %v7127_v54  ;;  %v8150_v30 = vpack.c.bf16 %v7150_v29, %v7147_v27  ;;  %v7165_v50 = vld [vmem:[%s10719_s4 + $0x368] sm:$0xff]  ;;  %v7168_v51 = vld [vmem:[%s10719_s4 + $0x380] sm:$0xff] }
0x1abd   : > { %v8162_v57 = vpack.c.bf16 %v7168_v51, %v7165_v50 }
0x1abf   : > { %8087 = vmatpush1.bf16.msra.mxu1 %v8086_v0  ;;  %v7136_v0 = vld [vmem:[%s10719_s4 + $0x290] sm:$0xff] }
0x1ac0   : > { %8089 = vmatprep.subr.bf16.mxu1 %v8088_v1  ;;  %v8125_v1 = vpack.c.bf16 %v7129_v60, %v7126_v59  ;;  %v8127_v2 = vpack.c.bf16 %v7136_v0, %v7133_v63  ;;  %v7171_v59 = vld [vmem:[%s10719_s4 + $0x398] sm:$0xff]  ;;  %v7174_v60 = vld [vmem:[%s10719_s4 + $0x3b0] sm:$0xff] }
0x1ac1   : > { %v8166_v0 = vpack.c.bf16 %v7174_v60, %v7171_v59 }
0x1ac3   : > { %8091 = vmatpush1.bf16.msra.mxu1 %v8090_v4  ;;  %v7142_v4 = vld [vmem:[%s10719_s4 + $0x2c0] sm:$0xff] }
0x1ac4   : > { %8093 = vmatprep.subr.bf16.mxu1 %v8092_v8  ;;  %v8129_v8 = vpack.c.bf16 %v7135_v5, %v7132_v3  ;;  %v8131_v9 = vpack.c.bf16 %v7142_v4, %v7139_v7  ;;  %v7148_v5 = vld [vmem:[%s10719_s4 + $0x2e0] sm:$0xff]  ;;  %v7151_v7 = vld [vmem:[%s10719_s4 + $0x2f8] sm:$0xff]  ;;  %v4784_v4 = vpop.permute.xlu1 %4783 }
0x1ac7   : > { %8095 = vmatpush1.bf16.msra.mxu1 %v8094_v17  ;;  %v7116_v17 = vld [vmem:[%s10719_s4 + $0x1f0] sm:$0xff] }
0x1ac8   : > { %8097 = vmatprep.subr.bf16.mxu1 %v8096_v18  ;;  %v7119_v18 = vld [vmem:[%s10719_s4 + $0x208] sm:$0xff] }
0x1ac9   : > { %v8136_v19 = vpack.c.bf16 %v7119_v18, %v7116_v17  ;;  %v7160_v17 = vld [vmem:[%s10719_s4 + $0x340] sm:$0xff]  ;;  %v7163_v18 = vld [vmem:[%s10719_s4 + $0x358] sm:$0xff] }
0x1acb   : > { %8099 = vmatpush1.bf16.msra.mxu1 %v8098_v61  ;;  %v7122_v61 = vld [vmem:[%s10719_s4 + $0x220] sm:$0xff] }
0x1acc   : > { %8100 = vmatprep.subr.bf16.mxu1 %v8828_v6  ;;  %v8139_v20 = vpack.c.bf16 %v7125_v12, %v7122_v61  ;;  %v7172_v12 = vld [vmem:[%s10719_s4 + $0x3a0] sm:$0xff] }
0x1ace   : > { %7112 = vmatmul.mubr.msk.f32.vlgmr.msra.gmra.mrb[34].mxu1 %vm2121_vm2, %v4873_v23 }
0x1acf   : > { %8102 = vmatpush3.bf16.msra.mxu1 %v8101_v22  ;;  %7669 = vmatprep.mubr.msk.f32.mxu1 %vm8835_vm0, %v8834_v10  ;;  %v7131_v22 = vld [vmem:[%s10719_s4 + $0x268] sm:$0xff] }
0x1ad0   : > { %8103 = vmatprep.subr.bf16.mxu1 %v8828_v6  ;;  %v8142_v40 = vpack.c.bf16 %v7131_v22, %v7128_v21 }
0x1ad3   : > { %8105 = vmatpush3.bf16.msra.mxu1 %v8104_v26  ;;  %v7143_v26 = vld [vmem:[%s10719_s4 + $0x2c8] sm:$0xff] }
0x1ad4   : > { %8106 = vmatprep.subr.bf16.mxu1 %v8828_v6 }
0x1ad7   : > { %8108 = vmatpush3.bf16.msra.mxu1 %v8107_v28  ;;  %v8148_v28 = vpack.c.bf16 %v7143_v26, %v7140_v25 }
0x1ad8   : > { %8109 = vmatprep.subr.bf16.mxu1 %v8828_v6 }
0x1adb   : > { %8111 = vmatpush3.bf16.msra.mxu1 %v8110_v34  ;;  %v7149_v34 = vld [vmem:[%s10719_s4 + $0x2e8] sm:$0xff] }
0x1adc   : > { %8112 = vmatprep.subr.bf16.mxu1 %v8828_v6  ;;  %v8152_v37 = vpack.c.bf16 %v7149_v34, %v7146_v16 }
0x1adf   : > { %8114 = vmatpush3.bf16.msra.mxu1 %v8113_v39  ;;  %v7152_v39 = vld [vmem:[%s10719_s4 + $0x300] sm:$0xff] }
0x1ae0   : > { %8116 = vmatprep.subr.bf16.mxu1 %v8115_v43  ;;  %v7155_v43 = vld [vmem:[%s10719_s4 + $0x318] sm:$0xff] }
0x1ae1   : > { %v8156_v46 = vpack.c.bf16 %v7155_v43, %v7152_v39 }
0x1ae2   : > { %7670 = vmatmul.mubr.msk.f32.vlgmr.msra.gmra.mrb[36].mxu1 %vm2121_vm2, %v4873_v23  ;;  %v7137_v23 = vld [vmem:[%s10719_s4 + $0x298] sm:$0xff] }
0x1ae3   : > { %8118 = vmatpush1.bf16.msra.mxu1 %v8117_v48  ;;  %5338 = vmatprep.mubr.f32.mxu1 %v8834_v10  ;;  %v8145_v24 = vpack.c.bf16 %v7137_v23, %v7134_v33  ;;  %v7158_v48 = vld [vmem:[%s10719_s4 + $0x330] sm:$0xff]  ;;  %v10210_v33 = vld [vmem:[#allocation5] sm:$0xff] }
0x1ae4   : > { %8120 = vmatprep.subr.bf16.mxu1 %v8119_v49  ;;  %v7161_v49 = vld [vmem:[%s10719_s4 + $0x348] sm:$0xff] }
0x1ae5   : > { %v8160_v54 = vpack.c.bf16 %v7161_v49, %v7158_v48 }
0x1ae7   : > { %8122 = vmatpush1.bf16.msra.mxu1 %v8121_v58  ;;  %v7164_v58 = vld [vmem:[%s10719_s4 + $0x360] sm:$0xff] }
0x1ae8   : > { %8124 = vmatprep.subr.bf16.mxu1 %v8123_v55  ;;  %v7167_v55 = vld [vmem:[%s10719_s4 + $0x378] sm:$0xff] }
0x1ae9   : > { %v8164_v63 = vpack.c.bf16 %v7167_v55, %v7164_v58 }
0x1aeb   : > { %8126 = vmatpush1.bf16.msra.mxu1 %v8125_v1  ;;  %v7170_v1 = vld [vmem:[%s10719_s4 + $0x390] sm:$0xff] }
0x1aec   : > { %8128 = vmatprep.subr.bf16.mxu1 %v8127_v2  ;;  %v7173_v2 = vld [vmem:[%s10719_s4 + $0x3a8] sm:$0xff] }
0x1aed   : > { %v8168_v3 = vpack.c.bf16 %v7173_v2, %v7170_v1 }
0x1aef   : > { %8130 = vmatpush1.bf16.msra.mxu1 %v8129_v8  ;;  %v8171_v8 = vpack.c.bf16 %v7151_v7, %v7148_v5 }
0x1af0   : > { %8132 = vmatprep.subr.bf16.mxu1 %v8131_v9  ;;  %v4888_v9 = vadd.f32 %v10067_v32, %v4784_v4  ;;  %v7166_v32 = vld [vmem:[%s10719_s4 + $0x370] sm:$0xff] }
0x1af3   : > { %8134 = vmatpush1.bf16.msra.mxu1 %v8133_v15  ;;  %v8174_v15 = vpack.c.bf16 %v7157_v14, %v7154_v13 }
0x1af4   : > { %8135 = vmatprep.subr.bf16.mxu1 %v8828_v6 }
0x1af6   : > { %7144 = vmatmul.mubr.msk.f32.vlgmr.msra.gmra.mrb[34].mxu1 %vm2121_vm2, %v4883_v11 }
0x1af7   : > { %8137 = vmatpush3.bf16.msra.mxu1 %v8136_v19  ;;  %7692 = vmatprep.mubr.msk.f32.mxu1 %vm8835_vm0, %v8834_v10  ;;  %v8177_v19 = vpack.c.bf16 %v7163_v18, %v7160_v17  ;;  %v10369_v18 = vld [vmem:[#allocation25 + $0x8] sm:$0xff] }
0x1af8   : > { %8138 = vmatprep.subr.bf16.mxu1 %v8828_v6  ;;  %7178 = vmatprep.mubr.msk.f32.mxu0 %vm2442_vm14, %v10369_v18 }
0x1afb   : > { %8140 = vmatpush3.bf16.msra.mxu1 %v8139_v20  ;;  %v7175_v20 = vld [vmem:[%s10719_s4 + $0x3b8] sm:$0xff] }
0x1afc   : > { %8141 = vmatprep.subr.bf16.mxu1 %v8828_v6  ;;  %v8183_v21 = vpack.c.bf16 %v7175_v20, %v7172_v12 }
0x1aff   : > { %8143 = vmatpush3.bf16.msra.mxu1 %v8142_v40 }
0x1b00   : > { %8144 = vmatprep.subr.bf16.mxu1 %v8828_v6 }
0x1b03   : > { %8146 = vmatpush3.bf16.msra.mxu1 %v8145_v24 }
0x1b04   : > { %8147 = vmatprep.subr.bf16.mxu1 %v8828_v6 }
0x1b07   : > { %8149 = vmatpush3.bf16.msra.mxu1 %v8148_v28 }
0x1b08   : > { %8151 = vmatprep.subr.bf16.mxu1 %v8150_v30 }
0x1b0a   : > { %7693 = vmatmul.mubr.msk.f32.vlgmr.msra.gmra.mrb[36].mxu1 %vm2121_vm2, %v4883_v11  ;;  %v7169_v11 = vld [vmem:[%s10719_s4 + $0x388] sm:$0xff]  ;;  %s10726_s4 = smov 73  }
0x1b0b   : > { %8153 = vmatpush1.bf16.msra.mxu1 %v8152_v37  ;;  %5516 = vmatprep.mubr.f32.mxu1 %v8834_v10  ;;  %v8180_v61 = vpack.c.bf16 %v7169_v11, %v7166_v32 }
0x1b0c   : > { %8155 = vmatprep.subr.bf16.mxu1 %v8154_v38 }
0x1b0f   : > { %8157 = vmatpush1.bf16.msra.mxu1 %v8156_v46 }
0x1b10   : > { %8159 = vmatprep.subr.bf16.mxu1 %v8158_v47 }
0x1b13   : > { %8161 = vmatpush1.bf16.msra.mxu1 %v8160_v54 }
0x1b14   : > { %8163 = vmatprep.subr.bf16.mxu1 %v8162_v57 }
0x1b17   : > { %8165 = vmatpush1.bf16.msra.mxu1 %v8164_v63 }
0x1b18   : > { %8167 = vmatprep.subr.bf16.mxu1 %v8166_v0 }
0x1b1b   : > { %8169 = vmatpush1.bf16.msra.mxu1 %v8168_v3 }
0x1b1c   : > { %8170 = vmatprep.subr.bf16.mxu1 %v8828_v6 }
0x1b1e   : > { %7176 = vmatmul.mubr.msk.f32.vlgmr.msra.gmra.mrb[34].mxu1 %vm2121_vm2, %v4888_v9 }
0x1b1f   : > { %8172 = vmatpush3.bf16.msra.mxu1 %v8171_v8  ;;  %7715 = vmatprep.mubr.msk.f32.mxu1 %vm8835_vm0, %v8834_v10 }
0x1b20   : > { %8173 = vmatprep.subr.bf16.mxu1 %v8828_v6 }
0x1b23   : > { %8175 = vmatpush3.bf16.msra.mxu1 %v8174_v15 }
0x1b24   : > { %8176 = vmatprep.subr.bf16.mxu1 %v8828_v6 }
0x1b27   : > { %8178 = vmatpush3.bf16.msra.mxu1 %v8177_v19 }
0x1b28   : > { %8179 = vmatprep.subr.bf16.mxu1 %v8828_v6 }
0x1b2b   : > { %8181 = vmatpush3.bf16.msra.mxu1 %v8180_v61  ;;  %v6031_v61 = vld [vmem:[%s10734_s5] sm:$0xff]  ;;  %s10752_s5 = sld [smem:[#allocation57_spill]] }
0x1b2c   : > { %8182 = vmatprep.subr.bf16.mxu1 %v8828_v6 }
0x1b2f   : > { %8184 = vmatpush3.bf16.msra.mxu1 %v8183_v21 }
0x1b32   : > { %7716 = vmatmul.mubr.msk.f32.vlgmr.msra.gmra.mrb[36].mxu1 %vm2121_vm2, %v4888_v9  ;;  %vm10731_vm2 = vcmask 613376  }
0x1b33   : > { %vm10732_vm9 = vmmov %vm10731_vm2 }
0x1bf1   : > { %v5518_v22 = vpop.f32.mrb[34].mxu1 }
0x1bf2   : > { %5600 = vrot.lane.b32.xlu0 %v5518_v22, %s10720_s11  ;;  %v5520_v40 = vpop.f32.mrb[35].mxu1 }
0x1bf6   : > { %5602 = vrot.lane.b32.xlu0 %v5520_v40, %s10720_s11 }
0x1bfa   : > { %5641 = vrot.lane.b32.xlu0 %v10210_v33, %s10698_s10 }
0x1bfe   : > { %5685 = vrot.lane.b32.xlu0 %v10004_v31, %s10694_s23 }
0x1c02   : > { %5681 = vrot.lane.b32.xlu0 %v10210_v33, %s10694_s23 }
0x1c05   : > { %v5589_v23 = vpop.f32.mrb[36].mxu1 }
0x1c06   : > { %5725 = vrot.lane.b32.xlu0 %v10004_v31, %s10700_s26  ;;  %5604 = vrot.lane.b32.xlu1 %v5589_v23, %s10720_s11  ;;  %v7717_v24 = vpop.f32.mrb[37].mxu1 }
0x1c0a   : > { %5721 = vrot.lane.b32.xlu0 %v10210_v33, %s10700_s26  ;;  %5683 = vrot.lane.b32.xlu1 %v10023_v41, %s10694_s23 }
0x1c0e   : > { %5765 = vrot.lane.b32.xlu0 %v10004_v31, %s10721_s3  ;;  %5723 = vrot.lane.b32.xlu1 %v10023_v41, %s10700_s26 }
0x1c12   : > { %5761 = vrot.lane.b32.xlu0 %v10210_v33, %s10721_s3  ;;  %5763 = vrot.lane.b32.xlu1 %v10023_v41, %s10721_s3 }
0x1c16   : > { %5805 = vrot.lane.b32.xlu0 %v10004_v31, %s10722_s1  ;;  %5803 = vrot.lane.b32.xlu1 %v10023_v41, %s10722_s1 }
0x1c1a   : > { %5801 = vrot.lane.b32.xlu0 %v10210_v33, %s10722_s1  ;;  %5843 = vrot.lane.b32.xlu1 %v10023_v41, %s10723_s7 }
0x1c1e   : > { %5845 = vrot.lane.b32.xlu0 %v10004_v31, %s10723_s7  ;;  %5883 = vrot.lane.b32.xlu1 %v10023_v41, %s10724_s2 }
0x1c22   : > { %5841 = vrot.lane.b32.xlu0 %v10210_v33, %s10723_s7  ;;  %5923 = vrot.lane.b32.xlu1 %v10023_v41, %s10725_s0 }
0x1c26   : > { %5885 = vrot.lane.b32.xlu0 %v10004_v31, %s10724_s2  ;;  %5963 = vrot.lane.b32.xlu1 %v10023_v41, %s10726_s4 }
0x1c2a   : > { %5881 = vrot.lane.b32.xlu0 %v10210_v33, %s10724_s2 }
0x1c2e   : > { %5925 = vrot.lane.b32.xlu0 %v10004_v31, %s10725_s0 }
0x1c32   : > { %5921 = vrot.lane.b32.xlu0 %v10210_v33, %s10725_s0 }
0x1c36   : > { %5965 = vrot.lane.b32.xlu0 %v10004_v31, %s10726_s4  ;;  %v10274_v31 = vpop.permute.xlu1 %5643 }
0x1c64   : > { %v5601_v25 = vpop.permute.xlu0 %5600 }
0x1c65   : > { %5611 = vst.msk [vmem:[#allocation11] sm:$0xff] %vm1468_vm12, %v5601_v25 }
0x1c68   : > { %v5603_v26 = vpop.permute.xlu0 %5602 }
0x1c69   : > { %v10263_v27 = vsel %vm1452_vm15, %v5601_v25, %v5603_v26 }
0x1c6c   : > { %v10265_v41 = vpop.permute.xlu0 %5641  ;;  %v10267_v29 = vld [vmem:[#allocation11] sm:$0xff] }
0x1c6d   : > { %5621 = vrot.lane.b32.xlu1 %v10267_v29, %s10698_s10 }
0x1c70   : > { %v5686_v28 = vpop.permute.xlu0 %5685 }
0x1c71   : > { %5694 = vst.msk [vmem:[#allocation16 + $0x58] sm:$0xff] %vm1494_vm13, %v5686_v28  ;;  %5661 = vrot.lane.b32.xlu1 %v10267_v29, %s10694_s23 }
0x1c74   : > { %v5682_v30 = vpop.permute.xlu0 %5681 }
0x1c75   : > { %5701 = vrot.lane.b32.xlu1 %v10267_v29, %s10700_s26 }
0x1c78   : > { %v5726_v16 = vpop.permute.xlu0 %5725  ;;  %v5605_v34 = vpop.permute.xlu1 %5604 }
0x1c79   : > { %5734 = vst.msk [vmem:[#allocation16 + $0x88] sm:$0xff] %vm1494_vm13, %v5726_v16  ;;  %v5607_v35 = vsel %vm1452_vm15, %v5603_v26, %v5605_v34  ;;  %5741 = vrot.lane.b32.xlu1 %v10267_v29, %s10721_s3 }
0x1c7a   : > { %5613 = vst.msk [vmem:[#allocation11 + $0x10] sm:$0xff] %vm1471_vm3, %v5607_v35 }
0x1c7b   : > { %5614 = vst.msk [vmem:[#allocation11 + $0x10] sm:$0xff] %vm1473_vm11, %v8834_v10 }
0x1c7c   : > { %v5722_v36 = vpop.permute.xlu0 %5721  ;;  %v5684_v37 = vpop.permute.xlu1 %5683 }
0x1c7d   : > { %v10286_v38 = vsel %vm1178_vm5, %v5682_v30, %v5684_v37  ;;  %v10289_v39 = vsel %vm1178_vm5, %v5684_v37, %v5686_v28  ;;  %5781 = vrot.lane.b32.xlu1 %v10267_v29, %s10722_s1 }
0x1c80   : > { %v5766_v43 = vpop.permute.xlu0 %5765  ;;  %v5724_v44 = vpop.permute.xlu1 %5723 }
0x1c81   : > { %5774 = vst.msk [vmem:[#allocation16 + $0xb8] sm:$0xff] %vm1494_vm13, %v5766_v43  ;;  %v10295_v45 = vsel %vm1189_vm1, %v5722_v36, %v5724_v44  ;;  %v10298_v46 = vsel %vm1189_vm1, %v5724_v44, %v5726_v16  ;;  %5821 = vrot.lane.b32.xlu1 %v10267_v29, %s10723_s7 }
0x1c82   : > { %v5617_v47 = vld [vmem:[#allocation11 + $0x10] sm:$0xff] }
0x1c83   : > { %5625 = vrot.lane.b32.xlu0 %v5617_v47, %s10698_s10 }
0x1c84   : > { %v5762_v48 = vpop.permute.xlu0 %5761  ;;  %v5764_v49 = vpop.permute.xlu1 %5763 }
0x1c85   : > { %v10304_v50 = vsel %vm1200_vm4, %v5762_v48, %v5764_v49  ;;  %v10307_v51 = vsel %vm1200_vm4, %v5764_v49, %v5766_v43  ;;  %5861 = vrot.lane.b32.xlu1 %v10267_v29, %s10724_s2 }
0x1c87   : > { %5665 = vrot.lane.b32.xlu0 %v5617_v47, %s10694_s23 }
0x1c88   : > { %v5806_v54 = vpop.permute.xlu0 %5805  ;;  %v5804_v57 = vpop.permute.xlu1 %5803 }
0x1c89   : > { %5814 = vst.msk [vmem:[#allocation16 + $0xe8] sm:$0xff] %vm1494_vm13, %v5806_v54  ;;  %v10314_v58 = vsel %vm10727_vm6, %v5804_v57, %v5806_v54  ;;  %5901 = vrot.lane.b32.xlu1 %v10267_v29, %s10725_s0  ;;  %vm10733_vm6 = vcmask 605184  }
0x1c8b   : > { %5705 = vrot.lane.b32.xlu0 %v5617_v47, %s10700_s26 }
0x1c8c   : > { %v5802_v55 = vpop.permute.xlu0 %5801  ;;  %v5844_v60 = vpop.permute.xlu1 %5843 }
0x1c8d   : > { %v10320_v59 = vsel %vm10728_vm7, %v5802_v55, %v5804_v57  ;;  %5623 = vrot.lane.b32.xlu1 %v10263_v27, %s10698_s10  ;;  %vm10735_vm7 = vmmov %vm10733_vm6 }
0x1c8e   : > { %5812 = vst [vmem:[#allocation16 + $0xd8] sm:$0xff] %v10320_v59 }
0x1c8f   : > { %5745 = vrot.lane.b32.xlu0 %v5617_v47, %s10721_s3 }
0x1c90   : > { %v5846_v63 = vpop.permute.xlu0 %5845  ;;  %v5884_v3 = vpop.permute.xlu1 %5883 }
0x1c91   : > { %v10327_v0 = vsel %vm10729_vm8, %v5844_v60, %v5846_v63  ;;  %5854 = vst.msk [vmem:[#allocation16 + $0x118] sm:$0xff] %vm1494_vm13, %v5846_v63  ;;  %5663 = vrot.lane.b32.xlu1 %v10263_v27, %s10694_s23  ;;  %vm10736_vm8 = vcmask 596992  }
0x1c93   : > { %5785 = vrot.lane.b32.xlu0 %v5617_v47, %s10722_s1 }
0x1c94   : > { %v5842_v1 = vpop.permute.xlu0 %5841  ;;  %v5924_v9 = vpop.permute.xlu1 %5923 }
0x1c95   : > { %v10334_v2 = vsel %vm10730_vm10, %v5842_v1, %v5844_v60  ;;  %5703 = vrot.lane.b32.xlu1 %v10263_v27, %s10700_s26  ;;  %vm10737_vm10 = vcmask 908288  }
0x1c96   : > { %5852 = vst [vmem:[#allocation16 + $0x108] sm:$0xff] %v10334_v2  ;;  %v5648_v28 = vsel %vm10737_vm10, %v10274_v31, %v10027_v42 }
0x1c97   : > { %5825 = vrot.lane.b32.xlu0 %v5617_v47, %s10723_s7 }
0x1c98   : > { %v5886_v5 = vpop.permute.xlu0 %5885  ;;  %v10371_v19 = vpop.permute.xlu1 %5963 }
0x1c99   : > { %v10341_v7 = vsel %vm10731_vm2, %v5884_v3, %v5886_v5  ;;  %5894 = vst.msk [vmem:[#allocation16 + $0x148] sm:$0xff] %vm1494_vm13, %v5886_v5  ;;  %5743 = vrot.lane.b32.xlu1 %v10263_v27, %s10721_s3  ;;  %vm10738_vm2 = vmmov %vm10737_vm10  ;;  %vm10743_vm10 = vcmask 744448  }
0x1c9a   : > { %v5647_v30 = vsel %vm10738_vm2, %v10265_v41, %v10274_v31 }
0x1c9b   : > { %5865 = vrot.lane.b32.xlu0 %v5617_v47, %s10724_s2 }
0x1c9c   : > { %v5882_v4 = vpop.permute.xlu0 %5881 }
0x1c9d   : > { %v10348_v8 = vsel %vm10732_vm9, %v5882_v4, %v5884_v3  ;;  %5783 = vrot.lane.b32.xlu1 %v10263_v27, %s10722_s1  ;;  %vm10739_vm9 = vmmov %vm10738_vm2 }
0x1c9e   : > { %5892 = vst [vmem:[#allocation16 + $0x138] sm:$0xff] %v10348_v8 }
0x1c9f   : > { %5905 = vrot.lane.b32.xlu0 %v5617_v47, %s10725_s0 }
0x1ca0   : > { %v5926_v13 = vpop.permute.xlu0 %5925 }
0x1ca1   : > { %v10355_v14 = vsel %vm10733_vm6, %v5924_v9, %v5926_v13  ;;  %5934 = vst.msk [vmem:[#allocation16 + $0x178] sm:$0xff] %vm1494_vm13, %v5926_v13  ;;  %5823 = vrot.lane.b32.xlu1 %v10263_v27, %s10723_s7  ;;  %vm10740_vm6 = vmmov %vm10738_vm2 }
0x1ca2   : > { %vm10744_vm2 = vmmov %vm10743_vm10 }
0x1ca3   : > { %5945 = vrot.lane.b32.xlu0 %v5617_v47, %s10726_s4 }
0x1ca4   : > { %v5922_v15 = vpop.permute.xlu0 %5921 }
0x1ca5   : > { %v10362_v17 = vsel %vm10735_vm7, %v5922_v15, %v5924_v9  ;;  %5863 = vrot.lane.b32.xlu1 %v10263_v27, %s10724_s2  ;;  %vm10741_vm7 = vcmask 752640  }
0x1ca6   : > { %5932 = vst [vmem:[#allocation16 + $0x168] sm:$0xff] %v10362_v17 }
0x1ca7   : > { %5961 = vrot.lane.b32.xlu0 %v10210_v33, %s10726_s4 }
0x1ca8   : > { %v5966_v32 = vpop.permute.xlu0 %5965 }
0x1ca9   : > { %v10377_v11 = vsel %vm10736_vm8, %v10371_v19, %v5966_v32  ;;  %5974 = vst.msk [vmem:[#allocation16 + $0x1a8] sm:$0xff] %vm1494_vm13, %v5966_v32  ;;  %5903 = vrot.lane.b32.xlu1 %v10263_v27, %s10725_s0  ;;  %vm10742_vm8 = vmmov %vm10741_vm7 }
0x1cad   : > { %5943 = vrot.lane.b32.xlu1 %v10263_v27, %s10726_s4 }
0x1cb1   : > { %5941 = vrot.lane.b32.xlu1 %v10267_v29, %s10726_s4 }
0x1cb5   : > { %6034 = vperm.xlu1 %8465, %v6031_v61  }
0x1cdf   : > { %v5622_v12 = vpop.permute.xlu1 %5621 }
0x1ce3   : > { %v5662_v20 = vpop.permute.xlu1 %5661 }
0x1ce7   : > { %v5702_v21 = vpop.permute.xlu1 %5701 }
0x1ceb   : > { %v5742_v22 = vpop.permute.xlu1 %5741 }
0x1cef   : > { %v5782_v40 = vpop.permute.xlu1 %5781 }
0x1cf3   : > { %v5822_v33 = vpop.permute.xlu1 %5821 }
0x1cf5   : > { %v5626_v23 = vpop.permute.xlu0 %5625 }
0x1cf6   : > { %5634 = vst.msk [vmem:[#allocation16 + $0x10] sm:$0xff] %vm1494_vm13, %v5626_v23 }
0x1cf7   : > { %v10388_v24 = vpop.permute.xlu1 %5861 }
0x1cf9   : > { %v5666_v25 = vpop.permute.xlu0 %5665 }
0x1cfa   : > { %5674 = vst.msk [vmem:[#allocation16 + $0x40] sm:$0xff] %vm1494_vm13, %v5666_v25 }
0x1cfb   : > { %v10391_v26 = vpop.permute.xlu1 %5901 }
0x1cfd   : > { %v5706_v27 = vpop.permute.xlu0 %5705 }
0x1cfe   : > { %5714 = vst.msk [vmem:[#allocation16 + $0x70] sm:$0xff] %vm1494_vm13, %v5706_v27 }
0x1cff   : > { %v5624_v29 = vpop.permute.xlu1 %5623 }
0x1d00   : > { %v5627_v16 = vsel %vm10739_vm9, %v5622_v12, %v5624_v29  ;;  %v5628_v34 = vsel %vm10740_vm6, %v5624_v29, %v5626_v23  ;;  %vm10745_vm9 = vcmask 613376  }
0x1d01   : > { %v5746_v35 = vpop.permute.xlu0 %5745  ;;  %v8185_v36 = vpack.c.bf16 %v5648_v28, %v5628_v34  ;;  %v8187_v37 = vpack.c.bf16 %v5647_v30, %v5627_v16  ;;  %vm10746_vm6 = vmmov %vm10745_vm9  ;;  %v5977_v30 = vld [vmem:[#allocation16 + $0x10] sm:$0xff]  ;;  %v6029_v16 = vld [vmem:[#allocation25] sm:$0xff] }
0x1d02   : > { %5754 = vst.msk [vmem:[#allocation16 + $0xa0] sm:$0xff] %vm1494_vm13, %v5746_v35  ;;  %v5983_v34 = vld [vmem:[#allocation16 + $0x40] sm:$0xff] }
0x1d03   : > { %v5664_v43 = vpop.permute.xlu1 %5663  ;;  %8186 = vmatprep.subr.bf16.mxu0 %v8185_v36 }
0x1d04   : > { %v5667_v44 = vsel %vm1178_vm5, %v5662_v20, %v5664_v43  ;;  %v5668_v47 = vsel %vm1178_vm5, %v5664_v43, %v5666_v25  ;;  %8188 = vmatpush1.bf16.msra.mxu0 %v8187_v37  ;;  %v5992_v37 = vld [vmem:[#allocation16 + $0x88] sm:$0xff] }
0x1d05   : > { %v5786_v42 = vpop.permute.xlu0 %5785  ;;  %v8189_v48 = vpack.c.bf16 %v10289_v39, %v5668_v47  ;;  %v8191_v41 = vpack.c.bf16 %v10286_v38, %v5667_v44  ;;  %v5989_v36 = vld [vmem:[#allocation16 + $0x70] sm:$0xff]  ;;  %v5998_v47 = vld [vmem:[#allocation16 + $0xb8] sm:$0xff] }
0x1d06   : > { %5794 = vst.msk [vmem:[#allocation16 + $0xd0] sm:$0xff] %vm1494_vm13, %v5786_v42  ;;  %v8228_v43 = vpack.c.bf16 %v5992_v37, %v5989_v36 }
0x1d07   : > { %v5704_v31 = vpop.permute.xlu1 %5703  ;;  %8190 = vmatprep.subr.bf16.mxu0 %v8189_v48 }
0x1d08   : > { %v5707_v49 = vsel %vm1189_vm1, %v5702_v21, %v5704_v31  ;;  %v5708_v54 = vsel %vm1189_vm1, %v5704_v31, %v5706_v27  ;;  %8192 = vmatpush1.bf16.msra.mxu0 %v8191_v41 }
0x1d09   : > { %v5826_v57 = vpop.permute.xlu0 %5825  ;;  %v8193_v55 = vpack.c.bf16 %v10298_v46, %v5708_v54  ;;  %v8195_v60 = vpack.c.bf16 %v10295_v45, %v5707_v49  ;;  %v5995_v44 = vld [vmem:[#allocation16 + $0xa0] sm:$0xff]  ;;  %v6010_v49 = vld [vmem:[#allocation16 + $0x118] sm:$0xff] }
0x1d0a   : > { %5834 = vst.msk [vmem:[#allocation16 + $0x100] sm:$0xff] %vm1494_vm13, %v5826_v57 }
0x1d0b   : > { %v5744_v63 = vpop.permute.xlu1 %5743  ;;  %8194 = vmatprep.subr.bf16.mxu0 %v8193_v55  ;;  %v6016_v55 = vld [vmem:[#allocation16 + $0x148] sm:$0xff] }
0x1d0c   : > { %v5747_v38 = vsel %vm1200_vm4, %v5742_v22, %v5744_v63  ;;  %v5748_v39 = vsel %vm1200_vm4, %v5744_v63, %v5746_v35  ;;  %8196 = vmatpush1.bf16.msra.mxu0 %v8195_v60 }
0x1d0d   : > { %v5866_v1 = vpop.permute.xlu0 %5865  ;;  %v8197_v3 = vpack.c.bf16 %v10307_v51, %v5748_v39  ;;  %v8199_v5 = vpack.c.bf16 %v10304_v50, %v5747_v38  ;;  %v6001_v48 = vld [vmem:[#allocation16 + $0xd0] sm:$0xff]  ;;  %v6022_v38 = vld [vmem:[#allocation16 + $0x178] sm:$0xff] }
0x1d0e   : > { %5874 = vst.msk [vmem:[#allocation16 + $0x130] sm:$0xff] %vm1494_vm13, %v5866_v1 }
0x1d0f   : > { %v5784_v4 = vpop.permute.xlu1 %5783  ;;  %8198 = vmatprep.subr.bf16.mxu0 %v8197_v3  ;;  %v6028_v3 = vld [vmem:[#allocation16 + $0x1a8] sm:$0xff] }
0x1d10   : > { %v5787_v45 = vsel %vm10741_vm7, %v5782_v40, %v5784_v4  ;;  %v5788_v46 = vsel %vm10742_vm8, %v5784_v4, %v5786_v42  ;;  %8200 = vmatpush1.bf16.msra.mxu0 %v8199_v5  ;;  %vm10747_vm7 = vcmask 596992   ;;  %vm10748_vm8 = vcmask 605184   ;;  %v6184_v4 = vld [vmem:[%s9019_s14] sm:$0x7] }
0x1d11   : > { %v5906_v9 = vpop.permute.xlu0 %5905  ;;  %v8201_v13 = vpack.c.bf16 %v10314_v58, %v5788_v46  ;;  %v8203_v15 = vpack.c.bf16 %v10320_v59, %v5787_v45  ;;  %v8231_v42 = vpack.c.bf16 %v5998_v47, %v5995_v44  ;;  %v6007_v31 = vld [vmem:[#allocation16 + $0x100] sm:$0xff] }
0x1d12   : > { %5914 = vst.msk [vmem:[#allocation16 + $0x160] sm:$0xff] %vm1494_vm13, %v5906_v9  ;;  %v8237_v54 = vpack.c.bf16 %v6010_v49, %v6007_v31 }
0x1d13   : > { %v5824_v32 = vpop.permute.xlu1 %5823  ;;  %8202 = vmatprep.subr.bf16.mxu0 %v8201_v13 }
0x1d14   : > { %v5827_v50 = vsel %vm10743_vm10, %v5822_v33, %v5824_v32  ;;  %v5828_v51 = vsel %vm10744_vm2, %v5824_v32, %v5826_v57  ;;  %8204 = vmatpush1.bf16.msra.mxu0 %v8203_v15  ;;  %vm10749_vm10 = vmmov %vm10748_vm8  ;;  %v6193_v32 = vrot.slane %v6184_v4, %v9281_v56 }
0x1d15   : > { %5832 = vst [vmem:[#allocation16 + $0xf0] sm:$0xff] %v5827_v50  ;;  %v5946_v61 = vpop.permute.xlu0 %5945  ;;  %v8205_v12 = vpack.c.bf16 %v10327_v0, %v5828_v51  ;;  %v8207_v20 = vpack.c.bf16 %v10334_v2, %v5827_v50  ;;  %vm10750_vm2 = vmmov %vm10747_vm7  ;;  %v6013_v57 = vld [vmem:[#allocation16 + $0x130] sm:$0xff] }
0x1d16   : > { %5954 = vst.msk [vmem:[#allocation16 + $0x190] sm:$0xff] %vm1494_vm13, %v5946_v61  ;;  %v8240_v60 = vpack.c.bf16 %v6016_v55, %v6013_v57 }
0x1d17   : > { %v5864_v58 = vpop.permute.xlu1 %5863  ;;  %8206 = vmatprep.subr.bf16.mxu0 %v8205_v12 }
0x1d18   : > { %v5867_v59 = vsel %vm10745_vm9, %v10388_v24, %v5864_v58  ;;  %v5868_v21 = vsel %vm10746_vm6, %v5864_v58, %v5866_v1  ;;  %8208 = vmatpush1.bf16.msra.mxu0 %v8207_v20  ;;  %vm10751_vm9 = vmmov %vm10750_vm2  ;;  %vm10754_vm6 = vcmask 752640  }
0x1d19   : > { %5872 = vst [vmem:[#allocation16 + $0x120] sm:$0xff] %v5867_v59  ;;  %v5962_v22 = vpop.permute.xlu0 %5961  ;;  %v8209_v40 = vpack.c.bf16 %v10341_v7, %v5868_v21  ;;  %v8211_v33 = vpack.c.bf16 %v10348_v8, %v5867_v59  ;;  %v6019_v63 = vld [vmem:[#allocation16 + $0x160] sm:$0xff]  ;;  %v6197_v21 = vrot.slane %v6184_v4, %v9277_v53 }
0x1d1a   : > { %v5967_v0 = vsel %vm10747_vm7, %v5962_v22, %v10371_v19  ;;  %v8243_v39 = vpack.c.bf16 %v6022_v38, %v6019_v63 }
0x1d1b   : > { %5972 = vst [vmem:[#allocation16 + $0x198] sm:$0xff] %v5967_v0  ;;  %v5904_v2 = vpop.permute.xlu1 %5903  ;;  %8210 = vmatprep.subr.bf16.mxu0 %v8209_v40 }
0x1d1c   : > { %v5907_v23 = vsel %vm10748_vm8, %v10391_v26, %v5904_v2  ;;  %v5908_v24 = vsel %vm10749_vm10, %v5904_v2, %v5906_v9  ;;  %8212 = vmatpush1.bf16.msra.mxu0 %v8211_v33  ;;  %vm10756_vm8 = vcmask 744448   ;;  %vm10757_vm10 = vcmask 613376  }
0x1d1d   : > { %5912 = vst [vmem:[#allocation16 + $0x150] sm:$0xff] %v5907_v23  ;;  %v8213_v25 = vpack.c.bf16 %v10355_v14, %v5908_v24  ;;  %v8215_v27 = vpack.c.bf16 %v10362_v17, %v5907_v23  ;;  %v5980_v14 = vld [vmem:[#allocation16 + $0x28] sm:$0xff]  ;;  %v6025_v1 = vld [vmem:[#allocation16 + $0x190] sm:$0xff] }
0x1d1e   : > { %v8222_v17 = vpack.c.bf16 %v5980_v14, %v5977_v30  ;;  %v8246_v5 = vpack.c.bf16 %v6028_v3, %v6025_v1 }
0x1d1f   : > { %v5944_v7 = vpop.permute.xlu1 %5943  ;;  %8214 = vmatprep.subr.bf16.mxu0 %v8213_v25 }
0x1d20   : > { %v5948_v8 = vsel %vm10750_vm2, %v5944_v7, %v5946_v61  ;;  %8216 = vmatpush1.bf16.msra.mxu0 %v8215_v27  ;;  %v6189_v61 = vrot.slane %v6184_v4, %v9285_v62 }
0x1d21   : > { %v8217_v19 = vpack.c.bf16 %v10377_v11, %v5948_v8  ;;  %v5986_v11 = vld [vmem:[#allocation16 + $0x58] sm:$0xff]  ;;  %v6431_v8 = vld [vmem:[%s10752_s5] sm:$0xff] }
0x1d22   : > { %v8225_v35 = vpack.c.bf16 %v5986_v11, %v5983_v34 }
0x1d23   : > { %v5942_v29 = vpop.permute.xlu1 %5941  ;;  %8218 = vmatprep.subr.bf16.mxu0 %v8217_v19 }
0x1d24   : > { %v5947_v28 = vsel %vm10751_vm9, %v5942_v29, %v5944_v7  ;;  %vm10762_vm9 = vcmask 605184  }
0x1d25   : > { %5952 = vst [vmem:[#allocation16 + $0x180] sm:$0xff] %v5947_v28  ;;  %v8219_v26 = vpack.c.bf16 %v5967_v0, %v5947_v28 }
0x1d27   : > { %8220 = vmatpush1.bf16.msra.mxu0 %v8219_v26 }
0x1d28   : > { %8221 = vmatprep.subr.bf16.mxu0 %v8828_v6 }
0x1d2a   : > { %6105 = vmatmul.mubr.f32.vlgmr.msra.gmra.mrb[30].mxu0 %v6029_v16 }
0x1d2b   : > { %8223 = vmatpush1.bf16.msra.mxu0 %v8222_v17  ;;  %7179 = vmatprep.mubr.msk.f32.mxu0 %vm2442_vm14, %v10369_v18  ;;  %v6004_v18 = vld [vmem:[#allocation16 + $0xe8] sm:$0xff]  ;;  %vm10753_vm14 = vcmask 908288  }
0x1d2c   : > { %8224 = vmatprep.subr.bf16.mxu0 %v8828_v6  ;;  %v8234_v41 = vpack.c.bf16 %v6004_v18, %v6001_v48  ;;  %vm10755_vm7 = vmmov %vm10753_vm14 }
0x1d2f   : > { %8226 = vmatpush1.bf16.msra.mxu0 %v8225_v35 }
0x1d30   : > { %8227 = vmatprep.subr.bf16.mxu0 %v8828_v6 }
0x1d33   : > { %8229 = vmatpush1.bf16.msra.mxu0 %v8228_v43 }
0x1d34   : > { %8230 = vmatprep.subr.bf16.mxu0 %v8828_v6  ;;  %v6035_v46 = vpop.permute.xlu1 %6034 }
0x1d37   : > { %8232 = vmatpush1.bf16.msra.mxu0 %v8231_v42 }
0x1d38   : > { %8233 = vmatprep.subr.bf16.mxu0 %v8828_v6 }
0x1d3b   : > { %8235 = vmatpush1.bf16.msra.mxu0 %v8234_v41 }
0x1d3c   : > { %8236 = vmatprep.subr.bf16.mxu0 %v8828_v6 }
0x1d3f   : > { %8238 = vmatpush1.bf16.msra.mxu0 %v8237_v54 }
0x1d40   : > { %8239 = vmatprep.subr.bf16.mxu0 %v8828_v6 }
0x1d43   : > { %8241 = vmatpush1.bf16.msra.mxu0 %v8240_v60 }
0x1d44   : > { %8242 = vmatprep.subr.bf16.mxu0 %v8828_v6 }
0x1d47   : > { %8244 = vmatpush1.bf16.msra.mxu0 %v8243_v39 }
0x1d48   : > { %8245 = vmatprep.subr.bf16.mxu0 %v8828_v6 }
0x1d4b   : > { %8247 = vmatpush1.bf16.msra.mxu0 %v8246_v5 }
0x1d4e   : > { %6176 = vmatmul.mubr.f32.vlgmr.msra.gmra.mrb[32].mxu0 %v6029_v16 }
0x1d4f   : > { %6504 = vmatprep.mubr.f32.mxu0 %v8834_v10 }
0x1dfd   : > { %v6106_v45 = vpop.f32.mrb[30].mxu0 }
0x1dfe   : > { %v6108_v9 = vpop.f32.mrb[31].mxu0  ;;  %v6107_v13 = vadd.f32 %v6106_v45, %v6035_v46 }
0x1dff   : > { %v6109_v15 = vadd.f32 %v6108_v9, %v6035_v46 }
0x1e00   : > { %v6181_v51 = vmax.f32 %v6107_v13, 0.0 }
0x1e01   : > { %v6182_v50 = vmax.f32 %v6109_v15, 0.0 }
0x1e02   : > { %v6201_v20 = vmul.f32 %v6189_v61, %v6181_v51 }
0x1e03   : > { %v6202_v12 = vmul.f32 %v6193_v32, %v6182_v50 }
0x1e05   : > { %6210 = vrot.lane.b32.xlu0 %v6202_v12, %s10720_s11 }
0x1e09   : > { %6208 = vrot.lane.b32.xlu0 %v6201_v20, %s10720_s11 }
0x1e21   : > { %v6177_v58 = vpop.f32.mrb[32].mxu0 }
0x1e22   : > { %v6178_v59 = vadd.f32 %v6177_v58, %v6035_v46  ;;  %v6179_v22 = vpop.f32.mrb[33].mxu0 }
0x1e24   : > { %v6183_v40 = vmax.f32 %v6178_v59, 0.0 }
0x1e26   : > { %v6203_v33 = vmul.f32 %v6197_v21, %v6183_v40 }
0x1e28   : > { %6212 = vrot.lane.b32.xlu1 %v6203_v33, %s10720_s11 }
0x1e77   : > { %v6211_v0 = vpop.permute.xlu0 %6210 }
0x1e7b   : > { %v6209_v2 = vpop.permute.xlu0 %6208 }
0x1e7c   : > { %v6214_v23 = vsel %vm1452_vm15, %v6209_v2, %v6211_v0  ;;  %6219 = vst.msk [vmem:[#allocation13] sm:$0xff] %vm1468_vm12, %v6209_v2 }
0x1e83   : > { %v6243_v24 = vld [vmem:[#allocation13] sm:$0xff] }
0x1e84   : > { %6249 = vrot.lane.b32.xlu0 %v6243_v24, %s10694_s23  ;;  %6229 = vrot.lane.b32.xlu1 %v6243_v24, %s10698_s10 }
0x1e88   : > { %6289 = vrot.lane.b32.xlu0 %v6243_v24, %s10721_s3  ;;  %6269 = vrot.lane.b32.xlu1 %v6243_v24, %s10700_s26 }
0x1e8c   : > { %6329 = vrot.lane.b32.xlu0 %v6243_v24, %s10723_s7  ;;  %6309 = vrot.lane.b32.xlu1 %v6243_v24, %s10722_s1 }
0x1e90   : > { %6349 = vrot.lane.b32.xlu1 %v6243_v24, %s10724_s2 }
0x1e94   : > { %6231 = vrot.lane.b32.xlu1 %v6214_v23, %s10698_s10 }
0x1e98   : > { %6251 = vrot.lane.b32.xlu1 %v6214_v23, %s10694_s23 }
0x1e9a   : > { %v6213_v25 = vpop.permute.xlu1 %6212 }
0x1e9b   : > { %v6215_v27 = vsel %vm1452_vm15, %v6211_v0, %v6213_v25  ;;  %v6430_v25 = vld [vmem:[#allocation27] sm:$0xff] }
0x1e9c   : > { %6221 = vst.msk [vmem:[#allocation13 + $0x10] sm:$0xff] %vm1471_vm3, %v6215_v27  ;;  %6271 = vrot.lane.b32.xlu1 %v6214_v23, %s10700_s26 }
0x1e9d   : > { %6222 = vst.msk [vmem:[#allocation13 + $0x10] sm:$0xff] %vm1473_vm11, %v8834_v10 }
0x1ea0   : > { %6291 = vrot.lane.b32.xlu1 %v6214_v23, %s10721_s3 }
0x1ea4   : > { %6311 = vrot.lane.b32.xlu1 %v6214_v23, %s10722_s1  ;;  %v6225_v7 = vld [vmem:[#allocation13 + $0x10] sm:$0xff] }
0x1ea5   : > { %6233 = vrot.lane.b32.xlu0 %v6225_v7, %s10698_s10  ;;  %s8295_s10 = smul.u32 6, %s10771_s22 }
0x1ea8   : > { %6331 = vrot.lane.b32.xlu1 %v6214_v23, %s10723_s7 }
0x1ea9   : > { %6253 = vrot.lane.b32.xlu0 %v6225_v7, %s10694_s23  ;;  %s10767_s23 = sld [smem:[#allocation58_spill]] }
0x1eac   : > { %6351 = vrot.lane.b32.xlu1 %v6214_v23, %s10724_s2 }
0x1ead   : > { %6273 = vrot.lane.b32.xlu0 %v6225_v7, %s10700_s26  ;;  %s1158_s26 = scalar_lea.vmem %s9034_s30, %s8295_s10 }
0x1eb0   : > { %6371 = vrot.lane.b32.xlu1 %v6214_v23, %s10725_s0 }
0x1eb1   : > { %6293 = vrot.lane.b32.xlu0 %v6225_v7, %s10721_s3 }
0x1eb4   : > { %6391 = vrot.lane.b32.xlu1 %v6214_v23, %s10726_s4 }
0x1eb5   : > { %6313 = vrot.lane.b32.xlu0 %v6225_v7, %s10722_s1 }
0x1eb8   : > { %6389 = vrot.lane.b32.xlu1 %v6243_v24, %s10726_s4 }
0x1eb9   : > { %6333 = vrot.lane.b32.xlu0 %v6225_v7, %s10723_s7 }
0x1ebd   : > { %6353 = vrot.lane.b32.xlu0 %v6225_v7, %s10724_s2 }
0x1ec1   : > { %6373 = vrot.lane.b32.xlu0 %v6225_v7, %s10725_s0 }
0x1ec5   : > { %6369 = vrot.lane.b32.xlu0 %v6243_v24, %s10725_s0 }
0x1ec9   : > { %6393 = vrot.lane.b32.xlu0 %v6225_v7, %s10726_s4 }
0x1ecd   : > { %6434 = vperm.xlu0 %8466, %v6431_v8  }
0x1ef6   : > { %v6230_v19 = vpop.permute.xlu1 %6229  ;;  %v6250_v16 = vpop.permute.xlu0 %6249 }
0x1efa   : > { %v6270_v29 = vpop.permute.xlu1 %6269  ;;  %v6290_v11 = vpop.permute.xlu0 %6289 }
0x1efe   : > { %v6310_v28 = vpop.permute.xlu1 %6309  ;;  %v6330_v43 = vpop.permute.xlu0 %6329 }
0x1f02   : > { %v6350_v26 = vpop.permute.xlu1 %6349 }
0x1f06   : > { %v6232_v30 = vpop.permute.xlu1 %6231 }
0x1f07   : > { %v6235_v14 = vsel %vm10753_vm14, %v6230_v19, %v6232_v30  ;;  %vm10763_vm14 = vmmov %vm10762_vm9 }
0x1f08   : > { %6240 = vst [vmem:[#allocation16] sm:$0xff] %v6235_v14 }
0x1f0a   : > { %v6252_v17 = vpop.permute.xlu1 %6251 }
0x1f0b   : > { %v6255_v34 = vsel %vm1178_vm5, %v6250_v16, %v6252_v17 }
0x1f0c   : > { %6260 = vst [vmem:[#allocation16 + $0x18] sm:$0xff] %v6255_v34  ;;  %v8250_v60 = vpack.c.bf16 %v6255_v34, %v6235_v14 }
0x1f0e   : > { %v6272_v35 = vpop.permute.xlu1 %6271 }
0x1f0f   : > { %v6275_v36 = vsel %vm1189_vm1, %v6270_v29, %v6272_v35 }
0x1f10   : > { %6280 = vst [vmem:[#allocation16 + $0x30] sm:$0xff] %v6275_v36 }
0x1f12   : > { %v6292_v37 = vpop.permute.xlu1 %6291 }
0x1f13   : > { %v6295_v44 = vsel %vm1200_vm4, %v6290_v11, %v6292_v37  ;;  %v6584_v11 = vld [vmem:[%s9019_s14] sm:$0x7] }
0x1f14   : > { %6300 = vst [vmem:[#allocation16 + $0x48] sm:$0xff] %v6295_v44  ;;  %v8254_v46 = vpack.c.bf16 %v6295_v44, %v6275_v36 }
0x1f16   : > { %v6312_v47 = vpop.permute.xlu1 %6311 }
0x1f17   : > { %v6315_v42 = vsel %vm10754_vm6, %v6310_v28, %v6312_v47  ;;  %v6234_v48 = vpop.permute.xlu0 %6233 }
0x1f18   : > { %6320 = vst [vmem:[#allocation16 + $0x60] sm:$0xff] %v6315_v42  ;;  %v6236_v18 = vsel %vm10755_vm7, %v6232_v30, %v6234_v48  ;;  %6242 = vst.msk [vmem:[#allocation16 + $0x10] sm:$0xff] %vm1494_vm13, %v6234_v48  ;;  %vm10765_vm7 = vcmask 588800   ;;  %v6589_v48 = vrot.slane %v6584_v11, %v9285_v62 }
0x1f19   : > { %6241 = vst [vmem:[#allocation16 + $0x8] sm:$0xff] %v6236_v18 }
0x1f1a   : > { %v6332_v41 = vpop.permute.xlu1 %6331 }
0x1f1b   : > { %v6335_v31 = vsel %vm10756_vm8, %v6330_v43, %v6332_v41  ;;  %v6254_v49 = vpop.permute.xlu0 %6253 }
0x1f1c   : > { %6340 = vst [vmem:[#allocation16 + $0x78] sm:$0xff] %v6335_v31  ;;  %v6256_v54 = vsel %vm1178_vm5, %v6252_v17, %v6254_v49  ;;  %6262 = vst.msk [vmem:[#allocation16 + $0x28] sm:$0xff] %vm1494_vm13, %v6254_v49  ;;  %v8258_v12 = vpack.c.bf16 %v6335_v31, %v6315_v42 }
0x1f1d   : > { %6261 = vst [vmem:[#allocation16 + $0x20] sm:$0xff] %v6256_v54  ;;  %v8248_v57 = vpack.c.bf16 %v6256_v54, %v6236_v18  ;;  %vm10758_vm5 = vmmov %vm10754_vm6  ;;  %v6597_v54 = vrot.slane %v6584_v11, %v9277_v53 }
0x1f1e   : > { %v6352_v55 = vpop.permute.xlu1 %6351 }
0x1f1f   : > { %v6355_v63 = vsel %vm10757_vm10, %v6350_v26, %v6352_v55  ;;  %v6274_v38 = vpop.permute.xlu0 %6273  ;;  %8249 = vmatprep.subr.bf16.mxu0 %v8248_v57  ;;  %v6405_v27 = vld [vmem:[#allocation16 + $0x10] sm:$0xff] }
0x1f20   : > { %6360 = vst [vmem:[#allocation16 + $0x90] sm:$0xff] %v6355_v63  ;;  %v6276_v39 = vsel %vm1189_vm1, %v6272_v35, %v6274_v38  ;;  %6282 = vst.msk [vmem:[#allocation16 + $0x40] sm:$0xff] %vm1494_vm13, %v6274_v38  ;;  %8251 = vmatpush1.bf16.msra.mxu0 %v8250_v60 }
0x1f21   : > { %vm10759_vm1 = vmmov %vm10750_vm2 }
0x1f22   : > { %v6372_v1 = vpop.permute.xlu1 %6371  ;;  %vm10760_vm2 = vmmov %vm10756_vm8  ;;  %vm6647_vm8 = vcmask 64512  }
0x1f23   : > { %v6294_v3 = vpop.permute.xlu0 %6293  ;;  %vm10764_vm6 = vmmov %vm10759_vm1  ;;  %v6408_v24 = vld [vmem:[#allocation16 + $0x28] sm:$0xff] }
0x1f24   : > { %v6296_v5 = vsel %vm1200_vm4, %v6292_v37, %v6294_v3  ;;  %6302 = vst.msk [vmem:[#allocation16 + $0x58] sm:$0xff] %vm1494_vm13, %v6294_v3  ;;  %vm10761_vm4 = vmmov %vm10757_vm10  ;;  %v8265_v7 = vpack.c.bf16 %v6408_v24, %v6405_v27  ;;  %v6627_v3 = vld [vmem:[%s10767_s23] sm:$0x3] }
0x1f25   : > { %v8252_v4 = vpack.c.bf16 %v6296_v5, %v6276_v39  ;;  %vm10769_vm10 = vmmov %vm10758_vm5 }
0x1f26   : > { %v6392_v45 = vpop.permute.xlu1 %6391 }
0x1f27   : > { %v6314_v9 = vpop.permute.xlu0 %6313  ;;  %8253 = vmatprep.subr.bf16.mxu0 %v8252_v4  ;;  %v6411_v19 = vld [vmem:[#allocation16 + $0x40] sm:$0xff] }
0x1f28   : > { %v6316_v13 = vsel %vm10758_vm5, %v6312_v47, %v6314_v9  ;;  %6322 = vst.msk [vmem:[#allocation16 + $0x70] sm:$0xff] %vm1494_vm13, %v6314_v9  ;;  %8255 = vmatpush1.bf16.msra.mxu0 %v8254_v46  ;;  %v6593_v47 = vrot.slane %v6584_v11, %v9281_v56  ;;  %v6626_v9 = vld [vmem:[#allocation28] sm:$0x3] }
0x1f2a   : > { %v6390_v15 = vpop.permute.xlu1 %6389 }
0x1f2b   : > { %v6395_v32 = vsel %vm10759_vm1, %v6390_v15, %v6392_v45  ;;  %v6334_v50 = vpop.permute.xlu0 %6333  ;;  %v6414_v8 = vld [vmem:[#allocation16 + $0x58] sm:$0xff]  ;;  %v8855_v15 = vmov 1983009808  }
0x1f2c   : > { %6400 = vst [vmem:[#allocation16 + $0xc0] sm:$0xff] %v6395_v32  ;;  %v6336_v51 = vsel %vm10760_vm2, %v6332_v41, %v6334_v50  ;;  %6342 = vst.msk [vmem:[#allocation16 + $0x88] sm:$0xff] %vm1494_vm13, %v6334_v50  ;;  %v8268_v29 = vpack.c.bf16 %v6414_v8, %v6411_v19 }
0x1f2d   : > { %v8256_v61 = vpack.c.bf16 %v6336_v51, %v6316_v13 }
0x1f2f   : > { %v6354_v20 = vpop.permute.xlu0 %6353  ;;  %8257 = vmatprep.subr.bf16.mxu0 %v8256_v61  ;;  %v6417_v26 = vld [vmem:[#allocation16 + $0x70] sm:$0xff] }
0x1f30   : > { %v6356_v58 = vsel %vm10761_vm4, %v6352_v55, %v6354_v20  ;;  %6362 = vst.msk [vmem:[#allocation16 + $0xa0] sm:$0xff] %vm1494_vm13, %v6354_v20  ;;  %8259 = vmatpush1.bf16.msra.mxu0 %v8258_v12 }
0x1f33   : > { %v6374_v59 = vpop.permute.xlu0 %6373  ;;  %v6420_v28 = vld [vmem:[#allocation16 + $0x88] sm:$0xff] }
0x1f34   : > { %v6376_v21 = vsel %vm10762_vm9, %v6372_v1, %v6374_v59  ;;  %6382 = vst.msk [vmem:[#allocation16 + $0xb8] sm:$0xff] %vm1494_vm13, %v6374_v59  ;;  %v8271_v30 = vpack.c.bf16 %v6420_v28, %v6417_v26 }
0x1f35   : > { %v8260_v22 = vpack.c.bf16 %v6376_v21, %v6356_v58 }
0x1f37   : > { %v6370_v40 = vpop.permute.xlu0 %6369  ;;  %8261 = vmatprep.subr.bf16.mxu0 %v8260_v22  ;;  %v6423_v14 = vld [vmem:[#allocation16 + $0xa0] sm:$0xff] }
0x1f38   : > { %v6375_v33 = vsel %vm10763_vm14, %v6370_v40, %v6372_v1 }
0x1f39   : > { %6380 = vst [vmem:[#allocation16 + $0xa8] sm:$0xff] %v6375_v33  ;;  %v8262_v0 = vpack.c.bf16 %v6375_v33, %v6355_v63 }
0x1f3b   : > { %v6394_v2 = vpop.permute.xlu0 %6393  ;;  %8263 = vmatpush1.bf16.msra.mxu0 %v8262_v0  ;;  %v6426_v16 = vld [vmem:[#allocation16 + $0xb8] sm:$0xff] }
0x1f3c   : > { %v6396_v23 = vsel %vm10764_vm6, %v6392_v45, %v6394_v2  ;;  %6402 = vst.msk [vmem:[#allocation16 + $0xd0] sm:$0xff] %vm1494_vm13, %v6394_v2  ;;  %v8274_v17 = vpack.c.bf16 %v6426_v16, %v6423_v14  ;;  %vm10766_vm13 = vmmov %vm10765_vm7 }
0x1f3d   : > { %6456 = vmatprep.subr.mxu0 %v6396_v23 }
0x1f3f   : > { %6457 = vmatpush1.msra.mxu0 %v6395_v32  ;;  %v6797_v32 = vunpack.c.l.s4 %v8855_v15 }
0x1f40   : > { %7180 = vmatmul.mubr.msk.f32.vlgmr.msra.gmra.mrb[34].mxu0 %vm10765_vm7, %v6430_v25  ;;  %8264 = vmatprep.subr.bf16.mxu0 %v8828_v6 }
0x1f41   : > { %8266 = vmatpush3.bf16.msra.mxu0 %v8265_v7  ;;  %7736 = vmatprep.mubr.msk.f32.mxu0 %vm8835_vm0, %v8834_v10  ;;  %v6798_v50 = vunpack.c.0.s8 %v6797_v32 }
0x1f42   : > { %8267 = vmatprep.subr.bf16.mxu0 %v8828_v6 }
0x1f43   : > { %v6429_v34 = vld [vmem:[#allocation16 + $0xd0] sm:$0xff]  ;;  %v6801_v59 = vsub.s32 %v6798_v50, %v9264_v52 }
0x1f45   : > { %8269 = vmatpush3.bf16.msra.mxu0 %v8268_v29 }
0x1f46   : > { %8270 = vmatprep.subr.bf16.mxu0 %v8828_v6 }
0x1f49   : > { %8272 = vmatpush3.bf16.msra.mxu0 %v8271_v30 }
0x1f4a   : > { %8273 = vmatprep.subr.bf16.mxu0 %v8828_v6 }
0x1f4c   : > { %v6435_v36 = vpop.permute.xlu0 %6434 }
0x1f4d   : > { %8275 = vmatpush3.bf16.msra.mxu0 %v8274_v17 }
0x1f4e   : > { %7734 = vmatprep.subr.mxu0 %v8834_v10 }
0x1f51   : > { %7735 = vmatpush3.msra.mxu0 %v6429_v34 }
0x1f52   : > { %7737 = vmatmul.mubr.msk.f32.vlgmr.msra.gmra.mrb[36].mxu0 %vm10766_vm13, %v6430_v25 }
0x1f53   : > { %6715 = vmatprep.mubr.f32.mxu0 %v8834_v10 }
0x2013   : > { %v6506_v35 = vpop.f32.mrb[34].mxu0 }
0x2014   : > { %v6508_v37 = vpop.f32.mrb[35].mxu0  ;;  %v6507_v43 = vadd.f32 %v6506_v35, %v6435_v36 }
0x2015   : > { %v6509_v44 = vadd.f32 %v6508_v37, %v6435_v36 }
0x2016   : > { %v6581_v42 = vmax.f32 %v6507_v43, 0.0 }
0x2017   : > { %v6582_v6 = vmax.f32 %v6509_v44, 0.0 }
0x2018   : > { %v6601_v41 = vmul.f32 %v6589_v48, %v6581_v42 }
0x2019   : > { %v6602_v18 = vmul.f32 %v6593_v47, %v6582_v6 }
0x201b   : > { %6610 = vrot.lane.b32.xlu1 %v6602_v18, %s10720_s11 }
0x201f   : > { %6608 = vrot.lane.b32.xlu1 %v6601_v41, %s10720_s11 }
0x2025   : > { %v6577_v31 = vpop.f32.mrb[36].mxu0 }
0x2026   : > { %v6578_v49 = vadd.f32 %v6577_v31, %v6435_v36  ;;  %v7738_v57 = vpop.f32.mrb[37].mxu0 }
0x2028   : > { %v6583_v55 = vmax.f32 %v6578_v49, 0.0 }
0x202a   : > { %v6603_v60 = vmul.f32 %v6597_v54, %v6583_v55 }
0x202c   : > { %6612 = vrot.lane.b32.xlu0 %v6603_v60, %s10720_s11 }
0x208d   : > { %v6611_v56 = vpop.permute.xlu1 %6610 }
0x2091   : > { %v6609_v63 = vpop.permute.xlu1 %6608 }
0x2092   : > { %v6614_v62 = vsel %vm1452_vm15, %v6609_v63, %v6611_v56  ;;  %6619 = vst.msk [vmem:[#allocation15] sm:$0xff] %vm1468_vm12, %v6609_v63  ;;  %vm10768_vm12 = vmmov %vm10758_vm5 }
0x2093   : > { %6638 = vrot.lane.b32.xlu0 %v6614_v62, %s10722_s1 }
0x2099   : > { %v6623_v38 = vld [vmem:[#allocation15] sm:$0xff] }
0x209a   : > { %6636 = vrot.lane.b32.xlu0 %v6623_v38, %s10722_s1 }
0x209e   : > { %v6613_v39 = vpop.permute.xlu0 %6612 }
0x209f   : > { %v6615_v53 = vsel %vm1452_vm15, %v6611_v56, %v6613_v39  ;;  %vm6812_vm15 = vcmask 1041408  }
0x20a0   : > { %6621 = vst.msk [vmem:[#allocation15 + $0x10] sm:$0xff] %vm1471_vm3, %v6615_v53  ;;  %vm6813_vm3 = vcmask 1043458  }
0x20a1   : > { %6622 = vst.msk [vmem:[#allocation15 + $0x10] sm:$0xff] %vm1473_vm11, %v8834_v10  ;;  %vm6814_vm11 = vmor %vm6813_vm3, %vm6812_vm15 }
0x20a8   : > { %v6625_v1 = vld [vmem:[#allocation15 + $0x10] sm:$0xff] }
0x20a9   : > { %6640 = vrot.lane.b32.xlu1 %v6625_v1, %s10722_s1 }
0x20ad   : > { %6630 = vperm.xlu1 %8465, %v6627_v3  }
0x2105   : > { %v6639_v5 = vpop.permute.xlu0 %6638 }
0x210c   : > { %v6637_v4 = vpop.permute.xlu0 %6636 }
0x210d   : > { %v6642_v13 = vsel %vm10769_vm10, %v6637_v4, %v6639_v5 }
0x211b   : > { %v6641_v45 = vpop.permute.xlu1 %6640 }
0x211c   : > { %v6643_v46 = vsel %vm10768_vm12, %v6639_v5, %v6641_v45 }
0x211d   : > { %6651 = vmatprep.subr.mxu0 %v6643_v46 }
0x211e   : > { %6652 = vmatpush1.msra.mxu0 %v6642_v13 }
0x211f   : > { %7182 = vmatmul.mubr.msk.f32.vlgmr.msra.gmra.mrb[38].mxu0 %vm6647_vm8, %v6626_v9  ;;  %7739 = vmatprep.subr.mxu0 %v8834_v10 }
0x2120   : > { %7740 = vmatpush3.msra.mxu0 %v6641_v45  ;;  %7741 = vmatprep.mubr.msk.f32.mxu0 %vm8835_vm0, %v8834_v10  ;;  %vm6815_vm0 = vcmask 259076  }
0x2121   : > { %vm6816_vm5 = vmor %vm6815_vm0, %vm6814_vm11 }
0x2123   : > { %7742 = vmatmul.mubr.msk.f32.vlgmr.msra.gmra.mrb[40].mxu0 %vm6647_vm8, %v6626_v9 }
0x212c   : > { %v6631_v51 = vpop.permute.xlu1 %6630 }
0x21f2   : > { %v6717_v61 = vpop.f32.mrb[38].mxu0 }
0x21f3   : > { %v6718_v12 = vadd.f32 %v6717_v61, %v6631_v51  ;;  %v6719_v20 = vpop.f32.mrb[39].mxu0 }
0x21f4   : > { %v6720_v58 = vadd.f32 %v6719_v20, %v6631_v51 }
0x21f6   : > { %v6795_v21 = vcombine.low %v6718_v12, %v6720_v58  ;;  %v6788_v22 = vpop.f32.mrb[40].mxu0 }
0x21f7   : > { %v6789_v40 = vadd.f32 %v6788_v22, %v6631_v51  ;;  %v7743_v10 = vpop.f32.mrb[41].mxu0 }
0x21f8   : > { %v6802_v33 = vrot.slane %v6795_v21, %v6801_v59 }
0x21f9   : > { %v6809_v0 = vrot.slane %v6789_v40, %v6801_v59 }
0x21fb   : > { %v6810_v2 = vcombine.low %v6802_v33, %v6809_v0 }
0x21fd   : > { %6817 = vst.msk [vmem:[%s1158_s26] sm:$0x3f] %vm6816_vm5, %v6810_v2 }
0x21fe PF: > { %s84_s15 = sadd.s32 1, %s8775_s15  }
0x21ff   : > { %p81_p1 = scmp.ge.s32.totalorder %s84_s15, 4  }
0x2201   :  { %83 = sbr.rel (!%p81_p1) target bundleno = 66 (0x42), region = 271 }
0x2208   :  { %6839 = vsyncpa [#allocation18], 1 }
0x2209   :  { %6841 = vsyncpa [#allocation18 + $0x1], 1 }
0x220a   :  { %6842 = vsyncpa [#allocation20], 1 }
0x220b   :  { %6843 = vsyncpa [#allocation23], 1 }
0x220c   :  { %6844 = vsyncpa [#allocation26], 1 }
0x220d   :  { %6845 = vsyncpa [#allocation29], 1 }

</bundles_post_ra>
